<compile_context>
chip_gen: v7x
topology: tpu7x:2x2x1
jax: 0.10.0
libtpu: 0.0.40
codegen_flags: <defaults>
</compile_context>

<pallas_src>
import jax
import jax.numpy as jnp
from jax.experimental import pallas as pl
from jax.experimental.pallas import tpu as pltpu

# ---------------- model hyper-parameters (small synthetic sizes) ----------------
BATCH = 2
S = 64          # spatial resolution (szie in the original script)
WIDTH = 32      # channel width
MODES = 16      # retained Fourier modes (<= S//2)
NUM = 4         # number of Gabor kernels (args.num)
GABOR_LEN = S   # stands in for (szie + len - 1) in the original script
FC1 = 128

_INV_SQRT2 = 0.7071067811865476


def _gelu(x):
    # exact (erf) GELU — matches torch.nn.functional.gelu default
    return 0.5 * x * (1.0 + jax.lax.erf(x * _INV_SQRT2))


# ------------------------------ fused forward kernel ------------------------------
def _fno_forward_kernel(*refs):
    (x_ref, grid_ref, fc0w_ref, fc0b_ref,
     fdft_ref, icos_ref, nisin_ref) = refs[:7]
    layer_refs = refs[7:19]                     # 4 x (spec_w2, conv_w, conv_b)
    fc1w_ref, fc1b_ref, fc2w_ref, fc2b_ref = refs[19:23]
    out_ref = refs[23]

    fdft = fdft_ref[...]          # (2M, S)  rows [cos ; -sin]  (truncated rfft)
    icos = icos_ref[...]          # (S, M)   scaled cos  (inverse DFT, real part)
    nisin = nisin_ref[...]        # (S, M)   scaled -sin (inverse DFT, imag part)

    fc0w = fc0w_ref[...]          # (2, C)
    w0a = fc0w[0:1, :]            # (1, C) weight on a(x)
    w0b = fc0w[1:2, :]            # (1, C) weight on the grid coordinate
    b0 = fc0b_ref[...]            # (1, C)
    gridv = grid_ref[...]         # (S, 1)

    # ---- fc0 folded in as VPU FMAs (K=2 contraction is not worth the MXU) ----
    h = []
    for b in range(BATCH):
        xb = x_ref[b]                                    # (S, 1)
        h.append(xb * w0a + gridv * w0b + b0)            # (S, C)

    # ---- 4 fused Fourier layers ----
    for l in range(4):
        w2 = layer_refs[3 * l][...]       # (M, 2C, 2C) real-equivalent complex mix
        wl = layer_refs[3 * l + 1][...]   # (C, C)      1x1-conv weight (in, out)
        bl = layer_refs[3 * l + 2][...]   # (1, C)

        # truncated forward DFT (first MODES rfft bins) — one (2M,S)@(S,C) matmul per sample
        x2_list = []
        for b in range(BATCH):
            xri = jnp.dot(fdft, h[b], preferred_element_type=jnp.float32)    # (2M, C)
            x2_list.append(
                jnp.concatenate([xri[:MODES], xri[MODES:]], axis=-1))        # (M, 2C)
        x2 = jnp.stack(x2_list, axis=1)                                      # (M, B, 2C)

        # per-mode complex channel mix, real-equivalent form: [yr|yi] = [xr|xi] @ W2[m]
        y2 = jnp.einsum('mbc,mcd->mbd', x2, w2,
                        preferred_element_type=jnp.float32)                  # (M, B, 2C)

        for b in range(BATCH):
            yr = y2[:, b, :WIDTH]                                            # (M, C)
            yi = y2[:, b, WIDTH:]                                            # (M, C)
            # inverse DFT (irfft of the zero-padded spectrum) as two matmuls
            x1 = (jnp.dot(icos, yr, preferred_element_type=jnp.float32)
                  + jnp.dot(nisin, yi, preferred_element_type=jnp.float32))  # (S, C)
            # 1x1-conv residual + bias + spectral branch (+ GELU except last layer)
            z = jnp.dot(h[b], wl, preferred_element_type=jnp.float32) + bl + x1
            h[b] = _gelu(z) if l < 3 else z

    # ---- head: fc1 -> gelu -> fc2, intermediate kept in VMEM ----
    w1 = fc1w_ref[...]
    b1 = fc1b_ref[...]
    w2f = fc2w_ref[...]
    b2 = fc2b_ref[...]
    for b in range(BATCH):
        t = _gelu(jnp.dot(h[b], w1, preferred_element_type=jnp.float32) + b1)  # (S, 128)
        o = jnp.dot(t, w2f, preferred_element_type=jnp.float32) + b2           # (S, 1)
        out_ref[b] = o


# ------------------------------- kernel wrapper -----------------------------------
def _full_spec(shape):
    nd = len(shape)
    return pl.BlockSpec(shape, lambda i, _nd=nd: (0,) * _nd)


def fno1d_forward(x, params):
    """x: (BATCH, S, 1) -> (BATCH, S, 1), single fused Pallas kernel."""
    b, s, _ = x.shape
    gridv = jnp.linspace(0.0, 1.0, s, dtype=jnp.float32).reshape(s, 1)

    inputs = [x, gridv, params['fc0_w'], params['fc0_b'],
              params['fdft'], params['icos'], params['nisin']]
    for l in range(4):
        inputs += [params[f'spec{l}_w2'], params[f'w{l}_wt'], params[f'w{l}_b']]
    inputs += [params['fc1_w'], params['fc1_b'], params['fc2_w'], params['fc2_b']]

    return pl.pallas_call(
        _fno_forward_kernel,
        out_shape=jax.ShapeDtypeStruct((b, s, 1), jnp.float32),
        grid=(1,),
        in_specs=[_full_spec(a.shape) for a in inputs],
        out_specs=_full_spec((b, s, 1)),
        compiler_params=pltpu.CompilerParams(
            dimension_semantics=("arbitrary",)),
    )(*inputs)


# ------------------------------ parameter setup ----------------------------------
def _gabor_effective_gain(weights2):
    """GaborConv1d.forward + ifftshift + mode-slice + weights2-weighted sum."""
    gamma = jnp.linspace(0.01, 0.02, NUM, dtype=jnp.float32)[:, None]     # (NUM, 1)
    fwhm = jnp.linspace(0.001, 0.002, NUM, dtype=jnp.float32)[:, None]    # (NUM, 1)
    u = jnp.linspace(-0.5, 0.5, GABOR_LEN, dtype=jnp.float32)[None, :]    # (1, L)
    test1 = gamma * jnp.pi / (fwhm + 1e-5)
    test2 = u - fwhm
    gabor = jnp.exp(-(test1 ** 2) * (test2 ** 2))                         # (NUM, L)
    gabor = jnp.fft.ifftshift(gabor, axes=-1)[:, :MODES]                  # (NUM, MODES)
    return jnp.sum(weights2 * gabor, axis=0)                              # (MODES,)


def _dft_matrices(s, modes):
    """Truncated rfft / irfft as dense matmuls (exact for a MODES-limited spectrum)."""
    m = jnp.arange(modes, dtype=jnp.float32)[:, None]                     # (M, 1)
    n = jnp.arange(s, dtype=jnp.float32)[None, :]                         # (1, S)
    ang = 2.0 * jnp.pi * m * n / float(s)                                 # (M, S)
    cos = jnp.cos(ang)
    sin = jnp.sin(ang)
    fdft = jnp.concatenate([cos, -sin], axis=0)                           # (2M, S)
    scale = jnp.where(jnp.arange(modes) == 0, 1.0 / s, 2.0 / s)
    scale = scale.astype(jnp.float32)[None, :]                            # (1, M)
    icos = cos.T * scale                                                  # (S, M)
    nisin = -sin.T * scale                                                # (S, M)
    return fdft, icos, nisin


def init_params(key):
    ks = jax.random.split(key, 24)
    p = {}
    p['fc0_w'] = 0.1 * jax.random.normal(ks[0], (2, WIDTH), jnp.float32)
    p['fc0_b'] = 0.1 * jax.random.normal(ks[1], (1, WIDTH), jnp.float32)

    fdft, icos, nisin = _dft_matrices(S, MODES)
    p['fdft'], p['icos'], p['nisin'] = fdft, icos, nisin

    scale = 1.0 / (WIDTH * WIDTH)
    for l in range(4):
        k1, k2, k3 = jax.random.split(ks[2 + l], 3)
        w1_r = scale * jax.random.uniform(k1, (WIDTH, WIDTH, MODES), jnp.float32)
        w1_i = scale * jax.random.uniform(k2, (WIDTH, WIDTH, MODES), jnp.float32)
        weights2 = jax.random.uniform(k3, (NUM, 1), jnp.float32)
        g_eff = _gabor_effective_gain(weights2)                           # (MODES,)
        # effective complex weight = weights1 * gabor-gain, collapsed over the NUM axis
        wr = jnp.transpose(w1_r * g_eff[None, None, :], (2, 0, 1))        # (M, in, out)
        wi = jnp.transpose(w1_i * g_eff[None, None, :], (2, 0, 1))        # (M, in, out)
        p[f'spec{l}_wr'] = wr   # kept for the pure-JAX reference
        p[f'spec{l}_wi'] = wi
        # real-equivalent block weight: [yr | yi] = [xr | xi] @ [[Wr, Wi], [-Wi, Wr]]
        top = jnp.concatenate([wr, wi], axis=2)                           # (M, C, 2C)
        bot = jnp.concatenate([-wi, wr], axis=2)                          # (M, C, 2C)
        p[f'spec{l}_w2'] = jnp.concatenate([top, bot], axis=1)            # (M, 2C, 2C)

        k4, k5 = jax.random.split(ks[6 + l], 2)
        wconv = 0.1 * jax.random.normal(k4, (WIDTH, WIDTH), jnp.float32)  # (out, in)
        p[f'w{l}_wt'] = wconv.T                                           # (in, out)
        p[f'w{l}_b'] = 0.1 * jax.random.normal(k5, (1, WIDTH), jnp.float32)

    p['fc1_w'] = 0.1 * jax.random.normal(ks[10], (WIDTH, FC1), jnp.float32)
    p['fc1_b'] = 0.1 * jax.random.normal(ks[11], (1, FC1), jnp.float32)
    p['fc2_w'] = 0.1 * jax.random.normal(ks[12], (FC1, 1), jnp.float32)
    p['fc2_b'] = 0.1 * jax.random.normal(ks[13], (1, 1), jnp.float32)
    return p


# ------------------------- pure-JAX reference (FFT-based) --------------------------
def fno1d_reference(x, params):
    b, s, _ = x.shape
    gridx = jnp.broadcast_to(
        jnp.linspace(0.0, 1.0, s, dtype=jnp.float32).reshape(1, s, 1), (b, s, 1))
    h = jnp.concatenate([x, gridx], axis=-1) @ params['fc0_w'] + params['fc0_b']
    for l in range(4):
        hc = jnp.transpose(h, (0, 2, 1))                                  # (B, C, S)
        xft = jnp.fft.rfft(hc, axis=-1)[:, :, :MODES]                     # (B, C, M)
        w = (params[f'spec{l}_wr'] + 1j * params[f'spec{l}_wi']).astype(jnp.complex64)
        yft = jnp.einsum('bim,mio->bom', xft, w)                          # (B, C, M)
        pad = jnp.zeros((b, WIDTH, s // 2 + 1 - MODES), jnp.complex64)
        x1 = jnp.fft.irfft(jnp.concatenate([yft, pad], axis=-1), n=s, axis=-1)
        x1 = jnp.transpose(x1, (0, 2, 1))                                 # (B, S, C)
        z = h @ params[f'w{l}_wt'] + params[f'w{l}_b'] + x1
        h = _gelu(z) if l < 3 else z
    t = _gelu(h @ params['fc1_w'] + params['fc1_b'])
    return t @ params['fc2_w'] + params['fc2_b']


# ----------------------------------- main -----------------------------------------
if __name__ == "__main__":
    key = jax.random.PRNGKey(0)
    k_x, k_p = jax.random.split(key)
    x = jax.random.normal(k_x, (BATCH, S, 1), dtype=jnp.float32)
    params = init_params(k_p)

    out = jax.jit(fno1d_forward)(x, params)
    out = jax.block_until_ready(out)
    assert out.shape == (BATCH, S, 1)
    assert out.dtype == jnp.float32
    assert bool(jnp.all(jnp.isfinite(out)))

    ref = jax.block_until_ready(jax.jit(fno1d_reference)(x, params))
    assert bool(jnp.allclose(out, ref, rtol=2e-3, atol=2e-3)), \
        float(jnp.max(jnp.abs(out - ref)))

    print("KERNEL_OK")
</pallas_src>

<mosaic_0001>
module attributes {stable_mosaic.version = 11 : i64} {
  func.func @_fno_forward_kernel(%arg0: i32, %arg1: memref<2x64x1xf32, #tpu.memory_space<vmem>>, %arg2: memref<64x1xf32, #tpu.memory_space<vmem>>, %arg3: memref<2x32xf32, #tpu.memory_space<vmem>>, %arg4: memref<1x32xf32, #tpu.memory_space<vmem>>, %arg5: memref<32x64xf32, #tpu.memory_space<vmem>>, %arg6: memref<64x16xf32, #tpu.memory_space<vmem>>, %arg7: memref<64x16xf32, #tpu.memory_space<vmem>>, %arg8: memref<16x64x64xf32, #tpu.memory_space<vmem>>, %arg9: memref<32x32xf32, #tpu.memory_space<vmem>>, %arg10: memref<1x32xf32, #tpu.memory_space<vmem>>, %arg11: memref<16x64x64xf32, #tpu.memory_space<vmem>>, %arg12: memref<32x32xf32, #tpu.memory_space<vmem>>, %arg13: memref<1x32xf32, #tpu.memory_space<vmem>>, %arg14: memref<16x64x64xf32, #tpu.memory_space<vmem>>, %arg15: memref<32x32xf32, #tpu.memory_space<vmem>>, %arg16: memref<1x32xf32, #tpu.memory_space<vmem>>, %arg17: memref<16x64x64xf32, #tpu.memory_space<vmem>>, %arg18: memref<32x32xf32, #tpu.memory_space<vmem>>, %arg19: memref<1x32xf32, #tpu.memory_space<vmem>>, %arg20: memref<32x128xf32, #tpu.memory_space<vmem>>, %arg21: memref<1x128xf32, #tpu.memory_space<vmem>>, %arg22: memref<128x1xf32, #tpu.memory_space<vmem>>, %arg23: memref<1x1xf32, #tpu.memory_space<vmem>>, %arg24: memref<2x64x1xf32, #tpu.memory_space<vmem>>) attributes {dimension_semantics = [#tpu.dimension_semantics<arbitrary>], iteration_bounds = array<i64: 1>, scalar_prefetch = 0 : i64, scratch_operands = 0 : i64, tpu.core_type = #tpu.core_type<tc>, window_params = [{pipeline_mode = #tpu.pipeline_mode<synchronous>, transform_indices = @transform_0, window_bounds = array<i64: 2, 64, 1>}, {pipeline_mode = #tpu.pipeline_mode<synchronous>, transform_indices = @transform_1, window_bounds = array<i64: 64, 1>}, {pipeline_mode = #tpu.pipeline_mode<synchronous>, transform_indices = @transform_2, window_bounds = array<i64: 2, 32>}, {pipeline_mode = #tpu.pipeline_mode<synchronous>, transform_indices = @transform_3, window_bounds = array<i64: 1, 32>}, {pipeline_mode = #tpu.pipeline_mode<synchronous>, transform_indices = @transform_4, window_bounds = array<i64: 32, 64>}, {pipeline_mode = #tpu.pipeline_mode<synchronous>, transform_indices = @transform_5, window_bounds = array<i64: 64, 16>}, {pipeline_mode = #tpu.pipeline_mode<synchronous>, transform_indices = @transform_6, window_bounds = array<i64: 64, 16>}, {pipeline_mode = #tpu.pipeline_mode<synchronous>, transform_indices = @transform_7, window_bounds = array<i64: 16, 64, 64>}, {pipeline_mode = #tpu.pipeline_mode<synchronous>, transform_indices = @transform_8, window_bounds = array<i64: 32, 32>}, {pipeline_mode = #tpu.pipeline_mode<synchronous>, transform_indices = @transform_9, window_bounds = array<i64: 1, 32>}, {pipeline_mode = #tpu.pipeline_mode<synchronous>, transform_indices = @transform_10, window_bounds = array<i64: 16, 64, 64>}, {pipeline_mode = #tpu.pipeline_mode<synchronous>, transform_indices = @transform_11, window_bounds = array<i64: 32, 32>}, {pipeline_mode = #tpu.pipeline_mode<synchronous>, transform_indices = @transform_12, window_bounds = array<i64: 1, 32>}, {pipeline_mode = #tpu.pipeline_mode<synchronous>, transform_indices = @transform_13, window_bounds = array<i64: 16, 64, 64>}, {pipeline_mode = #tpu.pipeline_mode<synchronous>, transform_indices = @transform_14, window_bounds = array<i64: 32, 32>}, {pipeline_mode = #tpu.pipeline_mode<synchronous>, transform_indices = @transform_15, window_bounds = array<i64: 1, 32>}, {pipeline_mode = #tpu.pipeline_mode<synchronous>, transform_indices = @transform_16, window_bounds = array<i64: 16, 64, 64>}, {pipeline_mode = #tpu.pipeline_mode<synchronous>, transform_indices = @transform_17, window_bounds = array<i64: 32, 32>}, {pipeline_mode = #tpu.pipeline_mode<synchronous>, transform_indices = @transform_18, window_bounds = array<i64: 1, 32>}, {pipeline_mode = #tpu.pipeline_mode<synchronous>, transform_indices = @transform_19, window_bounds = array<i64: 32, 128>}, {pipeline_mode = #tpu.pipeline_mode<synchronous>, transform_indices = @transform_20, window_bounds = array<i64: 1, 128>}, {pipeline_mode = #tpu.pipeline_mode<synchronous>, transform_indices = @transform_21, window_bounds = array<i64: 128, 1>}, {pipeline_mode = #tpu.pipeline_mode<synchronous>, transform_indices = @transform_22, window_bounds = array<i64: 1, 1>}, {pipeline_mode = #tpu.pipeline_mode<synchronous>, transform_indices = @transform_23, window_bounds = array<i64: 2, 64, 1>}]} {
    %c0 = arith.constant 0 : index
    %c0_0 = arith.constant 0 : index
    %0 = vector.load %arg5[%c0, %c0_0] : memref<32x64xf32, #tpu.memory_space<vmem>>, vector<32x64xf32>
    %c0_1 = arith.constant 0 : index
    %c0_2 = arith.constant 0 : index
    %1 = vector.load %arg6[%c0_1, %c0_2] : memref<64x16xf32, #tpu.memory_space<vmem>>, vector<64x16xf32>
    %c0_3 = arith.constant 0 : index
    %c0_4 = arith.constant 0 : index
    %2 = vector.load %arg7[%c0_3, %c0_4] : memref<64x16xf32, #tpu.memory_space<vmem>>, vector<64x16xf32>
    %c0_5 = arith.constant 0 : index
    %c0_6 = arith.constant 0 : index
    %3 = vector.load %arg3[%c0_5, %c0_6] : memref<2x32xf32, #tpu.memory_space<vmem>>, vector<2x32xf32>
    %4 = vector.extract_strided_slice %3 {offsets = [0, 0], sizes = [1, 32], strides = [1, 1]} : vector<2x32xf32> to vector<1x32xf32>
    %5 = vector.extract_strided_slice %3 {offsets = [1, 0], sizes = [1, 32], strides = [1, 1]} : vector<2x32xf32> to vector<1x32xf32>
    %c0_7 = arith.constant 0 : index
    %c0_8 = arith.constant 0 : index
    %6 = vector.load %arg4[%c0_7, %c0_8] : memref<1x32xf32, #tpu.memory_space<vmem>>, vector<1x32xf32>
    %c0_9 = arith.constant 0 : index
    %c0_10 = arith.constant 0 : index
    %7 = vector.load %arg2[%c0_9, %c0_10] : memref<64x1xf32, #tpu.memory_space<vmem>>, vector<64x1xf32>
    %c0_11 = arith.constant 0 : index
    %c0_12 = arith.constant 0 : index
    %c0_13 = arith.constant 0 : index
    %8 = vector.load %arg1[%c0_11, %c0_12, %c0_13] : memref<2x64x1xf32, #tpu.memory_space<vmem>>, vector<1x64x1xf32>
    %9 = vector.shape_cast %8 : vector<1x64x1xf32> to vector<64x1xf32>
    %10 = vector.broadcast %9 : vector<64x1xf32> to vector<64x32xf32>
    %11 = vector.broadcast %4 : vector<1x32xf32> to vector<64x32xf32>
    %12 = arith.mulf %10, %11 : vector<64x32xf32>
    %13 = vector.broadcast %7 : vector<64x1xf32> to vector<64x32xf32>
    %14 = vector.broadcast %5 : vector<1x32xf32> to vector<64x32xf32>
    %15 = arith.mulf %13, %14 : vector<64x32xf32>
    %16 = arith.addf %12, %15 : vector<64x32xf32>
    %17 = vector.broadcast %6 : vector<1x32xf32> to vector<64x32xf32>
    %18 = arith.addf %16, %17 : vector<64x32xf32>
    %c1 = arith.constant 1 : index
    %c0_14 = arith.constant 0 : index
    %c0_15 = arith.constant 0 : index
    %19 = vector.load %arg1[%c1, %c0_14, %c0_15] : memref<2x64x1xf32, #tpu.memory_space<vmem>>, vector<1x64x1xf32>
    %20 = vector.shape_cast %19 : vector<1x64x1xf32> to vector<64x1xf32>
    %21 = vector.broadcast %20 : vector<64x1xf32> to vector<64x32xf32>
    %22 = vector.broadcast %4 : vector<1x32xf32> to vector<64x32xf32>
    %23 = arith.mulf %21, %22 : vector<64x32xf32>
    %24 = vector.broadcast %7 : vector<64x1xf32> to vector<64x32xf32>
    %25 = vector.broadcast %5 : vector<1x32xf32> to vector<64x32xf32>
    %26 = arith.mulf %24, %25 : vector<64x32xf32>
    %27 = arith.addf %23, %26 : vector<64x32xf32>
    %28 = vector.broadcast %6 : vector<1x32xf32> to vector<64x32xf32>
    %29 = arith.addf %27, %28 : vector<64x32xf32>
    %c0_16 = arith.constant 0 : index
    %c0_17 = arith.constant 0 : index
    %c0_18 = arith.constant 0 : index
    %30 = vector.load %arg8[%c0_16, %c0_17, %c0_18] : memref<16x64x64xf32, #tpu.memory_space<vmem>>, vector<16x64x64xf32>
    %c0_19 = arith.constant 0 : index
    %c0_20 = arith.constant 0 : index
    %31 = vector.load %arg9[%c0_19, %c0_20] : memref<32x32xf32, #tpu.memory_space<vmem>>, vector<32x32xf32>
    %c0_21 = arith.constant 0 : index
    %c0_22 = arith.constant 0 : index
    %32 = vector.load %arg10[%c0_21, %c0_22] : memref<1x32xf32, #tpu.memory_space<vmem>>, vector<1x32xf32>
    %cst = arith.constant dense<0.000000e+00> : vector<32x32xf32>
    %33 = tpu.matmul %0, %18, %cst {dimension_numbers = #tpu.dot_dimension_numbers<[1], [0], [0], [1], [0, 0, 1, 1], [], []>} : vector<32x64xf32>, vector<64x32xf32>, vector<32x32xf32> -> vector<32x32xf32>
    %34 = vector.extract_strided_slice %33 {offsets = [0, 0], sizes = [16, 32], strides = [1, 1]} : vector<32x32xf32> to vector<16x32xf32>
    %35 = vector.extract_strided_slice %33 {offsets = [16, 0], sizes = [16, 32], strides = [1, 1]} : vector<32x32xf32> to vector<16x32xf32>
    %36 = tpu.concatenate %34, %35 in 1 : vector<16x32xf32>, vector<16x32xf32> -> vector<16x64xf32>
    %cst_23 = arith.constant dense<0.000000e+00> : vector<32x32xf32>
    %37 = tpu.matmul %0, %29, %cst_23 {dimension_numbers = #tpu.dot_dimension_numbers<[1], [0], [0], [1], [0, 0, 1, 1], [], []>} : vector<32x64xf32>, vector<64x32xf32>, vector<32x32xf32> -> vector<32x32xf32>
    %38 = vector.extract_strided_slice %37 {offsets = [0, 0], sizes = [16, 32], strides = [1, 1]} : vector<32x32xf32> to vector<16x32xf32>
    %39 = vector.extract_strided_slice %37 {offsets = [16, 0], sizes = [16, 32], strides = [1, 1]} : vector<32x32xf32> to vector<16x32xf32>
    %40 = tpu.concatenate %38, %39 in 1 : vector<16x32xf32>, vector<16x32xf32> -> vector<16x64xf32>
    %41 = vector.shape_cast %36 : vector<16x64xf32> to vector<16x1x64xf32>
    %42 = vector.shape_cast %40 : vector<16x64xf32> to vector<16x1x64xf32>
    %43 = tpu.concatenate %41, %42 in 1 : vector<16x1x64xf32>, vector<16x1x64xf32> -> vector<16x2x64xf32>
    "tpu.trace_start"() <{level = 10 : i32, message = "mbc,mcd->mbd"}> : () -> ()
    %cst_24 = arith.constant dense<0.000000e+00> : vector<16x2x64xf32>
    %44 = tpu.matmul %43, %30, %cst_24 {dimension_numbers = #tpu.dot_dimension_numbers<[2], [1], [1], [2], [0, 0, 0, 1, 1, 2], [0], [0]>} : vector<16x2x64xf32>, vector<16x64x64xf32>, vector<16x2x64xf32> -> vector<16x2x64xf32>
    "tpu.trace_stop"() : () -> ()
    %45 = vector.extract_strided_slice %44 {offsets = [0, 0, 0], sizes = [16, 1, 32], strides = [1, 1, 1]} : vector<16x2x64xf32> to vector<16x1x32xf32>
    %46 = vector.shape_cast %45 : vector<16x1x32xf32> to vector<16x32xf32>
    %47 = vector.extract_strided_slice %44 {offsets = [0, 0, 32], sizes = [16, 1, 32], strides = [1, 1, 1]} : vector<16x2x64xf32> to vector<16x1x32xf32>
    %48 = vector.shape_cast %47 : vector<16x1x32xf32> to vector<16x32xf32>
    %cst_25 = arith.constant dense<0.000000e+00> : vector<64x32xf32>
    %49 = tpu.matmul %1, %46, %cst_25 {dimension_numbers = #tpu.dot_dimension_numbers<[1], [0], [0], [1], [0, 0, 1, 1], [], []>} : vector<64x16xf32>, vector<16x32xf32>, vector<64x32xf32> -> vector<64x32xf32>
    %cst_26 = arith.constant dense<0.000000e+00> : vector<64x32xf32>
    %50 = tpu.matmul %2, %48, %cst_26 {dimension_numbers = #tpu.dot_dimension_numbers<[1], [0], [0], [1], [0, 0, 1, 1], [], []>} : vector<64x16xf32>, vector<16x32xf32>, vector<64x32xf32> -> vector<64x32xf32>
    %51 = arith.addf %49, %50 : vector<64x32xf32>
    %cst_27 = arith.constant dense<0.000000e+00> : vector<64x32xf32>
    %52 = tpu.matmul %18, %31, %cst_27 {dimension_numbers = #tpu.dot_dimension_numbers<[1], [0], [0], [1], [0, 0, 1, 1], [], []>} : vector<64x32xf32>, vector<32x32xf32>, vector<64x32xf32> -> vector<64x32xf32>
    %53 = vector.broadcast %32 : vector<1x32xf32> to vector<64x32xf32>
    %54 = arith.addf %52, %53 : vector<64x32xf32>
    %55 = arith.addf %54, %51 : vector<64x32xf32>
    %cst_28 = arith.constant 5.000000e-01 : f32
    %56 = vector.broadcast %cst_28 : f32 to vector<64x32xf32>
    %57 = arith.mulf %56, %55 : vector<64x32xf32>
    %cst_29 = arith.constant 0.707106769 : f32
    %58 = vector.broadcast %cst_29 : f32 to vector<64x32xf32>
    %59 = arith.mulf %55, %58 : vector<64x32xf32>
    %60 = math.erf %59 : vector<64x32xf32>
    %cst_30 = arith.constant 1.000000e+00 : f32
    %61 = vector.broadcast %cst_30 : f32 to vector<64x32xf32>
    %62 = arith.addf %61, %60 : vector<64x32xf32>
    %63 = arith.mulf %57, %62 : vector<64x32xf32>
    %64 = vector.extract_strided_slice %44 {offsets = [0, 1, 0], sizes = [16, 1, 32], strides = [1, 1, 1]} : vector<16x2x64xf32> to vector<16x1x32xf32>
    %65 = vector.shape_cast %64 : vector<16x1x32xf32> to vector<16x32xf32>
    %66 = vector.extract_strided_slice %44 {offsets = [0, 1, 32], sizes = [16, 1, 32], strides = [1, 1, 1]} : vector<16x2x64xf32> to vector<16x1x32xf32>
    %67 = vector.shape_cast %66 : vector<16x1x32xf32> to vector<16x32xf32>
    %cst_31 = arith.constant dense<0.000000e+00> : vector<64x32xf32>
    %68 = tpu.matmul %1, %65, %cst_31 {dimension_numbers = #tpu.dot_dimension_numbers<[1], [0], [0], [1], [0, 0, 1, 1], [], []>} : vector<64x16xf32>, vector<16x32xf32>, vector<64x32xf32> -> vector<64x32xf32>
    %cst_32 = arith.constant dense<0.000000e+00> : vector<64x32xf32>
    %69 = tpu.matmul %2, %67, %cst_32 {dimension_numbers = #tpu.dot_dimension_numbers<[1], [0], [0], [1], [0, 0, 1, 1], [], []>} : vector<64x16xf32>, vector<16x32xf32>, vector<64x32xf32> -> vector<64x32xf32>
    %70 = arith.addf %68, %69 : vector<64x32xf32>
    %cst_33 = arith.constant dense<0.000000e+00> : vector<64x32xf32>
    %71 = tpu.matmul %29, %31, %cst_33 {dimension_numbers = #tpu.dot_dimension_numbers<[1], [0], [0], [1], [0, 0, 1, 1], [], []>} : vector<64x32xf32>, vector<32x32xf32>, vector<64x32xf32> -> vector<64x32xf32>
    %72 = vector.broadcast %32 : vector<1x32xf32> to vector<64x32xf32>
    %73 = arith.addf %71, %72 : vector<64x32xf32>
    %74 = arith.addf %73, %70 : vector<64x32xf32>
    %cst_34 = arith.constant 5.000000e-01 : f32
    %75 = vector.broadcast %cst_34 : f32 to vector<64x32xf32>
    %76 = arith.mulf %75, %74 : vector<64x32xf32>
    %cst_35 = arith.constant 0.707106769 : f32
    %77 = vector.broadcast %cst_35 : f32 to vector<64x32xf32>
    %78 = arith.mulf %74, %77 : vector<64x32xf32>
    %79 = math.erf %78 : vector<64x32xf32>
    %cst_36 = arith.constant 1.000000e+00 : f32
    %80 = vector.broadcast %cst_36 : f32 to vector<64x32xf32>
    %81 = arith.addf %80, %79 : vector<64x32xf32>
    %82 = arith.mulf %76, %81 : vector<64x32xf32>
    %c0_37 = arith.constant 0 : index
    %c0_38 = arith.constant 0 : index
    %c0_39 = arith.constant 0 : index
    %83 = vector.load %arg11[%c0_37, %c0_38, %c0_39] : memref<16x64x64xf32, #tpu.memory_space<vmem>>, vector<16x64x64xf32>
    %c0_40 = arith.constant 0 : index
    %c0_41 = arith.constant 0 : index
    %84 = vector.load %arg12[%c0_40, %c0_41] : memref<32x32xf32, #tpu.memory_space<vmem>>, vector<32x32xf32>
    %c0_42 = arith.constant 0 : index
    %c0_43 = arith.constant 0 : index
    %85 = vector.load %arg13[%c0_42, %c0_43] : memref<1x32xf32, #tpu.memory_space<vmem>>, vector<1x32xf32>
    %cst_44 = arith.constant dense<0.000000e+00> : vector<32x32xf32>
    %86 = tpu.matmul %0, %63, %cst_44 {dimension_numbers = #tpu.dot_dimension_numbers<[1], [0], [0], [1], [0, 0, 1, 1], [], []>} : vector<32x64xf32>, vector<64x32xf32>, vector<32x32xf32> -> vector<32x32xf32>
    %87 = vector.extract_strided_slice %86 {offsets = [0, 0], sizes = [16, 32], strides = [1, 1]} : vector<32x32xf32> to vector<16x32xf32>
    %88 = vector.extract_strided_slice %86 {offsets = [16, 0], sizes = [16, 32], strides = [1, 1]} : vector<32x32xf32> to vector<16x32xf32>
    %89 = tpu.concatenate %87, %88 in 1 : vector<16x32xf32>, vector<16x32xf32> -> vector<16x64xf32>
    %cst_45 = arith.constant dense<0.000000e+00> : vector<32x32xf32>
    %90 = tpu.matmul %0, %82, %cst_45 {dimension_numbers = #tpu.dot_dimension_numbers<[1], [0], [0], [1], [0, 0, 1, 1], [], []>} : vector<32x64xf32>, vector<64x32xf32>, vector<32x32xf32> -> vector<32x32xf32>
    %91 = vector.extract_strided_slice %90 {offsets = [0, 0], sizes = [16, 32], strides = [1, 1]} : vector<32x32xf32> to vector<16x32xf32>
    %92 = vector.extract_strided_slice %90 {offsets = [16, 0], sizes = [16, 32], strides = [1, 1]} : vector<32x32xf32> to vector<16x32xf32>
    %93 = tpu.concatenate %91, %92 in 1 : vector<16x32xf32>, vector<16x32xf32> -> vector<16x64xf32>
    %94 = vector.shape_cast %89 : vector<16x64xf32> to vector<16x1x64xf32>
    %95 = vector.shape_cast %93 : vector<16x64xf32> to vector<16x1x64xf32>
    %96 = tpu.concatenate %94, %95 in 1 : vector<16x1x64xf32>, vector<16x1x64xf32> -> vector<16x2x64xf32>
    "tpu.trace_start"() <{level = 10 : i32, message = "mbc,mcd->mbd"}> : () -> ()
    %cst_46 = arith.constant dense<0.000000e+00> : vector<16x2x64xf32>
    %97 = tpu.matmul %96, %83, %cst_46 {dimension_numbers = #tpu.dot_dimension_numbers<[2], [1], [1], [2], [0, 0, 0, 1, 1, 2], [0], [0]>} : vector<16x2x64xf32>, vector<16x64x64xf32>, vector<16x2x64xf32> -> vector<16x2x64xf32>
    "tpu.trace_stop"() : () -> ()
    %98 = vector.extract_strided_slice %97 {offsets = [0, 0, 0], sizes = [16, 1, 32], strides = [1, 1, 1]} : vector<16x2x64xf32> to vector<16x1x32xf32>
    %99 = vector.shape_cast %98 : vector<16x1x32xf32> to vector<16x32xf32>
    %100 = vector.extract_strided_slice %97 {offsets = [0, 0, 32], sizes = [16, 1, 32], strides = [1, 1, 1]} : vector<16x2x64xf32> to vector<16x1x32xf32>
    %101 = vector.shape_cast %100 : vector<16x1x32xf32> to vector<16x32xf32>
    %cst_47 = arith.constant dense<0.000000e+00> : vector<64x32xf32>
    %102 = tpu.matmul %1, %99, %cst_47 {dimension_numbers = #tpu.dot_dimension_numbers<[1], [0], [0], [1], [0, 0, 1, 1], [], []>} : vector<64x16xf32>, vector<16x32xf32>, vector<64x32xf32> -> vector<64x32xf32>
    %cst_48 = arith.constant dense<0.000000e+00> : vector<64x32xf32>
    %103 = tpu.matmul %2, %101, %cst_48 {dimension_numbers = #tpu.dot_dimension_numbers<[1], [0], [0], [1], [0, 0, 1, 1], [], []>} : vector<64x16xf32>, vector<16x32xf32>, vector<64x32xf32> -> vector<64x32xf32>
    %104 = arith.addf %102, %103 : vector<64x32xf32>
    %cst_49 = arith.constant dense<0.000000e+00> : vector<64x32xf32>
    %105 = tpu.matmul %63, %84, %cst_49 {dimension_numbers = #tpu.dot_dimension_numbers<[1], [0], [0], [1], [0, 0, 1, 1], [], []>} : vector<64x32xf32>, vector<32x32xf32>, vector<64x32xf32> -> vector<64x32xf32>
    %106 = vector.broadcast %85 : vector<1x32xf32> to vector<64x32xf32>
    %107 = arith.addf %105, %106 : vector<64x32xf32>
    %108 = arith.addf %107, %104 : vector<64x32xf32>
    %cst_50 = arith.constant 5.000000e-01 : f32
    %109 = vector.broadcast %cst_50 : f32 to vector<64x32xf32>
    %110 = arith.mulf %109, %108 : vector<64x32xf32>
    %cst_51 = arith.constant 0.707106769 : f32
    %111 = vector.broadcast %cst_51 : f32 to vector<64x32xf32>
    %112 = arith.mulf %108, %111 : vector<64x32xf32>
    %113 = math.erf %112 : vector<64x32xf32>
    %cst_52 = arith.constant 1.000000e+00 : f32
    %114 = vector.broadcast %cst_52 : f32 to vector<64x32xf32>
    %115 = arith.addf %114, %113 : vector<64x32xf32>
    %116 = arith.mulf %110, %115 : vector<64x32xf32>
    %117 = vector.extract_strided_slice %97 {offsets = [0, 1, 0], sizes = [16, 1, 32], strides = [1, 1, 1]} : vector<16x2x64xf32> to vector<16x1x32xf32>
    %118 = vector.shape_cast %117 : vector<16x1x32xf32> to vector<16x32xf32>
    %119 = vector.extract_strided_slice %97 {offsets = [0, 1, 32], sizes = [16, 1, 32], strides = [1, 1, 1]} : vector<16x2x64xf32> to vector<16x1x32xf32>
    %120 = vector.shape_cast %119 : vector<16x1x32xf32> to vector<16x32xf32>
    %cst_53 = arith.constant dense<0.000000e+00> : vector<64x32xf32>
    %121 = tpu.matmul %1, %118, %cst_53 {dimension_numbers = #tpu.dot_dimension_numbers<[1], [0], [0], [1], [0, 0, 1, 1], [], []>} : vector<64x16xf32>, vector<16x32xf32>, vector<64x32xf32> -> vector<64x32xf32>
    %cst_54 = arith.constant dense<0.000000e+00> : vector<64x32xf32>
    %122 = tpu.matmul %2, %120, %cst_54 {dimension_numbers = #tpu.dot_dimension_numbers<[1], [0], [0], [1], [0, 0, 1, 1], [], []>} : vector<64x16xf32>, vector<16x32xf32>, vector<64x32xf32> -> vector<64x32xf32>
    %123 = arith.addf %121, %122 : vector<64x32xf32>
    %cst_55 = arith.constant dense<0.000000e+00> : vector<64x32xf32>
    %124 = tpu.matmul %82, %84, %cst_55 {dimension_numbers = #tpu.dot_dimension_numbers<[1], [0], [0], [1], [0, 0, 1, 1], [], []>} : vector<64x32xf32>, vector<32x32xf32>, vector<64x32xf32> -> vector<64x32xf32>
    %125 = vector.broadcast %85 : vector<1x32xf32> to vector<64x32xf32>
    %126 = arith.addf %124, %125 : vector<64x32xf32>
    %127 = arith.addf %126, %123 : vector<64x32xf32>
    %cst_56 = arith.constant 5.000000e-01 : f32
    %128 = vector.broadcast %cst_56 : f32 to vector<64x32xf32>
    %129 = arith.mulf %128, %127 : vector<64x32xf32>
    %cst_57 = arith.constant 0.707106769 : f32
    %130 = vector.broadcast %cst_57 : f32 to vector<64x32xf32>
    %131 = arith.mulf %127, %130 : vector<64x32xf32>
    %132 = math.erf %131 : vector<64x32xf32>
    %cst_58 = arith.constant 1.000000e+00 : f32
    %133 = vector.broadcast %cst_58 : f32 to vector<64x32xf32>
    %134 = arith.addf %133, %132 : vector<64x32xf32>
    %135 = arith.mulf %129, %134 : vector<64x32xf32>
    %c0_59 = arith.constant 0 : index
    %c0_60 = arith.constant 0 : index
    %c0_61 = arith.constant 0 : index
    %136 = vector.load %arg14[%c0_59, %c0_60, %c0_61] : memref<16x64x64xf32, #tpu.memory_space<vmem>>, vector<16x64x64xf32>
    %c0_62 = arith.constant 0 : index
    %c0_63 = arith.constant 0 : index
    %137 = vector.load %arg15[%c0_62, %c0_63] : memref<32x32xf32, #tpu.memory_space<vmem>>, vector<32x32xf32>
    %c0_64 = arith.constant 0 : index
    %c0_65 = arith.constant 0 : index
    %138 = vector.load %arg16[%c0_64, %c0_65] : memref<1x32xf32, #tpu.memory_space<vmem>>, vector<1x32xf32>
    %cst_66 = arith.constant dense<0.000000e+00> : vector<32x32xf32>
    %139 = tpu.matmul %0, %116, %cst_66 {dimension_numbers = #tpu.dot_dimension_numbers<[1], [0], [0], [1], [0, 0, 1, 1], [], []>} : vector<32x64xf32>, vector<64x32xf32>, vector<32x32xf32> -> vector<32x32xf32>
    %140 = vector.extract_strided_slice %139 {offsets = [0, 0], sizes = [16, 32], strides = [1, 1]} : vector<32x32xf32> to vector<16x32xf32>
    %141 = vector.extract_strided_slice %139 {offsets = [16, 0], sizes = [16, 32], strides = [1, 1]} : vector<32x32xf32> to vector<16x32xf32>
    %142 = tpu.concatenate %140, %141 in 1 : vector<16x32xf32>, vector<16x32xf32> -> vector<16x64xf32>
    %cst_67 = arith.constant dense<0.000000e+00> : vector<32x32xf32>
    %143 = tpu.matmul %0, %135, %cst_67 {dimension_numbers = #tpu.dot_dimension_numbers<[1], [0], [0], [1], [0, 0, 1, 1], [], []>} : vector<32x64xf32>, vector<64x32xf32>, vector<32x32xf32> -> vector<32x32xf32>
    %144 = vector.extract_strided_slice %143 {offsets = [0, 0], sizes = [16, 32], strides = [1, 1]} : vector<32x32xf32> to vector<16x32xf32>
    %145 = vector.extract_strided_slice %143 {offsets = [16, 0], sizes = [16, 32], strides = [1, 1]} : vector<32x32xf32> to vector<16x32xf32>
    %146 = tpu.concatenate %144, %145 in 1 : vector<16x32xf32>, vector<16x32xf32> -> vector<16x64xf32>
    %147 = vector.shape_cast %142 : vector<16x64xf32> to vector<16x1x64xf32>
    %148 = vector.shape_cast %146 : vector<16x64xf32> to vector<16x1x64xf32>
    %149 = tpu.concatenate %147, %148 in 1 : vector<16x1x64xf32>, vector<16x1x64xf32> -> vector<16x2x64xf32>
    "tpu.trace_start"() <{level = 10 : i32, message = "mbc,mcd->mbd"}> : () -> ()
    %cst_68 = arith.constant dense<0.000000e+00> : vector<16x2x64xf32>
    %150 = tpu.matmul %149, %136, %cst_68 {dimension_numbers = #tpu.dot_dimension_numbers<[2], [1], [1], [2], [0, 0, 0, 1, 1, 2], [0], [0]>} : vector<16x2x64xf32>, vector<16x64x64xf32>, vector<16x2x64xf32> -> vector<16x2x64xf32>
    "tpu.trace_stop"() : () -> ()
    %151 = vector.extract_strided_slice %150 {offsets = [0, 0, 0], sizes = [16, 1, 32], strides = [1, 1, 1]} : vector<16x2x64xf32> to vector<16x1x32xf32>
    %152 = vector.shape_cast %151 : vector<16x1x32xf32> to vector<16x32xf32>
    %153 = vector.extract_strided_slice %150 {offsets = [0, 0, 32], sizes = [16, 1, 32], strides = [1, 1, 1]} : vector<16x2x64xf32> to vector<16x1x32xf32>
    %154 = vector.shape_cast %153 : vector<16x1x32xf32> to vector<16x32xf32>
    %cst_69 = arith.constant dense<0.000000e+00> : vector<64x32xf32>
    %155 = tpu.matmul %1, %152, %cst_69 {dimension_numbers = #tpu.dot_dimension_numbers<[1], [0], [0], [1], [0, 0, 1, 1], [], []>} : vector<64x16xf32>, vector<16x32xf32>, vector<64x32xf32> -> vector<64x32xf32>
    %cst_70 = arith.constant dense<0.000000e+00> : vector<64x32xf32>
    %156 = tpu.matmul %2, %154, %cst_70 {dimension_numbers = #tpu.dot_dimension_numbers<[1], [0], [0], [1], [0, 0, 1, 1], [], []>} : vector<64x16xf32>, vector<16x32xf32>, vector<64x32xf32> -> vector<64x32xf32>
    %157 = arith.addf %155, %156 : vector<64x32xf32>
    %cst_71 = arith.constant dense<0.000000e+00> : vector<64x32xf32>
    %158 = tpu.matmul %116, %137, %cst_71 {dimension_numbers = #tpu.dot_dimension_numbers<[1], [0], [0], [1], [0, 0, 1, 1], [], []>} : vector<64x32xf32>, vector<32x32xf32>, vector<64x32xf32> -> vector<64x32xf32>
    %159 = vector.broadcast %138 : vector<1x32xf32> to vector<64x32xf32>
    %160 = arith.addf %158, %159 : vector<64x32xf32>
    %161 = arith.addf %160, %157 : vector<64x32xf32>
    %cst_72 = arith.constant 5.000000e-01 : f32
    %162 = vector.broadcast %cst_72 : f32 to vector<64x32xf32>
    %163 = arith.mulf %162, %161 : vector<64x32xf32>
    %cst_73 = arith.constant 0.707106769 : f32
    %164 = vector.broadcast %cst_73 : f32 to vector<64x32xf32>
    %165 = arith.mulf %161, %164 : vector<64x32xf32>
    %166 = math.erf %165 : vector<64x32xf32>
    %cst_74 = arith.constant 1.000000e+00 : f32
    %167 = vector.broadcast %cst_74 : f32 to vector<64x32xf32>
    %168 = arith.addf %167, %166 : vector<64x32xf32>
    %169 = arith.mulf %163, %168 : vector<64x32xf32>
    %170 = vector.extract_strided_slice %150 {offsets = [0, 1, 0], sizes = [16, 1, 32], strides = [1, 1, 1]} : vector<16x2x64xf32> to vector<16x1x32xf32>
    %171 = vector.shape_cast %170 : vector<16x1x32xf32> to vector<16x32xf32>
    %172 = vector.extract_strided_slice %150 {offsets = [0, 1, 32], sizes = [16, 1, 32], strides = [1, 1, 1]} : vector<16x2x64xf32> to vector<16x1x32xf32>
    %173 = vector.shape_cast %172 : vector<16x1x32xf32> to vector<16x32xf32>
    %cst_75 = arith.constant dense<0.000000e+00> : vector<64x32xf32>
    %174 = tpu.matmul %1, %171, %cst_75 {dimension_numbers = #tpu.dot_dimension_numbers<[1], [0], [0], [1], [0, 0, 1, 1], [], []>} : vector<64x16xf32>, vector<16x32xf32>, vector<64x32xf32> -> vector<64x32xf32>
    %cst_76 = arith.constant dense<0.000000e+00> : vector<64x32xf32>
    %175 = tpu.matmul %2, %173, %cst_76 {dimension_numbers = #tpu.dot_dimension_numbers<[1], [0], [0], [1], [0, 0, 1, 1], [], []>} : vector<64x16xf32>, vector<16x32xf32>, vector<64x32xf32> -> vector<64x32xf32>
    %176 = arith.addf %174, %175 : vector<64x32xf32>
    %cst_77 = arith.constant dense<0.000000e+00> : vector<64x32xf32>
    %177 = tpu.matmul %135, %137, %cst_77 {dimension_numbers = #tpu.dot_dimension_numbers<[1], [0], [0], [1], [0, 0, 1, 1], [], []>} : vector<64x32xf32>, vector<32x32xf32>, vector<64x32xf32> -> vector<64x32xf32>
    %178 = vector.broadcast %138 : vector<1x32xf32> to vector<64x32xf32>
    %179 = arith.addf %177, %178 : vector<64x32xf32>
    %180 = arith.addf %179, %176 : vector<64x32xf32>
    %cst_78 = arith.constant 5.000000e-01 : f32
    %181 = vector.broadcast %cst_78 : f32 to vector<64x32xf32>
    %182 = arith.mulf %181, %180 : vector<64x32xf32>
    %cst_79 = arith.constant 0.707106769 : f32
    %183 = vector.broadcast %cst_79 : f32 to vector<64x32xf32>
    %184 = arith.mulf %180, %183 : vector<64x32xf32>
    %185 = math.erf %184 : vector<64x32xf32>
    %cst_80 = arith.constant 1.000000e+00 : f32
    %186 = vector.broadcast %cst_80 : f32 to vector<64x32xf32>
    %187 = arith.addf %186, %185 : vector<64x32xf32>
    %188 = arith.mulf %182, %187 : vector<64x32xf32>
    %c0_81 = arith.constant 0 : index
    %c0_82 = arith.constant 0 : index
    %c0_83 = arith.constant 0 : index
    %189 = vector.load %arg17[%c0_81, %c0_82, %c0_83] : memref<16x64x64xf32, #tpu.memory_space<vmem>>, vector<16x64x64xf32>
    %c0_84 = arith.constant 0 : index
    %c0_85 = arith.constant 0 : index
    %190 = vector.load %arg18[%c0_84, %c0_85] : memref<32x32xf32, #tpu.memory_space<vmem>>, vector<32x32xf32>
    %c0_86 = arith.constant 0 : index
    %c0_87 = arith.constant 0 : index
    %191 = vector.load %arg19[%c0_86, %c0_87] : memref<1x32xf32, #tpu.memory_space<vmem>>, vector<1x32xf32>
    %cst_88 = arith.constant dense<0.000000e+00> : vector<32x32xf32>
    %192 = tpu.matmul %0, %169, %cst_88 {dimension_numbers = #tpu.dot_dimension_numbers<[1], [0], [0], [1], [0, 0, 1, 1], [], []>} : vector<32x64xf32>, vector<64x32xf32>, vector<32x32xf32> -> vector<32x32xf32>
    %193 = vector.extract_strided_slice %192 {offsets = [0, 0], sizes = [16, 32], strides = [1, 1]} : vector<32x32xf32> to vector<16x32xf32>
    %194 = vector.extract_strided_slice %192 {offsets = [16, 0], sizes = [16, 32], strides = [1, 1]} : vector<32x32xf32> to vector<16x32xf32>
    %195 = tpu.concatenate %193, %194 in 1 : vector<16x32xf32>, vector<16x32xf32> -> vector<16x64xf32>
    %cst_89 = arith.constant dense<0.000000e+00> : vector<32x32xf32>
    %196 = tpu.matmul %0, %188, %cst_89 {dimension_numbers = #tpu.dot_dimension_numbers<[1], [0], [0], [1], [0, 0, 1, 1], [], []>} : vector<32x64xf32>, vector<64x32xf32>, vector<32x32xf32> -> vector<32x32xf32>
    %197 = vector.extract_strided_slice %196 {offsets = [0, 0], sizes = [16, 32], strides = [1, 1]} : vector<32x32xf32> to vector<16x32xf32>
    %198 = vector.extract_strided_slice %196 {offsets = [16, 0], sizes = [16, 32], strides = [1, 1]} : vector<32x32xf32> to vector<16x32xf32>
    %199 = tpu.concatenate %197, %198 in 1 : vector<16x32xf32>, vector<16x32xf32> -> vector<16x64xf32>
    %200 = vector.shape_cast %195 : vector<16x64xf32> to vector<16x1x64xf32>
    %201 = vector.shape_cast %199 : vector<16x64xf32> to vector<16x1x64xf32>
    %202 = tpu.concatenate %200, %201 in 1 : vector<16x1x64xf32>, vector<16x1x64xf32> -> vector<16x2x64xf32>
    "tpu.trace_start"() <{level = 10 : i32, message = "mbc,mcd->mbd"}> : () -> ()
    %cst_90 = arith.constant dense<0.000000e+00> : vector<16x2x64xf32>
    %203 = tpu.matmul %202, %189, %cst_90 {dimension_numbers = #tpu.dot_dimension_numbers<[2], [1], [1], [2], [0, 0, 0, 1, 1, 2], [0], [0]>} : vector<16x2x64xf32>, vector<16x64x64xf32>, vector<16x2x64xf32> -> vector<16x2x64xf32>
    "tpu.trace_stop"() : () -> ()
    %204 = vector.extract_strided_slice %203 {offsets = [0, 0, 0], sizes = [16, 1, 32], strides = [1, 1, 1]} : vector<16x2x64xf32> to vector<16x1x32xf32>
    %205 = vector.shape_cast %204 : vector<16x1x32xf32> to vector<16x32xf32>
    %206 = vector.extract_strided_slice %203 {offsets = [0, 0, 32], sizes = [16, 1, 32], strides = [1, 1, 1]} : vector<16x2x64xf32> to vector<16x1x32xf32>
    %207 = vector.shape_cast %206 : vector<16x1x32xf32> to vector<16x32xf32>
    %cst_91 = arith.constant dense<0.000000e+00> : vector<64x32xf32>
    %208 = tpu.matmul %1, %205, %cst_91 {dimension_numbers = #tpu.dot_dimension_numbers<[1], [0], [0], [1], [0, 0, 1, 1], [], []>} : vector<64x16xf32>, vector<16x32xf32>, vector<64x32xf32> -> vector<64x32xf32>
    %cst_92 = arith.constant dense<0.000000e+00> : vector<64x32xf32>
    %209 = tpu.matmul %2, %207, %cst_92 {dimension_numbers = #tpu.dot_dimension_numbers<[1], [0], [0], [1], [0, 0, 1, 1], [], []>} : vector<64x16xf32>, vector<16x32xf32>, vector<64x32xf32> -> vector<64x32xf32>
    %210 = arith.addf %208, %209 : vector<64x32xf32>
    %cst_93 = arith.constant dense<0.000000e+00> : vector<64x32xf32>
    %211 = tpu.matmul %169, %190, %cst_93 {dimension_numbers = #tpu.dot_dimension_numbers<[1], [0], [0], [1], [0, 0, 1, 1], [], []>} : vector<64x32xf32>, vector<32x32xf32>, vector<64x32xf32> -> vector<64x32xf32>
    %212 = vector.broadcast %191 : vector<1x32xf32> to vector<64x32xf32>
    %213 = arith.addf %211, %212 : vector<64x32xf32>
    %214 = arith.addf %213, %210 : vector<64x32xf32>
    %215 = vector.extract_strided_slice %203 {offsets = [0, 1, 0], sizes = [16, 1, 32], strides = [1, 1, 1]} : vector<16x2x64xf32> to vector<16x1x32xf32>
    %216 = vector.shape_cast %215 : vector<16x1x32xf32> to vector<16x32xf32>
    %217 = vector.extract_strided_slice %203 {offsets = [0, 1, 32], sizes = [16, 1, 32], strides = [1, 1, 1]} : vector<16x2x64xf32> to vector<16x1x32xf32>
    %218 = vector.shape_cast %217 : vector<16x1x32xf32> to vector<16x32xf32>
    %cst_94 = arith.constant dense<0.000000e+00> : vector<64x32xf32>
    %219 = tpu.matmul %1, %216, %cst_94 {dimension_numbers = #tpu.dot_dimension_numbers<[1], [0], [0], [1], [0, 0, 1, 1], [], []>} : vector<64x16xf32>, vector<16x32xf32>, vector<64x32xf32> -> vector<64x32xf32>
    %cst_95 = arith.constant dense<0.000000e+00> : vector<64x32xf32>
    %220 = tpu.matmul %2, %218, %cst_95 {dimension_numbers = #tpu.dot_dimension_numbers<[1], [0], [0], [1], [0, 0, 1, 1], [], []>} : vector<64x16xf32>, vector<16x32xf32>, vector<64x32xf32> -> vector<64x32xf32>
    %221 = arith.addf %219, %220 : vector<64x32xf32>
    %cst_96 = arith.constant dense<0.000000e+00> : vector<64x32xf32>
    %222 = tpu.matmul %188, %190, %cst_96 {dimension_numbers = #tpu.dot_dimension_numbers<[1], [0], [0], [1], [0, 0, 1, 1], [], []>} : vector<64x32xf32>, vector<32x32xf32>, vector<64x32xf32> -> vector<64x32xf32>
    %223 = vector.broadcast %191 : vector<1x32xf32> to vector<64x32xf32>
    %224 = arith.addf %222, %223 : vector<64x32xf32>
    %225 = arith.addf %224, %221 : vector<64x32xf32>
    %c0_97 = arith.constant 0 : index
    %c0_98 = arith.constant 0 : index
    %226 = vector.load %arg20[%c0_97, %c0_98] : memref<32x128xf32, #tpu.memory_space<vmem>>, vector<32x128xf32>
    %c0_99 = arith.constant 0 : index
    %c0_100 = arith.constant 0 : index
    %227 = vector.load %arg21[%c0_99, %c0_100] : memref<1x128xf32, #tpu.memory_space<vmem>>, vector<1x128xf32>
    %c0_101 = arith.constant 0 : index
    %c0_102 = arith.constant 0 : index
    %228 = vector.load %arg22[%c0_101, %c0_102] : memref<128x1xf32, #tpu.memory_space<vmem>>, vector<128x1xf32>
    %c0_103 = arith.constant 0 : index
    %c0_104 = arith.constant 0 : index
    %229 = vector.load %arg23[%c0_103, %c0_104] : memref<1x1xf32, #tpu.memory_space<vmem>>, vector<1x1xf32>
    %cst_105 = arith.constant dense<0.000000e+00> : vector<64x128xf32>
    %230 = tpu.matmul %214, %226, %cst_105 {dimension_numbers = #tpu.dot_dimension_numbers<[1], [0], [0], [1], [0, 0, 1, 1], [], []>} : vector<64x32xf32>, vector<32x128xf32>, vector<64x128xf32> -> vector<64x128xf32>
    %231 = vector.broadcast %227 : vector<1x128xf32> to vector<64x128xf32>
    %232 = arith.addf %230, %231 : vector<64x128xf32>
    %cst_106 = arith.constant 5.000000e-01 : f32
    %233 = vector.broadcast %cst_106 : f32 to vector<64x128xf32>
    %234 = arith.mulf %233, %232 : vector<64x128xf32>
    %cst_107 = arith.constant 0.707106769 : f32
    %235 = vector.broadcast %cst_107 : f32 to vector<64x128xf32>
    %236 = arith.mulf %232, %235 : vector<64x128xf32>
    %237 = math.erf %236 : vector<64x128xf32>
    %cst_108 = arith.constant 1.000000e+00 : f32
    %238 = vector.broadcast %cst_108 : f32 to vector<64x128xf32>
    %239 = arith.addf %238, %237 : vector<64x128xf32>
    %240 = arith.mulf %234, %239 : vector<64x128xf32>
    %cst_109 = arith.constant dense<0.000000e+00> : vector<64x1xf32>
    %241 = tpu.matmul %240, %228, %cst_109 {dimension_numbers = #tpu.dot_dimension_numbers<[1], [0], [0], [1], [0, 0, 1, 1], [], []>} : vector<64x128xf32>, vector<128x1xf32>, vector<64x1xf32> -> vector<64x1xf32>
    %242 = vector.broadcast %229 : vector<1x1xf32> to vector<64x1xf32>
    %243 = arith.addf %241, %242 : vector<64x1xf32>
    %c0_110 = arith.constant 0 : index
    %c0_111 = arith.constant 0 : index
    %c0_112 = arith.constant 0 : index
    %244 = vector.load %arg24[%c0_110, %c0_111, %c0_112] : memref<2x64x1xf32, #tpu.memory_space<vmem>>, vector<1x64x1xf32>
    %245 = vector.shape_cast %244 : vector<1x64x1xf32> to vector<64x1xf32>
    %246 = vector.shape_cast %243 : vector<64x1xf32> to vector<1x64x1xf32>
    tpu.vector_store %arg24[%c0_110, %c0_111, %c0_112], %246 {strides = array<i32>} : memref<2x64x1xf32, #tpu.memory_space<vmem>>, vector<1x64x1xf32>,
    %cst_113 = arith.constant dense<0.000000e+00> : vector<64x128xf32>
    %247 = tpu.matmul %225, %226, %cst_113 {dimension_numbers = #tpu.dot_dimension_numbers<[1], [0], [0], [1], [0, 0, 1, 1], [], []>} : vector<64x32xf32>, vector<32x128xf32>, vector<64x128xf32> -> vector<64x128xf32>
    %248 = vector.broadcast %227 : vector<1x128xf32> to vector<64x128xf32>
    %249 = arith.addf %247, %248 : vector<64x128xf32>
    %cst_114 = arith.constant 5.000000e-01 : f32
    %250 = vector.broadcast %cst_114 : f32 to vector<64x128xf32>
    %251 = arith.mulf %250, %249 : vector<64x128xf32>
    %cst_115 = arith.constant 0.707106769 : f32
    %252 = vector.broadcast %cst_115 : f32 to vector<64x128xf32>
    %253 = arith.mulf %249, %252 : vector<64x128xf32>
    %254 = math.erf %253 : vector<64x128xf32>
    %cst_116 = arith.constant 1.000000e+00 : f32
    %255 = vector.broadcast %cst_116 : f32 to vector<64x128xf32>
    %256 = arith.addf %255, %254 : vector<64x128xf32>
    %257 = arith.mulf %251, %256 : vector<64x128xf32>
    %cst_117 = arith.constant dense<0.000000e+00> : vector<64x1xf32>
    %258 = tpu.matmul %257, %228, %cst_117 {dimension_numbers = #tpu.dot_dimension_numbers<[1], [0], [0], [1], [0, 0, 1, 1], [], []>} : vector<64x128xf32>, vector<128x1xf32>, vector<64x1xf32> -> vector<64x1xf32>
    %259 = vector.broadcast %229 : vector<1x1xf32> to vector<64x1xf32>
    %260 = arith.addf %258, %259 : vector<64x1xf32>
    %c1_118 = arith.constant 1 : index
    %c0_119 = arith.constant 0 : index
    %c0_120 = arith.constant 0 : index
    %261 = vector.load %arg24[%c1_118, %c0_119, %c0_120] : memref<2x64x1xf32, #tpu.memory_space<vmem>>, vector<1x64x1xf32>
    %262 = vector.shape_cast %261 : vector<1x64x1xf32> to vector<64x1xf32>
    %263 = vector.shape_cast %260 : vector<64x1xf32> to vector<1x64x1xf32>
    tpu.vector_store %arg24[%c1_118, %c0_119, %c0_120], %263 {strides = array<i32>} : memref<2x64x1xf32, #tpu.memory_space<vmem>>, vector<1x64x1xf32>,
    return
  }
  func.func @transform_0(%arg0: i32) -> (i32, i32, i32) {
    %c0_i32 = arith.constant 0 : i32
    %c0_i32_0 = arith.constant 0 : i32
    %c0_i32_1 = arith.constant 0 : i32
    %c0_i32_2 = arith.constant 0 : i32
    return %c0_i32, %c0_i32_0, %c0_i32_1 : i32, i32, i32
  }
  func.func @transform_1(%arg0: i32) -> (i32, i32) {
    %c0_i32 = arith.constant 0 : i32
    %c0_i32_0 = arith.constant 0 : i32
    %c0_i32_1 = arith.constant 0 : i32
    return %c0_i32, %c0_i32_0 : i32, i32
  }
  func.func @transform_2(%arg0: i32) -> (i32, i32) {
    %c0_i32 = arith.constant 0 : i32
    %c0_i32_0 = arith.constant 0 : i32
    %c0_i32_1 = arith.constant 0 : i32
    return %c0_i32, %c0_i32_0 : i32, i32
  }
  func.func @transform_3(%arg0: i32) -> (i32, i32) {
    %c0_i32 = arith.constant 0 : i32
    %c0_i32_0 = arith.constant 0 : i32
    %c0_i32_1 = arith.constant 0 : i32
    return %c0_i32, %c0_i32_0 : i32, i32
  }
  func.func @transform_4(%arg0: i32) -> (i32, i32) {
    %c0_i32 = arith.constant 0 : i32
    %c0_i32_0 = arith.constant 0 : i32
    %c0_i32_1 = arith.constant 0 : i32
    return %c0_i32, %c0_i32_0 : i32, i32
  }
  func.func @transform_5(%arg0: i32) -> (i32, i32) {
    %c0_i32 = arith.constant 0 : i32
    %c0_i32_0 = arith.constant 0 : i32
    %c0_i32_1 = arith.constant 0 : i32
    return %c0_i32, %c0_i32_0 : i32, i32
  }
  func.func @transform_6(%arg0: i32) -> (i32, i32) {
    %c0_i32 = arith.constant 0 : i32
    %c0_i32_0 = arith.constant 0 : i32
    %c0_i32_1 = arith.constant 0 : i32
    return %c0_i32, %c0_i32_0 : i32, i32
  }
  func.func @transform_7(%arg0: i32) -> (i32, i32, i32) {
    %c0_i32 = arith.constant 0 : i32
    %c0_i32_0 = arith.constant 0 : i32
    %c0_i32_1 = arith.constant 0 : i32
    %c0_i32_2 = arith.constant 0 : i32
    return %c0_i32, %c0_i32_0, %c0_i32_1 : i32, i32, i32
  }
  func.func @transform_8(%arg0: i32) -> (i32, i32) {
    %c0_i32 = arith.constant 0 : i32
    %c0_i32_0 = arith.constant 0 : i32
    %c0_i32_1 = arith.constant 0 : i32
    return %c0_i32, %c0_i32_0 : i32, i32
  }
  func.func @transform_9(%arg0: i32) -> (i32, i32) {
    %c0_i32 = arith.constant 0 : i32
    %c0_i32_0 = arith.constant 0 : i32
    %c0_i32_1 = arith.constant 0 : i32
    return %c0_i32, %c0_i32_0 : i32, i32
  }
  func.func @transform_10(%arg0: i32) -> (i32, i32, i32) {
    %c0_i32 = arith.constant 0 : i32
    %c0_i32_0 = arith.constant 0 : i32
    %c0_i32_1 = arith.constant 0 : i32
    %c0_i32_2 = arith.constant 0 : i32
    return %c0_i32, %c0_i32_0, %c0_i32_1 : i32, i32, i32
  }
  func.func @transform_11(%arg0: i32) -> (i32, i32) {
    %c0_i32 = arith.constant 0 : i32
    %c0_i32_0 = arith.constant 0 : i32
    %c0_i32_1 = arith.constant 0 : i32
    return %c0_i32, %c0_i32_0 : i32, i32
  }
  func.func @transform_12(%arg0: i32) -> (i32, i32) {
    %c0_i32 = arith.constant 0 : i32
    %c0_i32_0 = arith.constant 0 : i32
    %c0_i32_1 = arith.constant 0 : i32
    return %c0_i32, %c0_i32_0 : i32, i32
  }
  func.func @transform_13(%arg0: i32) -> (i32, i32, i32) {
    %c0_i32 = arith.constant 0 : i32
    %c0_i32_0 = arith.constant 0 : i32
    %c0_i32_1 = arith.constant 0 : i32
    %c0_i32_2 = arith.constant 0 : i32
    return %c0_i32, %c0_i32_0, %c0_i32_1 : i32, i32, i32
  }
  func.func @transform_14(%arg0: i32) -> (i32, i32) {
    %c0_i32 = arith.constant 0 : i32
    %c0_i32_0 = arith.constant 0 : i32
    %c0_i32_1 = arith.constant 0 : i32
    return %c0_i32, %c0_i32_0 : i32, i32
  }
  func.func @transform_15(%arg0: i32) -> (i32, i32) {
    %c0_i32 = arith.constant 0 : i32
    %c0_i32_0 = arith.constant 0 : i32
    %c0_i32_1 = arith.constant 0 : i32
    return %c0_i32, %c0_i32_0 : i32, i32
  }
  func.func @transform_16(%arg0: i32) -> (i32, i32, i32) {
    %c0_i32 = arith.constant 0 : i32
    %c0_i32_0 = arith.constant 0 : i32
    %c0_i32_1 = arith.constant 0 : i32
    %c0_i32_2 = arith.constant 0 : i32
    return %c0_i32, %c0_i32_0, %c0_i32_1 : i32, i32, i32
  }
  func.func @transform_17(%arg0: i32) -> (i32, i32) {
    %c0_i32 = arith.constant 0 : i32
    %c0_i32_0 = arith.constant 0 : i32
    %c0_i32_1 = arith.constant 0 : i32
    return %c0_i32, %c0_i32_0 : i32, i32
  }
  func.func @transform_18(%arg0: i32) -> (i32, i32) {
    %c0_i32 = arith.constant 0 : i32
    %c0_i32_0 = arith.constant 0 : i32
    %c0_i32_1 = arith.constant 0 : i32
    return %c0_i32, %c0_i32_0 : i32, i32
  }
  func.func @transform_19(%arg0: i32) -> (i32, i32) {
    %c0_i32 = arith.constant 0 : i32
    %c0_i32_0 = arith.constant 0 : i32
    %c0_i32_1 = arith.constant 0 : i32
    return %c0_i32, %c0_i32_0 : i32, i32
  }
  func.func @transform_20(%arg0: i32) -> (i32, i32) {
    %c0_i32 = arith.constant 0 : i32
    %c0_i32_0 = arith.constant 0 : i32
    %c0_i32_1 = arith.constant 0 : i32
    return %c0_i32, %c0_i32_0 : i32, i32
  }
  func.func @transform_21(%arg0: i32) -> (i32, i32) {
    %c0_i32 = arith.constant 0 : i32
    %c0_i32_0 = arith.constant 0 : i32
    %c0_i32_1 = arith.constant 0 : i32
    return %c0_i32, %c0_i32_0 : i32, i32
  }
  func.func @transform_22(%arg0: i32) -> (i32, i32) {
    %c0_i32 = arith.constant 0 : i32
    %c0_i32_0 = arith.constant 0 : i32
    %c0_i32_1 = arith.constant 0 : i32
    return %c0_i32, %c0_i32_0 : i32, i32
  }
  func.func @transform_23(%arg0: i32) -> (i32, i32, i32) {
    %c0_i32 = arith.constant 0 : i32
    %c0_i32_0 = arith.constant 0 : i32
    %c0_i32_1 = arith.constant 0 : i32
    %c0_i32_2 = arith.constant 0 : i32
    return %c0_i32, %c0_i32_0, %c0_i32_1 : i32, i32, i32
  }
}

</mosaic_0001>

<bundles_post_ra>
// kernel: fno1d_forward.1
= control target key start
LH: loop header
LB: loop body
LE: loop exit
PB: predicated region body
PF: predicated region fallthrough
CT: control target
= control target key end

     0   :  { %s19373_s0 = inlined_call_operand.vmem [shape: f32[2,64,1], index: 0, kind: input, shape index: {}]   ;;  %s19374_s1 = inlined_call_operand.vmem [shape: f32[64,1], index: 1, kind: input, shape index: {}]   ;;  %s19375_s2 = inlined_call_operand.vmem [shape: f32[2,32], index: 2, kind: input, shape index: {}]   ;;  %s19376_s3 = inlined_call_operand.vmem [shape: f32[1,32], index: 3, kind: input, shape index: {}]   ;;  %s19377_s4 = inlined_call_operand.vmem [shape: f32[32,64], index: 4, kind: input, shape index: {}]   ;;  %s19378_s5 = inlined_call_operand.vmem [shape: f32[64,16], index: 5, kind: input, shape index: {}]   ;;  %s19379_s6 = inlined_call_operand.vmem [shape: f32[64,16], index: 6, kind: input, shape index: {}]   ;;  %s19380_s7 = inlined_call_operand.hbm [shape: f32[16,64,64], index: 7, kind: input, shape index: {}]   ;;  %s19381_s8 = inlined_call_operand.vmem [shape: f32[32,32], index: 8, kind: input, shape index: {}]   ;;  %s19382_s9 = inlined_call_operand.vmem [shape: f32[1,32], index: 9, kind: input, shape index: {}]   ;;  %s19383_s10 = inlined_call_operand.hbm [shape: f32[16,64,64], index: 10, kind: input, shape index: {}]   ;;  %s19384_s11 = inlined_call_operand.vmem [shape: f32[32,32], index: 11, kind: input, shape index: {}]   ;;  %s19385_s12 = inlined_call_operand.vmem [shape: f32[1,32], index: 12, kind: input, shape index: {}]   ;;  %s19386_s13 = inlined_call_operand.hbm [shape: f32[16,64,64], index: 13, kind: input, shape index: {}]   ;;  %s19387_s14 = inlined_call_operand.vmem [shape: f32[32,32], index: 14, kind: input, shape index: {}]   ;;  %s19388_s15 = inlined_call_operand.vmem [shape: f32[1,32], index: 15, kind: input, shape index: {}]   ;;  %s19389_s16 = inlined_call_operand.hbm [shape: f32[16,64,64], index: 16, kind: input, shape index: {}]   ;;  %s19390_s17 = inlined_call_operand.vmem [shape: f32[32,32], index: 17, kind: input, shape index: {}]   ;;  %s19391_s18 = inlined_call_operand.vmem [shape: f32[1,32], index: 18, kind: input, shape index: {}]   ;;  %s19392_s19 = inlined_call_operand.vmem [shape: f32[32,128], index: 19, kind: input, shape index: {}]   ;;  %s19393_s20 = inlined_call_operand.vmem [shape: f32[1,128], index: 20, kind: input, shape index: {}]   ;;  %s19394_s21 = inlined_call_operand.vmem [shape: f32[128,1], index: 21, kind: input, shape index: {}]   ;;  %s19395_s22 = inlined_call_operand.<no memory space> [shape: f32[1,1], index: 22, kind: input, shape index: {}]   ;;  %s19396_s23 = inlined_call_operand.vmem [shape: f32[2,64,1], index: 23, kind: output, shape index: {}]  }
   0x1   :  { %19403 = sst [smem:[#allocation13_spill]] %s19373_s0  ;;  %v28_v0 = vstv %s19395_s22 }
   0x2   :  { %19404 = sst [smem:[#allocation14_spill]] %s19374_s1  ;;  %29 = vst [vmem:[#allocation2] sm:$0x1] %v28_v0 }
   0x3   :  { %19405 = sst [smem:[#allocation15_spill]] %s19375_s2 }
   0x4   :  { %19406 = sst [smem:[#allocation16_spill]] %s19376_s3 }
   0x5   :  { %19407 = sst [smem:[#allocation17_spill]] %s19377_s4 }
   0x6   :  { %19408 = sst [smem:[#allocation18_spill]] %s19378_s5 }
   0x7   :  { %19409 = sst [smem:[#allocation19_spill]] %s19379_s6 }
   0x8   :  { %19410 = sst [smem:[#allocation20_spill]] %s19380_s7 }
   0x9   :  { %30 = vsyncpa [#allocation4], 0 }
   0xa   :  { %31 = vsyncpa [#allocation6], 0 }
   0xb   :  { %32 = vsyncpa [#allocation9], 0  ;;  %s16546_s24 = smov [#allocation5]   ;;  %s16547_s5 = smov [#allocation3]  }
   0xc   :  { %s68_s25 = sshll.u32 %s16546_s24, 4  ;;  %s52_s1 = sshll.u32 %s16547_s5, 4  ;;  %s69_s25 = int_to_ptr.vmem [resolvable:$true] %s68_s25  ;;  %s16682_s1 = int_to_ptr.vmem [resolvable:$true] %s52_s1 }
   0xd   :  { %s16452_s6 = scalar_lea.hbm %s19383_s10, 16384 }
   0xe   :  { %p16453_p0 = scmp.ne.s32.totalorder %s19383_s10, %s16452_s6  ;;  %p16456_p1 = scmp.lt.u32.totalorder %s16452_s6, %s19383_s10 }
  0x10   :  { %p16458_p2 = pnand %p16456_p1, %p16453_p0 }
  0x12   :  { %16461 = shalt.err (!%p16458_p2)
}
  0x13   :  { %s16462_s29 = scalar_lea.vmem %s69_s25, 16384  ;;  %p16467_p4 = scmp.lt.s32.totalorder %s69_s25, %s69_s25 }
  0x14   :  { %p16463_p3 = scmp.ne.s32.totalorder %s69_s25, %s16462_s29  ;;  %p16468_p5 = scmp.lt.s32.totalorder %s16462_s29, %s16462_s29 }
  0x16   :  { %p16469_p6 = por %p16468_p5, %p16467_p4 }
  0x18   :  { %p16470_p7 = pnand %p16469_p6, %p16463_p3 }
  0x1a   :  { %16473 = shalt.err (!%p16470_p7)
}
  0x1b   :  { %s16548_s3 = smov 128   ;;  %s16549_s0 = smov 8  }
  0x1c   :  { %74 = dma.hbm_to_vmem [thread:$0]  %s19383_s10, 16384, %s69_s25, [#allocation6], %s16548_s3, %s16548_s3, %s16549_s0  }
  0x1d   :  { %s19411_s26 = sld [smem:[#allocation20_spill]] }
  0x23   :  { %s16474_s2 = scalar_lea.hbm %s19411_s26, 16384 }
  0x24   :  { %p16475_p8 = scmp.ne.s32.totalorder %s19411_s26, %s16474_s2  ;;  %p16478_p9 = scmp.lt.u32.totalorder %s16474_s2, %s19411_s26 }
  0x26   :  { %p16480_p10 = pnand %p16478_p9, %p16475_p8 }
  0x28   :  { %16483 = shalt.err (!%p16480_p10)
}
  0x29   :  { %s16484_s28 = scalar_lea.vmem %s16682_s1, 16384  ;;  %p16489_p12 = scmp.lt.s32.totalorder %s16682_s1, %s16682_s1 }
  0x2a   :  { %p16485_p11 = scmp.ne.s32.totalorder %s16682_s1, %s16484_s28  ;;  %p16490_p13 = scmp.lt.s32.totalorder %s16484_s28, %s16484_s28 }
  0x2c   :  { %p16491_p0 = por %p16490_p13, %p16489_p12 }
  0x2e   :  { %p16492_p1 = pnand %p16491_p0, %p16485_p11 }
  0x30   :  { %16495 = shalt.err (!%p16492_p1)
}
  0x31   :  { %58 = dma.hbm_to_vmem [thread:$0]  %s19411_s26, 16384, %s16682_s1, [#allocation4], %s16548_s3, %s16548_s3, %s16549_s0  }
  0x32   :  { %s16550_s29 = smov [#allocation7]   ;;  %s16551_s30 = smov [#allocation8]  }
  0x33   :  { %s84_s4 = sshll.u32 %s16550_s29, 4  ;;  %s100_s24 = sshll.u32 %s16551_s30, 4  ;;  %s85_s4 = int_to_ptr.vmem [resolvable:$true] %s84_s4  ;;  %s16719_s24 = int_to_ptr.vmem [resolvable:$true] %s100_s24 }
  0x34   :  { %s16496_s6 = scalar_lea.hbm %s19386_s13, 16384 }
  0x35   :  { %p16497_p2 = scmp.ne.s32.totalorder %s19386_s13, %s16496_s6  ;;  %p16500_p3 = scmp.lt.u32.totalorder %s16496_s6, %s19386_s13 }
  0x37   :  { %p16502_p4 = pnand %p16500_p3, %p16497_p2 }
  0x39   :  { %16505 = shalt.err (!%p16502_p4)
}
  0x3a   :  { %s16506_s1 = scalar_lea.vmem %s85_s4, 16384  ;;  %p16511_p6 = scmp.lt.s32.totalorder %s85_s4, %s85_s4 }
  0x3b   :  { %p16507_p5 = scmp.ne.s32.totalorder %s85_s4, %s16506_s1  ;;  %p16512_p7 = scmp.lt.s32.totalorder %s16506_s1, %s16506_s1 }
  0x3d   :  { %p16513_p8 = por %p16512_p7, %p16511_p6 }
  0x3f   :  { %p16514_p9 = pnand %p16513_p8, %p16507_p5 }
  0x41   :  { %16517 = shalt.err (!%p16514_p9)
}
  0x42   :  { %90 = dma.hbm_to_vmem [thread:$0]  %s19386_s13, 16384, %s85_s4, [#allocation6], %s16548_s3, %s16548_s3, %s16549_s0  }
  0x43   :  { %s16518_s30 = scalar_lea.hbm %s19389_s16, 16384 }
  0x44   :  { %p16519_p10 = scmp.ne.s32.totalorder %s19389_s16, %s16518_s30  ;;  %p16522_p11 = scmp.lt.u32.totalorder %s16518_s30, %s19389_s16 }
  0x46   :  { %p16524_p12 = pnand %p16522_p11, %p16519_p10 }
  0x48   :  { %16527 = shalt.err (!%p16524_p12)
}
  0x49   :  { %s16528_s7 = scalar_lea.vmem %s16719_s24, 16384  ;;  %p16533_p0 = scmp.lt.s32.totalorder %s16719_s24, %s16719_s24 }
  0x4a   :  { %p16529_p13 = scmp.ne.s32.totalorder %s16719_s24, %s16528_s7  ;;  %p16534_p1 = scmp.lt.s32.totalorder %s16528_s7, %s16528_s7 }
  0x4c   :  { %p16535_p2 = por %p16534_p1, %p16533_p0 }
  0x4e   :  { %p16536_p3 = pnand %p16535_p2, %p16529_p13 }
  0x50   :  { %16539 = shalt.err (!%p16536_p3)
}
  0x51   :  { %106 = dma.hbm_to_vmem [thread:$0]  %s19389_s16, 16384, %s16719_s24, [#allocation9], %s16548_s3, %s16548_s3, %s16549_s0  }
  0x52   :  { %16540 = dma.done.wait [#allocation4], 16384  }
  0x53   :  { %16541 = vsyncadd [#allocation4], 4294950912 }
  0x54   :  { %16542 = dma.done.wait [#allocation6], 32768  }
  0x55   :  { %16543 = vsyncadd [#allocation6], 4294934528 }
  0x56   :  { %16544 = dma.done.wait [#allocation9], 16384  }
  0x57   :  { %16545 = vsyncadd [#allocation9], 4294950912  ;;  %v16552_v1 = vmov 0   ;;  %s19412_s1 = sld [smem:[#allocation13_spill]]  ;;  %s19413_s25 = sld [smem:[#allocation14_spill]]  ;;  %vm501_vm0 = vcmask 523264   ;;  %v209_v27 = vlaneseq }
  0x58   :  { %16223 = vset.pattern.permute.xlu1 %v16552_v1  ;;  %16222 = vset.pattern.permute.xlu0 %v16552_v1  ;;  %s19414_s2 = sld [smem:[#allocation17_spill]]  ;;  %s19415_s28 = sld [smem:[#allocation15_spill]]  ;;  %vm16555_vm1 = vmmov 0   ;;  %vm607_vm2 = vcmask 261120   ;;  %vm1001_vm3 = vcmask 1040384   ;;  %vm2203_vm4 = vcmask 1041409  }
  0x59   :  { %v16835_v28 = vshrl.u32 %v209_v27, 7  ;;  %s19416_s10 = sld [smem:[#allocation16_spill]]  ;;  %s16554_s30 = smov 32   ;;  %vm2206_vm5 = vcmask 1042434   ;;  %vm2209_vm6 = vcmask 1043459   ;;  %vm2212_vm7 = vcmask 1044484  }
  0x5a   :  { %vm2215_vm8 = vcmask 1045509   ;;  %vm2218_vm9 = vcmask 1046534   ;;  %vm2221_vm10 = vcmask 1047559   ;;  %s19424_s27 = sld [smem:[#allocation19_spill]]  ;;  %vm2243_vm11 = vcmask 130048   ;;  %s16558_s7 = smov 96  }
  0x5b   :  { %v16838_v29 = vsub.s32 0, %v16835_v28  ;;  %v263_v30 = vsub.s32 1, %v16835_v28  ;;  %s19425_s26 = sld [smem:[#allocation18_spill]]  ;;  %vm11351_vm12 = vcmask 7168  }
  0x5d   :  { %v161_v2 = vld [vmem:[%s19412_s1] sm:$0xff]  ;;  %v162_v4 = vld [vmem:[%s19412_s1 + $0x8] sm:$0xff]  ;;  %v163_v6 = vld [vmem:[%s19412_s1 + $0x10] sm:$0xff] }
  0x5e   :  { %v153_v3 = vld [vmem:[%s19413_s25] sm:$0xff]  ;;  %171 = vperm.xlu0 %16222, %v161_v2   ;;  %v154_v5 = vld [vmem:[%s19413_s25 + $0x8] sm:$0xff]  ;;  %v164_v7 = vld [vmem:[%s19412_s1 + $0x18] sm:$0xff] }
  0x5f   :  { %223 = vperm.xlu1 %16223, %v153_v3   ;;  %v155_v8 = vld [vmem:[%s19413_s25 + $0x10] sm:$0xff]  ;;  %v156_v9 = vld [vmem:[%s19413_s25 + $0x18] sm:$0xff]  ;;  %v165_v10 = vld [vmem:[%s19412_s1 + $0x20] sm:$0xff] }
  0x60   :  { %v166_v11 = vld [vmem:[%s19412_s1 + $0x28] sm:$0xff]  ;;  %v157_v12 = vld [vmem:[%s19413_s25 + $0x20] sm:$0xff]  ;;  %v167_v14 = vld [vmem:[%s19412_s1 + $0x30] sm:$0xff] }
  0x61   :  { %v158_v13 = vld [vmem:[%s19413_s25 + $0x28] sm:$0xff]  ;;  %v168_v15 = vld [vmem:[%s19412_s1 + $0x38] sm:$0xff]  ;;  %v159_v16 = vld [vmem:[%s19413_s25 + $0x30] sm:$0xff] }
  0x62   :  { %176 = vperm.xlu0 %16222, %v162_v4   ;;  %v160_v17 = vld [vmem:[%s19413_s25 + $0x38] sm:$0xff]  ;;  %v11651_v18 = vld [vmem:[%s19412_s1 + $0x40] sm:$0xff]  ;;  %v11652_v19 = vld [vmem:[%s19412_s1 + $0x48] sm:$0xff] }
  0x63   :  { %228 = vperm.xlu1 %16223, %v154_v5   ;;  %v11653_v20 = vld [vmem:[%s19412_s1 + $0x50] sm:$0xff]  ;;  %v11654_v21 = vld [vmem:[%s19412_s1 + $0x58] sm:$0xff]  ;;  %v11655_v22 = vld [vmem:[%s19412_s1 + $0x60] sm:$0xff] }
  0x64   :  { %v11656_v23 = vld [vmem:[%s19412_s1 + $0x68] sm:$0xff]  ;;  %v16825_v24 = vld [vmem:[%s19414_s2] sm:$0xff]  ;;  %v11657_v25 = vld [vmem:[%s19412_s1 + $0x70] sm:$0xff] }
  0x65   :  { %12993 = vmatprep.mubr.msk.f32.mxu1 %vm501_vm0, %v16825_v24  ;;  %v11658_v26 = vld [vmem:[%s19412_s1 + $0x78] sm:$0xff]  ;;  %v151_v31 = vld [vmem:[%s19415_s28] sm:$0x3] }
  0x66   :  { %181 = vperm.xlu0 %16222, %v163_v6   ;;  %v16845_v32 = vrot.slane %v151_v31, %v16838_v29  ;;  %v264_v33 = vrot.slane %v151_v31, %v263_v30  ;;  %v16852_v43 = vld [vmem:[%s19416_s10] ss:$0 sm:$0xff] }
  0x67   :  { %186 = vperm.xlu1 %16223, %v164_v7  }
  0x6a   :  { %233 = vperm.xlu0 %16222, %v155_v8  }
  0x6b   :  { %238 = vperm.xlu1 %16223, %v156_v9  }
  0x6e   :  { %191 = vperm.xlu0 %16222, %v165_v10  }
  0x6f   :  { %196 = vperm.xlu1 %16223, %v166_v11  }
  0x72   :  { %243 = vperm.xlu0 %16222, %v157_v12  }
  0x73   :  { %248 = vperm.xlu1 %16223, %v158_v13  }
  0x76   :  { %201 = vperm.xlu0 %16222, %v167_v14  }
  0x77   :  { %206 = vperm.xlu1 %16223, %v168_v15  }
  0x7a   :  { %253 = vperm.xlu0 %16222, %v159_v16  }
  0x7b   :  { %258 = vperm.xlu1 %16223, %v160_v17  }
  0x7e   :  { %306 = vperm.xlu0 %16222, %v11651_v18  }
  0x7f   :  { %311 = vperm.xlu1 %16223, %v11652_v19  }
  0x82   :  { %316 = vperm.xlu0 %16222, %v11653_v20  }
  0x83   :  { %321 = vperm.xlu1 %16223, %v11654_v21  }
  0x86   :  { %326 = vperm.xlu0 %16222, %v11655_v22  }
  0x87   :  { %331 = vperm.xlu1 %16223, %v11656_v23  }
  0x8a   :  { %336 = vperm.xlu0 %16222, %v11657_v25  }
  0x8b   :  { %341 = vperm.xlu1 %16223, %v11658_v26  }
  0xdd   :  { %v172_v34 = vpop.permute.xlu0 %171 }
  0xde   :  { %v224_v35 = vpop.permute.xlu1 %223  ;;  %v213_v36 = vmul.f32 %v16845_v32, %v172_v34 }
  0xdf   :  { %v265_v37 = vmul.f32 %v264_v33, %v224_v35 }
  0xe1   :  { %v177_v38 = vpop.permute.xlu0 %176  ;;  %v273_v40 = vadd.f32 %v265_v37, %v213_v36 }
  0xe2   :  { %v229_v39 = vpop.permute.xlu1 %228  ;;  %v214_v41 = vmul.f32 %v16845_v32, %v177_v38 }
  0xe3   :  { %v266_v42 = vmul.f32 %v264_v33, %v229_v39  ;;  %v16855_v47 = vadd.f32 %v16852_v43, %v273_v40 }
  0xe5   :  { %v274_v44 = vadd.f32 %v266_v42, %v214_v41  ;;  %v182_v45 = vpop.permute.xlu0 %181 }
  0xe6   :  { %v187_v46 = vpop.permute.xlu1 %186  ;;  %v215_v52 = vmul.f32 %v16845_v32, %v182_v45 }
  0xe7   :  { %v16858_v48 = vadd.f32 %v16852_v43, %v274_v44  ;;  %v216_v53 = vmul.f32 %v16845_v32, %v187_v46  ;;  %v133_v44 = vld [vmem:[%s19414_s2 + $0x10] sm:$0xff] }
  0xe9   :  { %v14913_v49 = vpack.c.bf16 %v16858_v48, %v16855_v47  ;;  %v234_v50 = vpop.permute.xlu0 %233 }
  0xea   :  { %v239_v51 = vpop.permute.xlu1 %238  ;;  %v267_v54 = vmul.f32 %v264_v33, %v234_v50 }
  0xeb   :  { %v268_v55 = vmul.f32 %v264_v33, %v239_v51  ;;  %14914 = vmatprep.subr.bf16.mxu1 %v14913_v49 }
  0xec   :  { %14916 = vmatpush3.bf16.msra.mxu1 %v14913_v49  ;;  %v275_v56 = vadd.f32 %v267_v54, %v215_v52 }
  0xed   :  { %v276_v57 = vadd.f32 %v268_v55, %v216_v53  ;;  %v192_v58 = vpop.permute.xlu0 %191  ;;  %v134_v53 = vld [vmem:[%s19414_s2 + $0x18] sm:$0xff] }
  0xee   :  { %v197_v59 = vpop.permute.xlu1 %196  ;;  %v16865_v60 = vadd.f32 %v16852_v43, %v275_v56  ;;  %v217_v1 = vmul.f32 %v16845_v32, %v192_v58 }
  0xef   :  { %v16868_v61 = vadd.f32 %v16852_v43, %v276_v57  ;;  %v218_v2 = vmul.f32 %v16845_v32, %v197_v59 }
  0xf1   :  { %v14917_v62 = vpack.c.bf16 %v16868_v61, %v16865_v60  ;;  %v244_v63 = vpop.permute.xlu0 %243 }
  0xf2   :  { %v249_v0 = vpop.permute.xlu1 %248  ;;  %v269_v3 = vmul.f32 %v264_v33, %v244_v63 }
  0xf3   :  { %v270_v4 = vmul.f32 %v264_v33, %v249_v0  ;;  %14918 = vmatprep.subr.bf16.mxu1 %v14917_v62 }
  0xf4   :  { %14920 = vmatpush3.bf16.msra.mxu1 %v14917_v62  ;;  %v277_v5 = vadd.f32 %v269_v3, %v217_v1 }
  0xf5   :  { %v278_v6 = vadd.f32 %v270_v4, %v218_v2  ;;  %v202_v7 = vpop.permute.xlu0 %201 }
  0xf6   :  { %v207_v8 = vpop.permute.xlu1 %206  ;;  %v16875_v9 = vadd.f32 %v16852_v43, %v277_v5  ;;  %v219_v14 = vmul.f32 %v16845_v32, %v202_v7 }
  0xf7   :  { %v16878_v10 = vadd.f32 %v16852_v43, %v278_v6  ;;  %v220_v15 = vmul.f32 %v16845_v32, %v207_v8  ;;  %v369_v6 = vld [vmem:[#allocation3 + $0x8] sm:$0xff] }
  0xf9   :  { %v14921_v11 = vpack.c.bf16 %v16878_v10, %v16875_v9  ;;  %v254_v12 = vpop.permute.xlu0 %253 }
  0xfa   :  { %v259_v13 = vpop.permute.xlu1 %258  ;;  %v271_v16 = vmul.f32 %v264_v33, %v254_v12  ;;  %v376_v12 = vld [vmem:[#allocation3 + $0x40] sm:$0xff] }
  0xfb   :  { %v272_v17 = vmul.f32 %v264_v33, %v259_v13  ;;  %14922 = vmatprep.subr.bf16.mxu1 %v14921_v11  ;;  %v377_v13 = vld [vmem:[#allocation3 + $0x48] sm:$0xff] }
  0xfc   :  { %14924 = vmatpush3.bf16.msra.mxu1 %v14921_v11  ;;  %v279_v18 = vadd.f32 %v271_v16, %v219_v14  ;;  %v16553_v11 = vmov 0.0|0.0   ;;  %v14958_v14 = vpack.c.bf16 %v377_v13, %v376_v12  ;;  %v16982_v12 = vld [vmem:[#allocation3 + $0x88] sm:$0xff] }
  0xfd   :  { %v280_v19 = vadd.f32 %v272_v17, %v220_v15  ;;  %v307_v20 = vpop.permute.xlu0 %306  ;;  %14945 = vmatprep.subr.bf16.mxu0 %v16553_v11  ;;  %v370_v15 = vld [vmem:[#allocation3 + $0x10] sm:$0xff]  ;;  %v16986_v13 = vld [vmem:[#allocation3 + $0xc8] sm:$0xff] }
  0xfe   :  { %v312_v21 = vpop.permute.xlu1 %311  ;;  %v16885_v22 = vadd.f32 %v16852_v43, %v279_v18  ;;  %v344_v25 = vmul.f32 %v307_v20, %v16845_v32  ;;  %v378_v20 = vld [vmem:[#allocation3 + $0x50] sm:$0xff] }
  0xff   :  { %v16888_v23 = vadd.f32 %v16852_v43, %v280_v19  ;;  %v345_v26 = vmul.f32 %v312_v21, %v16845_v32  ;;  %v379_v21 = vld [vmem:[#allocation3 + $0x58] sm:$0xff] }
 0x100   :  { %v352_v27 = vadd.f32 %v344_v25, %v265_v37  ;;  %v132_v37 = vld [vmem:[%s19414_s2 + $0x8] sm:$0xff]  ;;  %v14961_v25 = vpack.c.bf16 %v379_v21, %v378_v20 }
 0x101   :  { %v353_v30 = vadd.f32 %v345_v26, %v266_v42  ;;  %v14925_v31 = vpack.c.bf16 %v16888_v23, %v16885_v22  ;;  %v317_v33 = vpop.permute.xlu0 %316  ;;  %v372_v26 = vld [vmem:[#allocation3 + $0x20] sm:$0xff] }
 0x102   :  { %v322_v34 = vpop.permute.xlu1 %321  ;;  %v16895_v35 = vadd.f32 %v16852_v43, %v352_v27  ;;  %v346_v38 = vmul.f32 %v317_v33, %v16845_v32  ;;  %v373_v27 = vld [vmem:[#allocation3 + $0x28] sm:$0xff] }
 0x103   :  { %v16898_v36 = vadd.f32 %v16852_v43, %v353_v30  ;;  %v347_v39 = vmul.f32 %v322_v34, %v16845_v32  ;;  %14926 = vmatprep.subr.bf16.mxu1 %v14925_v31  ;;  %v14952_v30 = vpack.c.bf16 %v373_v27, %v372_v26  ;;  %v381_v33 = vld [vmem:[#allocation3 + $0x68] sm:$0xff] }
 0x104   :  { %14928 = vmatpush3.bf16.msra.mxu1 %v14925_v31  ;;  %v354_v40 = vadd.f32 %v346_v38, %v267_v54  ;;  %v380_v31 = vld [vmem:[#allocation3 + $0x60] sm:$0xff]  ;;  %v374_v38 = vld [vmem:[#allocation3 + $0x30] sm:$0xff]  ;;  %v17010_v27 = vld [vmem:[#allocation3 + $0xa8] sm:$0xff] }
 0x105   :  { %v355_v41 = vadd.f32 %v347_v39, %v268_v55  ;;  %v14929_v42 = vpack.c.bf16 %v16898_v36, %v16895_v35  ;;  %v327_v45 = vpop.permute.xlu0 %326  ;;  %v14964_v34 = vpack.c.bf16 %v381_v33, %v380_v31  ;;  %v375_v39 = vld [vmem:[#allocation3 + $0x38] sm:$0xff]  ;;  %v17014_v31 = vld [vmem:[#allocation3 + $0xe8] sm:$0xff] }
 0x106   :  { %v332_v46 = vpop.permute.xlu1 %331  ;;  %v16911_v49 = vadd.f32 %v16852_v43, %v354_v40  ;;  %v348_v51 = vmul.f32 %v327_v45, %v16845_v32  ;;  %v382_v40 = vld [vmem:[#allocation3 + $0x70] sm:$0xff] }
 0x107   :  { %v16914_v50 = vadd.f32 %v16852_v43, %v355_v41  ;;  %v349_v52 = vmul.f32 %v332_v46, %v16845_v32  ;;  %12994 = vmatmul.mubr.msk.f32.vlgmr.msra.gmra.mrb[0].mxu1 %vm501_vm0, %v132_v37  ;;  %14930 = vmatprep.subr.bf16.mxu1 %v14929_v42  ;;  %v383_v41 = vld [vmem:[#allocation3 + $0x78] sm:$0xff]  ;;  %v16556_v46 = vmov 0.0  }
 0x108   :  { %12996 = vmatprep.mubr.msk.f32.mxu1 %vm501_vm0, %v133_v44  ;;  %v356_v54 = vadd.f32 %v348_v51, %v269_v3  ;;  %14932 = vmatpush3.bf16.msra.mxu1 %v14929_v42  ;;  %v14967_v42 = vpack.c.bf16 %v383_v41, %v382_v40 }
 0x109   :  { %v357_v55 = vadd.f32 %v349_v52, %v270_v4  ;;  %v14933_v56 = vpack.c.bf16 %v16914_v50, %v16911_v49  ;;  %v337_v57 = vpop.permute.xlu0 %336  ;;  %13037 = vmatprep.mubr.msk.f32.mxu0 %vm16555_vm1, %v16556_v46 }
 0x10a   :  { %v342_v58 = vpop.permute.xlu1 %341  ;;  %v16926_v59 = vadd.f32 %v16852_v43, %v356_v54  ;;  %v350_v63 = vmul.f32 %v337_v57, %v16845_v32 }
 0x10b   :  { %v16929_v62 = vadd.f32 %v16852_v43, %v357_v55  ;;  %v351_v0 = vmul.f32 %v342_v58, %v16845_v32  ;;  %12997 = vmatmul.mubr.msk.f32.gmra.mrb[2].mxu1 %vm501_vm0, %v134_v53  ;;  %14934 = vmatprep.subr.bf16.mxu1 %v14933_v56 }
 0x10c   :  { %13015 = vmatprep.mubr.msk.f32.mxu1 %vm501_vm0, %v16825_v24  ;;  %v358_v1 = vadd.f32 %v350_v63, %v271_v16  ;;  %14936 = vmatpush3.bf16.msra.mxu1 %v14933_v56  ;;  %v368_v24 = vld [vmem:[#allocation3] sm:$0xff]  ;;  %v371_v16 = vld [vmem:[#allocation3 + $0x18] sm:$0xff] }
 0x10d   :  { %v359_v2 = vadd.f32 %v351_v0, %v272_v17  ;;  %v14937_v3 = vpack.c.bf16 %v16929_v62, %v16926_v59  ;;  %v14946_v8 = vpack.c.bf16 %v369_v6, %v368_v24  ;;  %v14949_v18 = vpack.c.bf16 %v371_v16, %v370_v15  ;;  %v16991_v15 = vld [vmem:[#allocation3 + $0x98] sm:$0xff]  ;;  %v16993_v16 = vld [vmem:[#allocation3 + $0xd0] sm:$0xff] }
 0x10e   :  { %v16939_v4 = vadd.f32 %v16852_v43, %v358_v1 }
 0x10f   :  { %v16942_v5 = vadd.f32 %v16852_v43, %v359_v2  ;;  %14938 = vmatprep.subr.bf16.mxu1 %v14937_v3  ;;  %14947 = vmatpush3.bf16.msra.mxu0 %v14946_v8  ;;  %v16980_v8 = vld [vmem:[#allocation3 + $0x80] sm:$0xff] }
 0x110   :  { %14940 = vmatpush3.bf16.msra.mxu1 %v14937_v3  ;;  %14948 = vmatprep.subr.bf16.mxu0 %v16553_v11 }
 0x111   :  { %v14941_v32 = vpack.c.bf16 %v16942_v5, %v16939_v4 }
 0x113   :  { %14942 = vmatprep.subr.bf16.mxu1 %v14941_v32  ;;  %14950 = vmatpush3.bf16.msra.mxu0 %v14949_v18  ;;  %v14970_v18 = vpack.c.bf16 %v16982_v12, %v16980_v8 }
 0x114   :  { %14944 = vmatpush3.bf16.msra.mxu1 %v14941_v32  ;;  %14951 = vmatprep.subr.bf16.mxu0 %v16553_v11 }
 0x115   :  { %14957 = vmatprep.subr.bf16.mxu1 %v16553_v11 }
 0x117   :  { %13016 = vmatmul.mubr.msk.f32.vlgmr.msra.gmra.mrb[4].mxu1 %vm501_vm0, %v132_v37  ;;  %14953 = vmatpush3.bf16.msra.mxu0 %v14952_v30  ;;  %v14955_v37 = vpack.c.bf16 %v375_v39, %v374_v38  ;;  %v17012_v30 = vld [vmem:[#allocation3 + $0xe0] sm:$0xff] }
 0x118   :  { %13018 = vmatprep.mubr.msk.f32.mxu1 %vm501_vm0, %v133_v44  ;;  %14959 = vmatpush3.bf16.msra.mxu1 %v14958_v14  ;;  %v16988_v14 = vld [vmem:[#allocation3 + $0x90] sm:$0xff] }
 0x119   :  { %14960 = vmatprep.subr.bf16.mxu1 %v16553_v11  ;;  %14954 = vmatprep.subr.bf16.mxu0 %v16553_v11  ;;  %v14973_v39 = vpack.c.bf16 %v16991_v15, %v16988_v14  ;;  %v398_v14 = vld [vmem:[#allocation3 + $0xf0] sm:$0xff]  ;;  %v399_v15 = vld [vmem:[#allocation3 + $0xf8] sm:$0xff] }
 0x11b   :  { %13019 = vmatmul.mubr.msk.f32.gmra.mrb[6].mxu1 %vm501_vm0, %v134_v53  ;;  %14956 = vmatpush3.bf16.msra.mxu0 %v14955_v37  ;;  %v16557_v53 = vmov 1966171168  }
 0x11c   :  { %14962 = vmatpush3.bf16.msra.mxu1 %v14961_v25  ;;  %14969 = vmatprep.subr.bf16.mxu0 %v16553_v11  ;;  %v709_v54 = vunpack.c.l.s4 %v16557_v53 }
 0x11d   :  { %14963 = vmatprep.subr.bf16.mxu1 %v16553_v11  ;;  %13056 = vmatprep.mubr.msk.f32.mxu1 %vm16555_vm1, %v16556_v46 }
 0x11e   :  { %v710_v55 = vunpack.c.0.s8 %v709_v54 }
 0x120   :  { %14965 = vmatpush3.bf16.msra.mxu1 %v14964_v34  ;;  %v16973_v58 = vsub.s32 %v710_v55, %v16835_v28  ;;  %v16984_v28 = vld [vmem:[#allocation3 + $0xc0] sm:$0xff] }
 0x121   :  { %14966 = vmatprep.subr.bf16.mxu1 %v16553_v11  ;;  %v14982_v38 = vpack.c.bf16 %v16986_v13, %v16984_v28 }
 0x124   :  { %14968 = vmatpush3.bf16.msra.mxu1 %v14967_v42 }
 0x125   :  { %14981 = vmatprep.subr.bf16.mxu1 %v16553_v11 }
 0x1da   :  { %v16949_v7 = vpop.f32.mrb[0].mxu1 }
 0x1db   :  { %v580_v43 = vpop.f32.mrb[1].mxu1 }
 0x1de   :  { %v12998_v17 = vpop.f32.mrb[2].mxu1 }
 0x1df   :  { %v590_v19 = vpop.f32.mrb[3].mxu1 }
 0x1e0   :  { %601 = vrot.lane.b32.xlu1 %v590_v19, %s16554_s30  ;;  %v16999_v19 = vld [vmem:[#allocation3 + $0xa0] sm:$0xff] }
 0x1e4   :  { %603 = vrot.lane.b32.xlu1 %v12998_v17, %s16554_s30  ;;  %v16995_v17 = vld [vmem:[#allocation3 + $0xd8] sm:$0xff] }
 0x1e5   :  { %v14985_v37 = vpack.c.bf16 %v16995_v17, %v16993_v16 }
 0x1ea   :  { %v16961_v44 = vpop.f32.mrb[4].mxu1 }
 0x1eb   :  { %v676_v45 = vpop.f32.mrb[5].mxu1 }
 0x1ee   :  { %v13020_v51 = vpop.f32.mrb[6].mxu1 }
 0x1ef   :  { %v686_v52 = vpop.f32.mrb[7].mxu1 }
 0x1f0   :  { %697 = vrot.lane.b32.xlu0 %v686_v52, %s16554_s30 }
 0x1f4   :  { %699 = vrot.lane.b32.xlu0 %v13020_v51, %s16554_s30 }
 0x252   :  { %v602_v56 = vpop.permute.xlu1 %601 }
 0x253   :  { %v608_v57 = vsel %vm607_vm2, %v580_v43, %v602_v56 }
 0x254   :  { %v707_v0 = vcombine.high %v608_v57, %v608_v57  ;;  %v714_v2 = vrot.slane %v608_v57, %v16973_v58 }
 0x256   :  { %v604_v63 = vpop.permute.xlu1 %603  ;;  %v721_v3 = vrot.slane %v707_v0, %v16973_v58  ;;  %v722_v24 = vcombine.high %v714_v2, %v714_v2  ;;  %v17002_v20 = vrot.slane %v714_v2, %v16973_v58 }
 0x257   :  { %v609_v1 = vsel %vm607_vm2, %v16949_v7, %v604_v63 }
 0x258   :  { %v756_v32 = vcombine.high %v609_v1, %v609_v1  ;;  %v763_v6 = vrot.slane %v609_v1, %v16973_v58  ;;  %v723_v43 = vcombine.high %v721_v3, %v721_v3  ;;  %v17005_v21 = vrot.slane %v721_v3, %v16973_v58 }
 0x259   :  { %v17008_v25 = vrot.slane %v722_v24, %v16973_v58  ;;  %v752_v56 = vcombine.high %v17002_v20, %v17002_v20 }
 0x25a   :  { %v770_v7 = vrot.slane %v756_v32, %v16973_v58  ;;  %v771_v26 = vcombine.high %v763_v6, %v763_v6  ;;  %v17017_v33 = vrot.slane %v723_v43, %v16973_v58  ;;  %v17026_v41 = vrot.slane %v763_v6, %v16973_v58 }
 0x25b   :  { %v754_v63 = vcombine.high %v17008_v25, %v17008_v25  ;;  %v19417_v17 = vcombine.high %v17005_v21, %v17005_v21 }
 0x25c   :  { %v772_v40 = vcombine.high %v770_v7, %v770_v7  ;;  %v17029_v42 = vrot.slane %v770_v7, %v16973_v58 }
 0x25e   :  { %v17051_v24 = vrot.slane %v772_v40, %v16973_v58 }
 0x262   :  { %v698_v34 = vpop.permute.xlu0 %697 }
 0x263   :  { %v703_v51 = vsel %vm607_vm2, %v676_v45, %v698_v34  ;;  %v17044_v45 = vrot.slane %v771_v26, %v16973_v58 }
 0x264   :  { %v823_v52 = vcombine.high %v703_v51, %v703_v51  ;;  %v830_v53 = vrot.slane %v703_v51, %v16973_v58 }
 0x266   :  { %v837_v0 = vrot.slane %v823_v52, %v16973_v58  ;;  %v838_v1 = vcombine.high %v830_v53, %v830_v53  ;;  %v846_v2 = vrot.slane %v830_v53, %v16973_v58  ;;  %v700_v3 = vpop.permute.xlu0 %699 }
 0x267   :  { %v704_v28 = vsel %vm607_vm2, %v16961_v44, %v700_v3 }
 0x268   :  { %v839_v13 = vcombine.high %v837_v0, %v837_v0  ;;  %v853_v7 = vrot.slane %v837_v0, %v16973_v58  ;;  %v860_v26 = vrot.slane %v838_v1, %v16973_v58  ;;  %v868_v34 = vcombine.high %v846_v2, %v846_v2 }
 0x269   :  { %v924_v40 = vrot.slane %v846_v2, %v16838_v29  ;;  %v872_v52 = vcombine.high %v704_v28, %v704_v28  ;;  %v879_v53 = vrot.slane %v704_v28, %v16973_v58 }
 0x26a   :  { %v867_v55 = vrot.slane %v839_v13, %v16973_v58  ;;  %v869_v43 = vcombine.high %v853_v7, %v853_v7  ;;  %v870_v54 = vcombine.high %v860_v26, %v860_v26  ;;  %v928_v44 = vrot.slane %v860_v26, %v16838_v29 }
 0x26b   :  { %v932_v3 = vrot.slane %v868_v34, %v16838_v29  ;;  %v940_v0 = vrot.slane %v853_v7, %v16838_v29  ;;  %v886_v1 = vrot.slane %v872_v52, %v16973_v58  ;;  %v887_v6 = vcombine.high %v879_v53, %v879_v53 }
 0x26c   :  { %v871_v32 = vcombine.high %v867_v55, %v867_v55  ;;  %v895_v51 = vrot.slane %v879_v53, %v16973_v58  ;;  %v1002_v2 = vsel %vm1001_vm3, %v17002_v20, %v924_v40  ;;  %v1003_v28 = vsel %vm1001_vm3, %v17008_v25, %v928_v44 }
 0x26d   :  { %v888_v13 = vcombine.high %v886_v1, %v886_v1  ;;  %v902_v57 = vrot.slane %v886_v1, %v16973_v58  ;;  %v909_v26 = vrot.slane %v887_v6, %v16973_v58  ;;  %13038 = vmatmul.mubr.msk.f32.vlgmr.msra.gmra.mrb[0].mxu0 %vm501_vm0, %v1002_v2  ;;  %13057 = vmatmul.mubr.msk.f32.vlgmr.msra.gmra.mrb[8].mxu1 %vm501_vm0, %v1003_v28 }
 0x26e   :  { %v917_v7 = vcombine.high %v895_v51, %v895_v51  ;;  %v956_v34 = vrot.slane %v895_v51, %v16838_v29  ;;  %14971 = vmatpush3.bf16.msra.mxu0 %v14970_v18  ;;  %14983 = vmatpush3.bf16.msra.mxu1 %v14982_v38  ;;  %v1004_v20 = vsel %vm1001_vm3, %v752_v56, %v932_v3 }
 0x26f   :  { %v916_v25 = vrot.slane %v888_v13, %v16973_v58  ;;  %v918_v40 = vcombine.high %v902_v57, %v902_v57  ;;  %v919_v52 = vcombine.high %v909_v26, %v909_v26  ;;  %v960_v6 = vrot.slane %v909_v26, %v16838_v29  ;;  %14972 = vmatprep.subr.bf16.mxu0 %v16553_v11 }
 0x270   :  { %v964_v53 = vrot.slane %v917_v7, %v16838_v29  ;;  %v972_v44 = vrot.slane %v902_v57, %v16838_v29  ;;  %14984 = vmatprep.subr.bf16.mxu1 %v16553_v11  ;;  %13075 = vmatprep.mubr.msk.f32.mxu0 %vm16555_vm1, %v16556_v46  ;;  %v936_v8 = vrot.slane %v870_v54, %v16838_v29  ;;  %v390_v54 = vld [vmem:[#allocation3 + $0xb0] sm:$0xff] }
 0x271   :  { %v920_v12 = vcombine.high %v916_v25, %v916_v25  ;;  %13094 = vmatprep.mubr.msk.f32.mxu1 %vm16555_vm1, %v16556_v46  ;;  %v17097_v18 = vsel %vm1001_vm3, %v17005_v21, %v940_v0  ;;  %v944_v38 = vrot.slane %v867_v55, %v16838_v29  ;;  %v948_v56 = vrot.slane %v869_v43, %v16838_v29  ;;  %v391_v55 = vld [vmem:[#allocation3 + $0xb8] sm:$0xff] }
 0x272   :  { %14974 = vmatpush3.bf16.msra.mxu0 %v14973_v39  ;;  %14986 = vmatpush3.bf16.msra.mxu1 %v14985_v37  ;;  %v1005_v57 = vsel %vm1001_vm3, %v754_v63, %v936_v8  ;;  %v952_v51 = vrot.slane %v871_v32, %v16838_v29  ;;  %v17111_v3 = vsel %vm1001_vm3, %v17026_v41, %v956_v34 }
 0x273   :  { %14975 = vmatprep.subr.bf16.mxu0 %v16553_v11  ;;  %14987 = vmatprep.subr.bf16.mxu1 %v16553_v11  ;;  %v17117_v16 = vsel %vm1001_vm3, %v17017_v33, %v944_v38  ;;  %v17123_v39 = vsel %vm1001_vm3, %v19417_v17, %v948_v56  ;;  %v17127_v37 = vsel %vm1001_vm3, %v17044_v45, %v960_v6  ;;  %v401_v6 = vld [vmem:[#allocation3 + $0x108] sm:$0xff]  ;;  %v410_v38 = vld [vmem:[#allocation3 + $0x150] sm:$0xff]  ;;  %v411_v56 = vld [vmem:[#allocation3 + $0x158] sm:$0xff] }
 0x274   :  { %v19418_v63 = vcombine.high %v17017_v33, %v17017_v33  ;;  %v19419_v43 = vcombine.high %v17026_v41, %v17026_v41  ;;  %v968_v21 = vrot.slane %v919_v52, %v16838_v29  ;;  %v17144_v1 = vsel %vm1001_vm3, %v17029_v42, %v972_v44  ;;  %v400_v52 = vld [vmem:[#allocation3 + $0x100] sm:$0xff]  ;;  %v406_v17 = vld [vmem:[#allocation3 + $0x130] sm:$0xff] }
 0x275   :  { %v976_v2 = vrot.slane %v916_v25, %v16838_v29  ;;  %v980_v28 = vrot.slane %v918_v40, %v16838_v29  ;;  %v804_v33 = vcombine.high %v17051_v24, %v17051_v24  ;;  %v984_v13 = vrot.slane %v920_v12, %v16838_v29  ;;  %v402_v12 = vld [vmem:[#allocation3 + $0x110] sm:$0xff] }
 0x276   :  { %v17133_v32 = vsel %vm1001_vm3, %v19418_v63, %v952_v51  ;;  %v17139_v0 = vsel %vm1001_vm3, %v19419_v43, %v964_v53  ;;  %v19420_v41 = vpack.c.bf16 %v17010_v27, %v16999_v19  ;;  %v19421_v26 = vpack.c.bf16 %v17014_v31, %v17012_v30  ;;  %v408_v19 = vld [vmem:[#allocation3 + $0x140] sm:$0xff]  ;;  %v409_v27 = vld [vmem:[#allocation3 + $0x148] sm:$0xff]  ;;  %v407_v63 = vld [vmem:[#allocation3 + $0x138] sm:$0xff] }
 0x277   :  { %v14979_v7 = vpack.c.bf16 %v391_v55, %v390_v54  ;;  %v14991_v34 = vpack.c.bf16 %v399_v15, %v398_v14  ;;  %v19422_v25 = vcombine.high %v17044_v45, %v17044_v45  ;;  %v17167_v30 = vsel %vm1001_vm3, %v17051_v24, %v976_v2  ;;  %v403_v24 = vld [vmem:[#allocation3 + $0x118] sm:$0xff]  ;;  %v404_v51 = vld [vmem:[#allocation3 + $0x120] sm:$0xff]  ;;  %v405_v55 = vld [vmem:[#allocation3 + $0x128] sm:$0xff] }
 0x278   :  { %14977 = vmatpush3.bf16.msra.mxu0 %v19420_v41  ;;  %14989 = vmatpush3.bf16.msra.mxu1 %v19421_v26  ;;  %v19423_v31 = vcombine.high %v17029_v42, %v17029_v42  ;;  %v17176_v45 = vsel %vm1001_vm3, %v804_v33, %v984_v13  ;;  %v14994_v44 = vpack.c.bf16 %v401_v6, %v400_v52  ;;  %v412_v14 = vld [vmem:[#allocation3 + $0x160] sm:$0xff]  ;;  %v413_v15 = vld [vmem:[#allocation3 + $0x168] sm:$0xff]  ;;  %v414_v43 = vld [vmem:[#allocation3 + $0x170] sm:$0xff] }
 0x279   :  { %v17161_v40 = vsel %vm1001_vm3, %v19422_v25, %v968_v21  ;;  %14978 = vmatprep.subr.bf16.mxu0 %v16553_v11  ;;  %14990 = vmatprep.subr.bf16.mxu1 %v16553_v11  ;;  %v15006_v8 = vpack.c.bf16 %v409_v27, %v408_v19  ;;  %v14997_v42 = vpack.c.bf16 %v403_v24, %v402_v12  ;;  %v415_v21 = vld [vmem:[#allocation3 + $0x178] sm:$0xff]  ;;  %v416_v33 = vld [vmem:[#allocation3 + $0x180] sm:$0xff]  ;;  %v417_v13 = vld [vmem:[#allocation3 + $0x188] sm:$0xff] }
 0x27a   :  { %v17173_v53 = vsel %vm1001_vm3, %v19423_v31, %v980_v28  ;;  %v15009_v54 = vpack.c.bf16 %v411_v56, %v410_v38  ;;  %v15003_v2 = vpack.c.bf16 %v407_v63, %v406_v17  ;;  %v15015_v28 = vpack.c.bf16 %v415_v21, %v414_v43  ;;  %v424_v41 = vld [vmem:[#allocation3 + $0x1c0] sm:$0xff]  ;;  %v425_v26 = vld [vmem:[#allocation3 + $0x1c8] sm:$0xff]  ;;  %v418_v52 = vld [vmem:[#allocation3 + $0x190] sm:$0xff] }
 0x27b   :  { %v419_v25 = vld [vmem:[#allocation3 + $0x198] sm:$0xff]  ;;  %v426_v6 = vld [vmem:[#allocation3 + $0x1d0] sm:$0xff]  ;;  %v428_v12 = vld [vmem:[#allocation3 + $0x1e0] sm:$0xff] }
 0x27c   :  { %14980 = vmatpush3.bf16.msra.mxu0 %v14979_v7  ;;  %14992 = vmatpush3.bf16.msra.mxu1 %v14991_v34  ;;  %v15018_v7 = vpack.c.bf16 %v417_v13, %v416_v33  ;;  %v15030_v34 = vpack.c.bf16 %v425_v26, %v424_v41  ;;  %v427_v19 = vld [vmem:[#allocation3 + $0x1d8] sm:$0xff]  ;;  %v15021_v27 = vpack.c.bf16 %v419_v25, %v418_v52  ;;  %v429_v24 = vld [vmem:[#allocation3 + $0x1e8] sm:$0xff]  ;;  %v422_v38 = vld [vmem:[#allocation3 + $0x1b0] sm:$0xff] }
 0x27d   :  { %14993 = vmatprep.subr.bf16.mxu0 %v16553_v11  ;;  %15005 = vmatprep.subr.bf16.mxu1 %v16553_v11  ;;  %v15033_v31 = vpack.c.bf16 %v427_v19, %v426_v6  ;;  %v423_v56 = vld [vmem:[#allocation3 + $0x1b8] sm:$0xff]  ;;  %v434_v43 = vld [vmem:[#allocation3 + $0x210] sm:$0xff]  ;;  %v436_v41 = vld [vmem:[#allocation3 + $0x220] sm:$0xff] }
 0x27e   :  { %v435_v21 = vld [vmem:[#allocation3 + $0x218] sm:$0xff]  ;;  %v437_v26 = vld [vmem:[#allocation3 + $0x228] sm:$0xff]  ;;  %v438_v52 = vld [vmem:[#allocation3 + $0x230] sm:$0xff] }
 0x27f   :  { %13076 = vmatmul.mubr.msk.f32.vlgmr.msra.gmra.mrb[2].mxu0 %vm501_vm0, %v1004_v20  ;;  %13095 = vmatmul.mubr.msk.f32.vlgmr.msra.gmra.mrb[10].mxu1 %vm501_vm0, %v1005_v57  ;;  %v15000_v20 = vpack.c.bf16 %v405_v55, %v404_v51  ;;  %v15012_v57 = vpack.c.bf16 %v413_v15, %v412_v14  ;;  %v15027_v51 = vpack.c.bf16 %v423_v56, %v422_v38  ;;  %v432_v14 = vld [vmem:[#allocation3 + $0x200] sm:$0xff]  ;;  %v433_v15 = vld [vmem:[#allocation3 + $0x208] sm:$0xff]  ;;  %v439_v25 = vld [vmem:[#allocation3 + $0x238] sm:$0xff] }
 0x280   :  { %14995 = vmatpush3.bf16.msra.mxu0 %v14994_v44  ;;  %15007 = vmatpush3.bf16.msra.mxu1 %v15006_v8  ;;  %v420_v44 = vld [vmem:[#allocation3 + $0x1a0] sm:$0xff]  ;;  %v421_v8 = vld [vmem:[#allocation3 + $0x1a8] sm:$0xff]  ;;  %v15042_v17 = vpack.c.bf16 %v433_v15, %v432_v14  ;;  %v15045_v33 = vpack.c.bf16 %v435_v21, %v434_v43  ;;  %v446_v6 = vld [vmem:[#allocation3 + $0x270] sm:$0xff] }
 0x281   :  { %14996 = vmatprep.subr.bf16.mxu0 %v16553_v11  ;;  %15008 = vmatprep.subr.bf16.mxu1 %v16553_v11  ;;  %v447_v19 = vld [vmem:[#allocation3 + $0x278] sm:$0xff]  ;;  %v450_v38 = vld [vmem:[#allocation3 + $0x290] sm:$0xff]  ;;  %v452_v14 = vld [vmem:[#allocation3 + $0x2a0] sm:$0xff] }
 0x282   :  { %13113 = vmatprep.mubr.msk.f32.mxu0 %vm16555_vm1, %v16556_v46  ;;  %13132 = vmatprep.mubr.msk.f32.mxu1 %vm16555_vm1, %v16556_v46  ;;  %v451_v56 = vld [vmem:[#allocation3 + $0x298] sm:$0xff]  ;;  %v453_v15 = vld [vmem:[#allocation3 + $0x2a8] sm:$0xff]  ;;  %v462_v43 = vld [vmem:[#allocation3 + $0x2f0] sm:$0xff] }
 0x283   :  { %v463_v21 = vld [vmem:[#allocation3 + $0x2f8] sm:$0xff] }
 0x284   :  { %14998 = vmatpush3.bf16.msra.mxu0 %v14997_v42  ;;  %15010 = vmatpush3.bf16.msra.mxu1 %v15009_v54  ;;  %v430_v42 = vld [vmem:[#allocation3 + $0x1f0] sm:$0xff]  ;;  %v431_v54 = vld [vmem:[#allocation3 + $0x1f8] sm:$0xff] }
 0x285   :  { %14999 = vmatprep.subr.bf16.mxu0 %v16553_v11  ;;  %15011 = vmatprep.subr.bf16.mxu1 %v16553_v11  ;;  %v15039_v55 = vpack.c.bf16 %v431_v54, %v430_v42  ;;  %v458_v42 = vld [vmem:[#allocation3 + $0x2d0] sm:$0xff]  ;;  %v459_v54 = vld [vmem:[#allocation3 + $0x2d8] sm:$0xff] }
 0x288   :  { %15001 = vmatpush3.bf16.msra.mxu0 %v15000_v20  ;;  %15013 = vmatpush3.bf16.msra.mxu1 %v15012_v57  ;;  %v440_v20 = vld [vmem:[#allocation3 + $0x240] sm:$0xff]  ;;  %v441_v57 = vld [vmem:[#allocation3 + $0x248] sm:$0xff] }
 0x289   :  { %15002 = vmatprep.subr.bf16.mxu0 %v16553_v11  ;;  %15014 = vmatprep.subr.bf16.mxu1 %v16553_v11  ;;  %v15054_v63 = vpack.c.bf16 %v441_v57, %v440_v20  ;;  %v460_v20 = vld [vmem:[#allocation3 + $0x2e0] sm:$0xff]  ;;  %v461_v57 = vld [vmem:[#allocation3 + $0x2e8] sm:$0xff] }
 0x28c   :  { %15004 = vmatpush3.bf16.msra.mxu0 %v15003_v2  ;;  %15016 = vmatpush3.bf16.msra.mxu1 %v15015_v28  ;;  %v442_v2 = vld [vmem:[#allocation3 + $0x250] sm:$0xff]  ;;  %v443_v28 = vld [vmem:[#allocation3 + $0x258] sm:$0xff] }
 0x28d   :  { %15017 = vmatprep.subr.bf16.mxu0 %v16553_v11  ;;  %15029 = vmatprep.subr.bf16.mxu1 %v16553_v11  ;;  %v15057_v13 = vpack.c.bf16 %v443_v28, %v442_v2  ;;  %v15087_v28 = vpack.c.bf16 %v463_v21, %v462_v43  ;;  %v484_v43 = vld [vmem:[#allocation3 + $0x3a0] sm:$0xff]  ;;  %v485_v21 = vld [vmem:[#allocation3 + $0x3a8] sm:$0xff] }
 0x28f   :  { %13114 = vmatmul.mubr.msk.f32.vlgmr.msra.gmra.mrb[4].mxu0 %vm501_vm0, %v17097_v18  ;;  %13133 = vmatmul.mubr.msk.f32.vlgmr.msra.gmra.mrb[12].mxu1 %vm501_vm0, %v17117_v16  ;;  %v15024_v18 = vpack.c.bf16 %v421_v8, %v420_v44  ;;  %v15036_v16 = vpack.c.bf16 %v429_v24, %v428_v12  ;;  %v448_v44 = vld [vmem:[#allocation3 + $0x280] sm:$0xff]  ;;  %v449_v8 = vld [vmem:[#allocation3 + $0x288] sm:$0xff] }
 0x290   :  { %15019 = vmatpush3.bf16.msra.mxu0 %v15018_v7  ;;  %15031 = vmatpush3.bf16.msra.mxu1 %v15030_v34  ;;  %v444_v7 = vld [vmem:[#allocation3 + $0x260] sm:$0xff]  ;;  %v445_v34 = vld [vmem:[#allocation3 + $0x268] sm:$0xff] }
 0x291   :  { %15020 = vmatprep.subr.bf16.mxu0 %v16553_v11  ;;  %15032 = vmatprep.subr.bf16.mxu1 %v16553_v11  ;;  %v456_v12 = vld [vmem:[#allocation3 + $0x2c0] sm:$0xff]  ;;  %v457_v24 = vld [vmem:[#allocation3 + $0x2c8] sm:$0xff] }
 0x292   :  { %13151 = vmatprep.mubr.msk.f32.mxu0 %vm16555_vm1, %v16556_v46  ;;  %13170 = vmatprep.mubr.msk.f32.mxu1 %vm16555_vm1, %v16556_v46 }
 0x294   :  { %15022 = vmatpush3.bf16.msra.mxu0 %v15021_v27  ;;  %15034 = vmatpush3.bf16.msra.mxu1 %v15033_v31  ;;  %v15051_v27 = vpack.c.bf16 %v439_v25, %v438_v52  ;;  %v15063_v31 = vpack.c.bf16 %v447_v19, %v446_v6  ;;  %v474_v52 = vld [vmem:[#allocation3 + $0x350] sm:$0xff]  ;;  %v475_v25 = vld [vmem:[#allocation3 + $0x358] sm:$0xff] }
 0x295   :  { %15023 = vmatprep.subr.bf16.mxu0 %v16553_v11  ;;  %15035 = vmatprep.subr.bf16.mxu1 %v16553_v11  ;;  %v15105_v19 = vpack.c.bf16 %v475_v25, %v474_v52 }
 0x298   :  { %15025 = vmatpush3.bf16.msra.mxu0 %v15024_v18  ;;  %15037 = vmatpush3.bf16.msra.mxu1 %v15036_v16  ;;  %v15066_v18 = vpack.c.bf16 %v449_v8, %v448_v44  ;;  %v15078_v16 = vpack.c.bf16 %v457_v24, %v456_v12  ;;  %v476_v44 = vld [vmem:[#allocation3 + $0x360] sm:$0xff]  ;;  %v477_v8 = vld [vmem:[#allocation3 + $0x368] sm:$0xff]  ;;  %v470_v12 = vld [vmem:[#allocation3 + $0x330] sm:$0xff] }
 0x299   :  { %15026 = vmatprep.subr.bf16.mxu0 %v16553_v11  ;;  %15038 = vmatprep.subr.bf16.mxu1 %v16553_v11  ;;  %v471_v24 = vld [vmem:[#allocation3 + $0x338] sm:$0xff] }
 0x29c   :  { %15028 = vmatpush3.bf16.msra.mxu0 %v15027_v51  ;;  %15040 = vmatpush3.bf16.msra.mxu1 %v15039_v55  ;;  %v15069_v51 = vpack.c.bf16 %v451_v56, %v450_v38  ;;  %v15081_v55 = vpack.c.bf16 %v459_v54, %v458_v42  ;;  %v15099_v38 = vpack.c.bf16 %v471_v24, %v470_v12  ;;  %v480_v42 = vld [vmem:[#allocation3 + $0x380] sm:$0xff]  ;;  %v481_v54 = vld [vmem:[#allocation3 + $0x388] sm:$0xff] }
 0x29d   :  { %15041 = vmatprep.subr.bf16.mxu0 %v16553_v11  ;;  %15053 = vmatprep.subr.bf16.mxu1 %v16553_v11 }
 0x29f   :  { %13152 = vmatmul.mubr.msk.f32.vlgmr.msra.gmra.mrb[6].mxu0 %vm501_vm0, %v17123_v39  ;;  %13171 = vmatmul.mubr.msk.f32.vlgmr.msra.gmra.mrb[14].mxu1 %vm501_vm0, %v17133_v32  ;;  %v15048_v39 = vpack.c.bf16 %v437_v26, %v436_v41  ;;  %v15060_v32 = vpack.c.bf16 %v445_v34, %v444_v7  ;;  %v472_v41 = vld [vmem:[#allocation3 + $0x340] sm:$0xff]  ;;  %v473_v26 = vld [vmem:[#allocation3 + $0x348] sm:$0xff] }
 0x2a0   :  { %15043 = vmatpush3.bf16.msra.mxu0 %v15042_v17  ;;  %15055 = vmatpush3.bf16.msra.mxu1 %v15054_v63  ;;  %v454_v17 = vld [vmem:[#allocation3 + $0x2b0] sm:$0xff]  ;;  %v455_v63 = vld [vmem:[#allocation3 + $0x2b8] sm:$0xff]  ;;  %v15102_v34 = vpack.c.bf16 %v473_v26, %v472_v41 }
 0x2a1   :  { %15044 = vmatprep.subr.bf16.mxu0 %v16553_v11  ;;  %15056 = vmatprep.subr.bf16.mxu1 %v16553_v11  ;;  %v15075_v2 = vpack.c.bf16 %v455_v63, %v454_v17  ;;  %v494_v41 = vld [vmem:[#allocation3 + $0x3f0] sm:$0xff]  ;;  %v495_v26 = vld [vmem:[#allocation3 + $0x3f8] sm:$0xff] }
 0x2a2   :  { %13189 = vmatprep.mubr.msk.f32.mxu0 %vm16555_vm1, %v16556_v46  ;;  %13208 = vmatprep.mubr.msk.f32.mxu1 %vm16555_vm1, %v16556_v46 }
 0x2a4   :  { %15046 = vmatpush3.bf16.msra.mxu0 %v15045_v33  ;;  %15058 = vmatpush3.bf16.msra.mxu1 %v15057_v13  ;;  %v464_v33 = vld [vmem:[#allocation3 + $0x300] sm:$0xff]  ;;  %v465_v13 = vld [vmem:[#allocation3 + $0x308] sm:$0xff] }
 0x2a5   :  { %15047 = vmatprep.subr.bf16.mxu0 %v16553_v11  ;;  %15059 = vmatprep.subr.bf16.mxu1 %v16553_v11  ;;  %v15090_v7 = vpack.c.bf16 %v465_v13, %v464_v33  ;;  %v486_v33 = vld [vmem:[#allocation3 + $0x3b0] sm:$0xff]  ;;  %v487_v13 = vld [vmem:[#allocation3 + $0x3b8] sm:$0xff] }
 0x2a8   :  { %15049 = vmatpush3.bf16.msra.mxu0 %v15048_v39  ;;  %15061 = vmatpush3.bf16.msra.mxu1 %v15060_v32  ;;  %v466_v39 = vld [vmem:[#allocation3 + $0x310] sm:$0xff]  ;;  %v467_v32 = vld [vmem:[#allocation3 + $0x318] sm:$0xff] }
 0x2a9   :  { %15050 = vmatprep.subr.bf16.mxu0 %v16553_v11  ;;  %15062 = vmatprep.subr.bf16.mxu1 %v16553_v11  ;;  %v15093_v6 = vpack.c.bf16 %v467_v32, %v466_v39 }
 0x2ac   :  { %15052 = vmatpush3.bf16.msra.mxu0 %v15051_v27  ;;  %15064 = vmatpush3.bf16.msra.mxu1 %v15063_v31  ;;  %v468_v27 = vld [vmem:[#allocation3 + $0x320] sm:$0xff]  ;;  %v469_v31 = vld [vmem:[#allocation3 + $0x328] sm:$0xff] }
 0x2ad   :  { %15065 = vmatprep.subr.bf16.mxu0 %v16553_v11  ;;  %15077 = vmatprep.subr.bf16.mxu1 %v16553_v11 }
 0x2af   :  { %13190 = vmatmul.mubr.msk.f32.vlgmr.msra.gmra.mrb[8].mxu0 %vm501_vm0, %v17111_v3  ;;  %13209 = vmatmul.mubr.msk.f32.vlgmr.msra.gmra.mrb[16].mxu1 %vm501_vm0, %v17127_v37  ;;  %v15072_v3 = vpack.c.bf16 %v453_v15, %v452_v14  ;;  %v15084_v37 = vpack.c.bf16 %v461_v57, %v460_v20  ;;  %v15114_v14 = vpack.c.bf16 %v481_v54, %v480_v42  ;;  %v482_v20 = vld [vmem:[#allocation3 + $0x390] sm:$0xff]  ;;  %v483_v57 = vld [vmem:[#allocation3 + $0x398] sm:$0xff] }
 0x2b0   :  { %15067 = vmatpush3.bf16.msra.mxu0 %v15066_v18  ;;  %15079 = vmatpush3.bf16.msra.mxu1 %v15078_v16  ;;  %v478_v18 = vld [vmem:[#allocation3 + $0x370] sm:$0xff]  ;;  %v479_v16 = vld [vmem:[#allocation3 + $0x378] sm:$0xff]  ;;  %v15117_v17 = vpack.c.bf16 %v483_v57, %v482_v20 }
 0x2b1   :  { %15068 = vmatprep.subr.bf16.mxu0 %v16553_v11  ;;  %15080 = vmatprep.subr.bf16.mxu1 %v16553_v11  ;;  %v15111_v56 = vpack.c.bf16 %v479_v16, %v478_v18 }
 0x2b2   :  { %13227 = vmatprep.mubr.msk.f32.mxu0 %vm16555_vm1, %v16556_v46  ;;  %13246 = vmatprep.mubr.msk.f32.mxu1 %vm16555_vm1, %v16556_v46 }
 0x2b4   :  { %15070 = vmatpush3.bf16.msra.mxu0 %v15069_v51  ;;  %15082 = vmatpush3.bf16.msra.mxu1 %v15081_v55  ;;  %v488_v51 = vld [vmem:[#allocation3 + $0x3c0] sm:$0xff]  ;;  %v489_v55 = vld [vmem:[#allocation3 + $0x3c8] sm:$0xff] }
 0x2b5   :  { %15071 = vmatprep.subr.bf16.mxu0 %v16553_v11  ;;  %15083 = vmatprep.subr.bf16.mxu1 %v16553_v11  ;;  %v15126_v15 = vpack.c.bf16 %v489_v55, %v488_v51 }
 0x2b8   :  { %15073 = vmatpush3.bf16.msra.mxu0 %v15072_v3  ;;  %15085 = vmatpush3.bf16.msra.mxu1 %v15084_v37  ;;  %v490_v3 = vld [vmem:[#allocation3 + $0x3d0] sm:$0xff]  ;;  %v491_v37 = vld [vmem:[#allocation3 + $0x3d8] sm:$0xff] }
 0x2b9   :  { %15074 = vmatprep.subr.bf16.mxu0 %v16553_v11  ;;  %15086 = vmatprep.subr.bf16.mxu1 %v16553_v11  ;;  %v15129_v63 = vpack.c.bf16 %v491_v37, %v490_v3 }
 0x2bc   :  { %15076 = vmatpush3.bf16.msra.mxu0 %v15075_v2  ;;  %15088 = vmatpush3.bf16.msra.mxu1 %v15087_v28  ;;  %v492_v2 = vld [vmem:[#allocation3 + $0x3e0] sm:$0xff]  ;;  %v493_v28 = vld [vmem:[#allocation3 + $0x3e8] sm:$0xff] }
 0x2bd   :  { %15089 = vmatprep.subr.bf16.mxu0 %v16553_v11  ;;  %15101 = vmatprep.subr.bf16.mxu1 %v16553_v11 }
 0x2bf   :  { %13228 = vmatmul.mubr.msk.f32.vlgmr.msra.gmra.mrb[10].mxu0 %vm501_vm0, %v17139_v0  ;;  %13247 = vmatmul.mubr.msk.f32.vlgmr.msra.gmra.mrb[18].mxu1 %vm501_vm0, %v17161_v40  ;;  %v15096_v0 = vpack.c.bf16 %v469_v31, %v468_v27  ;;  %v15108_v40 = vpack.c.bf16 %v477_v8, %v476_v44 }
 0x2c0   :  { %15091 = vmatpush3.bf16.msra.mxu0 %v15090_v7  ;;  %15103 = vmatpush3.bf16.msra.mxu1 %v15102_v34  ;;  %v15123_v7 = vpack.c.bf16 %v487_v13, %v486_v33  ;;  %v15135_v34 = vpack.c.bf16 %v495_v26, %v494_v41 }
 0x2c1   :  { %15092 = vmatprep.subr.bf16.mxu0 %v16553_v11  ;;  %15104 = vmatprep.subr.bf16.mxu1 %v16553_v11 }
 0x2c2   :  { %13265 = vmatprep.mubr.msk.f32.mxu0 %vm16555_vm1, %v16556_v46  ;;  %13284 = vmatprep.mubr.msk.f32.mxu1 %vm16555_vm1, %v16556_v46 }
 0x2c4   :  { %15094 = vmatpush3.bf16.msra.mxu0 %v15093_v6  ;;  %15106 = vmatpush3.bf16.msra.mxu1 %v15105_v19 }
 0x2c5   :  { %15095 = vmatprep.subr.bf16.mxu0 %v16553_v11  ;;  %15107 = vmatprep.subr.bf16.mxu1 %v16553_v11 }
 0x2c8   :  { %15097 = vmatpush3.bf16.msra.mxu0 %v15096_v0  ;;  %15109 = vmatpush3.bf16.msra.mxu1 %v15108_v40 }
 0x2c9   :  { %15098 = vmatprep.subr.bf16.mxu0 %v16553_v11  ;;  %15110 = vmatprep.subr.bf16.mxu1 %v16553_v11 }
 0x2cc   :  { %15100 = vmatpush3.bf16.msra.mxu0 %v15099_v38  ;;  %15112 = vmatpush3.bf16.msra.mxu1 %v15111_v56 }
 0x2cd   :  { %15113 = vmatprep.subr.bf16.mxu0 %v16553_v11  ;;  %15125 = vmatprep.subr.bf16.mxu1 %v16553_v11 }
 0x2cf   :  { %13266 = vmatmul.mubr.msk.f32.vlgmr.msra.gmra.mrb[12].mxu0 %vm501_vm0, %v17144_v1  ;;  %13285 = vmatmul.mubr.msk.f32.vlgmr.msra.gmra.mrb[20].mxu1 %vm501_vm0, %v17167_v30  ;;  %v15120_v1 = vpack.c.bf16 %v485_v21, %v484_v43  ;;  %v15132_v30 = vpack.c.bf16 %v493_v28, %v492_v2 }
 0x2d0   :  { %15115 = vmatpush3.bf16.msra.mxu0 %v15114_v14  ;;  %15127 = vmatpush3.bf16.msra.mxu1 %v15126_v15 }
 0x2d1   :  { %15116 = vmatprep.subr.bf16.mxu0 %v16553_v11  ;;  %15128 = vmatprep.subr.bf16.mxu1 %v16553_v11 }
 0x2d2   :  { %13303 = vmatprep.mubr.msk.f32.mxu0 %vm16555_vm1, %v16556_v46  ;;  %13322 = vmatprep.mubr.msk.f32.mxu1 %vm16555_vm1, %v16556_v46 }
 0x2d4   :  { %15118 = vmatpush3.bf16.msra.mxu0 %v15117_v17  ;;  %15130 = vmatpush3.bf16.msra.mxu1 %v15129_v63 }
 0x2d5   :  { %15119 = vmatprep.subr.bf16.mxu0 %v16553_v11  ;;  %15131 = vmatprep.subr.bf16.mxu1 %v16553_v11 }
 0x2d8   :  { %15121 = vmatpush3.bf16.msra.mxu0 %v15120_v1  ;;  %15133 = vmatpush3.bf16.msra.mxu1 %v15132_v30 }
 0x2d9   :  { %15122 = vmatprep.subr.bf16.mxu0 %v16553_v11  ;;  %15134 = vmatprep.subr.bf16.mxu1 %v16553_v11 }
 0x2dc   :  { %15124 = vmatpush3.bf16.msra.mxu0 %v15123_v7  ;;  %15136 = vmatpush3.bf16.msra.mxu1 %v15135_v34 }
 0x2df   :  { %13304 = vmatmul.mubr.msk.f32.vlgmr.msra.gmra.mrb[14].mxu0 %vm501_vm0, %v17173_v53  ;;  %13323 = vmatmul.mubr.msk.f32.vlgmr.msra.gmra.mrb[22].mxu1 %vm501_vm0, %v17176_v45 }
 0x340   :  { %v1087_v39 = vpop.f32.mrb[0].mxu0  ;;  %v1160_v32 = vpop.f32.mrb[8].mxu1 }
 0x341   :  { %v2687_v52 = vrot.slane %v1087_v39, 1  ;;  %v13039_v25 = vpop.f32.mrb[1].mxu0  ;;  %v2202_v6 = vrot.slane %v1160_v32, 7  ;;  %v13058_v19 = vpop.f32.mrb[9].mxu1 }
 0x343   :  { %v2204_v27 = vsel %vm2203_vm4, %v2202_v6, %v1087_v39  ;;  %v2688_v31 = vsel %vm2203_vm4, %v1160_v32, %v2687_v52 }
 0x352   :  { %v1233_v44 = vpop.f32.mrb[2].mxu0  ;;  %v1306_v8 = vpop.f32.mrb[10].mxu1 }
 0x353   :  { %v2205_v0 = vrot.slane %v1233_v44, 6  ;;  %v2689_v53 = vrot.slane %v1233_v44, 7  ;;  %v13077_v40 = vpop.f32.mrb[3].mxu0  ;;  %v2208_v12 = vrot.slane %v1306_v8, 5  ;;  %v2691_v45 = vrot.slane %v1306_v8, 6  ;;  %v13096_v24 = vpop.f32.mrb[11].mxu1 }
 0x355   :  { %v2207_v18 = vsel %vm2206_vm5, %v2205_v0, %v2204_v27  ;;  %v2690_v16 = vsel %vm2206_vm5, %v2689_v53, %v2688_v31 }
 0x356   :  { %v2210_v38 = vsel %vm2209_vm6, %v2208_v12, %v2207_v18  ;;  %v2692_v56 = vsel %vm2209_vm6, %v2691_v45, %v2690_v16 }
 0x362   :  { %v1379_v42 = vpop.f32.mrb[4].mxu0  ;;  %v1452_v54 = vpop.f32.mrb[12].mxu1 }
 0x363   :  { %v2211_v51 = vrot.slane %v1379_v42, 4  ;;  %v2693_v55 = vrot.slane %v1379_v42, 5  ;;  %v13115_v14 = vpop.f32.mrb[5].mxu0  ;;  %v2214_v15 = vrot.slane %v1452_v54, 3  ;;  %v2695_v20 = vrot.slane %v1452_v54, 4  ;;  %v13134_v57 = vpop.f32.mrb[13].mxu1 }
 0x365   :  { %v2213_v3 = vsel %vm2212_vm7, %v2211_v51, %v2210_v38  ;;  %v2694_v37 = vsel %vm2212_vm7, %v2693_v55, %v2692_v56 }
 0x366   :  { %v2216_v17 = vsel %vm2215_vm8, %v2214_v15, %v2213_v3  ;;  %v2696_v63 = vsel %vm2215_vm8, %v2695_v20, %v2694_v37 }
 0x372   :  { %v1525_v43 = vpop.f32.mrb[6].mxu0  ;;  %v1598_v21 = vpop.f32.mrb[14].mxu1 }
 0x373   :  { %v2217_v2 = vrot.slane %v1525_v43, 2  ;;  %v2697_v28 = vrot.slane %v1525_v43, 3  ;;  %v13153_v1 = vpop.f32.mrb[7].mxu0  ;;  %v2220_v30 = vrot.slane %v1598_v21, 1  ;;  %v2699_v33 = vrot.slane %v1598_v21, 2  ;;  %v13172_v13 = vpop.f32.mrb[15].mxu1 }
 0x375   :  { %v2219_v41 = vsel %vm2218_vm9, %v2217_v2, %v2216_v17  ;;  %v2698_v26 = vsel %vm2218_vm9, %v2697_v28, %v2696_v63  ;;  %v143_v2 = vld [vmem:[%s19424_s27] sm:$0xff] }
 0x376   :  { %v2700_v7 = vsel %vm2221_vm10, %v2699_v33, %v2698_v26  ;;  %v2222_v34 = vsel %vm2221_vm10, %v2220_v30, %v2219_v41  ;;  %13329 = vmatprep.mubr.msk.f32.mxu0 %vm2243_vm11, %v143_v2  ;;  %13381 = vmatprep.mubr.msk.f32.mxu1 %vm2243_vm11, %v143_v2 }
 0x382   :  { %v1671_v39 = vpop.f32.mrb[8].mxu0  ;;  %v1744_v32 = vpop.f32.mrb[16].mxu1 }
 0x383   :  { %v2701_v52 = vrot.slane %v1671_v39, 1  ;;  %v13191_v25 = vpop.f32.mrb[9].mxu0  ;;  %v2223_v6 = vrot.slane %v1744_v32, 7  ;;  %v13210_v19 = vpop.f32.mrb[17].mxu1 }
 0x385   :  { %v2224_v27 = vsel %vm2203_vm4, %v2223_v6, %v1671_v39  ;;  %v2702_v31 = vsel %vm2203_vm4, %v1744_v32, %v2701_v52 }
 0x392   :  { %v1817_v44 = vpop.f32.mrb[10].mxu0  ;;  %v1890_v8 = vpop.f32.mrb[18].mxu1 }
 0x393   :  { %v2225_v0 = vrot.slane %v1817_v44, 6  ;;  %v2703_v53 = vrot.slane %v1817_v44, 7  ;;  %v13229_v40 = vpop.f32.mrb[11].mxu0  ;;  %v2227_v12 = vrot.slane %v1890_v8, 5  ;;  %v2705_v45 = vrot.slane %v1890_v8, 6  ;;  %v13248_v24 = vpop.f32.mrb[19].mxu1 }
 0x394   :  { %v144_v24 = vld [vmem:[%s19424_s27 + $0x8] sm:$0xff] }
 0x395   :  { %v2226_v18 = vsel %vm2206_vm5, %v2225_v0, %v2224_v27  ;;  %v2704_v16 = vsel %vm2206_vm5, %v2703_v53, %v2702_v31 }
 0x396   :  { %v2228_v38 = vsel %vm2209_vm6, %v2227_v12, %v2226_v18  ;;  %v2706_v56 = vsel %vm2209_vm6, %v2705_v45, %v2704_v16  ;;  %v145_v18 = vld [vmem:[%s19424_s27 + $0x10] sm:$0xff] }
 0x3a2   :  { %v1963_v42 = vpop.f32.mrb[12].mxu0  ;;  %v2036_v54 = vpop.f32.mrb[20].mxu1 }
 0x3a3   :  { %v2229_v51 = vrot.slane %v1963_v42, 4  ;;  %v2707_v55 = vrot.slane %v1963_v42, 5  ;;  %v13267_v14 = vpop.f32.mrb[13].mxu0  ;;  %v2231_v15 = vrot.slane %v2036_v54, 3  ;;  %v2709_v20 = vrot.slane %v2036_v54, 4  ;;  %v13286_v57 = vpop.f32.mrb[21].mxu1 }
 0x3a4   :  { %v148_v42 = vld [vmem:[%s19424_s27 + $0x28] sm:$0xff]  ;;  %v149_v54 = vld [vmem:[%s19424_s27 + $0x30] sm:$0xff] }
 0x3a5   :  { %v2230_v3 = vsel %vm2212_vm7, %v2229_v51, %v2228_v38  ;;  %v2708_v37 = vsel %vm2212_vm7, %v2707_v55, %v2706_v56  ;;  %v146_v38 = vld [vmem:[%s19424_s27 + $0x18] sm:$0xff]  ;;  %v147_v56 = vld [vmem:[%s19424_s27 + $0x20] sm:$0xff]  ;;  %v498_v14 = vld [vmem:[%s19381_s8 + $0x10] sm:$0xff] }
 0x3a6   :  { %v2232_v17 = vsel %vm2215_vm8, %v2231_v15, %v2230_v3  ;;  %v2710_v63 = vsel %vm2215_vm8, %v2709_v20, %v2708_v37  ;;  %v150_v51 = vld [vmem:[%s19424_s27 + $0x38] sm:$0xff]  ;;  %v135_v55 = vld [vmem:[%s19425_s26] sm:$0xff]  ;;  %v136_v20 = vld [vmem:[%s19425_s26 + $0x8] sm:$0xff] }
 0x3a7   :  { %v499_v15 = vld [vmem:[%s19381_s8 + $0x18] sm:$0xff]  ;;  %v137_v57 = vld [vmem:[%s19425_s26 + $0x10] sm:$0xff] }
 0x3a8   :  { %v15149_v3 = vpack.c.bf16 %v499_v15, %v498_v14  ;;  %v138_v37 = vld [vmem:[%s19425_s26 + $0x18] sm:$0xff] }
 0x3b2   :  { %v2109_v43 = vpop.f32.mrb[14].mxu0  ;;  %v2182_v21 = vpop.f32.mrb[22].mxu1 }
 0x3b3   :  { %v2233_v28 = vrot.slane %v2109_v43, 2  ;;  %v2711_v1 = vrot.slane %v2109_v43, 3  ;;  %v13305_v30 = vpop.f32.mrb[15].mxu0  ;;  %v2235_v33 = vrot.slane %v2182_v21, 1  ;;  %v2713_v13 = vrot.slane %v2182_v21, 2  ;;  %v13324_v41 = vpop.f32.mrb[23].mxu1 }
 0x3b4   :  { %v141_v43 = vld [vmem:[%s19425_s26 + $0x30] sm:$0xff]  ;;  %v142_v21 = vld [vmem:[%s19425_s26 + $0x38] sm:$0xff] }
 0x3b5   :  { %v2234_v26 = vsel %vm2218_vm9, %v2233_v28, %v2232_v17  ;;  %v2712_v39 = vsel %vm2218_vm9, %v2711_v1, %v2710_v63  ;;  %v139_v17 = vld [vmem:[%s19425_s26 + $0x20] sm:$0xff]  ;;  %v140_v63 = vld [vmem:[%s19425_s26 + $0x28] sm:$0xff] }
 0x3b6   :  { %v2714_v32 = vsel %vm2221_vm10, %v2713_v13, %v2712_v39  ;;  %v2236_v52 = vsel %vm2221_vm10, %v2235_v33, %v2234_v26 }
 0x3b7   :  { %v16224_v25 = vpack.i.bf16 %v2714_v32, %v2700_v7  ;;  %v16229_v6 = vpack.i.bf16 %v2236_v52, %v2222_v34  ;;  %v15141_v19 = vpack.c.bf16 %v2236_v52, %v2222_v34  ;;  %v15157_v27 = vpack.c.bf16 %v2714_v32, %v2700_v7  ;;  %v496_v34 = vld [vmem:[%s19381_s8] sm:$0xff]  ;;  %v497_v7 = vld [vmem:[%s19381_s8 + $0x8] sm:$0xff] }
 0x3b8   :  { %v15145_v16 = vpack.c.bf16 %v497_v7, %v496_v34 }
 0x3b9   :  { %16225 = vrot.lane.b32.xlu0 %v16224_v25, %s16558_s7  ;;  %16230 = vrot.lane.b32.xlu1 %v16229_v6, %s16558_s7 }
 0x42b   :  { %v16226_v31 = vpop.permute.xlu0 %16225  ;;  %v16231_v44 = vpop.permute.xlu1 %16230 }
 0x42c   :  { %v16228_v8 = vunpack.i.h.bf16 %v16226_v31  ;;  %v16227_v0 = vunpack.i.l.bf16 %v16226_v31  ;;  %v16233_v53 = vunpack.i.h.bf16 %v16231_v44  ;;  %v16232_v40 = vunpack.i.l.bf16 %v16231_v44 }
 0x42e   :  { %v15153_v12 = vpack.c.bf16 %v16228_v8, %v16227_v0  ;;  %v15137_v45 = vpack.c.bf16 %v16233_v53, %v16232_v40 }
 0x430   :  { %15138 = vmatprep.subr.bf16.mxu0 %v15137_v45  ;;  %15154 = vmatprep.subr.bf16.mxu1 %v15153_v12 }
 0x431   :  { %15140 = vmatpush3.bf16.msra.mxu0 %v15137_v45  ;;  %15156 = vmatpush3.bf16.msra.mxu1 %v15153_v12 }
 0x432   :  { %15142 = vmatprep.subr.bf16.mxu0 %v15141_v19  ;;  %15158 = vmatprep.subr.bf16.mxu1 %v15157_v27 }
 0x434   :  { %13330 = vmatmul.mubr.msk.f32.vlgmr.msra.gmra.mrb[16].mxu0 %vm2243_vm11, %v144_v24  ;;  %13382 = vmatmul.mubr.msk.f32.vlgmr.msra.gmra.mrb[24].mxu1 %vm2243_vm11, %v144_v24 }
 0x435   :  { %15144 = vmatpush3.bf16.msra.mxu0 %v15141_v19  ;;  %15160 = vmatpush3.bf16.msra.mxu1 %v15157_v27 }
 0x436   :  { %13332 = vmatprep.mubr.msk.f32.mxu0 %vm2243_vm11, %v145_v18  ;;  %13384 = vmatprep.mubr.msk.f32.mxu1 %vm2243_vm11, %v145_v18 }
 0x437   :  { %15162 = vmatprep.subr.bf16.mxu1 %v15145_v16  ;;  %15146 = vmatprep.subr.bf16.mxu0 %v15145_v16 }
 0x438   :  { %13333 = vmatmul.mubr.msk.f32.gmra.mrb[18].mxu0 %vm2243_vm11, %v146_v38  ;;  %13385 = vmatmul.mubr.msk.f32.gmra.mrb[26].mxu1 %vm2243_vm11, %v146_v38 }
 0x439   :  { %13335 = vmatprep.mubr.msk.f32.mxu0 %vm2243_vm11, %v147_v56  ;;  %13387 = vmatprep.mubr.msk.f32.mxu1 %vm2243_vm11, %v147_v56 }
 0x43c   :  { %13336 = vmatmul.mubr.msk.f32.gmra.mrb[20].mxu0 %vm2243_vm11, %v148_v42  ;;  %13388 = vmatmul.mubr.msk.f32.gmra.mrb[28].mxu1 %vm2243_vm11, %v148_v42 }
 0x43d   :  { %13338 = vmatprep.mubr.msk.f32.mxu0 %vm2243_vm11, %v149_v54  ;;  %13390 = vmatprep.mubr.msk.f32.mxu1 %vm2243_vm11, %v149_v54 }
 0x440   :  { %13339 = vmatmul.mubr.msk.f32.gmra.mrb[22].mxu0 %vm2243_vm11, %v150_v51  ;;  %13391 = vmatmul.mubr.msk.f32.gmra.mrb[30].mxu1 %vm2243_vm11, %v150_v51 }
 0x441   :  { %13345 = vmatprep.mubr.msk.f32.mxu0 %vm2243_vm11, %v135_v55  ;;  %13397 = vmatprep.mubr.msk.f32.mxu1 %vm2243_vm11, %v135_v55 }
 0x444   :  { %13346 = vmatmul.mubr.msk.f32.vlgmr.msra.gmra.mrb[16].mxu0 %vm2243_vm11, %v136_v20  ;;  %13398 = vmatmul.mubr.msk.f32.vlgmr.msra.gmra.mrb[24].mxu1 %vm2243_vm11, %v136_v20 }
 0x445   :  { %15164 = vmatpush3.bf16.msra.mxu1 %v15145_v16  ;;  %13348 = vmatprep.mubr.msk.f32.mxu0 %vm2243_vm11, %v137_v57 }
 0x446   :  { %15148 = vmatpush3.bf16.msra.mxu0 %v15145_v16  ;;  %13400 = vmatprep.mubr.msk.f32.mxu1 %vm2243_vm11, %v137_v57 }
 0x447   :  { %15166 = vmatprep.subr.bf16.mxu1 %v15149_v3  ;;  %15150 = vmatprep.subr.bf16.mxu0 %v15149_v3 }
 0x448   :  { %13349 = vmatmul.mubr.msk.f32.gmra.mrb[18].mxu0 %vm2243_vm11, %v138_v37  ;;  %13401 = vmatmul.mubr.msk.f32.gmra.mrb[26].mxu1 %vm2243_vm11, %v138_v37 }
 0x449   :  { %13351 = vmatprep.mubr.msk.f32.mxu0 %vm2243_vm11, %v139_v17  ;;  %13403 = vmatprep.mubr.msk.f32.mxu1 %vm2243_vm11, %v139_v17 }
 0x44a   :  { %15168 = vmatpush3.bf16.msra.mxu1 %v15149_v3  ;;  %15152 = vmatpush3.bf16.msra.mxu0 %v15149_v3 }
 0x44c   :  { %13352 = vmatmul.mubr.msk.f32.gmra.mrb[20].mxu0 %vm2243_vm11, %v140_v63  ;;  %13404 = vmatmul.mubr.msk.f32.gmra.mrb[28].mxu1 %vm2243_vm11, %v140_v63 }
 0x44d   :  { %13354 = vmatprep.mubr.msk.f32.mxu0 %vm2243_vm11, %v141_v43  ;;  %13406 = vmatprep.mubr.msk.f32.mxu1 %vm2243_vm11, %v141_v43 }
 0x450   :  { %13355 = vmatmul.mubr.msk.f32.gmra.mrb[22].mxu0 %vm2243_vm11, %v142_v21  ;;  %13407 = vmatmul.mubr.msk.f32.gmra.mrb[30].mxu1 %vm2243_vm11, %v142_v21 }
 0x451   :  { %13365 = vmatprep.mubr.msk.f32.mxu0 %vm607_vm2, %v16855_v47  ;;  %13417 = vmatprep.mubr.msk.f32.mxu1 %vm607_vm2, %v16895_v35  ;;  %v16392_v47 = vld [vmem:[%s19414_s2] sm:$0xff] }
 0x454   :  { %13366 = vmatmul.mubr.msk.f32.vlgmr.msra.gmra.mrb[16].mxu0 %vm607_vm2, %v16858_v48  ;;  %13418 = vmatmul.mubr.msk.f32.vlgmr.msra.gmra.mrb[24].mxu1 %vm607_vm2, %v16898_v36  ;;  %v11699_v48 = vld [vmem:[%s19382_s9] ss:$0 sm:$0xff] }
 0x455   :  { %13368 = vmatprep.mubr.msk.f32.mxu0 %vm607_vm2, %v16865_v60  ;;  %13420 = vmatprep.mubr.msk.f32.mxu1 %vm607_vm2, %v16911_v49 }
 0x458   :  { %13369 = vmatmul.mubr.msk.f32.gmra.mrb[18].mxu0 %vm607_vm2, %v16868_v61  ;;  %13421 = vmatmul.mubr.msk.f32.gmra.mrb[26].mxu1 %vm607_vm2, %v16914_v50 }
 0x459   :  { %13371 = vmatprep.mubr.msk.f32.mxu0 %vm607_vm2, %v16875_v9  ;;  %13423 = vmatprep.mubr.msk.f32.mxu1 %vm607_vm2, %v16926_v59 }
 0x45c   :  { %13372 = vmatmul.mubr.msk.f32.gmra.mrb[20].mxu0 %vm607_vm2, %v16878_v10  ;;  %13424 = vmatmul.mubr.msk.f32.gmra.mrb[28].mxu1 %vm607_vm2, %v16929_v62 }
 0x45d   :  { %13374 = vmatprep.mubr.msk.f32.mxu0 %vm607_vm2, %v16885_v22  ;;  %13426 = vmatprep.mubr.msk.f32.mxu1 %vm607_vm2, %v16939_v4 }
 0x460   :  { %13375 = vmatmul.mubr.msk.f32.gmra.mrb[22].mxu0 %vm607_vm2, %v16888_v23  ;;  %13427 = vmatmul.mubr.msk.f32.gmra.mrb[30].mxu1 %vm607_vm2, %v16942_v5 }
 0x461   :  { %13445 = vmatprep.mubr.msk.f32.mxu0 %vm501_vm0, %v16392_v47  ;;  %13467 = vmatprep.mubr.msk.f32.mxu1 %vm501_vm0, %v16392_v47 }
 0x527   :  { %v13367_v60 = vpop.f32.mrb[16].mxu0  ;;  %v13419_v61 = vpop.f32.mrb[24].mxu1 }
 0x528   :  { %v2606_v9 = vadd.f32 %v13367_v60, %v11699_v48  ;;  %v3029_v10 = vadd.f32 %v13419_v61, %v11699_v48  ;;  %v2600_v22 = vpop.f32.mrb[17].mxu0  ;;  %v3023_v23 = vpop.f32.mrb[25].mxu1 }
 0x529   :  { %v2601_v35 = vadd.f32 %v11699_v48, %v2600_v22  ;;  %v3024_v36 = vadd.f32 %v11699_v48, %v3023_v23 }
 0x52a   :  { %v2656_v49 = vmul.f32 0.70710677, %v2606_v9  ;;  %v3079_v50 = vmul.f32 0.70710677, %v3029_v10  ;;  %v2648_v7 = vmul.f32 0.5, %v2606_v9  ;;  %v3071_v56 = vmul.f32 0.5, %v3029_v10 }
 0x52b   :  { %v2655_v59 = vmul.f32 0.70710677, %v2601_v35  ;;  %v3078_v62 = vmul.f32 0.70710677, %v3024_v36  ;;  %v13370_v4 = vpop.f32.mrb[18].mxu0  ;;  %v13422_v5 = vpop.f32.mrb[26].mxu1 }
 0x52c   :  { %16264 = verf.f32 %v2656_v49  ;;  %v17438_v2 = vadd.f32 %v13370_v4, %v11699_v48  ;;  %v17440_v28 = vadd.f32 %v13422_v5, %v11699_v48  ;;  %v2610_v1 = vpop.f32.mrb[19].mxu0  ;;  %v3033_v30 = vpop.f32.mrb[27].mxu1  ;;  %v2647_v3 = vmul.f32 0.5, %v2601_v35 }
 0x52d   :  { %16266 = verf.f32 %v3079_v50  ;;  %v17442_v33 = vadd.f32 %v11699_v48, %v2610_v1  ;;  %v17444_v13 = vadd.f32 %v11699_v48, %v3033_v30  ;;  %v3070_v21 = vmul.f32 0.5, %v3024_v36 }
 0x52e   :  { %16268 = verf.f32 %v2655_v59  ;;  %v2658_v41 = vmul.f32 0.70710677, %v17438_v2  ;;  %v3081_v32 = vmul.f32 0.70710677, %v17440_v28  ;;  %v2650_v35 = vmul.f32 0.5, %v17438_v2 }
 0x52f   :  { %16270 = verf.f32 %v3078_v62  ;;  %v13373_v26 = vpop.f32.mrb[20].mxu0  ;;  %v13425_v39 = vpop.f32.mrb[28].mxu1  ;;  %v2657_v52 = vmul.f32 0.70710677, %v17442_v33  ;;  %v3080_v25 = vmul.f32 0.70710677, %v17444_v13 }
 0x530   :  { %16272 = verf.f32 %v2658_v41  ;;  %v17450_v6 = vadd.f32 %v13373_v26, %v11699_v48  ;;  %v17452_v19 = vadd.f32 %v13425_v39, %v11699_v48  ;;  %v2620_v27 = vpop.f32.mrb[21].mxu0  ;;  %v3043_v31 = vpop.f32.mrb[29].mxu1  ;;  %v3073_v50 = vmul.f32 0.5, %v17440_v28 }
 0x531   :  { %16274 = verf.f32 %v3081_v32  ;;  %v17454_v44 = vadd.f32 %v11699_v48, %v2620_v27  ;;  %v17456_v8 = vadd.f32 %v11699_v48, %v3043_v31  ;;  %v2649_v1 = vmul.f32 0.5, %v17442_v33 }
 0x532   :  { %16276 = verf.f32 %v2657_v52  ;;  %v2660_v0 = vmul.f32 0.70710677, %v17450_v6  ;;  %v3083_v12 = vmul.f32 0.70710677, %v17452_v19  ;;  %v3072_v39 = vmul.f32 0.5, %v17444_v13 }
 0x533   :  { %v13376_v53 = vpop.f32.mrb[22].mxu0  ;;  %v13428_v40 = vpop.f32.mrb[30].mxu1  ;;  %16278 = verf.f32 %v3080_v25  ;;  %v2659_v45 = vmul.f32 0.70710677, %v17454_v44  ;;  %v3082_v24 = vmul.f32 0.70710677, %v17456_v8 }
 0x534   :  { %v2630_v34 = vpop.f32.mrb[23].mxu0  ;;  %16280 = verf.f32 %v2660_v0  ;;  %v17462_v18 = vadd.f32 %v13376_v53, %v11699_v48  ;;  %v3053_v16 = vpop.f32.mrb[31].mxu1  ;;  %v17464_v42 = vadd.f32 %v13428_v40, %v11699_v48  ;;  %v2652_v25 = vmul.f32 0.5, %v17450_v6 }
 0x535   :  { %16282 = verf.f32 %v3083_v12  ;;  %v17466_v54 = vadd.f32 %v11699_v48, %v2630_v34  ;;  %v17469_v15 = vadd.f32 %v11699_v48, %v3053_v16  ;;  %v3075_v0 = vmul.f32 0.5, %v17452_v19 }
 0x536   :  { %v16265_v38 = vpop.eup %16264  ;;  %16284 = verf.f32 %v2659_v45  ;;  %v2662_v14 = vmul.f32 0.70710677, %v17462_v18  ;;  %v3085_v37 = vmul.f32 0.70710677, %v17464_v42  ;;  %v2651_v13 = vmul.f32 0.5, %v17454_v44 }
 0x537   :  { %v16267_v51 = vpop.eup %16266  ;;  %v2672_v55 = vadd.f32 1.0, %v16265_v38  ;;  %16286 = verf.f32 %v3082_v24  ;;  %v2661_v61 = vmul.f32 0.70710677, %v17466_v54  ;;  %v3084_v10 = vmul.f32 0.70710677, %v17469_v15 }
 0x538   :  { %v16269_v20 = vpop.eup %16268  ;;  %v3095_v57 = vadd.f32 1.0, %v16267_v51  ;;  %16288 = verf.f32 %v2662_v14  ;;  %v3074_v24 = vmul.f32 0.5, %v17456_v8  ;;  %v2654_v44 = vmul.f32 0.5, %v17462_v18 }
 0x539   :  { %v16271_v17 = vpop.eup %16270  ;;  %v17472_v63 = vmul.f32 %v2672_v55, %v2648_v7  ;;  %v2671_v43 = vadd.f32 1.0, %v16269_v20  ;;  %16290 = verf.f32 %v3085_v37 }
 0x53a   :  { %v17474_v47 = vmul.f32 %v3095_v57, %v3071_v56  ;;  %v3094_v60 = vadd.f32 1.0, %v16271_v17  ;;  %v16273_v48 = vpop.eup %16272  ;;  %16292 = verf.f32 %v2661_v61  ;;  %v3077_v57 = vmul.f32 0.5, %v17464_v42 }
 0x53b   :  { %v17477_v9 = vmul.f32 %v2671_v43, %v2647_v3  ;;  %v16275_v22 = vpop.eup %16274  ;;  %v2674_v49 = vadd.f32 1.0, %v16273_v48  ;;  %16294 = verf.f32 %v3084_v10  ;;  %v2653_v17 = vmul.f32 0.5, %v17466_v54 }
 0x53c   :  { %v17480_v23 = vmul.f32 %v3094_v60, %v3070_v21  ;;  %v16277_v36 = vpop.eup %16276  ;;  %v3097_v59 = vadd.f32 1.0, %v16275_v22  ;;  %v3076_v60 = vmul.f32 0.5, %v17469_v15  ;;  %v16393_v15 = vld [vmem:[%s19414_s2 + $0x8] sm:$0xff]  ;;  %v16394_v22 = vld [vmem:[%s19414_s2 + $0x10] sm:$0xff] }
 0x53d   :  { %v15169_v62 = vpack.c.bf16 %v17472_v63, %v17477_v9  ;;  %v16279_v4 = vpop.eup %16278  ;;  %v17486_v5 = vmul.f32 %v2674_v49, %v2650_v35  ;;  %v2673_v30 = vadd.f32 1.0, %v16277_v36  ;;  %v16395_v35 = vld [vmem:[%s19414_s2 + $0x18] sm:$0xff]  ;;  %v3110_v49 = vld [vmem:[#allocation5] sm:$0xff]  ;;  %v3111_v36 = vld [vmem:[#allocation5 + $0x8] sm:$0xff] }
 0x53e   :  { %v15185_v41 = vpack.c.bf16 %v17474_v47, %v17480_v23  ;;  %v16281_v2 = vpop.eup %16280  ;;  %v17491_v26 = vmul.f32 %v3097_v59, %v3073_v50  ;;  %v3096_v28 = vadd.f32 1.0, %v16279_v4  ;;  %v3118_v50 = vld [vmem:[#allocation5 + $0x40] sm:$0xff]  ;;  %v15202_v59 = vpack.c.bf16 %v3111_v36, %v3110_v49  ;;  %v3112_v4 = vld [vmem:[#allocation5 + $0x10] sm:$0xff]  ;;  %v17593_v36 = vld [vmem:[#allocation5 + $0xe8] sm:$0xff] }
 0x53f   :  { %15170 = vmatprep.subr.bf16.mxu0 %v15169_v62  ;;  %v16283_v32 = vpop.eup %16282  ;;  %v17494_v52 = vmul.f32 %v2673_v30, %v2649_v1  ;;  %v2676_v27 = vadd.f32 1.0, %v16281_v2  ;;  %v3113_v1 = vld [vmem:[#allocation5 + $0x18] sm:$0xff] }
 0x540   :  { %15186 = vmatprep.subr.bf16.mxu1 %v15185_v41  ;;  %15172 = vmatpush3.bf16.msra.mxu0 %v15169_v62  ;;  %v16285_v33 = vpop.eup %16284  ;;  %v17497_v31 = vmul.f32 %v3096_v28, %v3072_v39  ;;  %v3099_v53 = vadd.f32 1.0, %v16283_v32  ;;  %v3119_v62 = vld [vmem:[#allocation5 + $0x48] sm:$0xff]  ;;  %v3121_v2 = vld [vmem:[#allocation5 + $0x58] sm:$0xff]  ;;  %v15205_v39 = vpack.c.bf16 %v3113_v1, %v3112_v4  ;;  %v3114_v32 = vld [vmem:[#allocation5 + $0x20] sm:$0xff] }
 0x541   :  { %15188 = vmatpush3.bf16.msra.mxu1 %v15185_v41  ;;  %v16287_v40 = vpop.eup %16286  ;;  %v17500_v12 = vmul.f32 %v2676_v27, %v2652_v25  ;;  %v2675_v45 = vadd.f32 1.0, %v16285_v33  ;;  %v15173_v34 = vpack.c.bf16 %v17486_v5, %v17494_v52  ;;  %v15214_v30 = vpack.c.bf16 %v3119_v62, %v3118_v50  ;;  %v3120_v41 = vld [vmem:[#allocation5 + $0x50] sm:$0xff]  ;;  %v3115_v25 = vld [vmem:[#allocation5 + $0x28] sm:$0xff]  ;;  %v3122_v33 = vld [vmem:[#allocation5 + $0x60] sm:$0xff] }
 0x542   :  { %v16289_v6 = vpop.eup %16288  ;;  %v17505_v7 = vmul.f32 %v3099_v53, %v3075_v0  ;;  %v3098_v16 = vadd.f32 1.0, %v16287_v40  ;;  %v15189_v19 = vpack.c.bf16 %v17491_v26, %v17497_v31  ;;  %v15217_v28 = vpack.c.bf16 %v3121_v2, %v3120_v41  ;;  %v3123_v0 = vld [vmem:[#allocation5 + $0x68] sm:$0xff]  ;;  %v17595_v50 = vld [vmem:[#allocation5 + $0xb0] sm:$0xff] }
 0x543   :  { %v16291_v38 = vpop.eup %16290  ;;  %v17510_v56 = vmul.f32 %v2675_v45, %v2651_v13  ;;  %v2678_v51 = vadd.f32 1.0, %v16289_v6  ;;  %15174 = vmatprep.subr.bf16.mxu0 %v15173_v34  ;;  %v15208_v27 = vpack.c.bf16 %v3115_v25, %v3114_v32  ;;  %v15220_v53 = vpack.c.bf16 %v3123_v0, %v3122_v33  ;;  %v3116_v6 = vld [vmem:[#allocation5 + $0x30] sm:$0xff] }
 0x544   :  { %v17512_v55 = vmul.f32 %v3098_v16, %v3074_v24  ;;  %v3101_v14 = vadd.f32 1.0, %v16291_v38  ;;  %15190 = vmatprep.subr.bf16.mxu1 %v15189_v19  ;;  %15176 = vmatpush3.bf16.msra.mxu0 %v15173_v34  ;;  %v16293_v20 = vpop.eup %16292  ;;  %v3117_v24 = vld [vmem:[#allocation5 + $0x38] sm:$0xff]  ;;  %v3124_v38 = vld [vmem:[#allocation5 + $0x70] sm:$0xff] }
 0x545   :  { %15192 = vmatpush3.bf16.msra.mxu1 %v15189_v19  ;;  %v15177_v8 = vpack.c.bf16 %v17500_v12, %v17510_v56  ;;  %v16295_v3 = vpop.eup %16294  ;;  %v17518_v37 = vmul.f32 %v2678_v51, %v2654_v44  ;;  %v2677_v43 = vadd.f32 1.0, %v16293_v20  ;;  %v15211_v16 = vpack.c.bf16 %v3117_v24, %v3116_v6  ;;  %v3125_v51 = vld [vmem:[#allocation5 + $0x78] sm:$0xff]  ;;  %v17606_v2 = vld [vmem:[#allocation5 + $0xf0] sm:$0xff] }
 0x546   :  { %v15193_v21 = vpack.c.bf16 %v17505_v7, %v17512_v55  ;;  %v17523_v18 = vmul.f32 %v3101_v14, %v3077_v57  ;;  %v3100_v61 = vadd.f32 1.0, %v16295_v3  ;;  %v15223_v20 = vpack.c.bf16 %v3125_v51, %v3124_v38  ;;  %v17571_v3 = vld [vmem:[#allocation5 + $0x88] sm:$0xff] }
 0x547   :  { %15178 = vmatprep.subr.bf16.mxu0 %v15177_v8  ;;  %v17526_v42 = vmul.f32 %v2677_v43, %v2653_v17  ;;  %v17573_v17 = vld [vmem:[#allocation5 + $0xc0] sm:$0xff]  ;;  %v17575_v43 = vld [vmem:[#allocation5 + $0xc8] sm:$0xff] }
 0x548   :  { %15194 = vmatprep.subr.bf16.mxu1 %v15193_v21  ;;  %15180 = vmatpush3.bf16.msra.mxu0 %v15177_v8  ;;  %v17528_v48 = vmul.f32 %v3100_v61, %v3076_v60  ;;  %v17569_v8 = vld [vmem:[#allocation5 + $0x80] sm:$0xff]  ;;  %v17579_v60 = vld [vmem:[#allocation5 + $0x98] sm:$0xff]  ;;  %v17581_v61 = vld [vmem:[#allocation5 + $0xd0] sm:$0xff]  ;;  %v15238_v1 = vpack.c.bf16 %v17575_v43, %v17573_v17 }
 0x549   :  { %15196 = vmatpush3.bf16.msra.mxu1 %v15193_v21  ;;  %v15181_v54 = vpack.c.bf16 %v17518_v37, %v17526_v42  ;;  %v17577_v21 = vld [vmem:[#allocation5 + $0x90] sm:$0xff]  ;;  %v15226_v49 = vpack.c.bf16 %v17571_v3, %v17569_v8 }
 0x54a   :  { %v15197_v10 = vpack.c.bf16 %v17523_v18, %v17528_v48 }
 0x54b   :  { %15182 = vmatprep.subr.bf16.mxu0 %v15181_v54 }
 0x54c   :  { %15198 = vmatprep.subr.bf16.mxu1 %v15197_v10  ;;  %15184 = vmatpush3.bf16.msra.mxu0 %v15181_v54  ;;  %v17583_v54 = vld [vmem:[#allocation5 + $0xd8] sm:$0xff] }
 0x54d   :  { %15200 = vmatpush3.bf16.msra.mxu1 %v15197_v10  ;;  %15201 = vmatprep.subr.bf16.mxu0 %v16553_v11  ;;  %v17585_v10 = vld [vmem:[#allocation5 + $0xa0] sm:$0xff]  ;;  %v15241_v41 = vpack.c.bf16 %v17583_v54, %v17581_v61 }
 0x54e   :  { %15213 = vmatprep.subr.bf16.mxu1 %v16553_v11 }
 0x54f   :  { %13446 = vmatmul.mubr.msk.f32.vlgmr.msra.gmra.mrb[24].mxu0 %vm501_vm0, %v16393_v15 }
 0x550   :  { %13468 = vmatmul.mubr.msk.f32.vlgmr.msra.gmra.mrb[32].mxu1 %vm501_vm0, %v16393_v15  ;;  %13448 = vmatprep.mubr.msk.f32.mxu0 %vm501_vm0, %v16394_v22  ;;  %v17587_v15 = vld [vmem:[#allocation5 + $0xa8] sm:$0xff] }
 0x551   :  { %13470 = vmatprep.mubr.msk.f32.mxu1 %vm501_vm0, %v16394_v22  ;;  %15203 = vmatpush3.bf16.msra.mxu0 %v15202_v59  ;;  %v17589_v22 = vld [vmem:[#allocation5 + $0xe0] sm:$0xff]  ;;  %v17597_v59 = vld [vmem:[#allocation5 + $0xb8] sm:$0xff] }
 0x552   :  { %15215 = vmatpush3.bf16.msra.mxu1 %v15214_v30  ;;  %15204 = vmatprep.subr.bf16.mxu0 %v16553_v11  ;;  %v15229_v30 = vpack.c.bf16 %v17579_v60, %v17577_v21 }
 0x553   :  { %13449 = vmatmul.mubr.msk.f32.gmra.mrb[26].mxu0 %vm501_vm0, %v16395_v35  ;;  %15216 = vmatprep.subr.bf16.mxu1 %v16553_v11 }
 0x554   :  { %13471 = vmatmul.mubr.msk.f32.gmra.mrb[34].mxu1 %vm501_vm0, %v16395_v35  ;;  %13489 = vmatprep.mubr.msk.f32.mxu0 %vm16555_vm1, %v16556_v46 }
 0x555   :  { %13508 = vmatprep.mubr.msk.f32.mxu1 %vm16555_vm1, %v16556_v46  ;;  %15206 = vmatpush3.bf16.msra.mxu0 %v15205_v39  ;;  %v17608_v39 = vld [vmem:[#allocation5 + $0xf8] sm:$0xff] }
 0x556   :  { %15218 = vmatpush3.bf16.msra.mxu1 %v15217_v28  ;;  %15207 = vmatprep.subr.bf16.mxu0 %v16553_v11 }
 0x557   :  { %15219 = vmatprep.subr.bf16.mxu1 %v16553_v11 }
 0x559   :  { %15209 = vmatpush3.bf16.msra.mxu0 %v15208_v27  ;;  %v15232_v27 = vpack.c.bf16 %v17587_v15, %v17585_v10 }
 0x55a   :  { %15210 = vmatprep.subr.bf16.mxu0 %v16553_v11  ;;  %15221 = vmatpush3.bf16.msra.mxu1 %v15220_v53 }
 0x55b   :  { %15222 = vmatprep.subr.bf16.mxu1 %v16553_v11 }
 0x55d   :  { %15212 = vmatpush3.bf16.msra.mxu0 %v15211_v16 }
 0x55e   :  { %15225 = vmatprep.subr.bf16.mxu0 %v16553_v11  ;;  %15224 = vmatpush3.bf16.msra.mxu1 %v15223_v20 }
 0x55f   :  { %15237 = vmatprep.subr.bf16.mxu1 %v16553_v11 }
 0x622   :  { %v13447_v40 = vpop.f32.mrb[24].mxu0 }
 0x623   :  { %v17561_v13 = vpop.f32.mrb[32].mxu1  ;;  %v3309_v45 = vpop.f32.mrb[25].mxu0 }
 0x624   :  { %v3404_v34 = vpop.f32.mrb[33].mxu1 }
 0x626   :  { %v13450_v19 = vpop.f32.mrb[26].mxu0 }
 0x627   :  { %v13472_v44 = vpop.f32.mrb[34].mxu1  ;;  %v3319_v14 = vpop.f32.mrb[27].mxu0 }
 0x628   :  { %v3414_v57 = vpop.f32.mrb[35].mxu1  ;;  %3330 = vrot.lane.b32.xlu1 %v3319_v14, %s16554_s30 }
 0x629   :  { %3425 = vrot.lane.b32.xlu0 %v3414_v57, %s16554_s30 }
 0x62c   :  { %3332 = vrot.lane.b32.xlu1 %v13450_v19, %s16554_s30 }
 0x62d   :  { %3427 = vrot.lane.b32.xlu0 %v13472_v44, %s16554_s30 }
 0x69a   :  { %v3331_v35 = vpop.permute.xlu1 %3330 }
 0x69b   :  { %v3336_v62 = vsel %vm607_vm2, %v3309_v45, %v3331_v35  ;;  %v3426_v4 = vpop.permute.xlu0 %3425 }
 0x69c   :  { %v3435_v28 = vcombine.high %v3336_v62, %v3336_v62  ;;  %v3442_v32 = vrot.slane %v3336_v62, %v16973_v58  ;;  %v3431_v25 = vsel %vm607_vm2, %v3404_v34, %v3426_v4 }
 0x69d   :  { %v3551_v33 = vcombine.high %v3431_v25, %v3431_v25  ;;  %v3558_v0 = vrot.slane %v3431_v25, %v16973_v58 }
 0x69e   :  { %v3449_v6 = vrot.slane %v3435_v28, %v16973_v58  ;;  %v3450_v24 = vcombine.high %v3442_v32, %v3442_v32  ;;  %v3458_v16 = vrot.slane %v3442_v32, %v16973_v58  ;;  %v3333_v19 = vpop.permute.xlu1 %3332 }
 0x69f   :  { %v3565_v38 = vrot.slane %v3551_v33, %v16973_v58  ;;  %v3566_v51 = vcombine.high %v3558_v0, %v3558_v0  ;;  %v3574_v44 = vrot.slane %v3558_v0, %v16973_v58  ;;  %v3337_v14 = vsel %vm607_vm2, %v13447_v40, %v3333_v19  ;;  %v3428_v25 = vpop.permute.xlu0 %3427 }
 0x6a0   :  { %v3451_v20 = vcombine.high %v3449_v6, %v3449_v6  ;;  %v17627_v57 = vrot.slane %v3449_v6, %v16973_v58  ;;  %v3472_v8 = vrot.slane %v3450_v24, %v16973_v58  ;;  %v3480_v3 = vcombine.high %v3458_v16, %v3458_v16 }
 0x6a1   :  { %v3567_v17 = vcombine.high %v3565_v38, %v3565_v38  ;;  %v17631_v43 = vrot.slane %v3565_v38, %v16973_v58  ;;  %v3588_v35 = vrot.slane %v3566_v51, %v16973_v58  ;;  %v3596_v62 = vcombine.high %v3574_v44, %v3574_v44 }
 0x6a2   :  { %v17635_v4 = vrot.slane %v3451_v20, %v16973_v58  ;;  %v3482_v28 = vcombine.high %v3472_v8, %v3472_v8  ;;  %v3652_v32 = vrot.slane %v3574_v44, %v16838_v29  ;;  %v3484_v51 = vcombine.high %v3337_v14, %v3337_v14 }
 0x6a3   :  { %v17641_v33 = vrot.slane %v3567_v17, %v16973_v58  ;;  %v3597_v0 = vcombine.high %v17631_v43, %v17631_v43  ;;  %v3598_v6 = vcombine.high %v3588_v35, %v3588_v35  ;;  %v3656_v24 = vrot.slane %v3588_v35, %v16838_v29 }
 0x6a4   :  { %v3660_v19 = vrot.slane %v3596_v62, %v16838_v29  ;;  %v3668_v38 = vrot.slane %v17631_v43, %v16838_v29  ;;  %v3491_v20 = vrot.slane %v3337_v14, %v16973_v58  ;;  %v3432_v17 = vsel %vm607_vm2, %v17561_v13, %v3428_v25 }
 0x6a5   :  { %v3599_v44 = vcombine.high %v17641_v33, %v17641_v33  ;;  %v3729_v34 = vsel %vm1001_vm3, %v3458_v16, %v3652_v32  ;;  %v3730_v45 = vsel %vm1001_vm3, %v3472_v8, %v3656_v24  ;;  %v3498_v35 = vrot.slane %v3484_v51, %v16973_v58 }
 0x6a6   :  { %v3499_v40 = vcombine.high %v3491_v20, %v3491_v20  ;;  %v3507_v62 = vrot.slane %v3491_v20, %v16973_v58  ;;  %v3600_v53 = vcombine.high %v3432_v17, %v3432_v17  ;;  %13490 = vmatmul.mubr.msk.f32.vlgmr.msra.gmra.mrb[28].mxu0 %vm501_vm0, %v3729_v34  ;;  %v3607_v14 = vrot.slane %v3432_v17, %v16973_v58 }
 0x6a7   :  { %15227 = vmatpush3.bf16.msra.mxu0 %v15226_v49  ;;  %13509 = vmatmul.mubr.msk.f32.vlgmr.msra.gmra.mrb[36].mxu1 %vm501_vm0, %v3730_v45  ;;  %v17662_v43 = vsel %vm1001_vm3, %v3480_v3, %v3660_v19  ;;  %v3664_v13 = vrot.slane %v3598_v6, %v16838_v29  ;;  %v3500_v16 = vcombine.high %v3498_v35, %v3498_v35 }
 0x6a8   :  { %v17666_v8 = vrot.slane %v3498_v35, %v16973_v58  ;;  %v3521_v32 = vrot.slane %v3499_v40, %v16973_v58  ;;  %v3529_v25 = vcombine.high %v3507_v62, %v3507_v62  ;;  %15239 = vmatpush3.bf16.msra.mxu1 %v15238_v1  ;;  %v3614_v34 = vrot.slane %v3600_v53, %v16973_v58 }
 0x6a9   :  { %v3615_v24 = vcombine.high %v3607_v14, %v3607_v14  ;;  %v3623_v49 = vrot.slane %v3607_v14, %v16973_v58  ;;  %15228 = vmatprep.subr.bf16.mxu0 %v16553_v11  ;;  %15240 = vmatprep.subr.bf16.mxu1 %v16553_v11  ;;  %v3528_v45 = vrot.slane %v3500_v16, %v16973_v58 }
 0x6aa   :  { %v3530_v3 = vcombine.high %v17666_v8, %v17666_v8  ;;  %v3531_v6 = vcombine.high %v3521_v32, %v3521_v32  ;;  %13527 = vmatprep.mubr.msk.f32.mxu0 %vm16555_vm1, %v16556_v46  ;;  %13546 = vmatprep.mubr.msk.f32.mxu1 %vm16555_vm1, %v16556_v46  ;;  %v3616_v1 = vcombine.high %v3614_v34, %v3614_v34 }
 0x6ab   :  { %v3630_v53 = vrot.slane %v3614_v34, %v16973_v58  ;;  %v3637_v40 = vrot.slane %v3615_v24, %v16973_v58  ;;  %v3645_v19 = vcombine.high %v3623_v49, %v3623_v49  ;;  %15230 = vmatpush3.bf16.msra.mxu0 %v15229_v30  ;;  %v3684_v51 = vrot.slane %v3623_v49, %v16838_v29  ;;  %v3151_v49 = vld [vmem:[#allocation5 + $0x148] sm:$0xff] }
 0x6ac   :  { %15242 = vmatpush3.bf16.msra.mxu1 %v15241_v41  ;;  %15231 = vmatprep.subr.bf16.mxu0 %v16553_v11  ;;  %v3732_v20 = vsel %vm1001_vm3, %v3482_v28, %v3664_v13  ;;  %v17693_v17 = vsel %vm1001_vm3, %v17627_v57, %v3668_v38  ;;  %v3644_v35 = vrot.slane %v3616_v1, %v16973_v58  ;;  %v3142_v28 = vld [vmem:[#allocation5 + $0x100] sm:$0xff] }
 0x6ad   :  { %v3646_v14 = vcombine.high %v3630_v53, %v3630_v53  ;;  %v3647_v16 = vcombine.high %v3637_v40, %v3637_v40  ;;  %v3688_v21 = vrot.slane %v3637_v40, %v16838_v29  ;;  %15243 = vmatprep.subr.bf16.mxu1 %v16553_v11  ;;  %v3692_v60 = vrot.slane %v3645_v19, %v16838_v29 }
 0x6ae   :  { %v3700_v61 = vrot.slane %v3630_v53, %v16838_v29  ;;  %v3672_v54 = vrot.slane %v17641_v33, %v16838_v29  ;;  %v3676_v30 = vrot.slane %v3597_v0, %v16838_v29  ;;  %v3648_v41 = vcombine.high %v3644_v35, %v3644_v35  ;;  %v3143_v33 = vld [vmem:[#allocation5 + $0x108] sm:$0xff]  ;;  %v3150_v0 = vld [vmem:[#allocation5 + $0x140] sm:$0xff] }
 0x6af   :  { %15233 = vmatpush3.bf16.msra.mxu0 %v15232_v27  ;;  %v3483_v38 = vcombine.high %v17635_v4, %v17635_v4  ;;  %v3680_v13 = vrot.slane %v3599_v44, %v16838_v29  ;;  %v17710_v34 = vsel %vm1001_vm3, %v3507_v62, %v3684_v51  ;;  %v19426_v24 = vpack.c.bf16 %v17593_v36, %v17589_v22 }
 0x6b0   :  { %15234 = vmatprep.subr.bf16.mxu0 %v16553_v11  ;;  %v17718_v10 = vsel %vm1001_vm3, %v17635_v4, %v3672_v54  ;;  %v19427_v15 = vcombine.high %v17627_v57, %v17627_v57  ;;  %v17727_v44 = vsel %vm1001_vm3, %v3521_v32, %v3688_v21  ;;  %v17734_v36 = vsel %vm1001_vm3, %v3529_v25, %v3692_v60  ;;  %v3154_v60 = vld [vmem:[#allocation5 + $0x160] sm:$0xff]  ;;  %v3148_v54 = vld [vmem:[#allocation5 + $0x130] sm:$0xff] }
 0x6b1   :  { %15245 = vmatpush3.bf16.msra.mxu1 %v19426_v24  ;;  %v17731_v22 = vsel %vm1001_vm3, %v3483_v38, %v3680_v13  ;;  %v3696_v4 = vrot.slane %v3647_v16, %v16838_v29  ;;  %v17739_v62 = vsel %vm1001_vm3, %v17666_v8, %v3700_v61  ;;  %v3704_v57 = vrot.slane %v3644_v35, %v16838_v29  ;;  %v3144_v35 = vld [vmem:[#allocation5 + $0x110] sm:$0xff]  ;;  %v3155_v61 = vld [vmem:[#allocation5 + $0x168] sm:$0xff]  ;;  %v3158_v24 = vld [vmem:[#allocation5 + $0x180] sm:$0xff] }
 0x6b2   :  { %v17724_v27 = vsel %vm1001_vm3, %v19427_v15, %v3676_v30  ;;  %15246 = vmatprep.subr.bf16.mxu1 %v16553_v11  ;;  %v3708_v1 = vrot.slane %v3646_v14, %v16838_v29  ;;  %v3532_v32 = vcombine.high %v3528_v45, %v3528_v45  ;;  %v3712_v53 = vrot.slane %v3648_v41, %v16838_v29  ;;  %v3145_v14 = vld [vmem:[#allocation5 + $0x118] sm:$0xff]  ;;  %v3156_v41 = vld [vmem:[#allocation5 + $0x170] sm:$0xff] }
 0x6b3   :  { %v19428_v40 = vpack.c.bf16 %v17597_v59, %v17595_v50  ;;  %v15250_v19 = vpack.c.bf16 %v3143_v33, %v3142_v28  ;;  %v15262_v25 = vpack.c.bf16 %v3151_v49, %v3150_v0  ;;  %v17748_v51 = vsel %vm1001_vm3, %v3531_v6, %v3696_v4  ;;  %v3152_v59 = vld [vmem:[#allocation5 + $0x150] sm:$0xff]  ;;  %v3153_v6 = vld [vmem:[#allocation5 + $0x158] sm:$0xff]  ;;  %v3159_v33 = vld [vmem:[#allocation5 + $0x188] sm:$0xff] }
 0x6b4   :  { %v19429_v8 = vpack.c.bf16 %v17608_v39, %v17606_v2  ;;  %v17755_v16 = vsel %vm1001_vm3, %v3528_v45, %v3704_v57  ;;  %v17758_v21 = vsel %vm1001_vm3, %v3530_v3, %v3708_v1  ;;  %v17761_v50 = vsel %vm1001_vm3, %v3532_v32, %v3712_v53  ;;  %v3146_v45 = vld [vmem:[#allocation5 + $0x120] sm:$0xff]  ;;  %v3147_v3 = vld [vmem:[#allocation5 + $0x128] sm:$0xff]  ;;  %v3149_v30 = vld [vmem:[#allocation5 + $0x138] sm:$0xff] }
 0x6b5   :  { %15236 = vmatpush3.bf16.msra.mxu0 %v19428_v40  ;;  %v15253_v2 = vpack.c.bf16 %v3145_v14, %v3144_v35  ;;  %v15265_v39 = vpack.c.bf16 %v3153_v6, %v3152_v59  ;;  %v3157_v28 = vld [vmem:[#allocation5 + $0x178] sm:$0xff]  ;;  %v15259_v38 = vpack.c.bf16 %v3149_v30, %v3148_v54  ;;  %v3166_v0 = vld [vmem:[#allocation5 + $0x1c0] sm:$0xff]  ;;  %v3167_v49 = vld [vmem:[#allocation5 + $0x1c8] sm:$0xff]  ;;  %v15274_v15 = vpack.c.bf16 %v3159_v33, %v3158_v24 }
 0x6b6   :  { %15248 = vmatpush3.bf16.msra.mxu1 %v19429_v8  ;;  %15249 = vmatprep.subr.bf16.mxu0 %v16553_v11  ;;  %v15271_v13 = vpack.c.bf16 %v3157_v28, %v3156_v41  ;;  %v15286_v4 = vpack.c.bf16 %v3167_v49, %v3166_v0  ;;  %v3160_v57 = vld [vmem:[#allocation5 + $0x190] sm:$0xff]  ;;  %v3161_v1 = vld [vmem:[#allocation5 + $0x198] sm:$0xff]  ;;  %v3163_v8 = vld [vmem:[#allocation5 + $0x1a8] sm:$0xff] }
 0x6b7   :  { %15261 = vmatprep.subr.bf16.mxu1 %v16553_v11  ;;  %v3168_v32 = vld [vmem:[#allocation5 + $0x1d0] sm:$0xff]  ;;  %v3169_v53 = vld [vmem:[#allocation5 + $0x1d8] sm:$0xff]  ;;  %v15277_v40 = vpack.c.bf16 %v3161_v1, %v3160_v57  ;;  %v3170_v35 = vld [vmem:[#allocation5 + $0x1e0] sm:$0xff] }
 0x6b8   :  { %13528 = vmatmul.mubr.msk.f32.vlgmr.msra.gmra.mrb[30].mxu0 %vm501_vm0, %v17662_v43  ;;  %v15256_v43 = vpack.c.bf16 %v3147_v3, %v3146_v45  ;;  %v3171_v14 = vld [vmem:[#allocation5 + $0x1e8] sm:$0xff]  ;;  %v3164_v59 = vld [vmem:[#allocation5 + $0x1b0] sm:$0xff]  ;;  %v3165_v6 = vld [vmem:[#allocation5 + $0x1b8] sm:$0xff] }
 0x6b9   :  { %15251 = vmatpush3.bf16.msra.mxu0 %v15250_v19  ;;  %13547 = vmatmul.mubr.msk.f32.vlgmr.msra.gmra.mrb[38].mxu1 %vm501_vm0, %v3732_v20  ;;  %v15268_v20 = vpack.c.bf16 %v3155_v61, %v3154_v60  ;;  %v15289_v19 = vpack.c.bf16 %v3169_v53, %v3168_v32  ;;  %v15283_v45 = vpack.c.bf16 %v3165_v6, %v3164_v59  ;;  %v3174_v60 = vld [vmem:[#allocation5 + $0x200] sm:$0xff]  ;;  %v3175_v61 = vld [vmem:[#allocation5 + $0x208] sm:$0xff]  ;;  %v3176_v41 = vld [vmem:[#allocation5 + $0x210] sm:$0xff] }
 0x6ba   :  { %15263 = vmatpush3.bf16.msra.mxu1 %v15262_v25  ;;  %15252 = vmatprep.subr.bf16.mxu0 %v16553_v11  ;;  %v3162_v25 = vld [vmem:[#allocation5 + $0x1a0] sm:$0xff]  ;;  %v15298_v54 = vpack.c.bf16 %v3175_v61, %v3174_v60  ;;  %v3177_v28 = vld [vmem:[#allocation5 + $0x218] sm:$0xff]  ;;  %v3179_v49 = vld [vmem:[#allocation5 + $0x228] sm:$0xff] }
 0x6bb   :  { %15264 = vmatprep.subr.bf16.mxu1 %v16553_v11  ;;  %13565 = vmatprep.mubr.msk.f32.mxu0 %vm16555_vm1, %v16556_v46  ;;  %v15301_v24 = vpack.c.bf16 %v3177_v28, %v3176_v41  ;;  %v3178_v0 = vld [vmem:[#allocation5 + $0x220] sm:$0xff]  ;;  %v3180_v57 = vld [vmem:[#allocation5 + $0x230] sm:$0xff]  ;;  %v3181_v1 = vld [vmem:[#allocation5 + $0x238] sm:$0xff] }
 0x6bc   :  { %13584 = vmatprep.mubr.msk.f32.mxu1 %vm16555_vm1, %v16556_v46  ;;  %v3188_v32 = vld [vmem:[#allocation5 + $0x270] sm:$0xff]  ;;  %v3189_v53 = vld [vmem:[#allocation5 + $0x278] sm:$0xff]  ;;  %v3194_v60 = vld [vmem:[#allocation5 + $0x2a0] sm:$0xff] }
 0x6bd   :  { %15254 = vmatpush3.bf16.msra.mxu0 %v15253_v2  ;;  %v3172_v2 = vld [vmem:[#allocation5 + $0x1f0] sm:$0xff]  ;;  %v3193_v6 = vld [vmem:[#allocation5 + $0x298] sm:$0xff]  ;;  %v3195_v61 = vld [vmem:[#allocation5 + $0x2a8] sm:$0xff] }
 0x6be   :  { %15266 = vmatpush3.bf16.msra.mxu1 %v15265_v39  ;;  %15255 = vmatprep.subr.bf16.mxu0 %v16553_v11  ;;  %v3173_v39 = vld [vmem:[#allocation5 + $0x1f8] sm:$0xff]  ;;  %v3192_v59 = vld [vmem:[#allocation5 + $0x290] sm:$0xff] }
 0x6bf   :  { %15267 = vmatprep.subr.bf16.mxu1 %v16553_v11  ;;  %v15295_v3 = vpack.c.bf16 %v3173_v39, %v3172_v2  ;;  %v3200_v2 = vld [vmem:[#allocation5 + $0x2d0] sm:$0xff]  ;;  %v3201_v39 = vld [vmem:[#allocation5 + $0x2d8] sm:$0xff] }
 0x6c0   :  { %v3204_v41 = vld [vmem:[#allocation5 + $0x2f0] sm:$0xff]  ;;  %v3205_v28 = vld [vmem:[#allocation5 + $0x2f8] sm:$0xff] }
 0x6c1   :  { %15257 = vmatpush3.bf16.msra.mxu0 %v15256_v43  ;;  %v3182_v43 = vld [vmem:[#allocation5 + $0x240] sm:$0xff] }
 0x6c2   :  { %15269 = vmatpush3.bf16.msra.mxu1 %v15268_v20  ;;  %15258 = vmatprep.subr.bf16.mxu0 %v16553_v11  ;;  %v3183_v20 = vld [vmem:[#allocation5 + $0x248] sm:$0xff] }
 0x6c3   :  { %15270 = vmatprep.subr.bf16.mxu1 %v16553_v11  ;;  %v15310_v30 = vpack.c.bf16 %v3183_v20, %v3182_v43  ;;  %v3202_v43 = vld [vmem:[#allocation5 + $0x2e0] sm:$0xff]  ;;  %v3203_v20 = vld [vmem:[#allocation5 + $0x2e8] sm:$0xff] }
 0x6c5   :  { %15260 = vmatpush3.bf16.msra.mxu0 %v15259_v38  ;;  %v3184_v38 = vld [vmem:[#allocation5 + $0x250] sm:$0xff] }
 0x6c6   :  { %15272 = vmatpush3.bf16.msra.mxu1 %v15271_v13  ;;  %15273 = vmatprep.subr.bf16.mxu0 %v16553_v11  ;;  %v3185_v13 = vld [vmem:[#allocation5 + $0x258] sm:$0xff] }
 0x6c7   :  { %15285 = vmatprep.subr.bf16.mxu1 %v16553_v11  ;;  %v15313_v33 = vpack.c.bf16 %v3185_v13, %v3184_v38  ;;  %v15343_v13 = vpack.c.bf16 %v3205_v28, %v3204_v41  ;;  %v3226_v41 = vld [vmem:[#allocation5 + $0x3a0] sm:$0xff]  ;;  %v3227_v28 = vld [vmem:[#allocation5 + $0x3a8] sm:$0xff] }
 0x6c8   :  { %13566 = vmatmul.mubr.msk.f32.vlgmr.msra.gmra.mrb[32].mxu0 %vm501_vm0, %v17693_v17  ;;  %v15280_v17 = vpack.c.bf16 %v3163_v8, %v3162_v25  ;;  %v3190_v25 = vld [vmem:[#allocation5 + $0x280] sm:$0xff]  ;;  %v3191_v8 = vld [vmem:[#allocation5 + $0x288] sm:$0xff] }
 0x6c9   :  { %15275 = vmatpush3.bf16.msra.mxu0 %v15274_v15  ;;  %13585 = vmatmul.mubr.msk.f32.vlgmr.msra.gmra.mrb[40].mxu1 %vm501_vm0, %v17718_v10  ;;  %v15292_v10 = vpack.c.bf16 %v3171_v14, %v3170_v35  ;;  %v3186_v15 = vld [vmem:[#allocation5 + $0x260] sm:$0xff]  ;;  %v3199_v14 = vld [vmem:[#allocation5 + $0x2c8] sm:$0xff] }
 0x6ca   :  { %15287 = vmatpush3.bf16.msra.mxu1 %v15286_v4  ;;  %15276 = vmatprep.subr.bf16.mxu0 %v16553_v11  ;;  %v3187_v4 = vld [vmem:[#allocation5 + $0x268] sm:$0xff]  ;;  %v3198_v35 = vld [vmem:[#allocation5 + $0x2c0] sm:$0xff] }
 0x6cb   :  { %15288 = vmatprep.subr.bf16.mxu1 %v16553_v11  ;;  %13603 = vmatprep.mubr.msk.f32.mxu0 %vm16555_vm1, %v16556_v46 }
 0x6cc   :  { %13622 = vmatprep.mubr.msk.f32.mxu1 %vm16555_vm1, %v16556_v46 }
 0x6cd   :  { %15278 = vmatpush3.bf16.msra.mxu0 %v15277_v40  ;;  %v15307_v40 = vpack.c.bf16 %v3181_v1, %v3180_v57  ;;  %v3216_v57 = vld [vmem:[#allocation5 + $0x350] sm:$0xff]  ;;  %v3217_v1 = vld [vmem:[#allocation5 + $0x358] sm:$0xff] }
 0x6ce   :  { %15290 = vmatpush3.bf16.msra.mxu1 %v15289_v19  ;;  %15279 = vmatprep.subr.bf16.mxu0 %v16553_v11  ;;  %v15319_v19 = vpack.c.bf16 %v3189_v53, %v3188_v32  ;;  %v15361_v53 = vpack.c.bf16 %v3217_v1, %v3216_v57 }
 0x6cf   :  { %15291 = vmatprep.subr.bf16.mxu1 %v16553_v11 }
 0x6d1   :  { %15281 = vmatpush3.bf16.msra.mxu0 %v15280_v17  ;;  %v15322_v17 = vpack.c.bf16 %v3191_v8, %v3190_v25  ;;  %v3218_v25 = vld [vmem:[#allocation5 + $0x360] sm:$0xff]  ;;  %v3219_v8 = vld [vmem:[#allocation5 + $0x368] sm:$0xff] }
 0x6d2   :  { %15293 = vmatpush3.bf16.msra.mxu1 %v15292_v10  ;;  %15282 = vmatprep.subr.bf16.mxu0 %v16553_v11  ;;  %v15334_v10 = vpack.c.bf16 %v3199_v14, %v3198_v35  ;;  %v3212_v35 = vld [vmem:[#allocation5 + $0x330] sm:$0xff]  ;;  %v3213_v14 = vld [vmem:[#allocation5 + $0x338] sm:$0xff] }
 0x6d3   :  { %15294 = vmatprep.subr.bf16.mxu1 %v16553_v11 }
 0x6d5   :  { %15284 = vmatpush3.bf16.msra.mxu0 %v15283_v45  ;;  %v15325_v45 = vpack.c.bf16 %v3193_v6, %v3192_v59  ;;  %v15355_v59 = vpack.c.bf16 %v3213_v14, %v3212_v35 }
 0x6d6   :  { %15296 = vmatpush3.bf16.msra.mxu1 %v15295_v3  ;;  %15297 = vmatprep.subr.bf16.mxu0 %v16553_v11  ;;  %v15337_v3 = vpack.c.bf16 %v3201_v39, %v3200_v2  ;;  %v3222_v2 = vld [vmem:[#allocation5 + $0x380] sm:$0xff]  ;;  %v3223_v39 = vld [vmem:[#allocation5 + $0x388] sm:$0xff] }
 0x6d7   :  { %15309 = vmatprep.subr.bf16.mxu1 %v16553_v11 }
 0x6d8   :  { %13604 = vmatmul.mubr.msk.f32.vlgmr.msra.gmra.mrb[34].mxu0 %vm501_vm0, %v17724_v27  ;;  %v15304_v27 = vpack.c.bf16 %v3179_v49, %v3178_v0  ;;  %v3214_v0 = vld [vmem:[#allocation5 + $0x340] sm:$0xff]  ;;  %v3215_v49 = vld [vmem:[#allocation5 + $0x348] sm:$0xff] }
 0x6d9   :  { %15299 = vmatpush3.bf16.msra.mxu0 %v15298_v54  ;;  %13623 = vmatmul.mubr.msk.f32.vlgmr.msra.gmra.mrb[42].mxu1 %vm501_vm0, %v17731_v22  ;;  %v15316_v22 = vpack.c.bf16 %v3187_v4, %v3186_v15  ;;  %v3196_v54 = vld [vmem:[#allocation5 + $0x2b0] sm:$0xff]  ;;  %v15358_v4 = vpack.c.bf16 %v3215_v49, %v3214_v0  ;;  %v3237_v49 = vld [vmem:[#allocation5 + $0x3f8] sm:$0xff] }
 0x6da   :  { %15311 = vmatpush3.bf16.msra.mxu1 %v15310_v30  ;;  %15300 = vmatprep.subr.bf16.mxu0 %v16553_v11  ;;  %v3197_v30 = vld [vmem:[#allocation5 + $0x2b8] sm:$0xff]  ;;  %v3236_v0 = vld [vmem:[#allocation5 + $0x3f0] sm:$0xff] }
 0x6db   :  { %15312 = vmatprep.subr.bf16.mxu1 %v16553_v11  ;;  %13641 = vmatprep.mubr.msk.f32.mxu0 %vm16555_vm1, %v16556_v46  ;;  %v15331_v38 = vpack.c.bf16 %v3197_v30, %v3196_v54 }
 0x6dc   :  { %13660 = vmatprep.mubr.msk.f32.mxu1 %vm16555_vm1, %v16556_v46 }
 0x6dd   :  { %15302 = vmatpush3.bf16.msra.mxu0 %v15301_v24  ;;  %v3206_v24 = vld [vmem:[#allocation5 + $0x300] sm:$0xff] }
 0x6de   :  { %15314 = vmatpush3.bf16.msra.mxu1 %v15313_v33  ;;  %15303 = vmatprep.subr.bf16.mxu0 %v16553_v11  ;;  %v3207_v33 = vld [vmem:[#allocation5 + $0x308] sm:$0xff] }
 0x6df   :  { %15315 = vmatprep.subr.bf16.mxu1 %v16553_v11  ;;  %v15346_v15 = vpack.c.bf16 %v3207_v33, %v3206_v24  ;;  %v3228_v24 = vld [vmem:[#allocation5 + $0x3b0] sm:$0xff]  ;;  %v3229_v33 = vld [vmem:[#allocation5 + $0x3b8] sm:$0xff] }
 0x6e1   :  { %15305 = vmatpush3.bf16.msra.mxu0 %v15304_v27  ;;  %v3208_v27 = vld [vmem:[#allocation5 + $0x310] sm:$0xff] }
 0x6e2   :  { %15317 = vmatpush3.bf16.msra.mxu1 %v15316_v22  ;;  %15306 = vmatprep.subr.bf16.mxu0 %v16553_v11  ;;  %v3209_v22 = vld [vmem:[#allocation5 + $0x318] sm:$0xff] }
 0x6e3   :  { %15318 = vmatprep.subr.bf16.mxu1 %v16553_v11  ;;  %v15349_v32 = vpack.c.bf16 %v3209_v22, %v3208_v27  ;;  %v16396_v27 = vld [vmem:[%s19424_s27] sm:$0xff] }
 0x6e5   :  { %15308 = vmatpush3.bf16.msra.mxu0 %v15307_v40  ;;  %v3210_v40 = vld [vmem:[#allocation5 + $0x320] sm:$0xff] }
 0x6e6   :  { %15320 = vmatpush3.bf16.msra.mxu1 %v15319_v19  ;;  %15321 = vmatprep.subr.bf16.mxu0 %v16553_v11  ;;  %v3211_v19 = vld [vmem:[#allocation5 + $0x328] sm:$0xff] }
 0x6e7   :  { %15333 = vmatprep.subr.bf16.mxu1 %v16553_v11 }
 0x6e8   :  { %13642 = vmatmul.mubr.msk.f32.vlgmr.msra.gmra.mrb[36].mxu0 %vm501_vm0, %v17710_v34  ;;  %v15328_v34 = vpack.c.bf16 %v3195_v61, %v3194_v60  ;;  %v15370_v60 = vpack.c.bf16 %v3223_v39, %v3222_v2 }
 0x6e9   :  { %15323 = vmatpush3.bf16.msra.mxu0 %v15322_v17  ;;  %13661 = vmatmul.mubr.msk.f32.vlgmr.msra.gmra.mrb[44].mxu1 %vm501_vm0, %v17727_v44  ;;  %v15340_v44 = vpack.c.bf16 %v3203_v20, %v3202_v43  ;;  %v3220_v17 = vld [vmem:[#allocation5 + $0x370] sm:$0xff]  ;;  %v3225_v20 = vld [vmem:[#allocation5 + $0x398] sm:$0xff] }
 0x6ea   :  { %15335 = vmatpush3.bf16.msra.mxu1 %v15334_v10  ;;  %15324 = vmatprep.subr.bf16.mxu0 %v16553_v11  ;;  %v3221_v10 = vld [vmem:[#allocation5 + $0x378] sm:$0xff]  ;;  %v3224_v43 = vld [vmem:[#allocation5 + $0x390] sm:$0xff] }
 0x6eb   :  { %15336 = vmatprep.subr.bf16.mxu1 %v16553_v11  ;;  %13679 = vmatprep.mubr.msk.f32.mxu0 %vm16555_vm1, %v16556_v46  ;;  %v15367_v6 = vpack.c.bf16 %v3221_v10, %v3220_v17  ;;  %v15373_v54 = vpack.c.bf16 %v3225_v20, %v3224_v43 }
 0x6ec   :  { %13698 = vmatprep.mubr.msk.f32.mxu1 %vm16555_vm1, %v16556_v46 }
 0x6ed   :  { %15326 = vmatpush3.bf16.msra.mxu0 %v15325_v45  ;;  %v3230_v45 = vld [vmem:[#allocation5 + $0x3c0] sm:$0xff] }
 0x6ee   :  { %15338 = vmatpush3.bf16.msra.mxu1 %v15337_v3  ;;  %15327 = vmatprep.subr.bf16.mxu0 %v16553_v11  ;;  %v3231_v3 = vld [vmem:[#allocation5 + $0x3c8] sm:$0xff] }
 0x6ef   :  { %15339 = vmatprep.subr.bf16.mxu1 %v16553_v11  ;;  %v15382_v61 = vpack.c.bf16 %v3231_v3, %v3230_v45 }
 0x6f1   :  { %15329 = vmatpush3.bf16.msra.mxu0 %v15328_v34  ;;  %v3232_v34 = vld [vmem:[#allocation5 + $0x3d0] sm:$0xff] }
 0x6f2   :  { %15341 = vmatpush3.bf16.msra.mxu1 %v15340_v44  ;;  %15330 = vmatprep.subr.bf16.mxu0 %v16553_v11  ;;  %v3233_v44 = vld [vmem:[#allocation5 + $0x3d8] sm:$0xff] }
 0x6f3   :  { %15342 = vmatprep.subr.bf16.mxu1 %v16553_v11  ;;  %v15385_v30 = vpack.c.bf16 %v3233_v44, %v3232_v34 }
 0x6f5   :  { %15332 = vmatpush3.bf16.msra.mxu0 %v15331_v38  ;;  %v3234_v38 = vld [vmem:[#allocation5 + $0x3e0] sm:$0xff] }
 0x6f6   :  { %15344 = vmatpush3.bf16.msra.mxu1 %v15343_v13  ;;  %15345 = vmatprep.subr.bf16.mxu0 %v16553_v11  ;;  %v3235_v13 = vld [vmem:[#allocation5 + $0x3e8] sm:$0xff] }
 0x6f7   :  { %15357 = vmatprep.subr.bf16.mxu1 %v16553_v11 }
 0x6f8   :  { %13680 = vmatmul.mubr.msk.f32.vlgmr.msra.gmra.mrb[38].mxu0 %vm501_vm0, %v17734_v36  ;;  %v15352_v36 = vpack.c.bf16 %v3211_v19, %v3210_v40 }
 0x6f9   :  { %15347 = vmatpush3.bf16.msra.mxu0 %v15346_v15  ;;  %13699 = vmatmul.mubr.msk.f32.vlgmr.msra.gmra.mrb[46].mxu1 %vm501_vm0, %v17748_v51  ;;  %v15364_v51 = vpack.c.bf16 %v3219_v8, %v3218_v25  ;;  %v15379_v15 = vpack.c.bf16 %v3229_v33, %v3228_v24 }
 0x6fa   :  { %15359 = vmatpush3.bf16.msra.mxu1 %v15358_v4  ;;  %15348 = vmatprep.subr.bf16.mxu0 %v16553_v11  ;;  %v15391_v4 = vpack.c.bf16 %v3237_v49, %v3236_v0 }
 0x6fb   :  { %15360 = vmatprep.subr.bf16.mxu1 %v16553_v11  ;;  %13717 = vmatprep.mubr.msk.f32.mxu0 %vm16555_vm1, %v16556_v46 }
 0x6fc   :  { %13736 = vmatprep.mubr.msk.f32.mxu1 %vm16555_vm1, %v16556_v46 }
 0x6fd   :  { %15350 = vmatpush3.bf16.msra.mxu0 %v15349_v32 }
 0x6fe   :  { %15362 = vmatpush3.bf16.msra.mxu1 %v15361_v53  ;;  %15351 = vmatprep.subr.bf16.mxu0 %v16553_v11 }
 0x6ff   :  { %15363 = vmatprep.subr.bf16.mxu1 %v16553_v11 }
 0x701   :  { %15353 = vmatpush3.bf16.msra.mxu0 %v15352_v36 }
 0x702   :  { %15365 = vmatpush3.bf16.msra.mxu1 %v15364_v51  ;;  %15354 = vmatprep.subr.bf16.mxu0 %v16553_v11 }
 0x703   :  { %15366 = vmatprep.subr.bf16.mxu1 %v16553_v11 }
 0x705   :  { %15356 = vmatpush3.bf16.msra.mxu0 %v15355_v59 }
 0x706   :  { %15368 = vmatpush3.bf16.msra.mxu1 %v15367_v6  ;;  %15369 = vmatprep.subr.bf16.mxu0 %v16553_v11 }
 0x707   :  { %15381 = vmatprep.subr.bf16.mxu1 %v16553_v11 }
 0x708   :  { %13718 = vmatmul.mubr.msk.f32.vlgmr.msra.gmra.mrb[40].mxu0 %vm501_vm0, %v17739_v62  ;;  %v15376_v62 = vpack.c.bf16 %v3227_v28, %v3226_v41 }
 0x709   :  { %15371 = vmatpush3.bf16.msra.mxu0 %v15370_v60  ;;  %13737 = vmatmul.mubr.msk.f32.vlgmr.msra.gmra.mrb[48].mxu1 %vm501_vm0, %v17755_v16  ;;  %v15388_v16 = vpack.c.bf16 %v3235_v13, %v3234_v38 }
 0x70a   :  { %15383 = vmatpush3.bf16.msra.mxu1 %v15382_v61  ;;  %15372 = vmatprep.subr.bf16.mxu0 %v16553_v11 }
 0x70b   :  { %15384 = vmatprep.subr.bf16.mxu1 %v16553_v11  ;;  %13755 = vmatprep.mubr.msk.f32.mxu0 %vm16555_vm1, %v16556_v46 }
 0x70c   :  { %13774 = vmatprep.mubr.msk.f32.mxu1 %vm16555_vm1, %v16556_v46 }
 0x70d   :  { %15374 = vmatpush3.bf16.msra.mxu0 %v15373_v54 }
 0x70e   :  { %15386 = vmatpush3.bf16.msra.mxu1 %v15385_v30  ;;  %15375 = vmatprep.subr.bf16.mxu0 %v16553_v11 }
 0x70f   :  { %15387 = vmatprep.subr.bf16.mxu1 %v16553_v11 }
 0x711   :  { %15377 = vmatpush3.bf16.msra.mxu0 %v15376_v62 }
 0x712   :  { %15389 = vmatpush3.bf16.msra.mxu1 %v15388_v16  ;;  %15378 = vmatprep.subr.bf16.mxu0 %v16553_v11 }
 0x713   :  { %15390 = vmatprep.subr.bf16.mxu1 %v16553_v11 }
 0x715   :  { %15380 = vmatpush3.bf16.msra.mxu0 %v15379_v15 }
 0x716   :  { %15392 = vmatpush3.bf16.msra.mxu1 %v15391_v4 }
 0x718   :  { %13756 = vmatmul.mubr.msk.f32.vlgmr.msra.gmra.mrb[42].mxu0 %vm501_vm0, %v17758_v21 }
 0x719   :  { %13775 = vmatmul.mubr.msk.f32.vlgmr.msra.gmra.mrb[50].mxu1 %vm501_vm0, %v17761_v50  ;;  %13781 = vmatprep.mubr.msk.f32.mxu0 %vm2243_vm11, %v16396_v27 }
 0x71a   :  { %13833 = vmatprep.mubr.msk.f32.mxu1 %vm2243_vm11, %v16396_v27 }
 0x779   :  { %v3814_v22 = vpop.f32.mrb[28].mxu0 }
 0x77a   :  { %v5358_v57 = vrot.slane %v3814_v22, 1  ;;  %v13491_v1 = vpop.f32.mrb[29].mxu0  ;;  %v3887_v32 = vpop.f32.mrb[36].mxu1 }
 0x77b   :  { %v4929_v53 = vrot.slane %v3887_v32, 7  ;;  %v13510_v40 = vpop.f32.mrb[37].mxu1 }
 0x77c   :  { %v5359_v19 = vsel %vm2203_vm4, %v3887_v32, %v5358_v57 }
 0x77d   :  { %v4930_v21 = vsel %vm2203_vm4, %v4929_v53, %v3814_v22 }
 0x78b   :  { %v3960_v25 = vpop.f32.mrb[30].mxu0 }
 0x78c   :  { %v4931_v50 = vrot.slane %v3960_v25, 6  ;;  %v5360_v8 = vrot.slane %v3960_v25, 7  ;;  %v13529_v36 = vpop.f32.mrb[31].mxu0  ;;  %v4033_v51 = vpop.f32.mrb[38].mxu1 }
 0x78d   :  { %v4933_v35 = vrot.slane %v4033_v51, 5  ;;  %v5362_v14 = vrot.slane %v4033_v51, 6  ;;  %v13548_v17 = vpop.f32.mrb[39].mxu1 }
 0x78e   :  { %v4932_v10 = vsel %vm2206_vm5, %v4931_v50, %v4930_v21  ;;  %v5361_v59 = vsel %vm2206_vm5, %v5360_v8, %v5359_v19 }
 0x78f   :  { %v4934_v6 = vsel %vm2209_vm6, %v4933_v35, %v4932_v10  ;;  %v5363_v2 = vsel %vm2209_vm6, %v5362_v14, %v5361_v59 }
 0x79b   :  { %v4106_v39 = vpop.f32.mrb[32].mxu0 }
 0x79c   :  { %v4935_v45 = vrot.slane %v4106_v39, 4  ;;  %v5364_v3 = vrot.slane %v4106_v39, 5  ;;  %v13567_v60 = vpop.f32.mrb[33].mxu0  ;;  %v4179_v61 = vpop.f32.mrb[40].mxu1 }
 0x79d   :  { %v4937_v43 = vrot.slane %v4179_v61, 3  ;;  %v5366_v20 = vrot.slane %v4179_v61, 4  ;;  %v13586_v34 = vpop.f32.mrb[41].mxu1 }
 0x79e   :  { %v4936_v44 = vsel %vm2212_vm7, %v4935_v45, %v4934_v6  ;;  %v5365_v54 = vsel %vm2212_vm7, %v5364_v3, %v5363_v2 }
 0x79f   :  { %v4938_v30 = vsel %vm2215_vm8, %v4937_v43, %v4936_v44  ;;  %v5367_v41 = vsel %vm2215_vm8, %v5366_v20, %v5365_v54 }
 0x7ab   :  { %v4252_v28 = vpop.f32.mrb[34].mxu0 }
 0x7ac   :  { %v4939_v38 = vrot.slane %v4252_v28, 2  ;;  %v5368_v13 = vrot.slane %v4252_v28, 3  ;;  %v13605_v62 = vpop.f32.mrb[35].mxu0  ;;  %v4325_v16 = vpop.f32.mrb[42].mxu1 }
 0x7ad   :  { %v4941_v24 = vrot.slane %v4325_v16, 1  ;;  %v5370_v33 = vrot.slane %v4325_v16, 2  ;;  %v13624_v0 = vpop.f32.mrb[43].mxu1 }
 0x7ae   :  { %v4940_v49 = vsel %vm2218_vm9, %v4939_v38, %v4938_v30  ;;  %v5369_v15 = vsel %vm2218_vm9, %v5368_v13, %v5367_v41 }
 0x7af   :  { %v5371_v4 = vsel %vm2221_vm10, %v5370_v33, %v5369_v15  ;;  %v4942_v27 = vsel %vm2221_vm10, %v4941_v24, %v4940_v49 }
 0x7bb   :  { %v4398_v22 = vpop.f32.mrb[36].mxu0 }
 0x7bc   :  { %v5372_v57 = vrot.slane %v4398_v22, 1  ;;  %v13643_v1 = vpop.f32.mrb[37].mxu0  ;;  %v4471_v32 = vpop.f32.mrb[44].mxu1 }
 0x7bd   :  { %v4943_v53 = vrot.slane %v4471_v32, 7  ;;  %v13662_v40 = vpop.f32.mrb[45].mxu1 }
 0x7be   :  { %v5373_v19 = vsel %vm2203_vm4, %v4471_v32, %v5372_v57 }
 0x7bf   :  { %v4944_v21 = vsel %vm2203_vm4, %v4943_v53, %v4398_v22 }
 0x7cb   :  { %v4544_v25 = vpop.f32.mrb[38].mxu0 }
 0x7cc   :  { %v4945_v50 = vrot.slane %v4544_v25, 6  ;;  %v5374_v8 = vrot.slane %v4544_v25, 7  ;;  %v13681_v36 = vpop.f32.mrb[39].mxu0  ;;  %v4617_v51 = vpop.f32.mrb[46].mxu1 }
 0x7cd   :  { %v4947_v35 = vrot.slane %v4617_v51, 5  ;;  %v5376_v14 = vrot.slane %v4617_v51, 6  ;;  %v13700_v17 = vpop.f32.mrb[47].mxu1 }
 0x7ce   :  { %v4946_v10 = vsel %vm2206_vm5, %v4945_v50, %v4944_v21  ;;  %v5375_v59 = vsel %vm2206_vm5, %v5374_v8, %v5373_v19  ;;  %v16397_v17 = vld [vmem:[%s19424_s27 + $0x8] sm:$0xff] }
 0x7cf   :  { %v4948_v6 = vsel %vm2209_vm6, %v4947_v35, %v4946_v10  ;;  %v5377_v2 = vsel %vm2209_vm6, %v5376_v14, %v5375_v59  ;;  %v3238_v14 = vld [vmem:[%s19384_s11] sm:$0xff]  ;;  %v16398_v10 = vld [vmem:[%s19424_s27 + $0x10] sm:$0xff]  ;;  %v16399_v59 = vld [vmem:[%s19424_s27 + $0x18] sm:$0xff] }
 0x7db   :  { %v4690_v39 = vpop.f32.mrb[40].mxu0 }
 0x7dc   :  { %v4949_v45 = vrot.slane %v4690_v39, 4  ;;  %v5378_v3 = vrot.slane %v4690_v39, 5  ;;  %v13719_v60 = vpop.f32.mrb[41].mxu0  ;;  %v4763_v61 = vpop.f32.mrb[48].mxu1  ;;  %v16402_v39 = vld [vmem:[%s19424_s27 + $0x30] sm:$0xff] }
 0x7dd   :  { %v4951_v43 = vrot.slane %v4763_v61, 3  ;;  %v5380_v20 = vrot.slane %v4763_v61, 4  ;;  %v13738_v34 = vpop.f32.mrb[49].mxu1  ;;  %v3241_v60 = vld [vmem:[%s19384_s11 + $0x18] sm:$0xff]  ;;  %v16404_v61 = vld [vmem:[%s19425_s26] sm:$0xff] }
 0x7de   :  { %v4950_v44 = vsel %vm2212_vm7, %v4949_v45, %v4948_v6  ;;  %v5379_v54 = vsel %vm2212_vm7, %v5378_v3, %v5377_v2  ;;  %v16400_v6 = vld [vmem:[%s19424_s27 + $0x20] sm:$0xff]  ;;  %v16401_v2 = vld [vmem:[%s19424_s27 + $0x28] sm:$0xff]  ;;  %v16403_v45 = vld [vmem:[%s19424_s27 + $0x38] sm:$0xff] }
 0x7df   :  { %v4952_v30 = vsel %vm2215_vm8, %v4951_v43, %v4950_v44  ;;  %v5381_v41 = vsel %vm2215_vm8, %v5380_v20, %v5379_v54  ;;  %v3240_v3 = vld [vmem:[%s19384_s11 + $0x10] sm:$0xff]  ;;  %v16405_v20 = vld [vmem:[%s19425_s26 + $0x8] sm:$0xff]  ;;  %v16407_v44 = vld [vmem:[%s19425_s26 + $0x18] sm:$0xff] }
 0x7e0   :  { %v15405_v43 = vpack.c.bf16 %v3241_v60, %v3240_v3  ;;  %v16406_v34 = vld [vmem:[%s19425_s26 + $0x10] sm:$0xff]  ;;  %v16408_v54 = vld [vmem:[%s19425_s26 + $0x20] sm:$0xff] }
 0x7eb   :  { %v4836_v28 = vpop.f32.mrb[42].mxu0 }
 0x7ec   :  { %v4953_v38 = vrot.slane %v4836_v28, 2  ;;  %v5382_v13 = vrot.slane %v4836_v28, 3  ;;  %v13757_v62 = vpop.f32.mrb[43].mxu0  ;;  %v4909_v16 = vpop.f32.mrb[50].mxu1  ;;  %v16411_v28 = vld [vmem:[%s19425_s26 + $0x38] sm:$0xff] }
 0x7ed   :  { %v4955_v24 = vrot.slane %v4909_v16, 1  ;;  %v5384_v33 = vrot.slane %v4909_v16, 2  ;;  %v13776_v0 = vpop.f32.mrb[51].mxu1 }
 0x7ee   :  { %v4954_v49 = vsel %vm2218_vm9, %v4953_v38, %v4952_v30  ;;  %v5383_v15 = vsel %vm2218_vm9, %v5382_v13, %v5381_v41  ;;  %v16409_v30 = vld [vmem:[%s19425_s26 + $0x28] sm:$0xff]  ;;  %v16410_v41 = vld [vmem:[%s19425_s26 + $0x30] sm:$0xff] }
 0x7ef   :  { %v5385_v22 = vsel %vm2221_vm10, %v5384_v33, %v5383_v15  ;;  %v4956_v57 = vsel %vm2221_vm10, %v4955_v24, %v4954_v49 }
 0x7f0   :  { %v16234_v1 = vpack.i.bf16 %v5385_v22, %v5371_v4  ;;  %v16239_v32 = vpack.i.bf16 %v4956_v57, %v4942_v27  ;;  %v15397_v53 = vpack.c.bf16 %v4956_v57, %v4942_v27  ;;  %v15413_v40 = vpack.c.bf16 %v5385_v22, %v5371_v4  ;;  %v3239_v4 = vld [vmem:[%s19384_s11 + $0x8] sm:$0xff] }
 0x7f1   :  { %v15401_v27 = vpack.c.bf16 %v3239_v4, %v3238_v14 }
 0x7f2   :  { %16235 = vrot.lane.b32.xlu0 %v16234_v1, %s16558_s7  ;;  %16240 = vrot.lane.b32.xlu1 %v16239_v32, %s16558_s7 }
 0x864   :  { %v16236_v19 = vpop.permute.xlu0 %16235  ;;  %v16241_v21 = vpop.permute.xlu1 %16240 }
 0x865   :  { %v16238_v25 = vunpack.i.h.bf16 %v16236_v19  ;;  %v16237_v50 = vunpack.i.l.bf16 %v16236_v19  ;;  %v16243_v8 = vunpack.i.h.bf16 %v16241_v21  ;;  %v16242_v36 = vunpack.i.l.bf16 %v16241_v21 }
 0x867   :  { %v15409_v51 = vpack.c.bf16 %v16238_v25, %v16237_v50  ;;  %v15393_v35 = vpack.c.bf16 %v16243_v8, %v16242_v36 }
 0x869   :  { %15394 = vmatprep.subr.bf16.mxu0 %v15393_v35  ;;  %15410 = vmatprep.subr.bf16.mxu1 %v15409_v51 }
 0x86a   :  { %15396 = vmatpush3.bf16.msra.mxu0 %v15393_v35  ;;  %15412 = vmatpush3.bf16.msra.mxu1 %v15409_v51 }
 0x86b   :  { %15398 = vmatprep.subr.bf16.mxu0 %v15397_v53  ;;  %15414 = vmatprep.subr.bf16.mxu1 %v15413_v40 }
 0x86d   :  { %13782 = vmatmul.mubr.msk.f32.vlgmr.msra.gmra.mrb[44].mxu0 %vm2243_vm11, %v16397_v17  ;;  %13834 = vmatmul.mubr.msk.f32.vlgmr.msra.gmra.mrb[52].mxu1 %vm2243_vm11, %v16397_v17 }
 0x86e   :  { %15400 = vmatpush3.bf16.msra.mxu0 %v15397_v53  ;;  %15416 = vmatpush3.bf16.msra.mxu1 %v15413_v40 }
 0x86f   :  { %13784 = vmatprep.mubr.msk.f32.mxu0 %vm2243_vm11, %v16398_v10  ;;  %13836 = vmatprep.mubr.msk.f32.mxu1 %vm2243_vm11, %v16398_v10 }
 0x870   :  { %15418 = vmatprep.subr.bf16.mxu1 %v15401_v27  ;;  %15402 = vmatprep.subr.bf16.mxu0 %v15401_v27 }
 0x871   :  { %13785 = vmatmul.mubr.msk.f32.gmra.mrb[46].mxu0 %vm2243_vm11, %v16399_v59  ;;  %13837 = vmatmul.mubr.msk.f32.gmra.mrb[54].mxu1 %vm2243_vm11, %v16399_v59 }
 0x872   :  { %13787 = vmatprep.mubr.msk.f32.mxu0 %vm2243_vm11, %v16400_v6  ;;  %13839 = vmatprep.mubr.msk.f32.mxu1 %vm2243_vm11, %v16400_v6 }
 0x875   :  { %13788 = vmatmul.mubr.msk.f32.gmra.mrb[48].mxu0 %vm2243_vm11, %v16401_v2  ;;  %13840 = vmatmul.mubr.msk.f32.gmra.mrb[56].mxu1 %vm2243_vm11, %v16401_v2 }
 0x876   :  { %13790 = vmatprep.mubr.msk.f32.mxu0 %vm2243_vm11, %v16402_v39  ;;  %13842 = vmatprep.mubr.msk.f32.mxu1 %vm2243_vm11, %v16402_v39 }
 0x879   :  { %13791 = vmatmul.mubr.msk.f32.gmra.mrb[50].mxu0 %vm2243_vm11, %v16403_v45  ;;  %13843 = vmatmul.mubr.msk.f32.gmra.mrb[58].mxu1 %vm2243_vm11, %v16403_v45 }
 0x87a   :  { %13797 = vmatprep.mubr.msk.f32.mxu0 %vm2243_vm11, %v16404_v61  ;;  %13849 = vmatprep.mubr.msk.f32.mxu1 %vm2243_vm11, %v16404_v61 }
 0x87d   :  { %13798 = vmatmul.mubr.msk.f32.vlgmr.msra.gmra.mrb[44].mxu0 %vm2243_vm11, %v16405_v20  ;;  %13850 = vmatmul.mubr.msk.f32.vlgmr.msra.gmra.mrb[52].mxu1 %vm2243_vm11, %v16405_v20 }
 0x87e   :  { %15420 = vmatpush3.bf16.msra.mxu1 %v15401_v27  ;;  %13800 = vmatprep.mubr.msk.f32.mxu0 %vm2243_vm11, %v16406_v34 }
 0x87f   :  { %15404 = vmatpush3.bf16.msra.mxu0 %v15401_v27  ;;  %13852 = vmatprep.mubr.msk.f32.mxu1 %vm2243_vm11, %v16406_v34 }
 0x880   :  { %15422 = vmatprep.subr.bf16.mxu1 %v15405_v43  ;;  %15406 = vmatprep.subr.bf16.mxu0 %v15405_v43 }
 0x881   :  { %13801 = vmatmul.mubr.msk.f32.gmra.mrb[46].mxu0 %vm2243_vm11, %v16407_v44  ;;  %13853 = vmatmul.mubr.msk.f32.gmra.mrb[54].mxu1 %vm2243_vm11, %v16407_v44 }
 0x882   :  { %13803 = vmatprep.mubr.msk.f32.mxu0 %vm2243_vm11, %v16408_v54  ;;  %13855 = vmatprep.mubr.msk.f32.mxu1 %vm2243_vm11, %v16408_v54 }
 0x883   :  { %15424 = vmatpush3.bf16.msra.mxu1 %v15405_v43  ;;  %15408 = vmatpush3.bf16.msra.mxu0 %v15405_v43 }
 0x885   :  { %13804 = vmatmul.mubr.msk.f32.gmra.mrb[48].mxu0 %vm2243_vm11, %v16409_v30  ;;  %13856 = vmatmul.mubr.msk.f32.gmra.mrb[56].mxu1 %vm2243_vm11, %v16409_v30 }
 0x886   :  { %13806 = vmatprep.mubr.msk.f32.mxu0 %vm2243_vm11, %v16410_v41  ;;  %13858 = vmatprep.mubr.msk.f32.mxu1 %vm2243_vm11, %v16410_v41 }
 0x889   :  { %13807 = vmatmul.mubr.msk.f32.gmra.mrb[50].mxu0 %vm2243_vm11, %v16411_v28  ;;  %13859 = vmatmul.mubr.msk.f32.gmra.mrb[58].mxu1 %vm2243_vm11, %v16411_v28 }
 0x88a   :  { %13817 = vmatprep.mubr.msk.f32.mxu0 %vm607_vm2, %v17477_v9  ;;  %13869 = vmatprep.mubr.msk.f32.mxu1 %vm607_vm2, %v17480_v23 }
 0x88d   :  { %13818 = vmatmul.mubr.msk.f32.vlgmr.msra.gmra.mrb[44].mxu0 %vm607_vm2, %v17472_v63  ;;  %13870 = vmatmul.mubr.msk.f32.vlgmr.msra.gmra.mrb[52].mxu1 %vm607_vm2, %v17474_v47  ;;  %v16412_v63 = vld [vmem:[%s19414_s2] sm:$0xff] }
 0x88e   :  { %13820 = vmatprep.mubr.msk.f32.mxu0 %vm607_vm2, %v17494_v52  ;;  %13872 = vmatprep.mubr.msk.f32.mxu1 %vm607_vm2, %v17497_v31  ;;  %v11772_v47 = vld [vmem:[%s19385_s12] ss:$0 sm:$0xff] }
 0x891   :  { %13821 = vmatmul.mubr.msk.f32.gmra.mrb[46].mxu0 %vm607_vm2, %v17486_v5  ;;  %13873 = vmatmul.mubr.msk.f32.gmra.mrb[54].mxu1 %vm607_vm2, %v17491_v26 }
 0x892   :  { %13823 = vmatprep.mubr.msk.f32.mxu0 %vm607_vm2, %v17510_v56  ;;  %13875 = vmatprep.mubr.msk.f32.mxu1 %vm607_vm2, %v17512_v55 }
 0x895   :  { %13824 = vmatmul.mubr.msk.f32.gmra.mrb[48].mxu0 %vm607_vm2, %v17500_v12  ;;  %13876 = vmatmul.mubr.msk.f32.gmra.mrb[56].mxu1 %vm607_vm2, %v17505_v7 }
 0x896   :  { %13826 = vmatprep.mubr.msk.f32.mxu0 %vm607_vm2, %v17526_v42  ;;  %13878 = vmatprep.mubr.msk.f32.mxu1 %vm607_vm2, %v17528_v48 }
 0x899   :  { %13827 = vmatmul.mubr.msk.f32.gmra.mrb[50].mxu0 %vm607_vm2, %v17518_v37  ;;  %13879 = vmatmul.mubr.msk.f32.gmra.mrb[58].mxu1 %vm607_vm2, %v17523_v18 }
 0x89a   :  { %13897 = vmatprep.mubr.msk.f32.mxu0 %vm501_vm0, %v16412_v63  ;;  %13919 = vmatprep.mubr.msk.f32.mxu1 %vm501_vm0, %v16412_v63 }
 0x960   :  { %v13819_v9 = vpop.f32.mrb[44].mxu0  ;;  %v13871_v23 = vpop.f32.mrb[52].mxu1 }
 0x961   :  { %v5277_v5 = vadd.f32 %v13819_v9, %v11772_v47  ;;  %v5700_v26 = vadd.f32 %v13871_v23, %v11772_v47  ;;  %v5271_v52 = vpop.f32.mrb[45].mxu0  ;;  %v5694_v31 = vpop.f32.mrb[53].mxu1 }
 0x962   :  { %v5272_v12 = vadd.f32 %v11772_v47, %v5271_v52  ;;  %v5695_v7 = vadd.f32 %v11772_v47, %v5694_v31 }
 0x963   :  { %v5327_v56 = vmul.f32 0.70710677, %v5277_v5  ;;  %v5750_v55 = vmul.f32 0.70710677, %v5700_v26  ;;  %v5319_v4 = vmul.f32 0.5, %v5277_v5  ;;  %v5742_v6 = vmul.f32 0.5, %v5700_v26 }
 0x964   :  { %v5326_v37 = vmul.f32 0.70710677, %v5272_v12  ;;  %v5749_v18 = vmul.f32 0.70710677, %v5695_v7  ;;  %v13822_v42 = vpop.f32.mrb[46].mxu0  ;;  %v13874_v48 = vpop.f32.mrb[54].mxu1 }
 0x965   :  { %16296 = verf.f32 %v5327_v56  ;;  %v18023_v38 = vadd.f32 %v13822_v42, %v11772_v47  ;;  %v18025_v13 = vadd.f32 %v13874_v48, %v11772_v47  ;;  %v5281_v62 = vpop.f32.mrb[47].mxu0  ;;  %v5704_v16 = vpop.f32.mrb[55].mxu1  ;;  %v5318_v34 = vmul.f32 0.5, %v5272_v12 }
 0x966   :  { %16298 = verf.f32 %v5750_v55  ;;  %v18027_v24 = vadd.f32 %v11772_v47, %v5281_v62  ;;  %v18029_v33 = vadd.f32 %v11772_v47, %v5704_v16  ;;  %v5741_v28 = vmul.f32 0.5, %v5695_v7 }
 0x967   :  { %16300 = verf.f32 %v5326_v37  ;;  %v5329_v0 = vmul.f32 0.70710677, %v18023_v38  ;;  %v5752_v22 = vmul.f32 0.70710677, %v18025_v13  ;;  %v5321_v12 = vmul.f32 0.5, %v18023_v38 }
 0x968   :  { %16302 = verf.f32 %v5749_v18  ;;  %v13825_v49 = vpop.f32.mrb[48].mxu0  ;;  %v13877_v15 = vpop.f32.mrb[56].mxu1  ;;  %v5328_v57 = vmul.f32 0.70710677, %v18027_v24  ;;  %v5751_v1 = vmul.f32 0.70710677, %v18029_v33 }
 0x969   :  { %16304 = verf.f32 %v5329_v0  ;;  %v18035_v32 = vadd.f32 %v13825_v49, %v11772_v47  ;;  %v18037_v53 = vadd.f32 %v13877_v15, %v11772_v47  ;;  %v5291_v40 = vpop.f32.mrb[49].mxu0  ;;  %v5714_v19 = vpop.f32.mrb[57].mxu1  ;;  %v5744_v55 = vmul.f32 0.5, %v18025_v13 }
 0x96a   :  { %16306 = verf.f32 %v5752_v22  ;;  %v18039_v21 = vadd.f32 %v11772_v47, %v5291_v40  ;;  %v18041_v25 = vadd.f32 %v11772_v47, %v5714_v19  ;;  %v5320_v62 = vmul.f32 0.5, %v18027_v24 }
 0x96b   :  { %16308 = verf.f32 %v5328_v57  ;;  %v5331_v50 = vmul.f32 0.70710677, %v18035_v32  ;;  %v5754_v51 = vmul.f32 0.70710677, %v18037_v53  ;;  %v5743_v15 = vmul.f32 0.5, %v18029_v33 }
 0x96c   :  { %v13828_v8 = vpop.f32.mrb[50].mxu0  ;;  %v13880_v36 = vpop.f32.mrb[58].mxu1  ;;  %16310 = verf.f32 %v5751_v1  ;;  %v5330_v35 = vmul.f32 0.70710677, %v18039_v21  ;;  %v5753_v27 = vmul.f32 0.70710677, %v18041_v25 }
 0x96d   :  { %v5301_v14 = vpop.f32.mrb[51].mxu0  ;;  %16312 = verf.f32 %v5331_v50  ;;  %v18047_v17 = vadd.f32 %v13828_v8, %v11772_v47  ;;  %v5724_v10 = vpop.f32.mrb[59].mxu1  ;;  %v18049_v2 = vadd.f32 %v13880_v36, %v11772_v47  ;;  %v5323_v1 = vmul.f32 0.5, %v18035_v32 }
 0x96e   :  { %16314 = verf.f32 %v5754_v51  ;;  %v18051_v39 = vadd.f32 %v11772_v47, %v5301_v14  ;;  %v18054_v61 = vadd.f32 %v11772_v47, %v5724_v10  ;;  %v5746_v50 = vmul.f32 0.5, %v18037_v53 }
 0x96f   :  { %v16297_v59 = vpop.eup %16296  ;;  %16316 = verf.f32 %v5330_v35  ;;  %v5333_v60 = vmul.f32 0.70710677, %v18047_v17  ;;  %v5756_v44 = vmul.f32 0.70710677, %v18049_v2  ;;  %v5322_v33 = vmul.f32 0.5, %v18039_v21 }
 0x970   :  { %v16299_v45 = vpop.eup %16298  ;;  %v5343_v3 = vadd.f32 1.0, %v16297_v59  ;;  %16318 = verf.f32 %v5753_v27  ;;  %v5332_v23 = vmul.f32 0.70710677, %v18051_v39  ;;  %v5755_v26 = vmul.f32 0.70710677, %v18054_v61 }
 0x971   :  { %v16301_v43 = vpop.eup %16300  ;;  %v5766_v20 = vadd.f32 1.0, %v16299_v45  ;;  %16320 = verf.f32 %v5333_v60  ;;  %v5745_v27 = vmul.f32 0.5, %v18041_v25  ;;  %v5325_v21 = vmul.f32 0.5, %v18047_v17 }
 0x972   :  { %v16303_v54 = vpop.eup %16302  ;;  %v18057_v30 = vmul.f32 %v5343_v3, %v5319_v4  ;;  %v5342_v41 = vadd.f32 1.0, %v16301_v43  ;;  %16322 = verf.f32 %v5756_v44 }
 0x973   :  { %v18059_v63 = vmul.f32 %v5766_v20, %v5742_v6  ;;  %v5765_v9 = vadd.f32 1.0, %v16303_v54  ;;  %v16305_v47 = vpop.eup %16304  ;;  %16324 = verf.f32 %v5332_v23  ;;  %v5748_v20 = vmul.f32 0.5, %v18049_v2 }
 0x974   :  { %v18062_v5 = vmul.f32 %v5342_v41, %v5318_v34  ;;  %v16307_v52 = vpop.eup %16306  ;;  %v5345_v56 = vadd.f32 1.0, %v16305_v47  ;;  %16326 = verf.f32 %v5755_v26  ;;  %v5324_v54 = vmul.f32 0.5, %v18051_v39 }
 0x975   :  { %v18065_v31 = vmul.f32 %v5765_v9, %v5741_v28  ;;  %v16309_v7 = vpop.eup %16308  ;;  %v5768_v37 = vadd.f32 1.0, %v16307_v52  ;;  %v5747_v9 = vmul.f32 0.5, %v18054_v61  ;;  %v16413_v61 = vld [vmem:[%s19414_s2 + $0x8] sm:$0xff]  ;;  %v16414_v52 = vld [vmem:[%s19414_s2 + $0x10] sm:$0xff] }
 0x976   :  { %v15425_v18 = vpack.c.bf16 %v18057_v30, %v18062_v5  ;;  %v16311_v42 = vpop.eup %16310  ;;  %v18071_v48 = vmul.f32 %v5345_v56, %v5321_v12  ;;  %v5344_v16 = vadd.f32 1.0, %v16309_v7  ;;  %v16415_v12 = vld [vmem:[%s19414_s2 + $0x18] sm:$0xff]  ;;  %v5781_v56 = vld [vmem:[#allocation7] sm:$0xff]  ;;  %v5782_v7 = vld [vmem:[#allocation7 + $0x8] sm:$0xff] }
 0x977   :  { %v15441_v0 = vpack.c.bf16 %v18059_v63, %v18065_v31  ;;  %v16313_v38 = vpop.eup %16312  ;;  %v18076_v49 = vmul.f32 %v5768_v37, %v5744_v55  ;;  %v5767_v13 = vadd.f32 1.0, %v16311_v42  ;;  %v5789_v55 = vld [vmem:[#allocation7 + $0x40] sm:$0xff]  ;;  %v15458_v37 = vpack.c.bf16 %v5782_v7, %v5781_v56  ;;  %v5783_v42 = vld [vmem:[#allocation7 + $0x10] sm:$0xff]  ;;  %v18180_v7 = vld [vmem:[#allocation7 + $0xe8] sm:$0xff] }
 0x978   :  { %15426 = vmatprep.subr.bf16.mxu0 %v15425_v18  ;;  %v16315_v22 = vpop.eup %16314  ;;  %v18079_v57 = vmul.f32 %v5344_v16, %v5320_v62  ;;  %v5347_v40 = vadd.f32 1.0, %v16313_v38  ;;  %v5784_v62 = vld [vmem:[#allocation7 + $0x18] sm:$0xff] }
 0x979   :  { %15442 = vmatprep.subr.bf16.mxu1 %v15441_v0  ;;  %15428 = vmatpush3.bf16.msra.mxu0 %v15425_v18  ;;  %v16317_v24 = vpop.eup %16316  ;;  %v18082_v19 = vmul.f32 %v5767_v13, %v5743_v15  ;;  %v5770_v8 = vadd.f32 1.0, %v16315_v22  ;;  %v5790_v18 = vld [vmem:[#allocation7 + $0x48] sm:$0xff]  ;;  %v5792_v38 = vld [vmem:[#allocation7 + $0x58] sm:$0xff]  ;;  %v15461_v15 = vpack.c.bf16 %v5784_v62, %v5783_v42  ;;  %v5785_v22 = vld [vmem:[#allocation7 + $0x20] sm:$0xff] }
 0x97a   :  { %15444 = vmatpush3.bf16.msra.mxu1 %v15441_v0  ;;  %v16319_v36 = vpop.eup %16318  ;;  %v18085_v51 = vmul.f32 %v5347_v40, %v5323_v1  ;;  %v5346_v35 = vadd.f32 1.0, %v16317_v24  ;;  %v15429_v14 = vpack.c.bf16 %v18071_v48, %v18079_v57  ;;  %v15470_v16 = vpack.c.bf16 %v5790_v18, %v5789_v55  ;;  %v5791_v0 = vld [vmem:[#allocation7 + $0x50] sm:$0xff]  ;;  %v5786_v1 = vld [vmem:[#allocation7 + $0x28] sm:$0xff]  ;;  %v5793_v24 = vld [vmem:[#allocation7 + $0x60] sm:$0xff] }
 0x97b   :  { %v16321_v32 = vpop.eup %16320  ;;  %v18090_v4 = vmul.f32 %v5770_v8, %v5746_v50  ;;  %v5769_v10 = vadd.f32 1.0, %v16319_v36  ;;  %v15445_v53 = vpack.c.bf16 %v18076_v49, %v18082_v19  ;;  %v15473_v13 = vpack.c.bf16 %v5792_v38, %v5791_v0  ;;  %v5794_v50 = vld [vmem:[#allocation7 + $0x68] sm:$0xff]  ;;  %v18182_v55 = vld [vmem:[#allocation7 + $0xb0] sm:$0xff] }
 0x97c   :  { %v16323_v59 = vpop.eup %16322  ;;  %v18095_v6 = vmul.f32 %v5346_v35, %v5322_v33  ;;  %v5349_v45 = vadd.f32 1.0, %v16321_v32  ;;  %15430 = vmatprep.subr.bf16.mxu0 %v15429_v14  ;;  %v15464_v40 = vpack.c.bf16 %v5786_v1, %v5785_v22  ;;  %v15476_v8 = vpack.c.bf16 %v5794_v50, %v5793_v24  ;;  %v5787_v32 = vld [vmem:[#allocation7 + $0x30] sm:$0xff] }
 0x97d   :  { %v18097_v3 = vmul.f32 %v5769_v10, %v5745_v27  ;;  %v5772_v60 = vadd.f32 1.0, %v16323_v59  ;;  %15446 = vmatprep.subr.bf16.mxu1 %v15445_v53  ;;  %15432 = vmatpush3.bf16.msra.mxu0 %v15429_v14  ;;  %v16325_v43 = vpop.eup %16324  ;;  %v5788_v27 = vld [vmem:[#allocation7 + $0x38] sm:$0xff]  ;;  %v5795_v59 = vld [vmem:[#allocation7 + $0x70] sm:$0xff] }
 0x97e   :  { %15448 = vmatpush3.bf16.msra.mxu1 %v15445_v53  ;;  %v15433_v25 = vpack.c.bf16 %v18085_v51, %v18095_v6  ;;  %v16327_v34 = vpop.eup %16326  ;;  %v18103_v44 = vmul.f32 %v5349_v45, %v5325_v21  ;;  %v5348_v41 = vadd.f32 1.0, %v16325_v43  ;;  %v15467_v10 = vpack.c.bf16 %v5788_v27, %v5787_v32  ;;  %v5796_v45 = vld [vmem:[#allocation7 + $0x78] sm:$0xff]  ;;  %v18193_v38 = vld [vmem:[#allocation7 + $0xf0] sm:$0xff] }
 0x97f   :  { %v15449_v28 = vpack.c.bf16 %v18090_v4, %v18097_v3  ;;  %v18108_v17 = vmul.f32 %v5772_v60, %v5748_v20  ;;  %v5771_v23 = vadd.f32 1.0, %v16327_v34  ;;  %v15479_v43 = vpack.c.bf16 %v5796_v45, %v5795_v59  ;;  %v18158_v34 = vld [vmem:[#allocation7 + $0x88] sm:$0xff] }
 0x980   :  { %15434 = vmatprep.subr.bf16.mxu0 %v15433_v25  ;;  %v18111_v2 = vmul.f32 %v5348_v41, %v5324_v54  ;;  %v18160_v54 = vld [vmem:[#allocation7 + $0xc0] sm:$0xff]  ;;  %v18162_v41 = vld [vmem:[#allocation7 + $0xc8] sm:$0xff] }
 0x981   :  { %15450 = vmatprep.subr.bf16.mxu1 %v15449_v28  ;;  %15436 = vmatpush3.bf16.msra.mxu0 %v15433_v25  ;;  %v18113_v47 = vmul.f32 %v5771_v23, %v5747_v9  ;;  %v18156_v25 = vld [vmem:[#allocation7 + $0x80] sm:$0xff]  ;;  %v18166_v9 = vld [vmem:[#allocation7 + $0x98] sm:$0xff]  ;;  %v18168_v23 = vld [vmem:[#allocation7 + $0xd0] sm:$0xff]  ;;  %v15494_v62 = vpack.c.bf16 %v18162_v41, %v18160_v54 }
 0x982   :  { %15452 = vmatpush3.bf16.msra.mxu1 %v15449_v28  ;;  %v15437_v39 = vpack.c.bf16 %v18103_v44, %v18111_v2  ;;  %v18164_v28 = vld [vmem:[#allocation7 + $0x90] sm:$0xff]  ;;  %v15482_v56 = vpack.c.bf16 %v18158_v34, %v18156_v25 }
 0x983   :  { %v15453_v26 = vpack.c.bf16 %v18108_v17, %v18113_v47 }
 0x984   :  { %15438 = vmatprep.subr.bf16.mxu0 %v15437_v39 }
 0x985   :  { %15454 = vmatprep.subr.bf16.mxu1 %v15453_v26  ;;  %15440 = vmatpush3.bf16.msra.mxu0 %v15437_v39  ;;  %v18170_v39 = vld [vmem:[#allocation7 + $0xd8] sm:$0xff] }
 0x986   :  { %15456 = vmatpush3.bf16.msra.mxu1 %v15453_v26  ;;  %15457 = vmatprep.subr.bf16.mxu0 %v16553_v11  ;;  %v18172_v26 = vld [vmem:[#allocation7 + $0xa0] sm:$0xff]  ;;  %v15497_v0 = vpack.c.bf16 %v18170_v39, %v18168_v23 }
 0x987   :  { %15469 = vmatprep.subr.bf16.mxu1 %v16553_v11 }
 0x988   :  { %13898 = vmatmul.mubr.msk.f32.vlgmr.msra.gmra.mrb[52].mxu0 %vm501_vm0, %v16413_v61 }
 0x989   :  { %13920 = vmatmul.mubr.msk.f32.vlgmr.msra.gmra.mrb[60].mxu1 %vm501_vm0, %v16413_v61  ;;  %13900 = vmatprep.mubr.msk.f32.mxu0 %vm501_vm0, %v16414_v52  ;;  %v18174_v61 = vld [vmem:[#allocation7 + $0xa8] sm:$0xff] }
 0x98a   :  { %13922 = vmatprep.mubr.msk.f32.mxu1 %vm501_vm0, %v16414_v52  ;;  %15459 = vmatpush3.bf16.msra.mxu0 %v15458_v37  ;;  %v18176_v52 = vld [vmem:[#allocation7 + $0xe0] sm:$0xff]  ;;  %v18184_v37 = vld [vmem:[#allocation7 + $0xb8] sm:$0xff] }
 0x98b   :  { %15471 = vmatpush3.bf16.msra.mxu1 %v15470_v16  ;;  %15460 = vmatprep.subr.bf16.mxu0 %v16553_v11  ;;  %v15485_v16 = vpack.c.bf16 %v18166_v9, %v18164_v28 }
 0x98c   :  { %13901 = vmatmul.mubr.msk.f32.gmra.mrb[54].mxu0 %vm501_vm0, %v16415_v12  ;;  %15472 = vmatprep.subr.bf16.mxu1 %v16553_v11 }
 0x98d   :  { %13923 = vmatmul.mubr.msk.f32.gmra.mrb[62].mxu1 %vm501_vm0, %v16415_v12  ;;  %13941 = vmatprep.mubr.msk.f32.mxu0 %vm16555_vm1, %v16556_v46 }
 0x98e   :  { %13960 = vmatprep.mubr.msk.f32.mxu1 %vm16555_vm1, %v16556_v46  ;;  %15462 = vmatpush3.bf16.msra.mxu0 %v15461_v15  ;;  %v18195_v15 = vld [vmem:[#allocation7 + $0xf8] sm:$0xff] }
 0x98f   :  { %15474 = vmatpush3.bf16.msra.mxu1 %v15473_v13  ;;  %15463 = vmatprep.subr.bf16.mxu0 %v16553_v11 }
 0x990   :  { %15475 = vmatprep.subr.bf16.mxu1 %v16553_v11 }
 0x992   :  { %15465 = vmatpush3.bf16.msra.mxu0 %v15464_v40  ;;  %v15488_v40 = vpack.c.bf16 %v18174_v61, %v18172_v26 }
 0x993   :  { %15466 = vmatprep.subr.bf16.mxu0 %v16553_v11  ;;  %15477 = vmatpush3.bf16.msra.mxu1 %v15476_v8 }
 0x994   :  { %15478 = vmatprep.subr.bf16.mxu1 %v16553_v11 }
 0x996   :  { %15468 = vmatpush3.bf16.msra.mxu0 %v15467_v10 }
 0x997   :  { %15481 = vmatprep.subr.bf16.mxu0 %v16553_v11  ;;  %15480 = vmatpush3.bf16.msra.mxu1 %v15479_v43 }
 0x998   :  { %15493 = vmatprep.subr.bf16.mxu1 %v16553_v11 }
 0xa5b   :  { %v18145_v36 = vpop.f32.mrb[52].mxu0 }
 0xa5c   :  { %v18147_v33 = vpop.f32.mrb[60].mxu1  ;;  %v5980_v35 = vpop.f32.mrb[53].mxu0 }
 0xa5d   :  { %v6075_v14 = vpop.f32.mrb[61].mxu1 }
 0xa5f   :  { %v13902_v53 = vpop.f32.mrb[54].mxu0 }
 0xa60   :  { %v13924_v21 = vpop.f32.mrb[62].mxu1  ;;  %v5990_v60 = vpop.f32.mrb[55].mxu0 }
 0xa61   :  { %v6085_v20 = vpop.f32.mrb[63].mxu1  ;;  %6001 = vrot.lane.b32.xlu1 %v5990_v60, %s16554_s30 }
 0xa62   :  { %6096 = vrot.lane.b32.xlu0 %v6085_v20, %s16554_s30 }
 0xa65   :  { %6003 = vrot.lane.b32.xlu1 %v13902_v53, %s16554_s30 }
 0xa66   :  { %6098 = vrot.lane.b32.xlu0 %v13924_v21, %s16554_s30 }
 0xad3   :  { %v6002_v12 = vpop.permute.xlu1 %6001 }
 0xad4   :  { %v6007_v18 = vsel %vm607_vm2, %v5980_v35, %v6002_v12  ;;  %v6097_v42 = vpop.permute.xlu0 %6096 }
 0xad5   :  { %v6106_v13 = vcombine.high %v6007_v18, %v6007_v18  ;;  %v6113_v22 = vrot.slane %v6007_v18, %v16973_v58  ;;  %v6102_v1 = vsel %vm607_vm2, %v6075_v14, %v6097_v42 }
 0xad6   :  { %v6222_v24 = vcombine.high %v6102_v1, %v6102_v1  ;;  %v6229_v50 = vrot.slane %v6102_v1, %v16973_v58 }
 0xad7   :  { %v6120_v32 = vrot.slane %v6106_v13, %v16973_v58  ;;  %v6121_v27 = vcombine.high %v6113_v22, %v6113_v22  ;;  %v6129_v10 = vrot.slane %v6113_v22, %v16973_v58  ;;  %v6004_v53 = vpop.permute.xlu1 %6003 }
 0xad8   :  { %v6236_v59 = vrot.slane %v6222_v24, %v16973_v58  ;;  %v6237_v45 = vcombine.high %v6229_v50, %v6229_v50  ;;  %v6245_v21 = vrot.slane %v6229_v50, %v16973_v58  ;;  %v6008_v60 = vsel %vm607_vm2, %v18145_v36, %v6004_v53  ;;  %v6099_v1 = vpop.permute.xlu0 %6098 }
 0xad9   :  { %v6122_v43 = vcombine.high %v6120_v32, %v6120_v32  ;;  %v18215_v20 = vrot.slane %v6120_v32, %v16973_v58  ;;  %v6143_v25 = vrot.slane %v6121_v27, %v16973_v58  ;;  %v6151_v34 = vcombine.high %v6129_v10, %v6129_v10 }
 0xada   :  { %v6238_v54 = vcombine.high %v6236_v59, %v6236_v59  ;;  %v18219_v41 = vrot.slane %v6236_v59, %v16973_v58  ;;  %v6259_v12 = vrot.slane %v6237_v45, %v16973_v58  ;;  %v6267_v18 = vcombine.high %v6245_v21, %v6245_v21 }
 0xadb   :  { %v18223_v42 = vrot.slane %v6122_v43, %v16973_v58  ;;  %v6153_v13 = vcombine.high %v6143_v25, %v6143_v25  ;;  %v6323_v22 = vrot.slane %v6245_v21, %v16838_v29  ;;  %v6155_v45 = vcombine.high %v6008_v60, %v6008_v60 }
 0xadc   :  { %v18229_v24 = vrot.slane %v6238_v54, %v16973_v58  ;;  %v6268_v50 = vcombine.high %v18219_v41, %v18219_v41  ;;  %v6269_v32 = vcombine.high %v6259_v12, %v6259_v12  ;;  %v6327_v27 = vrot.slane %v6259_v12, %v16838_v29 }
 0xadd   :  { %v6331_v53 = vrot.slane %v6267_v18, %v16838_v29  ;;  %v6339_v59 = vrot.slane %v18219_v41, %v16838_v29  ;;  %v6162_v43 = vrot.slane %v6008_v60, %v16973_v58  ;;  %v6103_v54 = vsel %vm607_vm2, %v18147_v33, %v6099_v1 }
 0xade   :  { %v6270_v21 = vcombine.high %v18229_v24, %v18229_v24  ;;  %v6400_v14 = vsel %vm1001_vm3, %v6129_v10, %v6323_v22  ;;  %v6401_v35 = vsel %vm1001_vm3, %v6143_v25, %v6327_v27  ;;  %v6169_v12 = vrot.slane %v6155_v45, %v16973_v58 }
 0xadf   :  { %v6170_v36 = vcombine.high %v6162_v43, %v6162_v43  ;;  %v6178_v18 = vrot.slane %v6162_v43, %v16973_v58  ;;  %v6271_v8 = vcombine.high %v6103_v54, %v6103_v54  ;;  %13942 = vmatmul.mubr.msk.f32.vlgmr.msra.gmra.mrb[56].mxu0 %vm501_vm0, %v6400_v14  ;;  %v6278_v60 = vrot.slane %v6103_v54, %v16973_v58 }
 0xae0   :  { %15483 = vmatpush3.bf16.msra.mxu0 %v15482_v56  ;;  %13961 = vmatmul.mubr.msk.f32.vlgmr.msra.gmra.mrb[64].mxu1 %vm501_vm0, %v6401_v35  ;;  %v18250_v41 = vsel %vm1001_vm3, %v6151_v34, %v6331_v53  ;;  %v6335_v33 = vrot.slane %v6269_v32, %v16838_v29  ;;  %v6171_v10 = vcombine.high %v6169_v12, %v6169_v12 }
 0xae1   :  { %v18254_v25 = vrot.slane %v6169_v12, %v16973_v58  ;;  %v6192_v22 = vrot.slane %v6170_v36, %v16973_v58  ;;  %v6200_v1 = vcombine.high %v6178_v18, %v6178_v18  ;;  %15495 = vmatpush3.bf16.msra.mxu1 %v15494_v62  ;;  %v6285_v14 = vrot.slane %v6271_v8, %v16973_v58 }
 0xae2   :  { %v6286_v27 = vcombine.high %v6278_v60, %v6278_v60  ;;  %v6294_v56 = vrot.slane %v6278_v60, %v16973_v58  ;;  %15484 = vmatprep.subr.bf16.mxu0 %v16553_v11  ;;  %15496 = vmatprep.subr.bf16.mxu1 %v16553_v11  ;;  %v6199_v35 = vrot.slane %v6171_v10, %v16973_v58 }
 0xae3   :  { %v6201_v34 = vcombine.high %v18254_v25, %v18254_v25  ;;  %v6202_v32 = vcombine.high %v6192_v22, %v6192_v22  ;;  %13979 = vmatprep.mubr.msk.f32.mxu0 %vm16555_vm1, %v16556_v46  ;;  %13998 = vmatprep.mubr.msk.f32.mxu1 %vm16555_vm1, %v16556_v46  ;;  %v6287_v62 = vcombine.high %v6285_v14, %v6285_v14 }
 0xae4   :  { %v6301_v8 = vrot.slane %v6285_v14, %v16973_v58  ;;  %v6308_v36 = vrot.slane %v6286_v27, %v16973_v58  ;;  %v6316_v53 = vcombine.high %v6294_v56, %v6294_v56  ;;  %15486 = vmatpush3.bf16.msra.mxu0 %v15485_v16  ;;  %v6355_v45 = vrot.slane %v6294_v56, %v16838_v29  ;;  %v5822_v56 = vld [vmem:[#allocation7 + $0x148] sm:$0xff] }
 0xae5   :  { %15498 = vmatpush3.bf16.msra.mxu1 %v15497_v0  ;;  %15487 = vmatprep.subr.bf16.mxu0 %v16553_v11  ;;  %v6403_v43 = vsel %vm1001_vm3, %v6153_v13, %v6335_v33  ;;  %v18281_v54 = vsel %vm1001_vm3, %v18215_v20, %v6339_v59  ;;  %v6315_v12 = vrot.slane %v6287_v62, %v16973_v58  ;;  %v5813_v13 = vld [vmem:[#allocation7 + $0x100] sm:$0xff] }
 0xae6   :  { %v6317_v60 = vcombine.high %v6301_v8, %v6301_v8  ;;  %v6318_v10 = vcombine.high %v6308_v36, %v6308_v36  ;;  %v6359_v28 = vrot.slane %v6308_v36, %v16838_v29  ;;  %15499 = vmatprep.subr.bf16.mxu1 %v16553_v11  ;;  %v6363_v9 = vrot.slane %v6316_v53, %v16838_v29 }
 0xae7   :  { %v6371_v23 = vrot.slane %v6301_v8, %v16838_v29  ;;  %v6343_v39 = vrot.slane %v18229_v24, %v16838_v29  ;;  %v6347_v16 = vrot.slane %v6268_v50, %v16838_v29  ;;  %v6319_v0 = vcombine.high %v6315_v12, %v6315_v12  ;;  %v5814_v24 = vld [vmem:[#allocation7 + $0x108] sm:$0xff]  ;;  %v5821_v50 = vld [vmem:[#allocation7 + $0x140] sm:$0xff] }
 0xae8   :  { %15489 = vmatpush3.bf16.msra.mxu0 %v15488_v40  ;;  %v6154_v59 = vcombine.high %v18223_v42, %v18223_v42  ;;  %v6351_v33 = vrot.slane %v6270_v21, %v16838_v29  ;;  %v18298_v14 = vsel %vm1001_vm3, %v6178_v18, %v6355_v45  ;;  %v19430_v27 = vpack.c.bf16 %v18180_v7, %v18176_v52 }
 0xae9   :  { %15490 = vmatprep.subr.bf16.mxu0 %v16553_v11  ;;  %v18306_v26 = vsel %vm1001_vm3, %v18223_v42, %v6343_v39  ;;  %v19431_v61 = vcombine.high %v18215_v20, %v18215_v20  ;;  %v18315_v21 = vsel %vm1001_vm3, %v6192_v22, %v6359_v28  ;;  %v18322_v7 = vsel %vm1001_vm3, %v6200_v1, %v6363_v9  ;;  %v5825_v9 = vld [vmem:[#allocation7 + $0x160] sm:$0xff]  ;;  %v5819_v39 = vld [vmem:[#allocation7 + $0x130] sm:$0xff] }
 0xaea   :  { %15501 = vmatpush3.bf16.msra.mxu1 %v19430_v27  ;;  %v18319_v52 = vsel %vm1001_vm3, %v6154_v59, %v6351_v33  ;;  %v6367_v42 = vrot.slane %v6318_v10, %v16838_v29  ;;  %v18327_v18 = vsel %vm1001_vm3, %v18254_v25, %v6371_v23  ;;  %v6375_v20 = vrot.slane %v6315_v12, %v16838_v29  ;;  %v5815_v12 = vld [vmem:[#allocation7 + $0x110] sm:$0xff]  ;;  %v5826_v23 = vld [vmem:[#allocation7 + $0x168] sm:$0xff]  ;;  %v5829_v27 = vld [vmem:[#allocation7 + $0x180] sm:$0xff] }
 0xaeb   :  { %v18312_v40 = vsel %vm1001_vm3, %v19431_v61, %v6347_v16  ;;  %15502 = vmatprep.subr.bf16.mxu1 %v16553_v11  ;;  %v6379_v62 = vrot.slane %v6317_v60, %v16838_v29  ;;  %v6203_v22 = vcombine.high %v6199_v35, %v6199_v35  ;;  %v6383_v8 = vrot.slane %v6319_v0, %v16838_v29  ;;  %v5816_v60 = vld [vmem:[#allocation7 + $0x118] sm:$0xff]  ;;  %v5827_v0 = vld [vmem:[#allocation7 + $0x170] sm:$0xff] }
 0xaec   :  { %v19432_v36 = vpack.c.bf16 %v18184_v37, %v18182_v55  ;;  %v15506_v53 = vpack.c.bf16 %v5814_v24, %v5813_v13  ;;  %v15518_v1 = vpack.c.bf16 %v5822_v56, %v5821_v50  ;;  %v18336_v45 = vsel %vm1001_vm3, %v6202_v32, %v6367_v42  ;;  %v5823_v37 = vld [vmem:[#allocation7 + $0x150] sm:$0xff]  ;;  %v5824_v32 = vld [vmem:[#allocation7 + $0x158] sm:$0xff]  ;;  %v5830_v24 = vld [vmem:[#allocation7 + $0x188] sm:$0xff] }
 0xaed   :  { %v19433_v25 = vpack.c.bf16 %v18195_v15, %v18193_v38  ;;  %v18343_v10 = vsel %vm1001_vm3, %v6199_v35, %v6375_v20  ;;  %v18346_v28 = vsel %vm1001_vm3, %v6201_v34, %v6379_v62  ;;  %v18349_v55 = vsel %vm1001_vm3, %v6203_v22, %v6383_v8  ;;  %v5817_v35 = vld [vmem:[#allocation7 + $0x120] sm:$0xff]  ;;  %v5818_v34 = vld [vmem:[#allocation7 + $0x128] sm:$0xff]  ;;  %v5820_v16 = vld [vmem:[#allocation7 + $0x138] sm:$0xff] }
 0xaee   :  { %15492 = vmatpush3.bf16.msra.mxu0 %v19432_v36  ;;  %v15509_v38 = vpack.c.bf16 %v5816_v60, %v5815_v12  ;;  %v15521_v15 = vpack.c.bf16 %v5824_v32, %v5823_v37  ;;  %v5828_v13 = vld [vmem:[#allocation7 + $0x178] sm:$0xff]  ;;  %v15515_v59 = vpack.c.bf16 %v5820_v16, %v5819_v39  ;;  %v5837_v50 = vld [vmem:[#allocation7 + $0x1c0] sm:$0xff]  ;;  %v5838_v56 = vld [vmem:[#allocation7 + $0x1c8] sm:$0xff]  ;;  %v15530_v61 = vpack.c.bf16 %v5830_v24, %v5829_v27 }
 0xaef   :  { %15504 = vmatpush3.bf16.msra.mxu1 %v19433_v25  ;;  %15505 = vmatprep.subr.bf16.mxu0 %v16553_v11  ;;  %v15527_v33 = vpack.c.bf16 %v5828_v13, %v5827_v0  ;;  %v15542_v42 = vpack.c.bf16 %v5838_v56, %v5837_v50  ;;  %v5831_v20 = vld [vmem:[#allocation7 + $0x190] sm:$0xff]  ;;  %v5832_v62 = vld [vmem:[#allocation7 + $0x198] sm:$0xff]  ;;  %v5834_v25 = vld [vmem:[#allocation7 + $0x1a8] sm:$0xff] }
 0xaf0   :  { %15517 = vmatprep.subr.bf16.mxu1 %v16553_v11  ;;  %v5839_v22 = vld [vmem:[#allocation7 + $0x1d0] sm:$0xff]  ;;  %v5840_v8 = vld [vmem:[#allocation7 + $0x1d8] sm:$0xff]  ;;  %v15533_v36 = vpack.c.bf16 %v5832_v62, %v5831_v20  ;;  %v5841_v12 = vld [vmem:[#allocation7 + $0x1e0] sm:$0xff] }
 0xaf1   :  { %13980 = vmatmul.mubr.msk.f32.vlgmr.msra.gmra.mrb[58].mxu0 %vm501_vm0, %v18250_v41  ;;  %v15512_v41 = vpack.c.bf16 %v5818_v34, %v5817_v35  ;;  %v5842_v60 = vld [vmem:[#allocation7 + $0x1e8] sm:$0xff]  ;;  %v5835_v37 = vld [vmem:[#allocation7 + $0x1b0] sm:$0xff]  ;;  %v5836_v32 = vld [vmem:[#allocation7 + $0x1b8] sm:$0xff] }
 0xaf2   :  { %15507 = vmatpush3.bf16.msra.mxu0 %v15506_v53  ;;  %13999 = vmatmul.mubr.msk.f32.vlgmr.msra.gmra.mrb[66].mxu1 %vm501_vm0, %v6403_v43  ;;  %v15524_v43 = vpack.c.bf16 %v5826_v23, %v5825_v9  ;;  %v15545_v53 = vpack.c.bf16 %v5840_v8, %v5839_v22  ;;  %v15539_v35 = vpack.c.bf16 %v5836_v32, %v5835_v37  ;;  %v5845_v9 = vld [vmem:[#allocation7 + $0x200] sm:$0xff]  ;;  %v5846_v23 = vld [vmem:[#allocation7 + $0x208] sm:$0xff]  ;;  %v5847_v0 = vld [vmem:[#allocation7 + $0x210] sm:$0xff] }
 0xaf3   :  { %15519 = vmatpush3.bf16.msra.mxu1 %v15518_v1  ;;  %15508 = vmatprep.subr.bf16.mxu0 %v16553_v11  ;;  %v5833_v1 = vld [vmem:[#allocation7 + $0x1a0] sm:$0xff]  ;;  %v15554_v39 = vpack.c.bf16 %v5846_v23, %v5845_v9  ;;  %v5848_v13 = vld [vmem:[#allocation7 + $0x218] sm:$0xff]  ;;  %v5850_v56 = vld [vmem:[#allocation7 + $0x228] sm:$0xff] }
 0xaf4   :  { %15520 = vmatprep.subr.bf16.mxu1 %v16553_v11  ;;  %14017 = vmatprep.mubr.msk.f32.mxu0 %vm16555_vm1, %v16556_v46  ;;  %v15557_v27 = vpack.c.bf16 %v5848_v13, %v5847_v0  ;;  %v5849_v50 = vld [vmem:[#allocation7 + $0x220] sm:$0xff]  ;;  %v5851_v20 = vld [vmem:[#allocation7 + $0x230] sm:$0xff]  ;;  %v5852_v62 = vld [vmem:[#allocation7 + $0x238] sm:$0xff] }
 0xaf5   :  { %14036 = vmatprep.mubr.msk.f32.mxu1 %vm16555_vm1, %v16556_v46  ;;  %v5859_v22 = vld [vmem:[#allocation7 + $0x270] sm:$0xff]  ;;  %v5860_v8 = vld [vmem:[#allocation7 + $0x278] sm:$0xff]  ;;  %v5865_v9 = vld [vmem:[#allocation7 + $0x2a0] sm:$0xff] }
 0xaf6   :  { %15510 = vmatpush3.bf16.msra.mxu0 %v15509_v38  ;;  %v5843_v38 = vld [vmem:[#allocation7 + $0x1f0] sm:$0xff]  ;;  %v5864_v32 = vld [vmem:[#allocation7 + $0x298] sm:$0xff]  ;;  %v5866_v23 = vld [vmem:[#allocation7 + $0x2a8] sm:$0xff] }
 0xaf7   :  { %15522 = vmatpush3.bf16.msra.mxu1 %v15521_v15  ;;  %15511 = vmatprep.subr.bf16.mxu0 %v16553_v11  ;;  %v5844_v15 = vld [vmem:[#allocation7 + $0x1f8] sm:$0xff]  ;;  %v5863_v37 = vld [vmem:[#allocation7 + $0x290] sm:$0xff] }
 0xaf8   :  { %15523 = vmatprep.subr.bf16.mxu1 %v16553_v11  ;;  %v15551_v34 = vpack.c.bf16 %v5844_v15, %v5843_v38  ;;  %v5871_v38 = vld [vmem:[#allocation7 + $0x2d0] sm:$0xff]  ;;  %v5872_v15 = vld [vmem:[#allocation7 + $0x2d8] sm:$0xff] }
 0xaf9   :  { %v5875_v0 = vld [vmem:[#allocation7 + $0x2f0] sm:$0xff]  ;;  %v5876_v13 = vld [vmem:[#allocation7 + $0x2f8] sm:$0xff] }
 0xafa   :  { %15513 = vmatpush3.bf16.msra.mxu0 %v15512_v41  ;;  %v5853_v41 = vld [vmem:[#allocation7 + $0x240] sm:$0xff] }
 0xafb   :  { %15525 = vmatpush3.bf16.msra.mxu1 %v15524_v43  ;;  %15514 = vmatprep.subr.bf16.mxu0 %v16553_v11  ;;  %v5854_v43 = vld [vmem:[#allocation7 + $0x248] sm:$0xff] }
 0xafc   :  { %15526 = vmatprep.subr.bf16.mxu1 %v16553_v11  ;;  %v15566_v16 = vpack.c.bf16 %v5854_v43, %v5853_v41  ;;  %v5873_v41 = vld [vmem:[#allocation7 + $0x2e0] sm:$0xff]  ;;  %v5874_v43 = vld [vmem:[#allocation7 + $0x2e8] sm:$0xff] }
 0xafe   :  { %15516 = vmatpush3.bf16.msra.mxu0 %v15515_v59  ;;  %v5855_v59 = vld [vmem:[#allocation7 + $0x250] sm:$0xff] }
 0xaff   :  { %15528 = vmatpush3.bf16.msra.mxu1 %v15527_v33  ;;  %15529 = vmatprep.subr.bf16.mxu0 %v16553_v11  ;;  %v5856_v33 = vld [vmem:[#allocation7 + $0x258] sm:$0xff] }
 0xb00   :  { %15541 = vmatprep.subr.bf16.mxu1 %v16553_v11  ;;  %v15569_v24 = vpack.c.bf16 %v5856_v33, %v5855_v59  ;;  %v15599_v33 = vpack.c.bf16 %v5876_v13, %v5875_v0  ;;  %v5897_v0 = vld [vmem:[#allocation7 + $0x3a0] sm:$0xff]  ;;  %v5898_v13 = vld [vmem:[#allocation7 + $0x3a8] sm:$0xff] }
 0xb01   :  { %14018 = vmatmul.mubr.msk.f32.vlgmr.msra.gmra.mrb[60].mxu0 %vm501_vm0, %v18281_v54  ;;  %v15536_v54 = vpack.c.bf16 %v5834_v25, %v5833_v1  ;;  %v5861_v1 = vld [vmem:[#allocation7 + $0x280] sm:$0xff]  ;;  %v5862_v25 = vld [vmem:[#allocation7 + $0x288] sm:$0xff] }
 0xb02   :  { %15531 = vmatpush3.bf16.msra.mxu0 %v15530_v61  ;;  %14037 = vmatmul.mubr.msk.f32.vlgmr.msra.gmra.mrb[68].mxu1 %vm501_vm0, %v18306_v26  ;;  %v15548_v26 = vpack.c.bf16 %v5842_v60, %v5841_v12  ;;  %v5857_v61 = vld [vmem:[#allocation7 + $0x260] sm:$0xff]  ;;  %v5870_v60 = vld [vmem:[#allocation7 + $0x2c8] sm:$0xff] }
 0xb03   :  { %15543 = vmatpush3.bf16.msra.mxu1 %v15542_v42  ;;  %15532 = vmatprep.subr.bf16.mxu0 %v16553_v11  ;;  %v5858_v42 = vld [vmem:[#allocation7 + $0x268] sm:$0xff]  ;;  %v5869_v12 = vld [vmem:[#allocation7 + $0x2c0] sm:$0xff] }
 0xb04   :  { %15544 = vmatprep.subr.bf16.mxu1 %v16553_v11  ;;  %14055 = vmatprep.mubr.msk.f32.mxu0 %vm16555_vm1, %v16556_v46 }
 0xb05   :  { %14074 = vmatprep.mubr.msk.f32.mxu1 %vm16555_vm1, %v16556_v46 }
 0xb06   :  { %15534 = vmatpush3.bf16.msra.mxu0 %v15533_v36  ;;  %v15563_v36 = vpack.c.bf16 %v5852_v62, %v5851_v20  ;;  %v5887_v20 = vld [vmem:[#allocation7 + $0x350] sm:$0xff]  ;;  %v5888_v62 = vld [vmem:[#allocation7 + $0x358] sm:$0xff] }
 0xb07   :  { %15546 = vmatpush3.bf16.msra.mxu1 %v15545_v53  ;;  %15535 = vmatprep.subr.bf16.mxu0 %v16553_v11  ;;  %v15575_v53 = vpack.c.bf16 %v5860_v8, %v5859_v22  ;;  %v15617_v8 = vpack.c.bf16 %v5888_v62, %v5887_v20 }
 0xb08   :  { %15547 = vmatprep.subr.bf16.mxu1 %v16553_v11 }
 0xb0a   :  { %15537 = vmatpush3.bf16.msra.mxu0 %v15536_v54  ;;  %v15578_v54 = vpack.c.bf16 %v5862_v25, %v5861_v1  ;;  %v5889_v1 = vld [vmem:[#allocation7 + $0x360] sm:$0xff]  ;;  %v5890_v25 = vld [vmem:[#allocation7 + $0x368] sm:$0xff] }
 0xb0b   :  { %15549 = vmatpush3.bf16.msra.mxu1 %v15548_v26  ;;  %15538 = vmatprep.subr.bf16.mxu0 %v16553_v11  ;;  %v15590_v26 = vpack.c.bf16 %v5870_v60, %v5869_v12  ;;  %v5883_v12 = vld [vmem:[#allocation7 + $0x330] sm:$0xff]  ;;  %v5884_v60 = vld [vmem:[#allocation7 + $0x338] sm:$0xff] }
 0xb0c   :  { %15550 = vmatprep.subr.bf16.mxu1 %v16553_v11 }
 0xb0e   :  { %15540 = vmatpush3.bf16.msra.mxu0 %v15539_v35  ;;  %v15581_v35 = vpack.c.bf16 %v5864_v32, %v5863_v37  ;;  %v15611_v37 = vpack.c.bf16 %v5884_v60, %v5883_v12 }
 0xb0f   :  { %15552 = vmatpush3.bf16.msra.mxu1 %v15551_v34  ;;  %15553 = vmatprep.subr.bf16.mxu0 %v16553_v11  ;;  %v15593_v34 = vpack.c.bf16 %v5872_v15, %v5871_v38  ;;  %v5893_v38 = vld [vmem:[#allocation7 + $0x380] sm:$0xff]  ;;  %v5894_v15 = vld [vmem:[#allocation7 + $0x388] sm:$0xff] }
 0xb10   :  { %15565 = vmatprep.subr.bf16.mxu1 %v16553_v11 }
 0xb11   :  { %14056 = vmatmul.mubr.msk.f32.vlgmr.msra.gmra.mrb[62].mxu0 %vm501_vm0, %v18312_v40  ;;  %v15560_v40 = vpack.c.bf16 %v5850_v56, %v5849_v50  ;;  %v5885_v50 = vld [vmem:[#allocation7 + $0x340] sm:$0xff]  ;;  %v5886_v56 = vld [vmem:[#allocation7 + $0x348] sm:$0xff] }
 0xb12   :  { %15555 = vmatpush3.bf16.msra.mxu0 %v15554_v39  ;;  %14075 = vmatmul.mubr.msk.f32.vlgmr.msra.gmra.mrb[70].mxu1 %vm501_vm0, %v18319_v52  ;;  %v15572_v52 = vpack.c.bf16 %v5858_v42, %v5857_v61  ;;  %v5867_v39 = vld [vmem:[#allocation7 + $0x2b0] sm:$0xff]  ;;  %v15614_v42 = vpack.c.bf16 %v5886_v56, %v5885_v50  ;;  %v5908_v56 = vld [vmem:[#allocation7 + $0x3f8] sm:$0xff] }
 0xb13   :  { %15567 = vmatpush3.bf16.msra.mxu1 %v15566_v16  ;;  %15556 = vmatprep.subr.bf16.mxu0 %v16553_v11  ;;  %v5868_v16 = vld [vmem:[#allocation7 + $0x2b8] sm:$0xff]  ;;  %v5907_v50 = vld [vmem:[#allocation7 + $0x3f0] sm:$0xff] }
 0xb14   :  { %15568 = vmatprep.subr.bf16.mxu1 %v16553_v11  ;;  %14093 = vmatprep.mubr.msk.f32.mxu0 %vm16555_vm1, %v16556_v46  ;;  %v15587_v59 = vpack.c.bf16 %v5868_v16, %v5867_v39 }
 0xb15   :  { %14112 = vmatprep.mubr.msk.f32.mxu1 %vm16555_vm1, %v16556_v46 }
 0xb16   :  { %15558 = vmatpush3.bf16.msra.mxu0 %v15557_v27  ;;  %v5877_v27 = vld [vmem:[#allocation7 + $0x300] sm:$0xff] }
 0xb17   :  { %15570 = vmatpush3.bf16.msra.mxu1 %v15569_v24  ;;  %15559 = vmatprep.subr.bf16.mxu0 %v16553_v11  ;;  %v5878_v24 = vld [vmem:[#allocation7 + $0x308] sm:$0xff] }
 0xb18   :  { %15571 = vmatprep.subr.bf16.mxu1 %v16553_v11  ;;  %v15602_v61 = vpack.c.bf16 %v5878_v24, %v5877_v27  ;;  %v5899_v27 = vld [vmem:[#allocation7 + $0x3b0] sm:$0xff]  ;;  %v5900_v24 = vld [vmem:[#allocation7 + $0x3b8] sm:$0xff] }
 0xb1a   :  { %15561 = vmatpush3.bf16.msra.mxu0 %v15560_v40  ;;  %v5879_v40 = vld [vmem:[#allocation7 + $0x310] sm:$0xff] }
 0xb1b   :  { %15573 = vmatpush3.bf16.msra.mxu1 %v15572_v52  ;;  %15562 = vmatprep.subr.bf16.mxu0 %v16553_v11  ;;  %v5880_v52 = vld [vmem:[#allocation7 + $0x318] sm:$0xff] }
 0xb1c   :  { %15574 = vmatprep.subr.bf16.mxu1 %v16553_v11  ;;  %v15605_v22 = vpack.c.bf16 %v5880_v52, %v5879_v40  ;;  %v16416_v40 = vld [vmem:[%s19424_s27] sm:$0xff] }
 0xb1e   :  { %15564 = vmatpush3.bf16.msra.mxu0 %v15563_v36  ;;  %v5881_v36 = vld [vmem:[#allocation7 + $0x320] sm:$0xff] }
 0xb1f   :  { %15576 = vmatpush3.bf16.msra.mxu1 %v15575_v53  ;;  %15577 = vmatprep.subr.bf16.mxu0 %v16553_v11  ;;  %v5882_v53 = vld [vmem:[#allocation7 + $0x328] sm:$0xff] }
 0xb20   :  { %15589 = vmatprep.subr.bf16.mxu1 %v16553_v11 }
 0xb21   :  { %14094 = vmatmul.mubr.msk.f32.vlgmr.msra.gmra.mrb[64].mxu0 %vm501_vm0, %v18298_v14  ;;  %v15584_v14 = vpack.c.bf16 %v5866_v23, %v5865_v9  ;;  %v15626_v9 = vpack.c.bf16 %v5894_v15, %v5893_v38 }
 0xb22   :  { %15579 = vmatpush3.bf16.msra.mxu0 %v15578_v54  ;;  %14113 = vmatmul.mubr.msk.f32.vlgmr.msra.gmra.mrb[72].mxu1 %vm501_vm0, %v18315_v21  ;;  %v15596_v21 = vpack.c.bf16 %v5874_v43, %v5873_v41  ;;  %v5891_v54 = vld [vmem:[#allocation7 + $0x370] sm:$0xff]  ;;  %v5896_v43 = vld [vmem:[#allocation7 + $0x398] sm:$0xff] }
 0xb23   :  { %15591 = vmatpush3.bf16.msra.mxu1 %v15590_v26  ;;  %15580 = vmatprep.subr.bf16.mxu0 %v16553_v11  ;;  %v5892_v26 = vld [vmem:[#allocation7 + $0x378] sm:$0xff]  ;;  %v5895_v41 = vld [vmem:[#allocation7 + $0x390] sm:$0xff] }
 0xb24   :  { %15592 = vmatprep.subr.bf16.mxu1 %v16553_v11  ;;  %14131 = vmatprep.mubr.msk.f32.mxu0 %vm16555_vm1, %v16556_v46  ;;  %v15623_v32 = vpack.c.bf16 %v5892_v26, %v5891_v54  ;;  %v15629_v39 = vpack.c.bf16 %v5896_v43, %v5895_v41 }
 0xb25   :  { %14150 = vmatprep.mubr.msk.f32.mxu1 %vm16555_vm1, %v16556_v46 }
 0xb26   :  { %15582 = vmatpush3.bf16.msra.mxu0 %v15581_v35  ;;  %v5901_v35 = vld [vmem:[#allocation7 + $0x3c0] sm:$0xff] }
 0xb27   :  { %15594 = vmatpush3.bf16.msra.mxu1 %v15593_v34  ;;  %15583 = vmatprep.subr.bf16.mxu0 %v16553_v11  ;;  %v5902_v34 = vld [vmem:[#allocation7 + $0x3c8] sm:$0xff] }
 0xb28   :  { %15595 = vmatprep.subr.bf16.mxu1 %v16553_v11  ;;  %v15638_v23 = vpack.c.bf16 %v5902_v34, %v5901_v35 }
 0xb2a   :  { %15585 = vmatpush3.bf16.msra.mxu0 %v15584_v14  ;;  %v5903_v14 = vld [vmem:[#allocation7 + $0x3d0] sm:$0xff] }
 0xb2b   :  { %15597 = vmatpush3.bf16.msra.mxu1 %v15596_v21  ;;  %15586 = vmatprep.subr.bf16.mxu0 %v16553_v11  ;;  %v5904_v21 = vld [vmem:[#allocation7 + $0x3d8] sm:$0xff] }
 0xb2c   :  { %15598 = vmatprep.subr.bf16.mxu1 %v16553_v11  ;;  %v15641_v16 = vpack.c.bf16 %v5904_v21, %v5903_v14 }
 0xb2e   :  { %15588 = vmatpush3.bf16.msra.mxu0 %v15587_v59  ;;  %v5905_v59 = vld [vmem:[#allocation7 + $0x3e0] sm:$0xff] }
 0xb2f   :  { %15600 = vmatpush3.bf16.msra.mxu1 %v15599_v33  ;;  %15601 = vmatprep.subr.bf16.mxu0 %v16553_v11  ;;  %v5906_v33 = vld [vmem:[#allocation7 + $0x3e8] sm:$0xff] }
 0xb30   :  { %15613 = vmatprep.subr.bf16.mxu1 %v16553_v11 }
 0xb31   :  { %14132 = vmatmul.mubr.msk.f32.vlgmr.msra.gmra.mrb[66].mxu0 %vm501_vm0, %v18322_v7  ;;  %v15608_v7 = vpack.c.bf16 %v5882_v53, %v5881_v36 }
 0xb32   :  { %15603 = vmatpush3.bf16.msra.mxu0 %v15602_v61  ;;  %14151 = vmatmul.mubr.msk.f32.vlgmr.msra.gmra.mrb[74].mxu1 %vm501_vm0, %v18336_v45  ;;  %v15620_v45 = vpack.c.bf16 %v5890_v25, %v5889_v1  ;;  %v15635_v61 = vpack.c.bf16 %v5900_v24, %v5899_v27 }
 0xb33   :  { %15615 = vmatpush3.bf16.msra.mxu1 %v15614_v42  ;;  %15604 = vmatprep.subr.bf16.mxu0 %v16553_v11  ;;  %v15647_v42 = vpack.c.bf16 %v5908_v56, %v5907_v50 }
 0xb34   :  { %15616 = vmatprep.subr.bf16.mxu1 %v16553_v11  ;;  %14169 = vmatprep.mubr.msk.f32.mxu0 %vm16555_vm1, %v16556_v46 }
 0xb35   :  { %14188 = vmatprep.mubr.msk.f32.mxu1 %vm16555_vm1, %v16556_v46 }
 0xb36   :  { %15606 = vmatpush3.bf16.msra.mxu0 %v15605_v22 }
 0xb37   :  { %15618 = vmatpush3.bf16.msra.mxu1 %v15617_v8  ;;  %15607 = vmatprep.subr.bf16.mxu0 %v16553_v11 }
 0xb38   :  { %15619 = vmatprep.subr.bf16.mxu1 %v16553_v11 }
 0xb3a   :  { %15609 = vmatpush3.bf16.msra.mxu0 %v15608_v7 }
 0xb3b   :  { %15621 = vmatpush3.bf16.msra.mxu1 %v15620_v45  ;;  %15610 = vmatprep.subr.bf16.mxu0 %v16553_v11 }
 0xb3c   :  { %15622 = vmatprep.subr.bf16.mxu1 %v16553_v11 }
 0xb3e   :  { %15612 = vmatpush3.bf16.msra.mxu0 %v15611_v37 }
 0xb3f   :  { %15624 = vmatpush3.bf16.msra.mxu1 %v15623_v32  ;;  %15625 = vmatprep.subr.bf16.mxu0 %v16553_v11 }
 0xb40   :  { %15637 = vmatprep.subr.bf16.mxu1 %v16553_v11 }
 0xb41   :  { %14170 = vmatmul.mubr.msk.f32.vlgmr.msra.gmra.mrb[68].mxu0 %vm501_vm0, %v18327_v18  ;;  %v15632_v18 = vpack.c.bf16 %v5898_v13, %v5897_v0 }
 0xb42   :  { %15627 = vmatpush3.bf16.msra.mxu0 %v15626_v9  ;;  %14189 = vmatmul.mubr.msk.f32.vlgmr.msra.gmra.mrb[76].mxu1 %vm501_vm0, %v18343_v10  ;;  %v15644_v10 = vpack.c.bf16 %v5906_v33, %v5905_v59 }
 0xb43   :  { %15639 = vmatpush3.bf16.msra.mxu1 %v15638_v23  ;;  %15628 = vmatprep.subr.bf16.mxu0 %v16553_v11 }
 0xb44   :  { %15640 = vmatprep.subr.bf16.mxu1 %v16553_v11  ;;  %14207 = vmatprep.mubr.msk.f32.mxu0 %vm16555_vm1, %v16556_v46 }
 0xb45   :  { %14226 = vmatprep.mubr.msk.f32.mxu1 %vm16555_vm1, %v16556_v46 }
 0xb46   :  { %15630 = vmatpush3.bf16.msra.mxu0 %v15629_v39 }
 0xb47   :  { %15642 = vmatpush3.bf16.msra.mxu1 %v15641_v16  ;;  %15631 = vmatprep.subr.bf16.mxu0 %v16553_v11 }
 0xb48   :  { %15643 = vmatprep.subr.bf16.mxu1 %v16553_v11 }
 0xb4a   :  { %15633 = vmatpush3.bf16.msra.mxu0 %v15632_v18 }
 0xb4b   :  { %15645 = vmatpush3.bf16.msra.mxu1 %v15644_v10  ;;  %15634 = vmatprep.subr.bf16.mxu0 %v16553_v11 }
 0xb4c   :  { %15646 = vmatprep.subr.bf16.mxu1 %v16553_v11 }
 0xb4e   :  { %15636 = vmatpush3.bf16.msra.mxu0 %v15635_v61 }
 0xb4f   :  { %15648 = vmatpush3.bf16.msra.mxu1 %v15647_v42 }
 0xb51   :  { %14208 = vmatmul.mubr.msk.f32.vlgmr.msra.gmra.mrb[70].mxu0 %vm501_vm0, %v18346_v28 }
 0xb52   :  { %14227 = vmatmul.mubr.msk.f32.vlgmr.msra.gmra.mrb[78].mxu1 %vm501_vm0, %v18349_v55  ;;  %14233 = vmatprep.mubr.msk.f32.mxu0 %vm2243_vm11, %v16416_v40 }
 0xb53   :  { %14285 = vmatprep.mubr.msk.f32.mxu1 %vm2243_vm11, %v16416_v40 }
 0xbb2   :  { %v6485_v52 = vpop.f32.mrb[56].mxu0 }
 0xbb3   :  { %v8029_v20 = vrot.slane %v6485_v52, 1  ;;  %v13943_v62 = vpop.f32.mrb[57].mxu0  ;;  %v6558_v22 = vpop.f32.mrb[64].mxu1 }
 0xbb4   :  { %v7600_v8 = vrot.slane %v6558_v22, 7  ;;  %v13962_v36 = vpop.f32.mrb[65].mxu1 }
 0xbb5   :  { %v8030_v53 = vsel %vm2203_vm4, %v6558_v22, %v8029_v20 }
 0xbb6   :  { %v7601_v28 = vsel %vm2203_vm4, %v7600_v8, %v6485_v52 }
 0xbc4   :  { %v6631_v1 = vpop.f32.mrb[58].mxu0 }
 0xbc5   :  { %v7602_v55 = vrot.slane %v6631_v1, 6  ;;  %v8031_v25 = vrot.slane %v6631_v1, 7  ;;  %v13981_v7 = vpop.f32.mrb[59].mxu0  ;;  %v6704_v45 = vpop.f32.mrb[66].mxu1 }
 0xbc6   :  { %v7604_v12 = vrot.slane %v6704_v45, 5  ;;  %v8033_v60 = vrot.slane %v6704_v45, 6  ;;  %v14000_v54 = vpop.f32.mrb[67].mxu1 }
 0xbc7   :  { %v7603_v26 = vsel %vm2206_vm5, %v7602_v55, %v7601_v28  ;;  %v8032_v37 = vsel %vm2206_vm5, %v8031_v25, %v8030_v53 }
 0xbc8   :  { %v7605_v32 = vsel %vm2209_vm6, %v7604_v12, %v7603_v26  ;;  %v8034_v38 = vsel %vm2209_vm6, %v8033_v60, %v8032_v37 }
 0xbd4   :  { %v6777_v15 = vpop.f32.mrb[60].mxu0 }
 0xbd5   :  { %v7606_v35 = vrot.slane %v6777_v15, 4  ;;  %v8035_v34 = vrot.slane %v6777_v15, 5  ;;  %v14019_v9 = vpop.f32.mrb[61].mxu0  ;;  %v6850_v23 = vpop.f32.mrb[68].mxu1 }
 0xbd6   :  { %v7608_v41 = vrot.slane %v6850_v23, 3  ;;  %v8037_v43 = vrot.slane %v6850_v23, 4  ;;  %v14038_v14 = vpop.f32.mrb[69].mxu1 }
 0xbd7   :  { %v7607_v21 = vsel %vm2212_vm7, %v7606_v35, %v7605_v32  ;;  %v8036_v39 = vsel %vm2212_vm7, %v8035_v34, %v8034_v38 }
 0xbd8   :  { %v7609_v16 = vsel %vm2215_vm8, %v7608_v41, %v7607_v21  ;;  %v8038_v0 = vsel %vm2215_vm8, %v8037_v43, %v8036_v39 }
 0xbe4   :  { %v6923_v13 = vpop.f32.mrb[62].mxu0 }
 0xbe5   :  { %v7610_v59 = vrot.slane %v6923_v13, 2  ;;  %v8039_v33 = vrot.slane %v6923_v13, 3  ;;  %v14057_v18 = vpop.f32.mrb[63].mxu0  ;;  %v6996_v10 = vpop.f32.mrb[70].mxu1 }
 0xbe6   :  { %v7612_v27 = vrot.slane %v6996_v10, 1  ;;  %v8041_v24 = vrot.slane %v6996_v10, 2  ;;  %v14076_v50 = vpop.f32.mrb[71].mxu1 }
 0xbe7   :  { %v7611_v56 = vsel %vm2218_vm9, %v7610_v59, %v7609_v16  ;;  %v8040_v61 = vsel %vm2218_vm9, %v8039_v33, %v8038_v0 }
 0xbe8   :  { %v8042_v42 = vsel %vm2221_vm10, %v8041_v24, %v8040_v61  ;;  %v7613_v40 = vsel %vm2221_vm10, %v7612_v27, %v7611_v56 }
 0xbf4   :  { %v7069_v52 = vpop.f32.mrb[64].mxu0 }
 0xbf5   :  { %v8043_v20 = vrot.slane %v7069_v52, 1  ;;  %v14095_v62 = vpop.f32.mrb[65].mxu0  ;;  %v7142_v22 = vpop.f32.mrb[72].mxu1 }
 0xbf6   :  { %v7614_v8 = vrot.slane %v7142_v22, 7  ;;  %v14114_v36 = vpop.f32.mrb[73].mxu1 }
 0xbf7   :  { %v8044_v53 = vsel %vm2203_vm4, %v7142_v22, %v8043_v20 }
 0xbf8   :  { %v7615_v28 = vsel %vm2203_vm4, %v7614_v8, %v7069_v52 }
 0xc04   :  { %v7215_v1 = vpop.f32.mrb[66].mxu0 }
 0xc05   :  { %v7616_v55 = vrot.slane %v7215_v1, 6  ;;  %v8045_v25 = vrot.slane %v7215_v1, 7  ;;  %v14133_v7 = vpop.f32.mrb[67].mxu0  ;;  %v7288_v45 = vpop.f32.mrb[74].mxu1 }
 0xc06   :  { %v7618_v12 = vrot.slane %v7288_v45, 5  ;;  %v8047_v60 = vrot.slane %v7288_v45, 6  ;;  %v14152_v54 = vpop.f32.mrb[75].mxu1 }
 0xc07   :  { %v7617_v26 = vsel %vm2206_vm5, %v7616_v55, %v7615_v28  ;;  %v8046_v37 = vsel %vm2206_vm5, %v8045_v25, %v8044_v53  ;;  %v16417_v54 = vld [vmem:[%s19424_s27 + $0x8] sm:$0xff] }
 0xc08   :  { %v7619_v32 = vsel %vm2209_vm6, %v7618_v12, %v7617_v26  ;;  %v8048_v38 = vsel %vm2209_vm6, %v8047_v60, %v8046_v37  ;;  %v5909_v60 = vld [vmem:[%s19387_s14] sm:$0xff]  ;;  %v16418_v26 = vld [vmem:[%s19424_s27 + $0x10] sm:$0xff]  ;;  %v16419_v37 = vld [vmem:[%s19424_s27 + $0x18] sm:$0xff] }
 0xc14   :  { %v7361_v15 = vpop.f32.mrb[68].mxu0 }
 0xc15   :  { %v7620_v35 = vrot.slane %v7361_v15, 4  ;;  %v8049_v34 = vrot.slane %v7361_v15, 5  ;;  %v14171_v9 = vpop.f32.mrb[69].mxu0  ;;  %v7434_v23 = vpop.f32.mrb[76].mxu1  ;;  %v16422_v15 = vld [vmem:[%s19424_s27 + $0x30] sm:$0xff] }
 0xc16   :  { %v7622_v41 = vrot.slane %v7434_v23, 3  ;;  %v8051_v43 = vrot.slane %v7434_v23, 4  ;;  %v14190_v14 = vpop.f32.mrb[77].mxu1  ;;  %v5912_v9 = vld [vmem:[%s19387_s14 + $0x18] sm:$0xff]  ;;  %v16424_v23 = vld [vmem:[%s19425_s26] sm:$0xff] }
 0xc17   :  { %v7621_v21 = vsel %vm2212_vm7, %v7620_v35, %v7619_v32  ;;  %v8050_v39 = vsel %vm2212_vm7, %v8049_v34, %v8048_v38  ;;  %v16420_v32 = vld [vmem:[%s19424_s27 + $0x20] sm:$0xff]  ;;  %v16421_v38 = vld [vmem:[%s19424_s27 + $0x28] sm:$0xff]  ;;  %v16423_v35 = vld [vmem:[%s19424_s27 + $0x38] sm:$0xff] }
 0xc18   :  { %v7623_v16 = vsel %vm2215_vm8, %v7622_v41, %v7621_v21  ;;  %v8052_v0 = vsel %vm2215_vm8, %v8051_v43, %v8050_v39  ;;  %v5911_v34 = vld [vmem:[%s19387_s14 + $0x10] sm:$0xff]  ;;  %v16425_v43 = vld [vmem:[%s19425_s26 + $0x8] sm:$0xff]  ;;  %v16427_v21 = vld [vmem:[%s19425_s26 + $0x18] sm:$0xff] }
 0xc19   :  { %v15661_v41 = vpack.c.bf16 %v5912_v9, %v5911_v34  ;;  %v16426_v14 = vld [vmem:[%s19425_s26 + $0x10] sm:$0xff]  ;;  %v16428_v39 = vld [vmem:[%s19425_s26 + $0x20] sm:$0xff] }
 0xc24   :  { %v7507_v13 = vpop.f32.mrb[70].mxu0 }
 0xc25   :  { %v7624_v59 = vrot.slane %v7507_v13, 2  ;;  %v8053_v33 = vrot.slane %v7507_v13, 3  ;;  %v14209_v18 = vpop.f32.mrb[71].mxu0  ;;  %v7580_v10 = vpop.f32.mrb[78].mxu1  ;;  %v16431_v13 = vld [vmem:[%s19425_s26 + $0x38] sm:$0xff] }
 0xc26   :  { %v7626_v27 = vrot.slane %v7580_v10, 1  ;;  %v8055_v24 = vrot.slane %v7580_v10, 2  ;;  %v14228_v50 = vpop.f32.mrb[79].mxu1 }
 0xc27   :  { %v7625_v56 = vsel %vm2218_vm9, %v7624_v59, %v7623_v16  ;;  %v8054_v61 = vsel %vm2218_vm9, %v8053_v33, %v8052_v0  ;;  %v16429_v16 = vld [vmem:[%s19425_s26 + $0x28] sm:$0xff]  ;;  %v16430_v0 = vld [vmem:[%s19425_s26 + $0x30] sm:$0xff] }
 0xc28   :  { %v8056_v52 = vsel %vm2221_vm10, %v8055_v24, %v8054_v61  ;;  %v7627_v20 = vsel %vm2221_vm10, %v7626_v27, %v7625_v56 }
 0xc29   :  { %v16244_v62 = vpack.i.bf16 %v8056_v52, %v8042_v42  ;;  %v16249_v22 = vpack.i.bf16 %v7627_v20, %v7613_v40  ;;  %v15653_v8 = vpack.c.bf16 %v7627_v20, %v7613_v40  ;;  %v15669_v36 = vpack.c.bf16 %v8056_v52, %v8042_v42  ;;  %v5910_v42 = vld [vmem:[%s19387_s14 + $0x8] sm:$0xff] }
 0xc2a   :  { %v15657_v40 = vpack.c.bf16 %v5910_v42, %v5909_v60 }
 0xc2b   :  { %16245 = vrot.lane.b32.xlu0 %v16244_v62, %s16558_s7  ;;  %16250 = vrot.lane.b32.xlu1 %v16249_v22, %s16558_s7 }
 0xc9d   :  { %v16246_v53 = vpop.permute.xlu0 %16245  ;;  %v16251_v28 = vpop.permute.xlu1 %16250 }
 0xc9e   :  { %v16248_v1 = vunpack.i.h.bf16 %v16246_v53  ;;  %v16247_v55 = vunpack.i.l.bf16 %v16246_v53  ;;  %v16253_v25 = vunpack.i.h.bf16 %v16251_v28  ;;  %v16252_v7 = vunpack.i.l.bf16 %v16251_v28 }
 0xca0   :  { %v15665_v45 = vpack.c.bf16 %v16248_v1, %v16247_v55  ;;  %v15649_v12 = vpack.c.bf16 %v16253_v25, %v16252_v7 }
 0xca2   :  { %15650 = vmatprep.subr.bf16.mxu0 %v15649_v12  ;;  %15666 = vmatprep.subr.bf16.mxu1 %v15665_v45 }
 0xca3   :  { %15652 = vmatpush3.bf16.msra.mxu0 %v15649_v12  ;;  %15668 = vmatpush3.bf16.msra.mxu1 %v15665_v45 }
 0xca4   :  { %15654 = vmatprep.subr.bf16.mxu0 %v15653_v8  ;;  %15670 = vmatprep.subr.bf16.mxu1 %v15669_v36 }
 0xca6   :  { %14234 = vmatmul.mubr.msk.f32.vlgmr.msra.gmra.mrb[72].mxu0 %vm2243_vm11, %v16417_v54  ;;  %14286 = vmatmul.mubr.msk.f32.vlgmr.msra.gmra.mrb[80].mxu1 %vm2243_vm11, %v16417_v54 }
 0xca7   :  { %15656 = vmatpush3.bf16.msra.mxu0 %v15653_v8  ;;  %15672 = vmatpush3.bf16.msra.mxu1 %v15669_v36 }
 0xca8   :  { %14236 = vmatprep.mubr.msk.f32.mxu0 %vm2243_vm11, %v16418_v26  ;;  %14288 = vmatprep.mubr.msk.f32.mxu1 %vm2243_vm11, %v16418_v26 }
 0xca9   :  { %15674 = vmatprep.subr.bf16.mxu1 %v15657_v40  ;;  %15658 = vmatprep.subr.bf16.mxu0 %v15657_v40 }
 0xcaa   :  { %14237 = vmatmul.mubr.msk.f32.gmra.mrb[74].mxu0 %vm2243_vm11, %v16419_v37  ;;  %14289 = vmatmul.mubr.msk.f32.gmra.mrb[82].mxu1 %vm2243_vm11, %v16419_v37 }
 0xcab   :  { %14239 = vmatprep.mubr.msk.f32.mxu0 %vm2243_vm11, %v16420_v32  ;;  %14291 = vmatprep.mubr.msk.f32.mxu1 %vm2243_vm11, %v16420_v32 }
 0xcae   :  { %14240 = vmatmul.mubr.msk.f32.gmra.mrb[76].mxu0 %vm2243_vm11, %v16421_v38  ;;  %14292 = vmatmul.mubr.msk.f32.gmra.mrb[84].mxu1 %vm2243_vm11, %v16421_v38 }
 0xcaf   :  { %14242 = vmatprep.mubr.msk.f32.mxu0 %vm2243_vm11, %v16422_v15  ;;  %14294 = vmatprep.mubr.msk.f32.mxu1 %vm2243_vm11, %v16422_v15 }
 0xcb2   :  { %14243 = vmatmul.mubr.msk.f32.gmra.mrb[78].mxu0 %vm2243_vm11, %v16423_v35  ;;  %14295 = vmatmul.mubr.msk.f32.gmra.mrb[86].mxu1 %vm2243_vm11, %v16423_v35 }
 0xcb3   :  { %14249 = vmatprep.mubr.msk.f32.mxu0 %vm2243_vm11, %v16424_v23  ;;  %14301 = vmatprep.mubr.msk.f32.mxu1 %vm2243_vm11, %v16424_v23 }
 0xcb6   :  { %14250 = vmatmul.mubr.msk.f32.vlgmr.msra.gmra.mrb[72].mxu0 %vm2243_vm11, %v16425_v43  ;;  %14302 = vmatmul.mubr.msk.f32.vlgmr.msra.gmra.mrb[80].mxu1 %vm2243_vm11, %v16425_v43 }
 0xcb7   :  { %15676 = vmatpush3.bf16.msra.mxu1 %v15657_v40  ;;  %14252 = vmatprep.mubr.msk.f32.mxu0 %vm2243_vm11, %v16426_v14 }
 0xcb8   :  { %15660 = vmatpush3.bf16.msra.mxu0 %v15657_v40  ;;  %14304 = vmatprep.mubr.msk.f32.mxu1 %vm2243_vm11, %v16426_v14 }
 0xcb9   :  { %15678 = vmatprep.subr.bf16.mxu1 %v15661_v41  ;;  %15662 = vmatprep.subr.bf16.mxu0 %v15661_v41 }
 0xcba   :  { %14253 = vmatmul.mubr.msk.f32.gmra.mrb[74].mxu0 %vm2243_vm11, %v16427_v21  ;;  %14305 = vmatmul.mubr.msk.f32.gmra.mrb[82].mxu1 %vm2243_vm11, %v16427_v21 }
 0xcbb   :  { %14255 = vmatprep.mubr.msk.f32.mxu0 %vm2243_vm11, %v16428_v39  ;;  %14307 = vmatprep.mubr.msk.f32.mxu1 %vm2243_vm11, %v16428_v39 }
 0xcbc   :  { %15680 = vmatpush3.bf16.msra.mxu1 %v15661_v41  ;;  %15664 = vmatpush3.bf16.msra.mxu0 %v15661_v41 }
 0xcbe   :  { %14256 = vmatmul.mubr.msk.f32.gmra.mrb[76].mxu0 %vm2243_vm11, %v16429_v16  ;;  %14308 = vmatmul.mubr.msk.f32.gmra.mrb[84].mxu1 %vm2243_vm11, %v16429_v16 }
 0xcbf   :  { %14258 = vmatprep.mubr.msk.f32.mxu0 %vm2243_vm11, %v16430_v0  ;;  %14310 = vmatprep.mubr.msk.f32.mxu1 %vm2243_vm11, %v16430_v0 }
 0xcc2   :  { %14259 = vmatmul.mubr.msk.f32.gmra.mrb[78].mxu0 %vm2243_vm11, %v16431_v13  ;;  %14311 = vmatmul.mubr.msk.f32.gmra.mrb[86].mxu1 %vm2243_vm11, %v16431_v13 }
 0xcc3   :  { %14269 = vmatprep.mubr.msk.f32.mxu0 %vm607_vm2, %v18062_v5  ;;  %14321 = vmatprep.mubr.msk.f32.mxu1 %vm607_vm2, %v18065_v31 }
 0xcc6   :  { %14270 = vmatmul.mubr.msk.f32.vlgmr.msra.gmra.mrb[72].mxu0 %vm607_vm2, %v18057_v30  ;;  %14322 = vmatmul.mubr.msk.f32.vlgmr.msra.gmra.mrb[80].mxu1 %vm607_vm2, %v18059_v63  ;;  %v16432_v30 = vld [vmem:[%s19414_s2] sm:$0xff] }
 0xcc7   :  { %14272 = vmatprep.mubr.msk.f32.mxu0 %vm607_vm2, %v18079_v57  ;;  %14324 = vmatprep.mubr.msk.f32.mxu1 %vm607_vm2, %v18082_v19  ;;  %v11845_v63 = vld [vmem:[%s19388_s15] ss:$0 sm:$0xff] }
 0xcca   :  { %14273 = vmatmul.mubr.msk.f32.gmra.mrb[74].mxu0 %vm607_vm2, %v18071_v48  ;;  %14325 = vmatmul.mubr.msk.f32.gmra.mrb[82].mxu1 %vm607_vm2, %v18076_v49 }
 0xccb   :  { %14275 = vmatprep.mubr.msk.f32.mxu0 %vm607_vm2, %v18095_v6  ;;  %14327 = vmatprep.mubr.msk.f32.mxu1 %vm607_vm2, %v18097_v3 }
 0xcce   :  { %14276 = vmatmul.mubr.msk.f32.gmra.mrb[76].mxu0 %vm607_vm2, %v18085_v51  ;;  %14328 = vmatmul.mubr.msk.f32.gmra.mrb[84].mxu1 %vm607_vm2, %v18090_v4 }
 0xccf   :  { %14278 = vmatprep.mubr.msk.f32.mxu0 %vm607_vm2, %v18111_v2  ;;  %14330 = vmatprep.mubr.msk.f32.mxu1 %vm607_vm2, %v18113_v47 }
 0xcd2   :  { %14279 = vmatmul.mubr.msk.f32.gmra.mrb[78].mxu0 %vm607_vm2, %v18103_v44  ;;  %14331 = vmatmul.mubr.msk.f32.gmra.mrb[86].mxu1 %vm607_vm2, %v18108_v17 }
 0xcd3   :  { %14349 = vmatprep.mubr.msk.f32.mxu0 %vm501_vm0, %v16432_v30  ;;  %14371 = vmatprep.mubr.msk.f32.mxu1 %vm501_vm0, %v16432_v30 }
 0xd99   :  { %v14271_v5 = vpop.f32.mrb[72].mxu0  ;;  %v14323_v31 = vpop.f32.mrb[80].mxu1 }
 0xd9a   :  { %v7948_v48 = vadd.f32 %v14271_v5, %v11845_v63  ;;  %v8371_v49 = vadd.f32 %v14323_v31, %v11845_v63  ;;  %v7942_v57 = vpop.f32.mrb[73].mxu0  ;;  %v8365_v19 = vpop.f32.mrb[81].mxu1 }
 0xd9b   :  { %v7943_v51 = vadd.f32 %v11845_v63, %v7942_v57  ;;  %v8366_v4 = vadd.f32 %v11845_v63, %v8365_v19 }
 0xd9c   :  { %v7998_v6 = vmul.f32 0.70710677, %v7948_v48  ;;  %v8421_v3 = vmul.f32 0.70710677, %v8371_v49  ;;  %v7990_v42 = vmul.f32 0.5, %v7948_v48  ;;  %v8413_v32 = vmul.f32 0.5, %v8371_v49 }
 0xd9d   :  { %v7997_v44 = vmul.f32 0.70710677, %v7943_v51  ;;  %v8420_v17 = vmul.f32 0.70710677, %v8366_v4  ;;  %v14274_v2 = vpop.f32.mrb[74].mxu0  ;;  %v14326_v47 = vpop.f32.mrb[82].mxu1 }
 0xd9e   :  { %16328 = verf.f32 %v7998_v6  ;;  %v18611_v59 = vadd.f32 %v14274_v2, %v11845_v63  ;;  %v18613_v33 = vadd.f32 %v14326_v47, %v11845_v63  ;;  %v7952_v18 = vpop.f32.mrb[75].mxu0  ;;  %v8375_v10 = vpop.f32.mrb[83].mxu1  ;;  %v7989_v14 = vmul.f32 0.5, %v7943_v51 }
 0xd9f   :  { %16330 = verf.f32 %v8421_v3  ;;  %v18615_v27 = vadd.f32 %v11845_v63, %v7952_v18  ;;  %v18617_v24 = vadd.f32 %v11845_v63, %v8375_v10  ;;  %v8412_v13 = vmul.f32 0.5, %v8366_v4 }
 0xda0   :  { %16332 = verf.f32 %v7997_v44  ;;  %v8000_v50 = vmul.f32 0.70710677, %v18611_v59  ;;  %v8423_v52 = vmul.f32 0.70710677, %v18613_v33  ;;  %v7992_v51 = vmul.f32 0.5, %v18611_v59 }
 0xda1   :  { %16334 = verf.f32 %v8420_v17  ;;  %v14277_v56 = vpop.f32.mrb[76].mxu0  ;;  %v14329_v61 = vpop.f32.mrb[84].mxu1  ;;  %v7999_v20 = vmul.f32 0.70710677, %v18615_v27  ;;  %v8422_v62 = vmul.f32 0.70710677, %v18617_v24 }
 0xda2   :  { %16336 = verf.f32 %v8000_v50  ;;  %v18623_v22 = vadd.f32 %v14277_v56, %v11845_v63  ;;  %v18625_v8 = vadd.f32 %v14329_v61, %v11845_v63  ;;  %v7962_v36 = vpop.f32.mrb[77].mxu0  ;;  %v8385_v53 = vpop.f32.mrb[85].mxu1  ;;  %v8415_v3 = vmul.f32 0.5, %v18613_v33 }
 0xda3   :  { %16338 = verf.f32 %v8423_v52  ;;  %v18627_v28 = vadd.f32 %v11845_v63, %v7962_v36  ;;  %v18629_v1 = vadd.f32 %v11845_v63, %v8385_v53  ;;  %v7991_v18 = vmul.f32 0.5, %v18615_v27 }
 0xda4   :  { %16340 = verf.f32 %v7999_v20  ;;  %v8002_v55 = vmul.f32 0.70710677, %v18623_v22  ;;  %v8425_v45 = vmul.f32 0.70710677, %v18625_v8  ;;  %v8414_v61 = vmul.f32 0.5, %v18617_v24 }
 0xda5   :  { %v14280_v25 = vpop.f32.mrb[78].mxu0  ;;  %v14332_v7 = vpop.f32.mrb[86].mxu1  ;;  %16342 = verf.f32 %v8422_v62  ;;  %v8001_v12 = vmul.f32 0.70710677, %v18627_v28  ;;  %v8424_v40 = vmul.f32 0.70710677, %v18629_v1 }
 0xda6   :  { %v7972_v60 = vpop.f32.mrb[79].mxu0  ;;  %16344 = verf.f32 %v8002_v55  ;;  %v18635_v54 = vadd.f32 %v14280_v25, %v11845_v63  ;;  %v8395_v26 = vpop.f32.mrb[87].mxu1  ;;  %v18637_v38 = vadd.f32 %v14332_v7, %v11845_v63  ;;  %v7994_v62 = vmul.f32 0.5, %v18623_v22 }
 0xda7   :  { %16346 = verf.f32 %v8425_v45  ;;  %v18639_v15 = vadd.f32 %v11845_v63, %v7972_v60  ;;  %v18642_v23 = vadd.f32 %v11845_v63, %v8395_v26  ;;  %v8417_v55 = vmul.f32 0.5, %v18625_v8 }
 0xda8   :  { %v16329_v37 = vpop.eup %16328  ;;  %16348 = verf.f32 %v8001_v12  ;;  %v8004_v9 = vmul.f32 0.70710677, %v18635_v54  ;;  %v8427_v21 = vmul.f32 0.70710677, %v18637_v38  ;;  %v7993_v24 = vmul.f32 0.5, %v18627_v28 }
 0xda9   :  { %v16331_v35 = vpop.eup %16330  ;;  %v8014_v34 = vadd.f32 1.0, %v16329_v37  ;;  %16350 = verf.f32 %v8424_v40  ;;  %v8003_v31 = vmul.f32 0.70710677, %v18639_v15  ;;  %v8426_v49 = vmul.f32 0.70710677, %v18642_v23 }
 0xdaa   :  { %v16333_v41 = vpop.eup %16332  ;;  %v8437_v43 = vadd.f32 1.0, %v16331_v35  ;;  %16352 = verf.f32 %v8004_v9  ;;  %v8416_v40 = vmul.f32 0.5, %v18629_v1  ;;  %v7996_v28 = vmul.f32 0.5, %v18635_v54 }
 0xdab   :  { %v16335_v39 = vpop.eup %16334  ;;  %v18645_v16 = vmul.f32 %v8014_v34, %v7990_v42  ;;  %v8013_v0 = vadd.f32 1.0, %v16333_v41  ;;  %16354 = verf.f32 %v8427_v21 }
 0xdac   :  { %v18647_v30 = vmul.f32 %v8437_v43, %v8413_v32  ;;  %v8436_v5 = vadd.f32 1.0, %v16335_v39  ;;  %v16337_v63 = vpop.eup %16336  ;;  %16356 = verf.f32 %v8003_v31  ;;  %v8419_v43 = vmul.f32 0.5, %v18637_v38 }
 0xdad   :  { %v18650_v48 = vmul.f32 %v8013_v0, %v7989_v14  ;;  %v16339_v57 = vpop.eup %16338  ;;  %v8016_v6 = vadd.f32 1.0, %v16337_v63  ;;  %16358 = verf.f32 %v8426_v49  ;;  %v7995_v39 = vmul.f32 0.5, %v18639_v15 }
 0xdae   :  { %v18653_v19 = vmul.f32 %v8436_v5, %v8412_v13  ;;  %v16341_v4 = vpop.eup %16340  ;;  %v8439_v44 = vadd.f32 1.0, %v16339_v57  ;;  %v8418_v5 = vmul.f32 0.5, %v18642_v23  ;;  %v16433_v23 = vld [vmem:[%s19414_s2 + $0x8] sm:$0xff]  ;;  %v16434_v57 = vld [vmem:[%s19414_s2 + $0x10] sm:$0xff] }
 0xdaf   :  { %v15681_v17 = vpack.c.bf16 %v18645_v16, %v18650_v48  ;;  %v16343_v2 = vpop.eup %16342  ;;  %v18659_v47 = vmul.f32 %v8016_v6, %v7992_v51  ;;  %v8015_v10 = vadd.f32 1.0, %v16341_v4  ;;  %v16435_v51 = vld [vmem:[%s19414_s2 + $0x18] sm:$0xff]  ;;  %v8452_v6 = vld [vmem:[#allocation8] sm:$0xff]  ;;  %v8453_v4 = vld [vmem:[#allocation8 + $0x8] sm:$0xff] }
 0xdb0   :  { %v15697_v50 = vpack.c.bf16 %v18647_v30, %v18653_v19  ;;  %v16345_v59 = vpop.eup %16344  ;;  %v18664_v56 = vmul.f32 %v8439_v44, %v8415_v3  ;;  %v8438_v33 = vadd.f32 1.0, %v16343_v2  ;;  %v8460_v3 = vld [vmem:[#allocation8 + $0x40] sm:$0xff]  ;;  %v15714_v44 = vpack.c.bf16 %v8453_v4, %v8452_v6  ;;  %v8454_v2 = vld [vmem:[#allocation8 + $0x10] sm:$0xff]  ;;  %v18768_v4 = vld [vmem:[#allocation8 + $0xe8] sm:$0xff] }
 0xdb1   :  { %15682 = vmatprep.subr.bf16.mxu0 %v15681_v17  ;;  %v16347_v52 = vpop.eup %16346  ;;  %v18667_v20 = vmul.f32 %v8015_v10, %v7991_v18  ;;  %v8018_v36 = vadd.f32 1.0, %v16345_v59  ;;  %v8455_v18 = vld [vmem:[#allocation8 + $0x18] sm:$0xff] }
 0xdb2   :  { %15698 = vmatprep.subr.bf16.mxu1 %v15697_v50  ;;  %15684 = vmatpush3.bf16.msra.mxu0 %v15681_v17  ;;  %v16349_v27 = vpop.eup %16348  ;;  %v18670_v53 = vmul.f32 %v8438_v33, %v8414_v61  ;;  %v8441_v25 = vadd.f32 1.0, %v16347_v52  ;;  %v8461_v17 = vld [vmem:[#allocation8 + $0x48] sm:$0xff]  ;;  %v8463_v59 = vld [vmem:[#allocation8 + $0x58] sm:$0xff]  ;;  %v15717_v61 = vpack.c.bf16 %v8455_v18, %v8454_v2  ;;  %v8456_v52 = vld [vmem:[#allocation8 + $0x20] sm:$0xff] }
 0xdb3   :  { %15700 = vmatpush3.bf16.msra.mxu1 %v15697_v50  ;;  %v16351_v7 = vpop.eup %16350  ;;  %v18673_v45 = vmul.f32 %v8018_v36, %v7994_v62  ;;  %v8017_v12 = vadd.f32 1.0, %v16349_v27  ;;  %v15685_v60 = vpack.c.bf16 %v18659_v47, %v18667_v20  ;;  %v15726_v10 = vpack.c.bf16 %v8461_v17, %v8460_v3  ;;  %v8462_v50 = vld [vmem:[#allocation8 + $0x50] sm:$0xff]  ;;  %v8457_v62 = vld [vmem:[#allocation8 + $0x28] sm:$0xff]  ;;  %v8464_v27 = vld [vmem:[#allocation8 + $0x60] sm:$0xff] }
 0xdb4   :  { %v16353_v22 = vpop.eup %16352  ;;  %v18678_v42 = vmul.f32 %v8441_v25, %v8417_v55  ;;  %v8440_v26 = vadd.f32 1.0, %v16351_v7  ;;  %v15701_v8 = vpack.c.bf16 %v18664_v56, %v18670_v53  ;;  %v15729_v33 = vpack.c.bf16 %v8463_v59, %v8462_v50  ;;  %v8465_v55 = vld [vmem:[#allocation8 + $0x68] sm:$0xff]  ;;  %v18770_v3 = vld [vmem:[#allocation8 + $0xb0] sm:$0xff] }
 0xdb5   :  { %v16355_v37 = vpop.eup %16354  ;;  %v18683_v32 = vmul.f32 %v8017_v12, %v7993_v24  ;;  %v8020_v35 = vadd.f32 1.0, %v16353_v22  ;;  %15686 = vmatprep.subr.bf16.mxu0 %v15685_v60  ;;  %v15720_v36 = vpack.c.bf16 %v8457_v62, %v8456_v52  ;;  %v15732_v25 = vpack.c.bf16 %v8465_v55, %v8464_v27  ;;  %v8458_v22 = vld [vmem:[#allocation8 + $0x30] sm:$0xff] }
 0xdb6   :  { %v18685_v34 = vmul.f32 %v8440_v26, %v8416_v40  ;;  %v8443_v9 = vadd.f32 1.0, %v16355_v37  ;;  %15702 = vmatprep.subr.bf16.mxu1 %v15701_v8  ;;  %15688 = vmatpush3.bf16.msra.mxu0 %v15685_v60  ;;  %v16357_v41 = vpop.eup %16356  ;;  %v8459_v40 = vld [vmem:[#allocation8 + $0x38] sm:$0xff]  ;;  %v8466_v37 = vld [vmem:[#allocation8 + $0x70] sm:$0xff] }
 0xdb7   :  { %15704 = vmatpush3.bf16.msra.mxu1 %v15701_v8  ;;  %v15689_v1 = vpack.c.bf16 %v18673_v45, %v18683_v32  ;;  %v16359_v14 = vpop.eup %16358  ;;  %v18691_v21 = vmul.f32 %v8020_v35, %v7996_v28  ;;  %v8019_v0 = vadd.f32 1.0, %v16357_v41  ;;  %v15723_v26 = vpack.c.bf16 %v8459_v40, %v8458_v22  ;;  %v8467_v35 = vld [vmem:[#allocation8 + $0x78] sm:$0xff]  ;;  %v18781_v59 = vld [vmem:[#allocation8 + $0xf0] sm:$0xff] }
 0xdb8   :  { %v15705_v13 = vpack.c.bf16 %v18678_v42, %v18685_v34  ;;  %v18696_v54 = vmul.f32 %v8443_v9, %v8419_v43  ;;  %v8442_v31 = vadd.f32 1.0, %v16359_v14  ;;  %v15735_v41 = vpack.c.bf16 %v8467_v35, %v8466_v37  ;;  %v18746_v14 = vld [vmem:[#allocation8 + $0x88] sm:$0xff] }
 0xdb9   :  { %15690 = vmatprep.subr.bf16.mxu0 %v15689_v1  ;;  %v18699_v38 = vmul.f32 %v8019_v0, %v7995_v39  ;;  %v18748_v39 = vld [vmem:[#allocation8 + $0xc0] sm:$0xff]  ;;  %v18750_v0 = vld [vmem:[#allocation8 + $0xc8] sm:$0xff] }
 0xdba   :  { %15706 = vmatprep.subr.bf16.mxu1 %v15705_v13  ;;  %15692 = vmatpush3.bf16.msra.mxu0 %v15689_v1  ;;  %v18701_v63 = vmul.f32 %v8442_v31, %v8418_v5  ;;  %v18744_v1 = vld [vmem:[#allocation8 + $0x80] sm:$0xff]  ;;  %v18754_v5 = vld [vmem:[#allocation8 + $0x98] sm:$0xff]  ;;  %v18756_v31 = vld [vmem:[#allocation8 + $0xd0] sm:$0xff]  ;;  %v15750_v18 = vpack.c.bf16 %v18750_v0, %v18748_v39 }
 0xdbb   :  { %15708 = vmatpush3.bf16.msra.mxu1 %v15705_v13  ;;  %v15693_v15 = vpack.c.bf16 %v18691_v21, %v18699_v38  ;;  %v18752_v13 = vld [vmem:[#allocation8 + $0x90] sm:$0xff]  ;;  %v15738_v6 = vpack.c.bf16 %v18746_v14, %v18744_v1 }
 0xdbc   :  { %v15709_v49 = vpack.c.bf16 %v18696_v54, %v18701_v63 }
 0xdbd   :  { %15694 = vmatprep.subr.bf16.mxu0 %v15693_v15 }
 0xdbe   :  { %15710 = vmatprep.subr.bf16.mxu1 %v15709_v49  ;;  %15696 = vmatpush3.bf16.msra.mxu0 %v15693_v15  ;;  %v18758_v15 = vld [vmem:[#allocation8 + $0xd8] sm:$0xff] }
 0xdbf   :  { %15712 = vmatpush3.bf16.msra.mxu1 %v15709_v49  ;;  %15713 = vmatprep.subr.bf16.mxu0 %v16553_v11  ;;  %v18760_v49 = vld [vmem:[#allocation8 + $0xa0] sm:$0xff]  ;;  %v15753_v50 = vpack.c.bf16 %v18758_v15, %v18756_v31 }
 0xdc0   :  { %15725 = vmatprep.subr.bf16.mxu1 %v16553_v11 }
 0xdc1   :  { %14350 = vmatmul.mubr.msk.f32.vlgmr.msra.gmra.mrb[80].mxu0 %vm501_vm0, %v16433_v23 }
 0xdc2   :  { %14372 = vmatmul.mubr.msk.f32.vlgmr.msra.gmra.mrb[88].mxu1 %vm501_vm0, %v16433_v23  ;;  %14352 = vmatprep.mubr.msk.f32.mxu0 %vm501_vm0, %v16434_v57  ;;  %v18762_v23 = vld [vmem:[#allocation8 + $0xa8] sm:$0xff] }
 0xdc3   :  { %14374 = vmatprep.mubr.msk.f32.mxu1 %vm501_vm0, %v16434_v57  ;;  %15715 = vmatpush3.bf16.msra.mxu0 %v15714_v44  ;;  %v18764_v57 = vld [vmem:[#allocation8 + $0xe0] sm:$0xff]  ;;  %v18772_v44 = vld [vmem:[#allocation8 + $0xb8] sm:$0xff] }
 0xdc4   :  { %15727 = vmatpush3.bf16.msra.mxu1 %v15726_v10  ;;  %15716 = vmatprep.subr.bf16.mxu0 %v16553_v11  ;;  %v15741_v10 = vpack.c.bf16 %v18754_v5, %v18752_v13 }
 0xdc5   :  { %14353 = vmatmul.mubr.msk.f32.gmra.mrb[82].mxu0 %vm501_vm0, %v16435_v51  ;;  %15728 = vmatprep.subr.bf16.mxu1 %v16553_v11 }
 0xdc6   :  { %14375 = vmatmul.mubr.msk.f32.gmra.mrb[90].mxu1 %vm501_vm0, %v16435_v51  ;;  %14393 = vmatprep.mubr.msk.f32.mxu0 %vm16555_vm1, %v16556_v46 }
 0xdc7   :  { %14412 = vmatprep.mubr.msk.f32.mxu1 %vm16555_vm1, %v16556_v46  ;;  %15718 = vmatpush3.bf16.msra.mxu0 %v15717_v61  ;;  %v18783_v61 = vld [vmem:[#allocation8 + $0xf8] sm:$0xff] }
 0xdc8   :  { %15730 = vmatpush3.bf16.msra.mxu1 %v15729_v33  ;;  %15719 = vmatprep.subr.bf16.mxu0 %v16553_v11 }
 0xdc9   :  { %15731 = vmatprep.subr.bf16.mxu1 %v16553_v11 }
 0xdcb   :  { %15721 = vmatpush3.bf16.msra.mxu0 %v15720_v36  ;;  %v15744_v36 = vpack.c.bf16 %v18762_v23, %v18760_v49 }
 0xdcc   :  { %15722 = vmatprep.subr.bf16.mxu0 %v16553_v11  ;;  %15733 = vmatpush3.bf16.msra.mxu1 %v15732_v25 }
 0xdcd   :  { %15734 = vmatprep.subr.bf16.mxu1 %v16553_v11 }
 0xdcf   :  { %15724 = vmatpush3.bf16.msra.mxu0 %v15723_v26 }
 0xdd0   :  { %15737 = vmatprep.subr.bf16.mxu0 %v16553_v11  ;;  %15736 = vmatpush3.bf16.msra.mxu1 %v15735_v41 }
 0xdd1   :  { %15749 = vmatprep.subr.bf16.mxu1 %v16553_v11 }
 0xe94   :  { %v18733_v7 = vpop.f32.mrb[80].mxu0 }
 0xe95   :  { %v18735_v24 = vpop.f32.mrb[88].mxu1  ;;  %v8651_v12 = vpop.f32.mrb[81].mxu0 }
 0xe96   :  { %v8746_v60 = vpop.f32.mrb[89].mxu1 }
 0xe98   :  { %v14354_v8 = vpop.f32.mrb[82].mxu0 }
 0xe99   :  { %v14376_v28 = vpop.f32.mrb[90].mxu1  ;;  %v8661_v9 = vpop.f32.mrb[83].mxu0 }
 0xe9a   :  { %v8756_v43 = vpop.f32.mrb[91].mxu1  ;;  %8672 = vrot.lane.b32.xlu1 %v8661_v9, %s16554_s30 }
 0xe9b   :  { %8767 = vrot.lane.b32.xlu0 %v8756_v43, %s16554_s30 }
 0xe9e   :  { %8674 = vrot.lane.b32.xlu1 %v14354_v8, %s16554_s30 }
 0xe9f   :  { %8769 = vrot.lane.b32.xlu0 %v14376_v28, %s16554_s30 }
 0xf0c   :  { %v8673_v51 = vpop.permute.xlu1 %8672 }
 0xf0d   :  { %v8678_v17 = vsel %vm607_vm2, %v8651_v12, %v8673_v51  ;;  %v8768_v2 = vpop.permute.xlu0 %8767 }
 0xf0e   :  { %v8777_v33 = vcombine.high %v8678_v17, %v8678_v17  ;;  %v8784_v52 = vrot.slane %v8678_v17, %v16973_v58  ;;  %v8773_v62 = vsel %vm607_vm2, %v8746_v60, %v8768_v2 }
 0xf0f   :  { %v8893_v27 = vcombine.high %v8773_v62, %v8773_v62  ;;  %v8900_v55 = vrot.slane %v8773_v62, %v16973_v58 }
 0xf10   :  { %v8791_v22 = vrot.slane %v8777_v33, %v16973_v58  ;;  %v8792_v40 = vcombine.high %v8784_v52, %v8784_v52  ;;  %v8800_v26 = vrot.slane %v8784_v52, %v16973_v58  ;;  %v8675_v8 = vpop.permute.xlu1 %8674 }
 0xf11   :  { %v8907_v37 = vrot.slane %v8893_v27, %v16973_v58  ;;  %v8908_v35 = vcombine.high %v8900_v55, %v8900_v55  ;;  %v8916_v28 = vrot.slane %v8900_v55, %v16973_v58  ;;  %v8679_v9 = vsel %vm607_vm2, %v18733_v7, %v8675_v8  ;;  %v8770_v62 = vpop.permute.xlu0 %8769 }
 0xf12   :  { %v8793_v41 = vcombine.high %v8791_v22, %v8791_v22  ;;  %v18803_v43 = vrot.slane %v8791_v22, %v16973_v58  ;;  %v8814_v1 = vrot.slane %v8792_v40, %v16973_v58  ;;  %v8822_v14 = vcombine.high %v8800_v26, %v8800_v26 }
 0xf13   :  { %v8909_v39 = vcombine.high %v8907_v37, %v8907_v37  ;;  %v18807_v0 = vrot.slane %v8907_v37, %v16973_v58  ;;  %v8930_v51 = vrot.slane %v8908_v35, %v16973_v58  ;;  %v8938_v17 = vcombine.high %v8916_v28, %v8916_v28 }
 0xf14   :  { %v18811_v2 = vrot.slane %v8793_v41, %v16973_v58  ;;  %v8824_v33 = vcombine.high %v8814_v1, %v8814_v1  ;;  %v8994_v52 = vrot.slane %v8916_v28, %v16838_v29  ;;  %v8826_v35 = vcombine.high %v8679_v9, %v8679_v9 }
 0xf15   :  { %v18817_v27 = vrot.slane %v8909_v39, %v16973_v58  ;;  %v8939_v55 = vcombine.high %v18807_v0, %v18807_v0  ;;  %v8940_v22 = vcombine.high %v8930_v51, %v8930_v51  ;;  %v8998_v40 = vrot.slane %v8930_v51, %v16838_v29 }
 0xf16   :  { %v9002_v8 = vrot.slane %v8938_v17, %v16838_v29  ;;  %v9010_v37 = vrot.slane %v18807_v0, %v16838_v29  ;;  %v8833_v41 = vrot.slane %v8679_v9, %v16973_v58  ;;  %v8774_v39 = vsel %vm607_vm2, %v18735_v24, %v8770_v62 }
 0xf17   :  { %v8941_v28 = vcombine.high %v18817_v27, %v18817_v27  ;;  %v9071_v60 = vsel %vm1001_vm3, %v8800_v26, %v8994_v52  ;;  %v9072_v12 = vsel %vm1001_vm3, %v8814_v1, %v8998_v40  ;;  %v8840_v51 = vrot.slane %v8826_v35, %v16973_v58 }
 0xf18   :  { %v8841_v7 = vcombine.high %v8833_v41, %v8833_v41  ;;  %v8849_v17 = vrot.slane %v8833_v41, %v16973_v58  ;;  %v8942_v25 = vcombine.high %v8774_v39, %v8774_v39  ;;  %14394 = vmatmul.mubr.msk.f32.vlgmr.msra.gmra.mrb[84].mxu0 %vm501_vm0, %v9071_v60  ;;  %v8949_v9 = vrot.slane %v8774_v39, %v16973_v58 }
 0xf19   :  { %15739 = vmatpush3.bf16.msra.mxu0 %v15738_v6  ;;  %14413 = vmatmul.mubr.msk.f32.vlgmr.msra.gmra.mrb[92].mxu1 %vm501_vm0, %v9072_v12  ;;  %v18838_v0 = vsel %vm1001_vm3, %v8822_v14, %v9002_v8  ;;  %v9006_v24 = vrot.slane %v8940_v22, %v16838_v29  ;;  %v8842_v26 = vcombine.high %v8840_v51, %v8840_v51 }
 0xf1a   :  { %v18842_v1 = vrot.slane %v8840_v51, %v16973_v58  ;;  %v8863_v52 = vrot.slane %v8841_v7, %v16973_v58  ;;  %v8871_v62 = vcombine.high %v8849_v17, %v8849_v17  ;;  %15751 = vmatpush3.bf16.msra.mxu1 %v15750_v18  ;;  %v8956_v60 = vrot.slane %v8942_v25, %v16973_v58 }
 0xf1b   :  { %v8957_v40 = vcombine.high %v8949_v9, %v8949_v9  ;;  %v8965_v6 = vrot.slane %v8949_v9, %v16973_v58  ;;  %15740 = vmatprep.subr.bf16.mxu0 %v16553_v11  ;;  %15752 = vmatprep.subr.bf16.mxu1 %v16553_v11  ;;  %v8870_v12 = vrot.slane %v8842_v26, %v16973_v58 }
 0xf1c   :  { %v8872_v14 = vcombine.high %v18842_v1, %v18842_v1  ;;  %v8873_v22 = vcombine.high %v8863_v52, %v8863_v52  ;;  %14431 = vmatprep.mubr.msk.f32.mxu0 %vm16555_vm1, %v16556_v46  ;;  %14450 = vmatprep.mubr.msk.f32.mxu1 %vm16555_vm1, %v16556_v46  ;;  %v8958_v18 = vcombine.high %v8956_v60, %v8956_v60 }
 0xf1d   :  { %v8972_v25 = vrot.slane %v8956_v60, %v16973_v58  ;;  %v8979_v7 = vrot.slane %v8957_v40, %v16973_v58  ;;  %v8987_v8 = vcombine.high %v8965_v6, %v8965_v6  ;;  %15742 = vmatpush3.bf16.msra.mxu0 %v15741_v10  ;;  %v9026_v35 = vrot.slane %v8965_v6, %v16838_v29  ;;  %v8493_v40 = vld [vmem:[#allocation8 + $0x148] sm:$0xff] }
 0xf1e   :  { %15754 = vmatpush3.bf16.msra.mxu1 %v15753_v50  ;;  %15743 = vmatprep.subr.bf16.mxu0 %v16553_v11  ;;  %v9074_v41 = vsel %vm1001_vm3, %v8824_v33, %v9006_v24  ;;  %v18869_v39 = vsel %vm1001_vm3, %v18803_v43, %v9010_v37  ;;  %v8986_v51 = vrot.slane %v8958_v18, %v16973_v58  ;;  %v8484_v58 = vld [vmem:[#allocation8 + $0x100] sm:$0xff] }
 0xf1f   :  { %v8988_v9 = vcombine.high %v8972_v25, %v8972_v25  ;;  %v8989_v26 = vcombine.high %v8979_v7, %v8979_v7  ;;  %v9030_v13 = vrot.slane %v8979_v7, %v16838_v29  ;;  %15755 = vmatprep.subr.bf16.mxu1 %v16553_v11  ;;  %v9034_v5 = vrot.slane %v8987_v8, %v16838_v29 }
 0xf20   :  { %v9042_v31 = vrot.slane %v8972_v25, %v16838_v29  ;;  %v9014_v15 = vrot.slane %v18817_v27, %v16838_v29  ;;  %v9018_v10 = vrot.slane %v8939_v55, %v16838_v29  ;;  %v8990_v50 = vcombine.high %v8986_v51, %v8986_v51  ;;  %v8485_v27 = vld [vmem:[#allocation8 + $0x108] sm:$0xff]  ;;  %v8492_v55 = vld [vmem:[#allocation8 + $0x140] sm:$0xff] }
 0xf21   :  { %15745 = vmatpush3.bf16.msra.mxu0 %v15744_v36  ;;  %v8825_v33 = vcombine.high %v18811_v2, %v18811_v2  ;;  %v9022_v37 = vrot.slane %v8941_v28, %v16838_v29  ;;  %v18886_v24 = vsel %vm1001_vm3, %v8849_v17, %v9026_v35  ;;  %v19434_v60 = vpack.c.bf16 %v18768_v4, %v18764_v57  ;;  %v8486_v35 = vld [vmem:[#allocation8 + $0x110] sm:$0xff] }
 0xf22   :  { %15746 = vmatprep.subr.bf16.mxu0 %v16553_v11  ;;  %v18894_v49 = vsel %vm1001_vm3, %v18811_v2, %v9014_v15  ;;  %v19435_v23 = vcombine.high %v18803_v43, %v18803_v43  ;;  %v18903_v28 = vsel %vm1001_vm3, %v8863_v52, %v9030_v13  ;;  %v18910_v4 = vsel %vm1001_vm3, %v8871_v62, %v9034_v5  ;;  %v8497_v13 = vld [vmem:[#allocation8 + $0x168] sm:$0xff]  ;;  %v8490_v5 = vld [vmem:[#allocation8 + $0x130] sm:$0xff] }
 0xf23   :  { %15757 = vmatpush3.bf16.msra.mxu1 %v19434_v60  ;;  %v18907_v57 = vsel %vm1001_vm3, %v8825_v33, %v9022_v37  ;;  %v9038_v2 = vrot.slane %v8989_v26, %v16838_v29  ;;  %v18915_v17 = vsel %vm1001_vm3, %v18842_v1, %v9042_v31  ;;  %v9046_v43 = vrot.slane %v8986_v51, %v16838_v29  ;;  %v8487_v51 = vld [vmem:[#allocation8 + $0x118] sm:$0xff]  ;;  %v8496_v26 = vld [vmem:[#allocation8 + $0x160] sm:$0xff]  ;;  %v8498_v15 = vld [vmem:[#allocation8 + $0x170] sm:$0xff] }
 0xf24   :  { %v18900_v36 = vsel %vm1001_vm3, %v19435_v23, %v9018_v10  ;;  %15758 = vmatprep.subr.bf16.mxu1 %v16553_v11  ;;  %v9050_v6 = vrot.slane %v8988_v9, %v16838_v29  ;;  %v8874_v52 = vcombine.high %v8870_v12, %v8870_v12  ;;  %v9054_v18 = vrot.slane %v8990_v50, %v16838_v29  ;;  %v8491_v31 = vld [vmem:[#allocation8 + $0x138] sm:$0xff]  ;;  %v8500_v33 = vld [vmem:[#allocation8 + $0x180] sm:$0xff]  ;;  %v8501_v37 = vld [vmem:[#allocation8 + $0x188] sm:$0xff] }
 0xf25   :  { %v19436_v25 = vpack.c.bf16 %v18772_v44, %v18770_v3  ;;  %v15762_v7 = vpack.c.bf16 %v8485_v27, %v8484_v58  ;;  %v15774_v62 = vpack.c.bf16 %v8493_v40, %v8492_v55  ;;  %v18924_v8 = vsel %vm1001_vm3, %v8873_v22, %v9038_v2  ;;  %v8494_v44 = vld [vmem:[#allocation8 + $0x150] sm:$0xff]  ;;  %v8495_v22 = vld [vmem:[#allocation8 + $0x158] sm:$0xff]  ;;  %v8508_v60 = vld [vmem:[#allocation8 + $0x1c0] sm:$0xff] }
 0xf26   :  { %v19437_v1 = vpack.c.bf16 %v18783_v61, %v18781_v59  ;;  %v18931_v9 = vsel %vm1001_vm3, %v8870_v12, %v9046_v43  ;;  %v18934_v29 = vsel %vm1001_vm3, %v8872_v14, %v9050_v6  ;;  %v18937_v3 = vsel %vm1001_vm3, %v8874_v52, %v9054_v18  ;;  %v8488_v12 = vld [vmem:[#allocation8 + $0x120] sm:$0xff]  ;;  %v8489_v14 = vld [vmem:[#allocation8 + $0x128] sm:$0xff]  ;;  %v8499_v10 = vld [vmem:[#allocation8 + $0x178] sm:$0xff] }
 0xf27   :  { %15748 = vmatpush3.bf16.msra.mxu0 %v19436_v25  ;;  %v15765_v59 = vpack.c.bf16 %v8487_v51, %v8486_v35  ;;  %v15777_v61 = vpack.c.bf16 %v8495_v22, %v8494_v44  ;;  %v15771_v50 = vpack.c.bf16 %v8491_v31, %v8490_v5  ;;  %v15783_v58 = vpack.c.bf16 %v8499_v10, %v8498_v15  ;;  %v8509_v27 = vld [vmem:[#allocation8 + $0x1c8] sm:$0xff]  ;;  %v8502_v23 = vld [vmem:[#allocation8 + $0x190] sm:$0xff]  ;;  %v8503_v2 = vld [vmem:[#allocation8 + $0x198] sm:$0xff] }
 0xf28   :  { %15760 = vmatpush3.bf16.msra.mxu1 %v19437_v1  ;;  %15761 = vmatprep.subr.bf16.mxu0 %v16553_v11  ;;  %v15786_v55 = vpack.c.bf16 %v8501_v37, %v8500_v33  ;;  %v15798_v40 = vpack.c.bf16 %v8509_v27, %v8508_v60  ;;  %v8510_v43 = vld [vmem:[#allocation8 + $0x1d0] sm:$0xff]  ;;  %v8511_v6 = vld [vmem:[#allocation8 + $0x1d8] sm:$0xff]  ;;  %v15789_v52 = vpack.c.bf16 %v8503_v2, %v8502_v23  ;;  %v8504_v25 = vld [vmem:[#allocation8 + $0x1a0] sm:$0xff] }
 0xf29   :  { %15773 = vmatprep.subr.bf16.mxu1 %v16553_v11  ;;  %v15801_v18 = vpack.c.bf16 %v8511_v6, %v8510_v43  ;;  %v8513_v1 = vld [vmem:[#allocation8 + $0x1e8] sm:$0xff]  ;;  %v8506_v35 = vld [vmem:[#allocation8 + $0x1b0] sm:$0xff]  ;;  %v8507_v51 = vld [vmem:[#allocation8 + $0x1b8] sm:$0xff] }
 0xf2a   :  { %14432 = vmatmul.mubr.msk.f32.vlgmr.msra.gmra.mrb[86].mxu0 %vm501_vm0, %v18838_v0  ;;  %v15768_v0 = vpack.c.bf16 %v8489_v14, %v8488_v12  ;;  %v8514_v44 = vld [vmem:[#allocation8 + $0x1f0] sm:$0xff]  ;;  %v8515_v22 = vld [vmem:[#allocation8 + $0x1f8] sm:$0xff]  ;;  %v8516_v12 = vld [vmem:[#allocation8 + $0x200] sm:$0xff] }
 0xf2b   :  { %15763 = vmatpush3.bf16.msra.mxu0 %v15762_v7  ;;  %14451 = vmatmul.mubr.msk.f32.vlgmr.msra.gmra.mrb[94].mxu1 %vm501_vm0, %v9074_v41  ;;  %v15780_v41 = vpack.c.bf16 %v8497_v13, %v8496_v26  ;;  %v8505_v7 = vld [vmem:[#allocation8 + $0x1a8] sm:$0xff]  ;;  %v8524_v26 = vld [vmem:[#allocation8 + $0x240] sm:$0xff]  ;;  %v8518_v5 = vld [vmem:[#allocation8 + $0x210] sm:$0xff] }
 0xf2c   :  { %15775 = vmatpush3.bf16.msra.mxu1 %v15774_v62  ;;  %15764 = vmatprep.subr.bf16.mxu0 %v16553_v11  ;;  %v8512_v62 = vld [vmem:[#allocation8 + $0x1e0] sm:$0xff]  ;;  %v8517_v14 = vld [vmem:[#allocation8 + $0x208] sm:$0xff]  ;;  %v8519_v31 = vld [vmem:[#allocation8 + $0x218] sm:$0xff] }
 0xf2d   :  { %15776 = vmatprep.subr.bf16.mxu1 %v16553_v11  ;;  %14469 = vmatprep.mubr.msk.f32.mxu0 %vm16555_vm1, %v16556_v46  ;;  %v8525_v13 = vld [vmem:[#allocation8 + $0x248] sm:$0xff]  ;;  %v8526_v15 = vld [vmem:[#allocation8 + $0x250] sm:$0xff]  ;;  %v8527_v10 = vld [vmem:[#allocation8 + $0x258] sm:$0xff] }
 0xf2e   :  { %14488 = vmatprep.mubr.msk.f32.mxu1 %vm16555_vm1, %v16556_v46  ;;  %v8520_v33 = vld [vmem:[#allocation8 + $0x220] sm:$0xff]  ;;  %v8521_v37 = vld [vmem:[#allocation8 + $0x228] sm:$0xff]  ;;  %v8530_v23 = vld [vmem:[#allocation8 + $0x270] sm:$0xff] }
 0xf2f   :  { %15766 = vmatpush3.bf16.msra.mxu0 %v15765_v59  ;;  %v15795_v59 = vpack.c.bf16 %v8507_v51, %v8506_v35  ;;  %v8528_v60 = vld [vmem:[#allocation8 + $0x260] sm:$0xff]  ;;  %v8529_v27 = vld [vmem:[#allocation8 + $0x268] sm:$0xff]  ;;  %v8531_v2 = vld [vmem:[#allocation8 + $0x278] sm:$0xff] }
 0xf30   :  { %15778 = vmatpush3.bf16.msra.mxu1 %v15777_v61  ;;  %15767 = vmatprep.subr.bf16.mxu0 %v16553_v11  ;;  %v15807_v61 = vpack.c.bf16 %v8515_v22, %v8514_v44  ;;  %v15831_v6 = vpack.c.bf16 %v8531_v2, %v8530_v23  ;;  %v8542_v35 = vld [vmem:[#allocation8 + $0x2d0] sm:$0xff]  ;;  %v8543_v51 = vld [vmem:[#allocation8 + $0x2d8] sm:$0xff]  ;;  %v8552_v23 = vld [vmem:[#allocation8 + $0x320] sm:$0xff] }
 0xf31   :  { %15779 = vmatprep.subr.bf16.mxu1 %v16553_v11  ;;  %v15849_v22 = vpack.c.bf16 %v8543_v51, %v8542_v35  ;;  %v8553_v2 = vld [vmem:[#allocation8 + $0x328] sm:$0xff]  ;;  %v8572_v35 = vld [vmem:[#allocation8 + $0x3c0] sm:$0xff] }
 0xf32   :  { %v8573_v51 = vld [vmem:[#allocation8 + $0x3c8] sm:$0xff] }
 0xf33   :  { %15769 = vmatpush3.bf16.msra.mxu0 %v15768_v0  ;;  %v15810_v0 = vpack.c.bf16 %v8517_v14, %v8516_v12  ;;  %v8544_v12 = vld [vmem:[#allocation8 + $0x2e0] sm:$0xff]  ;;  %v8545_v14 = vld [vmem:[#allocation8 + $0x2e8] sm:$0xff] }
 0xf34   :  { %15781 = vmatpush3.bf16.msra.mxu1 %v15780_v41  ;;  %15770 = vmatprep.subr.bf16.mxu0 %v16553_v11  ;;  %v15822_v41 = vpack.c.bf16 %v8525_v13, %v8524_v26  ;;  %v8538_v26 = vld [vmem:[#allocation8 + $0x2b0] sm:$0xff]  ;;  %v8539_v13 = vld [vmem:[#allocation8 + $0x2b8] sm:$0xff] }
 0xf35   :  { %15782 = vmatprep.subr.bf16.mxu1 %v16553_v11 }
 0xf37   :  { %15772 = vmatpush3.bf16.msra.mxu0 %v15771_v50  ;;  %v15813_v50 = vpack.c.bf16 %v8519_v31, %v8518_v5  ;;  %v15843_v5 = vpack.c.bf16 %v8539_v13, %v8538_v26  ;;  %v8568_v26 = vld [vmem:[#allocation8 + $0x3a0] sm:$0xff]  ;;  %v8569_v13 = vld [vmem:[#allocation8 + $0x3a8] sm:$0xff] }
 0xf38   :  { %15784 = vmatpush3.bf16.msra.mxu1 %v15783_v58  ;;  %15785 = vmatprep.subr.bf16.mxu0 %v16553_v11  ;;  %v15825_v58 = vpack.c.bf16 %v8527_v10, %v8526_v15  ;;  %v8548_v15 = vld [vmem:[#allocation8 + $0x300] sm:$0xff]  ;;  %v8549_v10 = vld [vmem:[#allocation8 + $0x308] sm:$0xff] }
 0xf39   :  { %15797 = vmatprep.subr.bf16.mxu1 %v16553_v11 }
 0xf3a   :  { %14470 = vmatmul.mubr.msk.f32.vlgmr.msra.gmra.mrb[88].mxu0 %vm501_vm0, %v18869_v39  ;;  %v15792_v39 = vpack.c.bf16 %v8505_v7, %v8504_v25  ;;  %v8540_v25 = vld [vmem:[#allocation8 + $0x2c0] sm:$0xff]  ;;  %v8541_v7 = vld [vmem:[#allocation8 + $0x2c8] sm:$0xff] }
 0xf3b   :  { %15787 = vmatpush3.bf16.msra.mxu0 %v15786_v55  ;;  %14489 = vmatmul.mubr.msk.f32.vlgmr.msra.gmra.mrb[96].mxu1 %vm501_vm0, %v18894_v49  ;;  %v15804_v49 = vpack.c.bf16 %v8513_v1, %v8512_v62  ;;  %v8522_v55 = vld [vmem:[#allocation8 + $0x230] sm:$0xff]  ;;  %v15846_v1 = vpack.c.bf16 %v8541_v7, %v8540_v25  ;;  %v8563_v7 = vld [vmem:[#allocation8 + $0x378] sm:$0xff] }
 0xf3c   :  { %15799 = vmatpush3.bf16.msra.mxu1 %v15798_v40  ;;  %15788 = vmatprep.subr.bf16.mxu0 %v16553_v11  ;;  %v8523_v40 = vld [vmem:[#allocation8 + $0x238] sm:$0xff]  ;;  %v8562_v25 = vld [vmem:[#allocation8 + $0x370] sm:$0xff] }
 0xf3d   :  { %15800 = vmatprep.subr.bf16.mxu1 %v16553_v11  ;;  %14507 = vmatprep.mubr.msk.f32.mxu0 %vm16555_vm1, %v16556_v46  ;;  %v15819_v43 = vpack.c.bf16 %v8523_v40, %v8522_v55 }
 0xf3e   :  { %14526 = vmatprep.mubr.msk.f32.mxu1 %vm16555_vm1, %v16556_v46 }
 0xf3f   :  { %15790 = vmatpush3.bf16.msra.mxu0 %v15789_v52  ;;  %v8532_v52 = vld [vmem:[#allocation8 + $0x280] sm:$0xff] }
 0xf40   :  { %15802 = vmatpush3.bf16.msra.mxu1 %v15801_v18  ;;  %15791 = vmatprep.subr.bf16.mxu0 %v16553_v11  ;;  %v8533_v18 = vld [vmem:[#allocation8 + $0x288] sm:$0xff] }
 0xf41   :  { %15803 = vmatprep.subr.bf16.mxu1 %v16553_v11  ;;  %v15834_v62 = vpack.c.bf16 %v8533_v18, %v8532_v52  ;;  %v8554_v52 = vld [vmem:[#allocation8 + $0x330] sm:$0xff]  ;;  %v8555_v18 = vld [vmem:[#allocation8 + $0x338] sm:$0xff] }
 0xf43   :  { %15793 = vmatpush3.bf16.msra.mxu0 %v15792_v39  ;;  %v8534_v39 = vld [vmem:[#allocation8 + $0x290] sm:$0xff] }
 0xf44   :  { %15805 = vmatpush3.bf16.msra.mxu1 %v15804_v49  ;;  %15794 = vmatprep.subr.bf16.mxu0 %v16553_v11  ;;  %v8535_v49 = vld [vmem:[#allocation8 + $0x298] sm:$0xff] }
 0xf45   :  { %15806 = vmatprep.subr.bf16.mxu1 %v16553_v11  ;;  %v15837_v44 = vpack.c.bf16 %v8535_v49, %v8534_v39  ;;  %v8564_v39 = vld [vmem:[#allocation8 + $0x380] sm:$0xff]  ;;  %v8565_v49 = vld [vmem:[#allocation8 + $0x388] sm:$0xff] }
 0xf47   :  { %15796 = vmatpush3.bf16.msra.mxu0 %v15795_v59  ;;  %v8536_v59 = vld [vmem:[#allocation8 + $0x2a0] sm:$0xff] }
 0xf48   :  { %15808 = vmatpush3.bf16.msra.mxu1 %v15807_v61  ;;  %15809 = vmatprep.subr.bf16.mxu0 %v16553_v11  ;;  %v8537_v61 = vld [vmem:[#allocation8 + $0x2a8] sm:$0xff] }
 0xf49   :  { %15821 = vmatprep.subr.bf16.mxu1 %v16553_v11 }
 0xf4a   :  { %14508 = vmatmul.mubr.msk.f32.vlgmr.msra.gmra.mrb[90].mxu0 %vm501_vm0, %v18900_v36  ;;  %v15816_v36 = vpack.c.bf16 %v8521_v37, %v8520_v33  ;;  %v15858_v33 = vpack.c.bf16 %v8549_v10, %v8548_v15  ;;  %v8578_v15 = vld [vmem:[#allocation8 + $0x3f0] sm:$0xff]  ;;  %v8579_v10 = vld [vmem:[#allocation8 + $0x3f8] sm:$0xff] }
 0xf4b   :  { %15811 = vmatpush3.bf16.msra.mxu0 %v15810_v0  ;;  %14527 = vmatmul.mubr.msk.f32.vlgmr.msra.gmra.mrb[98].mxu1 %vm501_vm0, %v18907_v57  ;;  %v15828_v57 = vpack.c.bf16 %v8529_v27, %v8528_v60  ;;  %v8546_v0 = vld [vmem:[#allocation8 + $0x2f0] sm:$0xff]  ;;  %v8551_v27 = vld [vmem:[#allocation8 + $0x318] sm:$0xff] }
 0xf4c   :  { %15823 = vmatpush3.bf16.msra.mxu1 %v15822_v41  ;;  %15812 = vmatprep.subr.bf16.mxu0 %v16553_v11  ;;  %v8547_v41 = vld [vmem:[#allocation8 + $0x2f8] sm:$0xff]  ;;  %v8550_v60 = vld [vmem:[#allocation8 + $0x310] sm:$0xff] }
 0xf4d   :  { %15824 = vmatprep.subr.bf16.mxu1 %v16553_v11  ;;  %14545 = vmatprep.mubr.msk.f32.mxu0 %vm16555_vm1, %v16556_v46  ;;  %v15855_v31 = vpack.c.bf16 %v8547_v41, %v8546_v0  ;;  %v15861_v55 = vpack.c.bf16 %v8551_v27, %v8550_v60  ;;  %v8576_v0 = vld [vmem:[#allocation8 + $0x3e0] sm:$0xff]  ;;  %v8577_v41 = vld [vmem:[#allocation8 + $0x3e8] sm:$0xff] }
 0xf4e   :  { %14564 = vmatprep.mubr.msk.f32.mxu1 %vm16555_vm1, %v16556_v46 }
 0xf4f   :  { %15814 = vmatpush3.bf16.msra.mxu0 %v15813_v50  ;;  %v8556_v50 = vld [vmem:[#allocation8 + $0x340] sm:$0xff] }
 0xf50   :  { %15826 = vmatpush3.bf16.msra.mxu1 %v15825_v58  ;;  %15815 = vmatprep.subr.bf16.mxu0 %v16553_v11  ;;  %v8557_v58 = vld [vmem:[#allocation8 + $0x348] sm:$0xff] }
 0xf51   :  { %15827 = vmatprep.subr.bf16.mxu1 %v16553_v11  ;;  %v15870_v37 = vpack.c.bf16 %v8557_v58, %v8556_v50  ;;  %v15903_v58 = vpack.c.bf16 %v8579_v10, %v8578_v15 }
 0xf53   :  { %15817 = vmatpush3.bf16.msra.mxu0 %v15816_v36  ;;  %v8558_v36 = vld [vmem:[#allocation8 + $0x350] sm:$0xff] }
 0xf54   :  { %15829 = vmatpush3.bf16.msra.mxu1 %v15828_v57  ;;  %15818 = vmatprep.subr.bf16.mxu0 %v16553_v11  ;;  %v8559_v57 = vld [vmem:[#allocation8 + $0x358] sm:$0xff] }
 0xf55   :  { %15830 = vmatprep.subr.bf16.mxu1 %v16553_v11  ;;  %v15873_v40 = vpack.c.bf16 %v8559_v57, %v8558_v36 }
 0xf57   :  { %15820 = vmatpush3.bf16.msra.mxu0 %v15819_v43  ;;  %v8560_v43 = vld [vmem:[#allocation8 + $0x360] sm:$0xff] }
 0xf58   :  { %15832 = vmatpush3.bf16.msra.mxu1 %v15831_v6  ;;  %15833 = vmatprep.subr.bf16.mxu0 %v16553_v11  ;;  %v8561_v6 = vld [vmem:[#allocation8 + $0x368] sm:$0xff] }
 0xf59   :  { %15845 = vmatprep.subr.bf16.mxu1 %v16553_v11 }
 0xf5a   :  { %14546 = vmatmul.mubr.msk.f32.vlgmr.msra.gmra.mrb[92].mxu0 %vm501_vm0, %v18886_v24  ;;  %v15840_v24 = vpack.c.bf16 %v8537_v61, %v8536_v59  ;;  %v8566_v59 = vld [vmem:[#allocation8 + $0x390] sm:$0xff]  ;;  %v8567_v61 = vld [vmem:[#allocation8 + $0x398] sm:$0xff] }
 0xf5b   :  { %15835 = vmatpush3.bf16.msra.mxu0 %v15834_v62  ;;  %14565 = vmatmul.mubr.msk.f32.vlgmr.msra.gmra.mrb[100].mxu1 %vm501_vm0, %v18903_v28  ;;  %v15852_v28 = vpack.c.bf16 %v8545_v14, %v8544_v12  ;;  %v15867_v62 = vpack.c.bf16 %v8555_v18, %v8554_v52  ;;  %v8574_v12 = vld [vmem:[#allocation8 + $0x3d0] sm:$0xff]  ;;  %v8575_v14 = vld [vmem:[#allocation8 + $0x3d8] sm:$0xff] }
 0xf5c   :  { %15847 = vmatpush3.bf16.msra.mxu1 %v15846_v1  ;;  %15836 = vmatprep.subr.bf16.mxu0 %v16553_v11  ;;  %v15879_v1 = vpack.c.bf16 %v8563_v7, %v8562_v25 }
 0xf5d   :  { %15848 = vmatprep.subr.bf16.mxu1 %v16553_v11  ;;  %14583 = vmatprep.mubr.msk.f32.mxu0 %vm16555_vm1, %v16556_v46 }
 0xf5e   :  { %14602 = vmatprep.mubr.msk.f32.mxu1 %vm16555_vm1, %v16556_v46 }
 0xf5f   :  { %15838 = vmatpush3.bf16.msra.mxu0 %v15837_v44  ;;  %v15882_v44 = vpack.c.bf16 %v8565_v49, %v8564_v39 }
 0xf60   :  { %15850 = vmatpush3.bf16.msra.mxu1 %v15849_v22  ;;  %15839 = vmatprep.subr.bf16.mxu0 %v16553_v11  ;;  %v15894_v22 = vpack.c.bf16 %v8573_v51, %v8572_v35 }
 0xf61   :  { %15851 = vmatprep.subr.bf16.mxu1 %v16553_v11 }
 0xf63   :  { %15841 = vmatpush3.bf16.msra.mxu0 %v15840_v24  ;;  %v15885_v24 = vpack.c.bf16 %v8567_v61, %v8566_v59 }
 0xf64   :  { %15853 = vmatpush3.bf16.msra.mxu1 %v15852_v28  ;;  %15842 = vmatprep.subr.bf16.mxu0 %v16553_v11  ;;  %v15897_v28 = vpack.c.bf16 %v8575_v14, %v8574_v12 }
 0xf65   :  { %15854 = vmatprep.subr.bf16.mxu1 %v16553_v11 }
 0xf67   :  { %15844 = vmatpush3.bf16.msra.mxu0 %v15843_v5  ;;  %v8570_v5 = vld [vmem:[#allocation8 + $0x3b0] sm:$0xff] }
 0xf68   :  { %15856 = vmatpush3.bf16.msra.mxu1 %v15855_v31  ;;  %15857 = vmatprep.subr.bf16.mxu0 %v16553_v11  ;;  %v8571_v31 = vld [vmem:[#allocation8 + $0x3b8] sm:$0xff] }
 0xf69   :  { %15869 = vmatprep.subr.bf16.mxu1 %v16553_v11  ;;  %v15891_v50 = vpack.c.bf16 %v8571_v31, %v8570_v5 }
 0xf6a   :  { %14584 = vmatmul.mubr.msk.f32.vlgmr.msra.gmra.mrb[94].mxu0 %vm501_vm0, %v18910_v4  ;;  %v15864_v4 = vpack.c.bf16 %v8553_v2, %v8552_v23 }
 0xf6b   :  { %15859 = vmatpush3.bf16.msra.mxu0 %v15858_v33  ;;  %14603 = vmatmul.mubr.msk.f32.vlgmr.msra.gmra.mrb[102].mxu1 %vm501_vm0, %v18924_v8  ;;  %v15876_v8 = vpack.c.bf16 %v8561_v6, %v8560_v43 }
 0xf6c   :  { %15871 = vmatpush3.bf16.msra.mxu1 %v15870_v37  ;;  %15860 = vmatprep.subr.bf16.mxu0 %v16553_v11 }
 0xf6d   :  { %15872 = vmatprep.subr.bf16.mxu1 %v16553_v11  ;;  %14621 = vmatprep.mubr.msk.f32.mxu0 %vm16555_vm1, %v16556_v46 }
 0xf6e   :  { %14640 = vmatprep.mubr.msk.f32.mxu1 %vm16555_vm1, %v16556_v46 }
 0xf6f   :  { %15862 = vmatpush3.bf16.msra.mxu0 %v15861_v55 }
 0xf70   :  { %15874 = vmatpush3.bf16.msra.mxu1 %v15873_v40  ;;  %15863 = vmatprep.subr.bf16.mxu0 %v16553_v11 }
 0xf71   :  { %15875 = vmatprep.subr.bf16.mxu1 %v16553_v11 }
 0xf73   :  { %15865 = vmatpush3.bf16.msra.mxu0 %v15864_v4 }
 0xf74   :  { %15877 = vmatpush3.bf16.msra.mxu1 %v15876_v8  ;;  %15866 = vmatprep.subr.bf16.mxu0 %v16553_v11 }
 0xf75   :  { %15878 = vmatprep.subr.bf16.mxu1 %v16553_v11 }
 0xf77   :  { %15868 = vmatpush3.bf16.msra.mxu0 %v15867_v62 }
 0xf78   :  { %15880 = vmatpush3.bf16.msra.mxu1 %v15879_v1  ;;  %15881 = vmatprep.subr.bf16.mxu0 %v16553_v11 }
 0xf79   :  { %15893 = vmatprep.subr.bf16.mxu1 %v16553_v11 }
 0xf7a   :  { %14622 = vmatmul.mubr.msk.f32.vlgmr.msra.gmra.mrb[96].mxu0 %vm501_vm0, %v18915_v17  ;;  %v15888_v17 = vpack.c.bf16 %v8569_v13, %v8568_v26 }
 0xf7b   :  { %15883 = vmatpush3.bf16.msra.mxu0 %v15882_v44  ;;  %14641 = vmatmul.mubr.msk.f32.vlgmr.msra.gmra.mrb[104].mxu1 %vm501_vm0, %v18931_v9  ;;  %v15900_v9 = vpack.c.bf16 %v8577_v41, %v8576_v0 }
 0xf7c   :  { %15895 = vmatpush3.bf16.msra.mxu1 %v15894_v22  ;;  %15884 = vmatprep.subr.bf16.mxu0 %v16553_v11 }
 0xf7d   :  { %15896 = vmatprep.subr.bf16.mxu1 %v16553_v11  ;;  %14659 = vmatprep.mubr.msk.f32.mxu0 %vm16555_vm1, %v16556_v46 }
 0xf7e   :  { %14678 = vmatprep.mubr.msk.f32.mxu1 %vm16555_vm1, %v16556_v46  ;;  %v16436_v46 = vld [vmem:[%s19424_s27] sm:$0xff] }
 0xf7f   :  { %15886 = vmatpush3.bf16.msra.mxu0 %v15885_v24 }
 0xf80   :  { %15898 = vmatpush3.bf16.msra.mxu1 %v15897_v28  ;;  %15887 = vmatprep.subr.bf16.mxu0 %v16553_v11 }
 0xf81   :  { %15899 = vmatprep.subr.bf16.mxu1 %v16553_v11 }
 0xf83   :  { %15889 = vmatpush3.bf16.msra.mxu0 %v15888_v17 }
 0xf84   :  { %15901 = vmatpush3.bf16.msra.mxu1 %v15900_v9  ;;  %15890 = vmatprep.subr.bf16.mxu0 %v16553_v11 }
 0xf85   :  { %15902 = vmatprep.subr.bf16.mxu1 %v16553_v11 }
 0xf87   :  { %15892 = vmatpush3.bf16.msra.mxu0 %v15891_v50 }
 0xf88   :  { %15904 = vmatpush3.bf16.msra.mxu1 %v15903_v58 }
 0xf8a   :  { %14660 = vmatmul.mubr.msk.f32.vlgmr.msra.gmra.mrb[98].mxu0 %vm501_vm0, %v18934_v29 }
 0xf8b   :  { %14679 = vmatmul.mubr.msk.f32.vlgmr.msra.gmra.mrb[106].mxu1 %vm501_vm0, %v18937_v3  ;;  %14685 = vmatprep.mubr.msk.f32.mxu0 %vm2243_vm11, %v16436_v46 }
 0xf8c   :  { %14737 = vmatprep.mubr.msk.f32.mxu1 %vm2243_vm11, %v16436_v46 }
 0xfeb   :  { %v9156_v33 = vpop.f32.mrb[84].mxu0 }
 0xfec   :  { %v10660_v37 = vrot.slane %v9156_v33, 1  ;;  %v14395_v60 = vpop.f32.mrb[85].mxu0  ;;  %v9229_v11 = vpop.f32.mrb[92].mxu1 }
 0xfed   :  { %v10271_v27 = vrot.slane %v9229_v11, 7  ;;  %v14414_v36 = vpop.f32.mrb[93].mxu1 }
 0xfee   :  { %v10661_v57 = vsel %vm2203_vm4, %v9229_v11, %v10660_v37 }
 0xfef   :  { %v10272_v29 = vsel %vm2203_vm4, %v10271_v27, %v9156_v33 }
 0xffd   :  { %v9302_v55 = vpop.f32.mrb[86].mxu0 }
 0xffe   :  { %v10273_v3 = vrot.slane %v9302_v55, 6  ;;  %v10662_v40 = vrot.slane %v9302_v55, 7  ;;  %v14433_v23 = vpop.f32.mrb[87].mxu0  ;;  %v9375_v2 = vpop.f32.mrb[94].mxu1 }
 0xfff   :  { %v10275_v43 = vrot.slane %v9375_v2, 5  ;;  %v10664_v6 = vrot.slane %v9375_v2, 6  ;;  %v14452_v4 = vpop.f32.mrb[95].mxu1 }
0x1000   :  { %v10274_v8 = vsel %vm2206_vm5, %v10273_v3, %v10272_v29  ;;  %v10663_v52 = vsel %vm2206_vm5, %v10662_v40, %v10661_v57 }
0x1001   :  { %v10276_v18 = vsel %vm2209_vm6, %v10275_v43, %v10274_v8  ;;  %v10665_v25 = vsel %vm2209_vm6, %v10664_v6, %v10663_v52 }
0x100d   :  { %v9448_v7 = vpop.f32.mrb[88].mxu0 }
0x100e   :  { %v10277_v62 = vrot.slane %v9448_v7, 4  ;;  %v10666_v1 = vrot.slane %v9448_v7, 5  ;;  %v14471_v39 = vpop.f32.mrb[89].mxu0  ;;  %v9521_v49 = vpop.f32.mrb[96].mxu1 }
0x100f   :  { %v10279_v35 = vrot.slane %v9521_v49, 3  ;;  %v10668_v51 = vrot.slane %v9521_v49, 4  ;;  %v14490_v44 = vpop.f32.mrb[97].mxu1 }
0x1010   :  { %v10278_v22 = vsel %vm2212_vm7, %v10277_v62, %v10276_v18  ;;  %v10667_v59 = vsel %vm2212_vm7, %v10666_v1, %v10665_v25 }
0x1011   :  { %v10280_v61 = vsel %vm2215_vm8, %v10279_v35, %v10278_v22  ;;  %v10669_v12 = vsel %vm2215_vm8, %v10668_v51, %v10667_v59 }
0x101d   :  { %v9594_v14 = vpop.f32.mrb[90].mxu0 }
0x101e   :  { %v10281_v24 = vrot.slane %v9594_v14, 2  ;;  %v10670_v28 = vrot.slane %v9594_v14, 3  ;;  %v14509_v26 = vpop.f32.mrb[91].mxu0  ;;  %v9667_v13 = vpop.f32.mrb[98].mxu1 }
0x101f   :  { %v10283_v0 = vrot.slane %v9667_v13, 1  ;;  %v10672_v41 = vrot.slane %v9667_v13, 2  ;;  %v14528_v17 = vpop.f32.mrb[99].mxu1 }
0x1020   :  { %v10282_v9 = vsel %vm2218_vm9, %v10281_v24, %v10280_v61  ;;  %v10671_v5 = vsel %vm2218_vm9, %v10670_v28, %v10669_v12 }
0x1021   :  { %v10673_v31 = vsel %vm2221_vm10, %v10672_v41, %v10671_v5  ;;  %v10284_v15 = vsel %vm2221_vm10, %v10283_v0, %v10282_v9 }
0x102d   :  { %v9740_v10 = vpop.f32.mrb[92].mxu0 }
0x102e   :  { %v10674_v50 = vrot.slane %v9740_v10, 1  ;;  %v14547_v58 = vpop.f32.mrb[93].mxu0  ;;  %v9813_v46 = vpop.f32.mrb[100].mxu1 }
0x102f   :  { %v10285_v33 = vrot.slane %v9813_v46, 7  ;;  %v14566_v37 = vpop.f32.mrb[101].mxu1 }
0x1030   :  { %v10675_v60 = vsel %vm2203_vm4, %v9813_v46, %v10674_v50 }
0x1031   :  { %v10286_v11 = vsel %vm2203_vm4, %v10285_v33, %v9740_v10 }
0x103d   :  { %v9886_v27 = vpop.f32.mrb[94].mxu0 }
0x103e   :  { %v10287_v36 = vrot.slane %v9886_v27, 6  ;;  %v10676_v57 = vrot.slane %v9886_v27, 7  ;;  %v14585_v29 = vpop.f32.mrb[95].mxu0  ;;  %v9959_v55 = vpop.f32.mrb[102].mxu1 }
0x103f   :  { %v10289_v3 = vrot.slane %v9959_v55, 5  ;;  %v10678_v40 = vrot.slane %v9959_v55, 6  ;;  %v14604_v23 = vpop.f32.mrb[103].mxu1  ;;  %v16437_v29 = vld [vmem:[%s19424_s27 + $0x8] sm:$0xff]  ;;  %v16438_v55 = vld [vmem:[%s19424_s27 + $0x10] sm:$0xff] }
0x1040   :  { %v10288_v2 = vsel %vm2206_vm5, %v10287_v36, %v10286_v11  ;;  %v10677_v43 = vsel %vm2206_vm5, %v10676_v57, %v10675_v60  ;;  %v8580_v57 = vld [vmem:[%s19390_s17] sm:$0xff]  ;;  %v16441_v23 = vld [vmem:[%s19424_s27 + $0x28] sm:$0xff] }
0x1041   :  { %v10290_v6 = vsel %vm2209_vm6, %v10289_v3, %v10288_v2  ;;  %v10679_v4 = vsel %vm2209_vm6, %v10678_v40, %v10677_v43  ;;  %v16439_v3 = vld [vmem:[%s19424_s27 + $0x18] sm:$0xff]  ;;  %v16440_v40 = vld [vmem:[%s19424_s27 + $0x20] sm:$0xff]  ;;  %v16442_v2 = vld [vmem:[%s19424_s27 + $0x30] sm:$0xff] }
0x1042   :  { %v8582_v43 = vld [vmem:[%s19390_s17 + $0x10] sm:$0xff] }
0x104d   :  { %v10032_v8 = vpop.f32.mrb[96].mxu0 }
0x104e   :  { %v10291_v52 = vrot.slane %v10032_v8, 4  ;;  %v10680_v18 = vrot.slane %v10032_v8, 5  ;;  %v14623_v25 = vpop.f32.mrb[97].mxu0  ;;  %v10105_v7 = vpop.f32.mrb[104].mxu1  ;;  %v16444_v8 = vld [vmem:[%s19425_s26] sm:$0xff] }
0x104f   :  { %v10293_v62 = vrot.slane %v10105_v7, 3  ;;  %v10682_v1 = vrot.slane %v10105_v7, 4  ;;  %v14642_v39 = vpop.f32.mrb[105].mxu1  ;;  %v11043_v25 = vld [vmem:[%s19392_s19] sm:$0xff]  ;;  %v11044_v7 = vld [vmem:[%s19392_s19 + $0x8] sm:$0xff] }
0x1050   :  { %v10292_v49 = vsel %vm2212_vm7, %v10291_v52, %v10290_v6  ;;  %v10681_v35 = vsel %vm2212_vm7, %v10680_v18, %v10679_v4  ;;  %v8583_v6 = vld [vmem:[%s19390_s17 + $0x18] sm:$0xff]  ;;  %v16445_v18 = vld [vmem:[%s19425_s26 + $0x8] sm:$0xff] }
0x1051   :  { %v10294_v51 = vsel %vm2215_vm8, %v10293_v62, %v10292_v49  ;;  %v10683_v44 = vsel %vm2215_vm8, %v10682_v1, %v10681_v35  ;;  %v16443_v4 = vld [vmem:[%s19424_s27 + $0x38] sm:$0xff]  ;;  %v15917_v52 = vpack.c.bf16 %v8583_v6, %v8582_v43  ;;  %v16446_v62 = vld [vmem:[%s19425_s26 + $0x10] sm:$0xff]  ;;  %v19140_v1 = vpack.c.bf16 %v11044_v7, %v11043_v25  ;;  %v16448_v49 = vld [vmem:[%s19425_s26 + $0x20] sm:$0xff] }
0x1052   :  { %v16447_v39 = vld [vmem:[%s19425_s26 + $0x18] sm:$0xff]  ;;  %v16449_v35 = vld [vmem:[%s19425_s26 + $0x28] sm:$0xff] }
0x1053   :  { %v11057_v43 = vld [vmem:[%s19394_s21 + $0x48] sm:$0xff] }
0x1054   :  { %v11061_v25 = vld [vmem:[%s19394_s21 + $0x68] sm:$0xff] }
0x105d   :  { %v10178_v22 = vpop.f32.mrb[98].mxu0 }
0x105e   :  { %v10295_v59 = vrot.slane %v10178_v22, 2  ;;  %v10684_v61 = vrot.slane %v10178_v22, 3  ;;  %v14661_v12 = vpop.f32.mrb[99].mxu0  ;;  %v10251_v14 = vpop.f32.mrb[106].mxu1  ;;  %v11045_v22 = vld [vmem:[%s19392_s19 + $0x10] sm:$0xff] }
0x105f   :  { %v10297_v24 = vrot.slane %v10251_v14, 1  ;;  %v10686_v28 = vrot.slane %v10251_v14, 2  ;;  %v14680_v26 = vpop.f32.mrb[107].mxu1 }
0x1060   :  { %v10296_v13 = vsel %vm2218_vm9, %v10295_v59, %v10294_v51  ;;  %v10685_v0 = vsel %vm2218_vm9, %v10684_v61, %v10683_v44  ;;  %v16450_v51 = vld [vmem:[%s19425_s26 + $0x30] sm:$0xff]  ;;  %v16451_v44 = vld [vmem:[%s19425_s26 + $0x38] sm:$0xff] }
0x1061   :  { %v10687_v41 = vsel %vm2221_vm10, %v10686_v28, %v10685_v0  ;;  %v10298_v17 = vsel %vm2221_vm10, %v10297_v24, %v10296_v13  ;;  %v11046_v59 = vld [vmem:[%s19392_s19 + $0x18] sm:$0xff] }
0x1062   :  { %v16259_v9 = vpack.i.bf16 %v10687_v41, %v10673_v31  ;;  %v16254_v5 = vpack.i.bf16 %v10298_v17, %v10284_v15  ;;  %v15909_v10 = vpack.c.bf16 %v10298_v17, %v10284_v15  ;;  %v15925_v50 = vpack.c.bf16 %v10687_v41, %v10673_v31  ;;  %v8581_v31 = vld [vmem:[%s19390_s17 + $0x8] sm:$0xff] }
0x1063   :  { %v15913_v15 = vpack.c.bf16 %v8581_v31, %v8580_v57  ;;  %v15941_v61 = vpack.c.bf16 %v11046_v59, %v11045_v22 }
0x1064   :  { %16260 = vrot.lane.b32.xlu1 %v16259_v9, %s16558_s7  ;;  %16255 = vrot.lane.b32.xlu0 %v16254_v5, %s16558_s7 }
0x10d6   :  { %v16261_v58 = vpop.permute.xlu1 %16260  ;;  %v16256_v46 = vpop.permute.xlu0 %16255 }
0x10d7   :  { %v16263_v33 = vunpack.i.h.bf16 %v16261_v58  ;;  %v16262_v37 = vunpack.i.l.bf16 %v16261_v58  ;;  %v16258_v60 = vunpack.i.h.bf16 %v16256_v46  ;;  %v16257_v11 = vunpack.i.l.bf16 %v16256_v46 }
0x10d9   :  { %v15921_v27 = vpack.c.bf16 %v16263_v33, %v16262_v37  ;;  %v15905_v36 = vpack.c.bf16 %v16258_v60, %v16257_v11 }
0x10db   :  { %15906 = vmatprep.subr.bf16.mxu0 %v15905_v36  ;;  %15922 = vmatprep.subr.bf16.mxu1 %v15921_v27 }
0x10dc   :  { %15908 = vmatpush3.bf16.msra.mxu0 %v15905_v36  ;;  %15924 = vmatpush3.bf16.msra.mxu1 %v15921_v27 }
0x10dd   :  { %15910 = vmatprep.subr.bf16.mxu0 %v15909_v10  ;;  %15926 = vmatprep.subr.bf16.mxu1 %v15925_v50 }
0x10df   :  { %14686 = vmatmul.mubr.msk.f32.vlgmr.msra.gmra.mrb[100].mxu0 %vm2243_vm11, %v16437_v29  ;;  %14738 = vmatmul.mubr.msk.f32.vlgmr.msra.gmra.mrb[108].mxu1 %vm2243_vm11, %v16437_v29 }
0x10e0   :  { %15912 = vmatpush3.bf16.msra.mxu0 %v15909_v10  ;;  %15928 = vmatpush3.bf16.msra.mxu1 %v15925_v50 }
0x10e1   :  { %14688 = vmatprep.mubr.msk.f32.mxu0 %vm2243_vm11, %v16438_v55  ;;  %14740 = vmatprep.mubr.msk.f32.mxu1 %vm2243_vm11, %v16438_v55 }
0x10e2   :  { %15914 = vmatprep.subr.bf16.mxu0 %v15913_v15  ;;  %15930 = vmatprep.subr.bf16.mxu1 %v15913_v15 }
0x10e3   :  { %14689 = vmatmul.mubr.msk.f32.gmra.mrb[102].mxu0 %vm2243_vm11, %v16439_v3  ;;  %14741 = vmatmul.mubr.msk.f32.gmra.mrb[110].mxu1 %vm2243_vm11, %v16439_v3  ;;  %v11054_v3 = vld [vmem:[%s19394_s21 + $0x30] sm:$0xff] }
0x10e4   :  { %14691 = vmatprep.mubr.msk.f32.mxu0 %vm2243_vm11, %v16440_v40  ;;  %14743 = vmatprep.mubr.msk.f32.mxu1 %vm2243_vm11, %v16440_v40  ;;  %v11055_v40 = vld [vmem:[%s19394_s21 + $0x38] sm:$0xff] }
0x10e7   :  { %14692 = vmatmul.mubr.msk.f32.gmra.mrb[104].mxu0 %vm2243_vm11, %v16441_v23  ;;  %14744 = vmatmul.mubr.msk.f32.gmra.mrb[112].mxu1 %vm2243_vm11, %v16441_v23  ;;  %v15957_v23 = vpack.c.bf16 %v11055_v40, %v11054_v3 }
0x10e8   :  { %14694 = vmatprep.mubr.msk.f32.mxu0 %vm2243_vm11, %v16442_v2  ;;  %14746 = vmatprep.mubr.msk.f32.mxu1 %vm2243_vm11, %v16442_v2  ;;  %v11056_v2 = vld [vmem:[%s19394_s21 + $0x40] sm:$0xff] }
0x10e9   :  { %v15961_v6 = vpack.c.bf16 %v11057_v43, %v11056_v2 }
0x10eb   :  { %14695 = vmatmul.mubr.msk.f32.gmra.mrb[106].mxu0 %vm2243_vm11, %v16443_v4  ;;  %14747 = vmatmul.mubr.msk.f32.gmra.mrb[114].mxu1 %vm2243_vm11, %v16443_v4  ;;  %v11058_v4 = vld [vmem:[%s19394_s21 + $0x50] sm:$0xff] }
0x10ec   :  { %14701 = vmatprep.mubr.msk.f32.mxu0 %vm2243_vm11, %v16444_v8  ;;  %14753 = vmatprep.mubr.msk.f32.mxu1 %vm2243_vm11, %v16444_v8  ;;  %v11059_v8 = vld [vmem:[%s19394_s21 + $0x58] sm:$0xff] }
0x10ef   :  { %14702 = vmatmul.mubr.msk.f32.vlgmr.msra.gmra.mrb[100].mxu0 %vm2243_vm11, %v16445_v18  ;;  %14754 = vmatmul.mubr.msk.f32.vlgmr.msra.gmra.mrb[108].mxu1 %vm2243_vm11, %v16445_v18  ;;  %v11060_v18 = vld [vmem:[%s19394_s21 + $0x60] sm:$0xff] }
0x10f0   :  { %15916 = vmatpush3.bf16.msra.mxu0 %v15913_v15  ;;  %14704 = vmatprep.mubr.msk.f32.mxu0 %vm2243_vm11, %v16446_v62  ;;  %v15969_v7 = vpack.c.bf16 %v11061_v25, %v11060_v18 }
0x10f1   :  { %14756 = vmatprep.mubr.msk.f32.mxu1 %vm2243_vm11, %v16446_v62  ;;  %15918 = vmatprep.subr.bf16.mxu0 %v15917_v52  ;;  %v11062_v62 = vld [vmem:[%s19394_s21 + $0x70] sm:$0xff] }
0x10f2   :  { %15932 = vmatpush3.bf16.msra.mxu1 %v15913_v15 }
0x10f3   :  { %14705 = vmatmul.mubr.msk.f32.gmra.mrb[102].mxu0 %vm2243_vm11, %v16447_v39  ;;  %14757 = vmatmul.mubr.msk.f32.gmra.mrb[110].mxu1 %vm2243_vm11, %v16447_v39 }
0x10f4   :  { %14707 = vmatprep.mubr.msk.f32.mxu0 %vm2243_vm11, %v16448_v49  ;;  %14759 = vmatprep.mubr.msk.f32.mxu1 %vm2243_vm11, %v16448_v49  ;;  %v19279_v49 = vld [vmem:[%s19393_s20] ss:$0 sm:$0xff] }
0x10f5   :  { %15920 = vmatpush3.bf16.msra.mxu0 %v15917_v52  ;;  %15934 = vmatprep.subr.bf16.mxu1 %v15917_v52 }
0x10f6   :  { %15936 = vmatpush3.bf16.msra.mxu1 %v15917_v52  ;;  %15938 = vmatprep.subr.bf16.mxu0 %v19140_v1  ;;  %v15965_v52 = vpack.c.bf16 %v11059_v8, %v11058_v4 }
0x10f7   :  { %14708 = vmatmul.mubr.msk.f32.gmra.mrb[104].mxu0 %vm2243_vm11, %v16449_v35  ;;  %14760 = vmatmul.mubr.msk.f32.gmra.mrb[112].mxu1 %vm2243_vm11, %v16449_v35 }
0x10f8   :  { %14710 = vmatprep.mubr.msk.f32.mxu0 %vm2243_vm11, %v16450_v51  ;;  %14762 = vmatprep.mubr.msk.f32.mxu1 %vm2243_vm11, %v16450_v51 }
0x10fb   :  { %14711 = vmatmul.mubr.msk.f32.gmra.mrb[106].mxu0 %vm2243_vm11, %v16451_v44  ;;  %14763 = vmatmul.mubr.msk.f32.gmra.mrb[114].mxu1 %vm2243_vm11, %v16451_v44 }
0x10fc   :  { %14721 = vmatprep.mubr.msk.f32.mxu0 %vm607_vm2, %v18650_v48  ;;  %14773 = vmatprep.mubr.msk.f32.mxu1 %vm607_vm2, %v18653_v19  ;;  %v11050_v48 = vld [vmem:[%s19394_s21 + $0x10] sm:$0xff] }
0x10ff   :  { %14722 = vmatmul.mubr.msk.f32.vlgmr.msra.gmra.mrb[100].mxu0 %vm607_vm2, %v18645_v16  ;;  %14774 = vmatmul.mubr.msk.f32.vlgmr.msra.gmra.mrb[108].mxu1 %vm607_vm2, %v18647_v30  ;;  %v11048_v16 = vld [vmem:[%s19394_s21] sm:$0xff]  ;;  %v11049_v30 = vld [vmem:[%s19394_s21 + $0x8] sm:$0xff] }
0x1100   :  { %14724 = vmatprep.mubr.msk.f32.mxu0 %vm607_vm2, %v18667_v20  ;;  %14776 = vmatprep.mubr.msk.f32.mxu1 %vm607_vm2, %v18670_v53  ;;  %v15945_v19 = vpack.c.bf16 %v11049_v30, %v11048_v16  ;;  %v11052_v20 = vld [vmem:[%s19394_s21 + $0x20] sm:$0xff]  ;;  %v11053_v53 = vld [vmem:[%s19394_s21 + $0x28] sm:$0xff] }
0x1101   :  { %15940 = vmatpush3.bf16.msra.mxu0 %v19140_v1 }
0x1102   :  { %15942 = vmatprep.subr.bf16.mxu0 %v15941_v61  ;;  %15946 = vmatprep.subr.bf16.mxu1 %v15945_v19 }
0x1103   :  { %14725 = vmatmul.mubr.msk.f32.gmra.mrb[102].mxu0 %vm607_vm2, %v18659_v47  ;;  %14777 = vmatmul.mubr.msk.f32.gmra.mrb[110].mxu1 %vm607_vm2, %v18664_v56  ;;  %v11051_v47 = vld [vmem:[%s19394_s21 + $0x18] sm:$0xff] }
0x1104   :  { %14727 = vmatprep.mubr.msk.f32.mxu0 %vm607_vm2, %v18683_v32  ;;  %14779 = vmatprep.mubr.msk.f32.mxu1 %vm607_vm2, %v18685_v34  ;;  %v15949_v56 = vpack.c.bf16 %v11051_v47, %v11050_v48 }
0x1105   :  { %15944 = vmatpush3.bf16.msra.mxu0 %v15941_v61  ;;  %15948 = vmatpush3.bf16.msra.mxu1 %v15945_v19 }
0x1106   :  { %15978 = vmatprep.subr.bf16.mxu0 %v19140_v1  ;;  %15950 = vmatprep.subr.bf16.mxu1 %v15949_v56 }
0x1107   :  { %14728 = vmatmul.mubr.msk.f32.gmra.mrb[104].mxu0 %vm607_vm2, %v18673_v45  ;;  %14780 = vmatmul.mubr.msk.f32.gmra.mrb[112].mxu1 %vm607_vm2, %v18678_v42  ;;  %v15953_v45 = vpack.c.bf16 %v11053_v53, %v11052_v20  ;;  %v11918_v42 = vld [vmem:[%s19391_s18] ss:$0 sm:$0xff] }
0x1108   :  { %14730 = vmatprep.mubr.msk.f32.mxu0 %vm607_vm2, %v18699_v38  ;;  %14782 = vmatprep.mubr.msk.f32.mxu1 %vm607_vm2, %v18701_v63 }
0x1109   :  { %15952 = vmatpush3.bf16.msra.mxu1 %v15949_v56 }
0x110a   :  { %15954 = vmatprep.subr.bf16.mxu1 %v15953_v45 }
0x110b   :  { %14731 = vmatmul.mubr.msk.f32.gmra.mrb[106].mxu0 %vm607_vm2, %v18691_v21  ;;  %14783 = vmatmul.mubr.msk.f32.gmra.mrb[114].mxu1 %vm607_vm2, %v18696_v54 }
0x110d   :  { %15956 = vmatpush3.bf16.msra.mxu1 %v15953_v45 }
0x110e   :  { %15958 = vmatprep.subr.bf16.mxu1 %v15957_v23 }
0x1111   :  { %15960 = vmatpush3.bf16.msra.mxu1 %v15957_v23 }
0x1112   :  { %15962 = vmatprep.subr.bf16.mxu1 %v15961_v6 }
0x1115   :  { %15964 = vmatpush3.bf16.msra.mxu1 %v15961_v6 }
0x1116   :  { %15966 = vmatprep.subr.bf16.mxu1 %v15965_v52 }
0x1119   :  { %15968 = vmatpush3.bf16.msra.mxu1 %v15965_v52 }
0x111a   :  { %15970 = vmatprep.subr.bf16.mxu1 %v15969_v7 }
0x111d   :  { %15972 = vmatpush3.bf16.msra.mxu1 %v15969_v7 }
0x11d2   :  { %v14723_v32 = vpop.f32.mrb[100].mxu0  ;;  %v14775_v34 = vpop.f32.mrb[108].mxu1 }
0x11d3   :  { %v10613_v21 = vpop.f32.mrb[101].mxu0  ;;  %v10996_v54 = vpop.f32.mrb[109].mxu1  ;;  %v10619_v63 = vadd.f32 %v14723_v32, %v11918_v42  ;;  %v11002_v27 = vadd.f32 %v14775_v34, %v11918_v42 }
0x11d4   :  { %v10614_v38 = vadd.f32 %v11918_v42, %v10613_v21  ;;  %v10997_v11 = vadd.f32 %v11918_v42, %v10996_v54 }
0x11d6   :  { %v14726_v12 = vpop.f32.mrb[102].mxu0  ;;  %v14778_v14 = vpop.f32.mrb[110].mxu1  ;;  %14793 = vmatprep.mubr.msk.f32.mxu0 %vm607_vm2, %v10614_v38 }
0x11d7   :  { %v10623_v24 = vpop.f32.mrb[103].mxu0  ;;  %v11006_v28 = vpop.f32.mrb[111].mxu1  ;;  %14794 = vmatmul.mubr.msk.f32.vlgmr.msra.gmra.mrb[108].mxu0 %vm607_vm2, %v10619_v63  ;;  %v10629_v13 = vadd.f32 %v14726_v12, %v11918_v42  ;;  %v11012_v57 = vadd.f32 %v14778_v14, %v11918_v42 }
0x11d8   :  { %v10624_v26 = vadd.f32 %v11918_v42, %v10623_v24  ;;  %15980 = vmatpush3.bf16.msra.mxu0 %v19140_v1  ;;  %v11007_v36 = vadd.f32 %v11918_v42, %v11006_v28  ;;  %v11063_v1 = vld [vmem:[%s19394_s21 + $0x78] sm:$0xff] }
0x11d9   :  { %15982 = vmatprep.subr.bf16.mxu0 %v15941_v61  ;;  %v15973_v39 = vpack.c.bf16 %v11063_v1, %v11062_v62 }
0x11da   :  { %v14729_v0 = vpop.f32.mrb[104].mxu0  ;;  %v14781_v41 = vpop.f32.mrb[112].mxu1  ;;  %14796 = vmatprep.mubr.msk.f32.mxu0 %vm607_vm2, %v10624_v26 }
0x11db   :  { %v10633_v17 = vpop.f32.mrb[105].mxu0  ;;  %v11016_v9 = vpop.f32.mrb[113].mxu1  ;;  %14797 = vmatmul.mubr.msk.f32.gmra.mrb[110].mxu0 %vm607_vm2, %v10629_v13  ;;  %v10639_v10 = vadd.f32 %v14729_v0, %v11918_v42  ;;  %v11022_v15 = vadd.f32 %v14781_v41, %v11918_v42  ;;  %15974 = vmatprep.subr.bf16.mxu1 %v15973_v39 }
0x11dc   :  { %v10634_v5 = vadd.f32 %v11918_v42, %v10633_v17  ;;  %15984 = vmatpush3.bf16.msra.mxu0 %v15941_v61  ;;  %v11017_v31 = vadd.f32 %v11918_v42, %v11016_v9  ;;  %15976 = vmatpush3.bf16.msra.mxu1 %v15973_v39 }
0x11dd   :  { %15986 = vmatprep.subr.bf16.mxu0 %v15945_v19 }
0x11de   :  { %v14732_v50 = vpop.f32.mrb[106].mxu0  ;;  %v14784_v58 = vpop.f32.mrb[114].mxu1  ;;  %14799 = vmatprep.mubr.msk.f32.mxu0 %vm607_vm2, %v10634_v5 }
0x11df   :  { %v10643_v46 = vpop.f32.mrb[107].mxu0  ;;  %v11026_v33 = vpop.f32.mrb[115].mxu1  ;;  %14800 = vmatmul.mubr.msk.f32.gmra.mrb[112].mxu0 %vm607_vm2, %v10639_v10  ;;  %v10649_v60 = vadd.f32 %v14732_v50, %v11918_v42  ;;  %v11032_v55 = vadd.f32 %v14784_v58, %v11918_v42 }
0x11e0   :  { %v10644_v37 = vadd.f32 %v11918_v42, %v10643_v46  ;;  %v11027_v29 = vadd.f32 %v11918_v42, %v11026_v33 }
0x11e2   :  { %14802 = vmatprep.mubr.msk.f32.mxu0 %vm607_vm2, %v10644_v37 }
0x11e3   :  { %14803 = vmatmul.mubr.msk.f32.gmra.mrb[114].mxu0 %vm607_vm2, %v10649_v60 }
0x11e4   :  { %14857 = vmatprep.mubr.msk.f32.mxu0 %vm607_vm2, %v10997_v11 }
0x11e7   :  { %14858 = vmatmul.mubr.msk.f32.vlgmr.msra.gmra.mrb[116].mxu0 %vm607_vm2, %v11002_v27 }
0x11e8   :  { %14860 = vmatprep.mubr.msk.f32.mxu0 %vm607_vm2, %v11007_v36  ;;  %15988 = vmatpush3.bf16.msra.mxu0 %v15945_v19 }
0x11e9   :  { %15990 = vmatprep.subr.bf16.mxu0 %v15949_v56 }
0x11eb   :  { %14861 = vmatmul.mubr.msk.f32.gmra.mrb[118].mxu0 %vm607_vm2, %v11012_v57 }
0x11ec   :  { %14863 = vmatprep.mubr.msk.f32.mxu0 %vm607_vm2, %v11017_v31  ;;  %15992 = vmatpush3.bf16.msra.mxu0 %v15949_v56 }
0x11ed   :  { %15994 = vmatprep.subr.bf16.mxu0 %v15953_v45 }
0x11ef   :  { %14864 = vmatmul.mubr.msk.f32.gmra.mrb[120].mxu0 %vm607_vm2, %v11022_v15 }
0x11f0   :  { %14866 = vmatprep.mubr.msk.f32.mxu0 %vm607_vm2, %v11027_v29  ;;  %15996 = vmatpush3.bf16.msra.mxu0 %v15953_v45 }
0x11f1   :  { %15998 = vmatprep.subr.bf16.mxu0 %v15957_v23 }
0x11f3   :  { %14867 = vmatmul.mubr.msk.f32.gmra.mrb[122].mxu0 %vm607_vm2, %v11032_v55 }
0x11f4   :  { %16000 = vmatpush3.bf16.msra.mxu0 %v15957_v23 }
0x11f5   :  { %16002 = vmatprep.subr.bf16.mxu0 %v15961_v6 }
0x11f8   :  { %16004 = vmatpush3.bf16.msra.mxu0 %v15961_v6 }
0x11f9   :  { %16006 = vmatprep.subr.bf16.mxu0 %v15965_v52 }
0x11fc   :  { %16008 = vmatpush3.bf16.msra.mxu0 %v15965_v52 }
0x11fd   :  { %16010 = vmatprep.subr.bf16.mxu0 %v15969_v7 }
0x1200   :  { %16012 = vmatpush3.bf16.msra.mxu0 %v15969_v7 }
0x1201   :  { %16014 = vmatprep.subr.bf16.mxu0 %v15973_v39 }
0x1204   :  { %16016 = vmatpush3.bf16.msra.mxu0 %v15973_v39 }
0x12aa   :  { %v14795_v35 = vpop.f32.mrb[108].mxu0 }
0x12ab   :  { %v11167_v51 = vadd.f32 %v14795_v35, %v19279_v49  ;;  %v11161_v44 = vpop.f32.mrb[109].mxu0 }
0x12ac   :  { %v11162_v22 = vadd.f32 %v19279_v49, %v11161_v44 }
0x12ad   :  { %v11209_v59 = vmul.f32 0.70710677, %v11167_v51  ;;  %v11201_v5 = vmul.f32 0.5, %v11167_v51 }
0x12ae   :  { %v11208_v61 = vmul.f32 0.70710677, %v11162_v22  ;;  %v14798_v16 = vpop.f32.mrb[110].mxu0  ;;  %v11200_v0 = vmul.f32 0.5, %v11162_v22 }
0x12af   :  { %16360 = verf.f32 %v11209_v59  ;;  %v11177_v30 = vadd.f32 %v14798_v16, %v19279_v49  ;;  %v11171_v48 = vpop.f32.mrb[111].mxu0 }
0x12b0   :  { %16362 = verf.f32 %v11208_v61  ;;  %v11172_v19 = vadd.f32 %v19279_v49, %v11171_v48 }
0x12b1   :  { %v11211_v47 = vmul.f32 0.70710677, %v11177_v30  ;;  %v11203_v29 = vmul.f32 0.5, %v11177_v30 }
0x12b2   :  { %v11210_v56 = vmul.f32 0.70710677, %v11172_v19  ;;  %v14801_v20 = vpop.f32.mrb[112].mxu0  ;;  %v11202_v36 = vmul.f32 0.5, %v11172_v19 }
0x12b3   :  { %16364 = verf.f32 %v11211_v47  ;;  %v11187_v53 = vadd.f32 %v14801_v20, %v19279_v49  ;;  %v11181_v45 = vpop.f32.mrb[113].mxu0 }
0x12b4   :  { %16366 = verf.f32 %v11210_v56  ;;  %v11182_v42 = vadd.f32 %v19279_v49, %v11181_v45 }
0x12b5   :  { %v11213_v32 = vmul.f32 0.70710677, %v11187_v53  ;;  %v11205_v62 = vmul.f32 0.5, %v11187_v53 }
0x12b6   :  { %v11212_v34 = vmul.f32 0.70710677, %v11182_v42  ;;  %v14804_v21 = vpop.f32.mrb[114].mxu0  ;;  %v11204_v52 = vmul.f32 0.5, %v11182_v42 }
0x12b7   :  { %16368 = verf.f32 %v11213_v32  ;;  %v19288_v54 = vadd.f32 %v14804_v21, %v19279_v49  ;;  %v11191_v38 = vpop.f32.mrb[115].mxu0 }
0x12b8   :  { %16370 = verf.f32 %v11212_v34  ;;  %v11192_v63 = vadd.f32 %v19279_v49, %v11191_v38 }
0x12b9   :  { %v16361_v12 = vpop.eup %16360  ;;  %v11215_v14 = vmul.f32 0.70710677, %v19288_v54  ;;  %v11207_v56 = vmul.f32 0.5, %v19288_v54 }
0x12ba   :  { %v16363_v24 = vpop.eup %16362  ;;  %v11225_v28 = vadd.f32 1.0, %v16361_v12  ;;  %v11214_v26 = vmul.f32 0.70710677, %v11192_v63  ;;  %v14859_v13 = vpop.f32.mrb[116].mxu0  ;;  %v11206_v30 = vmul.f32 0.5, %v11192_v63 }
0x12bb   :  { %v11224_v41 = vadd.f32 1.0, %v16363_v24  ;;  %16372 = verf.f32 %v11215_v14  ;;  %v19293_v17 = vadd.f32 %v14859_v13, %v19279_v49  ;;  %v11450_v9 = vpop.f32.mrb[117].mxu0 }
0x12bc   :  { %16374 = verf.f32 %v11214_v26  ;;  %v11451_v10 = vadd.f32 %v19279_v49, %v11450_v9  ;;  %v11233_v37 = vmul.f32 %v11225_v28, %v11201_v5 }
0x12bd   :  { %v16365_v50 = vpop.eup %16364  ;;  %v11498_v58 = vmul.f32 0.70710677, %v19293_v17  ;;  %v11232_v46 = vmul.f32 %v11224_v41, %v11200_v0  ;;  %v11490_v14 = vmul.f32 0.5, %v19293_v17 }
0x12be   :  { %v16367_v33 = vpop.eup %16366  ;;  %v11227_v60 = vadd.f32 1.0, %v16365_v50  ;;  %v11497_v11 = vmul.f32 0.70710677, %v11451_v10  ;;  %v14862_v27 = vpop.f32.mrb[118].mxu0  ;;  %v11489_v63 = vmul.f32 0.5, %v11451_v10 }
0x12bf   :  { %v11226_v57 = vadd.f32 1.0, %v16367_v33  ;;  %16376 = verf.f32 %v11498_v58  ;;  %v19298_v31 = vadd.f32 %v14862_v27, %v19279_v49  ;;  %14837 = vmatprep.mubr.f32.mxu1 %v11232_v46  ;;  %v11460_v15 = vpop.f32.mrb[119].mxu0 }
0x12c0   :  { %16378 = verf.f32 %v11497_v11  ;;  %v11461_v55 = vadd.f32 %v19279_v49, %v11460_v15  ;;  %14838 = vmatmul.mubr.f32.vlgmr.msra.gmra.mrb[116].mxu1 %v11233_v37  ;;  %v11235_v8 = vmul.f32 %v11227_v60, %v11203_v29 }
0x12c1   :  { %v16369_v3 = vpop.eup %16368  ;;  %v11500_v40 = vmul.f32 0.70710677, %v19298_v31  ;;  %v11234_v23 = vmul.f32 %v11226_v57, %v11202_v36  ;;  %v11492_v41 = vmul.f32 0.5, %v19298_v31 }
0x12c2   :  { %v16371_v2 = vpop.eup %16370  ;;  %v11229_v43 = vadd.f32 1.0, %v16369_v3  ;;  %v11499_v6 = vmul.f32 0.70710677, %v11461_v55  ;;  %v14865_v4 = vpop.f32.mrb[120].mxu0  ;;  %v11491_v13 = vmul.f32 0.5, %v11461_v55 }
0x12c3   :  { %v11228_v18 = vadd.f32 1.0, %v16371_v2  ;;  %16380 = verf.f32 %v11500_v40  ;;  %v11476_v25 = vadd.f32 %v14865_v4, %v19279_v49  ;;  %14840 = vmatprep.mubr.f32.mxu1 %v11234_v23  ;;  %v11470_v7 = vpop.f32.mrb[121].mxu0  ;;  %v11960_v3 = vld [vmem:[#allocation2] ss:$0 sm:$0xff] }
0x12c4   :  { %16382 = verf.f32 %v11499_v6  ;;  %v11471_v1 = vadd.f32 %v19279_v49, %v11470_v7  ;;  %14841 = vmatmul.mubr.f32.gmra.mrb[118].mxu1 %v11235_v8  ;;  %v11237_v16 = vmul.f32 %v11229_v43, %v11205_v62 }
0x12c5   :  { %v16373_v39 = vpop.eup %16372  ;;  %v11502_v35 = vmul.f32 0.70710677, %v11476_v25  ;;  %v11236_v51 = vmul.f32 %v11228_v18, %v11204_v52  ;;  %v11494_v33 = vmul.f32 0.5, %v11476_v25 }
0x12c6   :  { %v16375_v44 = vpop.eup %16374  ;;  %v11231_v22 = vadd.f32 1.0, %v16373_v39  ;;  %v11501_v59 = vmul.f32 0.70710677, %v11471_v1  ;;  %v14868_v61 = vpop.f32.mrb[122].mxu0  ;;  %v11493_v46 = vmul.f32 0.5, %v11471_v1 }
0x12c7   :  { %v11230_v48 = vadd.f32 1.0, %v16375_v44  ;;  %16384 = verf.f32 %v11502_v35  ;;  %v11486_v19 = vadd.f32 %v14868_v61, %v19279_v49  ;;  %14843 = vmatprep.mubr.f32.mxu1 %v11236_v51  ;;  %v11480_v47 = vpop.f32.mrb[123].mxu0 }
0x12c8   :  { %16386 = verf.f32 %v11501_v59  ;;  %v11481_v20 = vadd.f32 %v19279_v49, %v11480_v47  ;;  %14844 = vmatmul.mubr.f32.gmra.mrb[120].mxu1 %v11237_v16  ;;  %v11239_v38 = vmul.f32 %v11231_v22, %v11207_v56 }
0x12c9   :  { %v16377_v53 = vpop.eup %16376  ;;  %v11504_v45 = vmul.f32 0.70710677, %v11486_v19  ;;  %v11238_v42 = vmul.f32 %v11230_v48, %v11206_v30  ;;  %v11496_v31 = vmul.f32 0.5, %v11486_v19 }
0x12ca   :  { %v16379_v32 = vpop.eup %16378  ;;  %v11514_v34 = vadd.f32 1.0, %v16377_v53  ;;  %v11503_v21 = vmul.f32 0.70710677, %v11481_v20  ;;  %v11495_v57 = vmul.f32 0.5, %v11481_v20 }
0x12cb   :  { %v11513_v12 = vadd.f32 1.0, %v16379_v32  ;;  %16388 = verf.f32 %v11504_v45  ;;  %14846 = vmatprep.mubr.f32.mxu1 %v11238_v42 }
0x12cc   :  { %16390 = verf.f32 %v11503_v21  ;;  %14847 = vmatmul.mubr.f32.gmra.mrb[122].mxu1 %v11239_v38  ;;  %v11522_v49 = vmul.f32 %v11514_v34, %v11490_v14 }
0x12cd   :  { %v16381_v54 = vpop.eup %16380  ;;  %v11521_v24 = vmul.f32 %v11513_v12, %v11489_v63 }
0x12ce   :  { %v16383_v28 = vpop.eup %16382  ;;  %v11516_v26 = vadd.f32 1.0, %v16381_v54 }
0x12cf   :  { %v11515_v0 = vadd.f32 1.0, %v16383_v28  ;;  %14901 = vmatprep.mubr.f32.mxu0 %v11521_v24 }
0x12d0   :  { %14902 = vmatmul.mubr.f32.vlgmr.msra.gmra.mrb[124].mxu0 %v11522_v49  ;;  %v11524_v58 = vmul.f32 %v11516_v26, %v11492_v41 }
0x12d1   :  { %v16385_v9 = vpop.eup %16384  ;;  %v11523_v5 = vmul.f32 %v11515_v0, %v11491_v13 }
0x12d2   :  { %v16387_v10 = vpop.eup %16386  ;;  %v11518_v50 = vadd.f32 1.0, %v16385_v9 }
0x12d3   :  { %v11517_v17 = vadd.f32 1.0, %v16387_v10  ;;  %14904 = vmatprep.mubr.f32.mxu0 %v11523_v5 }
0x12d4   :  { %14905 = vmatmul.mubr.f32.gmra.mrb[126].mxu0 %v11524_v58  ;;  %v11526_v36 = vmul.f32 %v11518_v50, %v11494_v33 }
0x12d5   :  { %v16389_v37 = vpop.eup %16388  ;;  %v11525_v60 = vmul.f32 %v11517_v17, %v11493_v46 }
0x12d6   :  { %v16391_v11 = vpop.eup %16390  ;;  %v11520_v27 = vadd.f32 1.0, %v16389_v37 }
0x12d7   :  { %v11519_v15 = vadd.f32 1.0, %v16391_v11  ;;  %14907 = vmatprep.mubr.f32.mxu0 %v11525_v60 }
0x12d8   :  { %14908 = vmatmul.mubr.f32.gmra.mrb[128].mxu0 %v11526_v36  ;;  %v11528_v55 = vmul.f32 %v11520_v27, %v11496_v31 }
0x12d9   :  { %v11527_v29 = vmul.f32 %v11519_v15, %v11495_v57 }
0x12db   :  { %14910 = vmatprep.mubr.f32.mxu0 %v11527_v29 }
0x12dc   :  { %14911 = vmatmul.mubr.f32.gmra.mrb[130].mxu0 %v11528_v55 }
0x1393   :  { %v14839_v40 = vpop.f32.mrb[116].mxu1 }
0x1394   :  { %v11318_v23 = vadd.f32 %v14839_v40, %v11960_v3  ;;  %v11312_v2 = vpop.f32.mrb[117].mxu1 }
0x1395   :  { %v11313_v43 = vadd.f32 %v11960_v3, %v11312_v2 }
0x1396   :  { %11353 = vst.msk [vmem:[%s19396_s23 + $0x8] sm:$0xff] %vm11351_vm12, %v11318_v23 }
0x1397   :  { %11352 = vst.msk [vmem:[%s19396_s23] sm:$0xff] %vm11351_vm12, %v11313_v43  ;;  %v14842_v6 = vpop.f32.mrb[118].mxu1 }
0x1398   :  { %v11328_v4 = vadd.f32 %v14842_v6, %v11960_v3  ;;  %v11322_v8 = vpop.f32.mrb[119].mxu1 }
0x1399   :  { %v11323_v52 = vadd.f32 %v11960_v3, %v11322_v8 }
0x139a   :  { %11355 = vst.msk [vmem:[%s19396_s23 + $0x18] sm:$0xff] %vm11351_vm12, %v11328_v4 }
0x139b   :  { %11354 = vst.msk [vmem:[%s19396_s23 + $0x10] sm:$0xff] %vm11351_vm12, %v11323_v52  ;;  %v14845_v18 = vpop.f32.mrb[120].mxu1 }
0x139c   :  { %v11338_v25 = vadd.f32 %v14845_v18, %v11960_v3  ;;  %v11332_v7 = vpop.f32.mrb[121].mxu1 }
0x139d   :  { %v11333_v62 = vadd.f32 %v11960_v3, %v11332_v7 }
0x139e   :  { %11357 = vst.msk [vmem:[%s19396_s23 + $0x28] sm:$0xff] %vm11351_vm12, %v11338_v25 }
0x139f   :  { %11356 = vst.msk [vmem:[%s19396_s23 + $0x20] sm:$0xff] %vm11351_vm12, %v11333_v62  ;;  %v14848_v1 = vpop.f32.mrb[122].mxu1 }
0x13a0   :  { %v11348_v39 = vadd.f32 %v14848_v1, %v11960_v3  ;;  %v11342_v35 = vpop.f32.mrb[123].mxu1 }
0x13a1   :  { %v11343_v51 = vadd.f32 %v11960_v3, %v11342_v35 }
0x13a2   :  { %11359 = vst.msk [vmem:[%s19396_s23 + $0x38] sm:$0xff] %vm11351_vm12, %v11348_v39 }
0x13a3   :  { %11358 = vst.msk [vmem:[%s19396_s23 + $0x30] sm:$0xff] %vm11351_vm12, %v11343_v51  ;;  %v14903_v44 = vpop.f32.mrb[124].mxu0 }
0x13a4   :  { %v11601_v22 = vadd.f32 %v14903_v44, %v11960_v3  ;;  %v11595_v59 = vpop.f32.mrb[125].mxu0 }
0x13a5   :  { %v11596_v61 = vadd.f32 %v11960_v3, %v11595_v59 }
0x13a6   :  { %11970 = vst.msk [vmem:[%s19396_s23 + $0x48] sm:$0xff] %vm11351_vm12, %v11601_v22 }
0x13a7   :  { %11969 = vst.msk [vmem:[%s19396_s23 + $0x40] sm:$0xff] %vm11351_vm12, %v11596_v61  ;;  %v14906_v16 = vpop.f32.mrb[126].mxu0 }
0x13a8   :  { %v11611_v30 = vadd.f32 %v14906_v16, %v11960_v3  ;;  %v11605_v48 = vpop.f32.mrb[127].mxu0 }
0x13a9   :  { %v11606_v19 = vadd.f32 %v11960_v3, %v11605_v48 }
0x13aa   :  { %11972 = vst.msk [vmem:[%s19396_s23 + $0x58] sm:$0xff] %vm11351_vm12, %v11611_v30 }
0x13ab   :  { %11971 = vst.msk [vmem:[%s19396_s23 + $0x50] sm:$0xff] %vm11351_vm12, %v11606_v19  ;;  %v14909_v47 = vpop.f32.mrb[128].mxu0 }
0x13ac   :  { %v11621_v56 = vadd.f32 %v14909_v47, %v11960_v3  ;;  %v11615_v20 = vpop.f32.mrb[129].mxu0 }
0x13ad   :  { %v11616_v53 = vadd.f32 %v11960_v3, %v11615_v20 }
0x13ae   :  { %11974 = vst.msk [vmem:[%s19396_s23 + $0x68] sm:$0xff] %vm11351_vm12, %v11621_v56 }
0x13af   :  { %11973 = vst.msk [vmem:[%s19396_s23 + $0x60] sm:$0xff] %vm11351_vm12, %v11616_v53  ;;  %v14912_v45 = vpop.f32.mrb[130].mxu0 }
0x13b0   :  { %v11631_v42 = vadd.f32 %v14912_v45, %v11960_v3  ;;  %v11625_v32 = vpop.f32.mrb[131].mxu0 }
0x13b1   :  { %v11626_v34 = vadd.f32 %v11960_v3, %v11625_v32 }
0x13b2   :  { %11976 = vst.msk [vmem:[%s19396_s23 + $0x78] sm:$0xff] %vm11351_vm12, %v11631_v42 }
0x13b3   :  { %11975 = vst.msk [vmem:[%s19396_s23 + $0x70] sm:$0xff] %vm11351_vm12, %v11626_v34 }
0x13b4   :  { %11647 = vsyncpa [#allocation4], 1 }
0x13b5   :  { %11648 = vsyncpa [#allocation6], 1 }
0x13b6   :  { %11649 = vsyncpa [#allocation9], 1 }

</bundles_post_ra>
